<compile_context>
chip_gen: v5e
topology: v5e:2x2
jax: 0.10.0
libtpu: 0.0.40
codegen_flags: <defaults>
</compile_context>

<pallas_src>
import jax
import jax.numpy as jnp
from jax.experimental import pallas as pl
from jax.experimental.pallas import tpu as pltpu

_LANE = 128
_EPS = 1e-5
_NUM_LAYERS = 6
_PREFETCH = (4, 5)   # 0-based layer indices whose conv weights are DMA-prefetched


# ----------------------------------------------------------------------------
# Fused kernel: bn1 + 6 x (conv3-replicate + relu + bn + maxpool2)
# ----------------------------------------------------------------------------
def _make_fused_kernel(n: int, l0: int):
    num_layers = _NUM_LAYERS
    n_in = 3 + 4 * num_layers

    def kernel(*refs):
        x_ref = refs[0]
        p = refs[1:n_in]                      # bn1_g, bn1_b, (w,b,gamma,beta)*6
        o_ref = refs[n_in]
        w_bufs = refs[n_in + 1:n_in + 1 + len(_PREFETCH)]
        sem = refs[n_in + 1 + len(_PREFETCH)]

        # Kick off HBM->VMEM prefetch of the large tail-layer conv weights so
        # their DMA overlaps layers 1..4 compute (all other inputs are plain
        # VMEM BlockSpecs and are resident before the body runs).
        copies = []
        for j, li in enumerate(_PREFETCH):
            cp = pltpu.make_async_copy(p[2 + 4 * li], w_bufs[j], sem.at[j])
            cp.start()
            copies.append(cp)

        def bn(v, g_ref, b_ref):
            # Training-mode BatchNorm1d: biased batch stats over all N*L rows.
            # Single pass: sum + sum-of-squares, var = E[x^2] - mean^2.
            cnt = jnp.float32(v.shape[0])
            mean = jnp.sum(v, axis=0, keepdims=True) / cnt
            ex2 = jnp.sum(v * v, axis=0, keepdims=True) / cnt
            var = jnp.maximum(ex2 - mean * mean, 0.0)
            return (v - mean) * jax.lax.rsqrt(var + _EPS) * g_ref[...] + b_ref[...]

        x = x_ref[...].astype(jnp.float32)     # (n*l0, 128) lane-padded rows
        x = bn(x, p[0], p[1])                  # bn1

        l = l0
        for li in range(num_layers):
            w_ref, cb_ref, g_ref, be_ref = p[2 + 4 * li:6 + 4 * li]
            if li in _PREFETCH:
                j = _PREFETCH.index(li)
                copies[j].wait()               # DMA hidden behind earlier layers
                w_ref = w_bufs[j]
            m, cpad = x.shape                  # m = n * l

            # Replicate-padded +-1 neighbours along L, per batch segment.
            # (m,1) iota + modulo marks each segment's first/last row; mask
            # generation is O(m), independent of batch size and lane width.
            pos = jax.lax.broadcasted_iota(jnp.int32, (m, 1), 0) % l
            posb = jnp.broadcast_to(pos, (m, cpad))
            left = jnp.where(posb == 0, x, pltpu.roll(x, shift=1, axis=0))
            right = jnp.where(posb == l - 1, x, pltpu.roll(x, shift=m - 1, axis=0))

            # conv(k=3) as 3 accumulating MXU dots, bf16 operands / f32 acc.
            # w_ref[k] are free tile-aligned views (no (m, 3*128) taps concat).
            y = jnp.dot(left.astype(jnp.bfloat16), w_ref[0],
                        preferred_element_type=jnp.float32)
            y += jnp.dot(x.astype(jnp.bfloat16), w_ref[1],
                         preferred_element_type=jnp.float32)
            y += jnp.dot(right.astype(jnp.bfloat16), w_ref[2],
                         preferred_element_type=jnp.float32)
            y = jnp.maximum(y + cb_ref[...], 0.0)   # conv bias + relu (f32)
            y = bn(y, g_ref, be_ref)                # batch norm (f32)
            cout = y.shape[1]
            # maxpool(2, 2) along L; l is even so pairs never cross batches.
            # TODO(synk): if the bundle dump shows a relayout copy here, switch
            # to jnp.maximum(y, pltpu.roll(y, m-1, 0)) + a strided row select.
            x = jnp.max(y.reshape(m // 2, 2, cout), axis=1)
            l //= 2

        o_ref[...] = x.astype(o_ref.dtype)

    return kernel


# ----------------------------------------------------------------------------
# Wrapper: layout / lane padding glue + the single pallas_call
# ----------------------------------------------------------------------------
def _pad_lanes(a, target):
    pad = target - a.shape[-1]
    if pad <= 0:
        return a
    cfg = [(0, 0)] * (a.ndim - 1) + [(0, pad)]
    return jnp.pad(a, cfg)


@jax.jit
def cnn_forward(x_ncl, params):
    n, c0, l0 = x_ncl.shape
    assert l0 % 64 == 0 and l0 >= 64, "need L divisible by 64 (six maxpool(2,2))"
    assert c0 <= _LANE, "input channels must fit one 128-lane block"
    # VMEM budget for the fused, no-grid design: peak live activation set is
    # roughly 4 KiB per (N*L) row in the first conv layer (x + left/right +
    # bf16 casts + y) plus ~0.5 MiB of weights.  Keep well inside the 32 MiB
    # scoped limit (v7x physical VMEM is only 64 MiB, so the same bound holds
    # there); beyond this, a gridded / two-pass-BN variant is required.
    assert n * l0 <= 6 * 1024, "fused all-VMEM variant sized for N*L <= 6144"

    # NCL (PyTorch) -> channels-last rows (N*L, C), zero-padded to 128 lanes.
    x = jnp.transpose(x_ncl, (0, 2, 1)).reshape(n * l0, c0)
    x = _pad_lanes(x, _LANE)

    vmem = pl.BlockSpec(memory_space=pltpu.MemorySpace.VMEM)
    hbm = pl.BlockSpec(memory_space=pl.ANY)

    ins = [x,
           _pad_lanes(params["bn1_g"].reshape(1, -1), _LANE),
           _pad_lanes(params["bn1_b"].reshape(1, -1), _LANE)]
    specs = [vmem, vmem, vmem]
    scratch = []
    cout_last = None
    for i in range(_NUM_LAYERS):
        w = params[f"conv{i+1}_w"]                   # (3, cin, cout)
        _, cin, cout = w.shape
        assert cin <= _LANE, "cin > 128 needs multi-block K (not implemented)"
        coutp = max(_LANE, ((cout + _LANE - 1) // _LANE) * _LANE)
        wp = jnp.pad(w, ((0, 0), (0, _LANE - cin), (0, coutp - cout)))
        ins.append(wp.astype(jnp.bfloat16))          # (3, 128, coutp) bf16
        if i in _PREFETCH:
            specs.append(hbm)                        # stays in HBM, DMA'd in-kernel
            scratch.append(pltpu.VMEM((3, _LANE, coutp), jnp.bfloat16))
        else:
            specs.append(vmem)
        ins.append(_pad_lanes(params[f"conv{i+1}_b"].reshape(1, -1), coutp))
        ins.append(_pad_lanes(params[f"bn{i+2}_g"].reshape(1, -1), coutp))
        ins.append(_pad_lanes(params[f"bn{i+2}_b"].reshape(1, -1), coutp))
        specs += [vmem, vmem, vmem]
        cout_last = cout

    scratch.append(pltpu.SemaphoreType.DMA((len(_PREFETCH),)))

    l_out = l0 // 64
    coutp_last = max(_LANE, ((cout_last + _LANE - 1) // _LANE) * _LANE)
    out = pl.pallas_call(
        _make_fused_kernel(n, l0),
        out_shape=jax.ShapeDtypeStruct((n * l_out, coutp_last), x_ncl.dtype),
        in_specs=specs,
        out_specs=vmem,
        scratch_shapes=scratch,
        compiler_params=pltpu.CompilerParams(vmem_limit_bytes=32 * 1024 * 1024),
    )(*ins)

    out = out[:, :cout_last]
    # (N*Lout, Cout) -> NCL to match the PyTorch module's output convention.
    return jnp.transpose(out.reshape(n, l_out, cout_last), (0, 2, 1))


# ----------------------------------------------------------------------------
# Parameter init (kernel-native layout: conv weight (3, Cin, Cout))
# ----------------------------------------------------------------------------
def init_params(key, num_channel):
    params = {}
    chans = [num_channel * (2 ** i) for i in range(7)]  # C, 2C, ..., 64C
    for i in range(6):
        cin, cout = chans[i], chans[i + 1]
        key, k1, k2 = jax.random.split(key, 3)
        scale = 1.0 / jnp.sqrt(3.0 * cin)
        params[f"conv{i+1}_w"] = scale * jax.random.normal(
            k1, (3, cin, cout), jnp.float32)
        params[f"conv{i+1}_b"] = scale * jax.random.normal(
            k2, (cout,), jnp.float32)
    for i in range(7):
        c = chans[i]
        key, k1, k2 = jax.random.split(key, 3)
        params[f"bn{i+1}_g"] = 1.0 + 0.1 * jax.random.normal(k1, (c,), jnp.float32)
        params[f"bn{i+1}_b"] = 0.1 * jax.random.normal(k2, (c,), jnp.float32)
    return params


# ----------------------------------------------------------------------------
# Plain-JAX reference (same math, fully independent path) for correctness.
# matmul_dtype=bf16 matches the kernel's MXU-operand precision choice.
# ----------------------------------------------------------------------------
def _ref_forward(x_ncl, params, matmul_dtype=jnp.float32):
    x = jnp.transpose(x_ncl, (0, 2, 1))  # NLC

    def bn(x, g, b):
        m = jnp.mean(x, axis=(0, 1), keepdims=True)
        v = jnp.mean((x - m) ** 2, axis=(0, 1), keepdims=True)
        return (x - m) * jax.lax.rsqrt(v + _EPS) * g + b

    def conv(x, w, bias):
        xp = jnp.pad(x, ((0, 0), (1, 1), (0, 0)), mode="edge")
        l = x.shape[1]
        acc = sum(jnp.einsum("nlc,cd->nld",
                             xp[:, k:k + l, :].astype(matmul_dtype),
                             w[k].astype(matmul_dtype),
                             preferred_element_type=jnp.float32)
                  for k in range(3))
        return jnp.maximum(acc + bias, 0.0)

    def pool(x):
        n, l, c = x.shape
        return jnp.max(x.reshape(n, l // 2, 2, c), axis=2)

    x = bn(x, params["bn1_g"], params["bn1_b"])
    for i in range(6):
        x = conv(x, params[f"conv{i+1}_w"], params[f"conv{i+1}_b"])
        x = bn(x, params[f"bn{i+2}_g"], params[f"bn{i+2}_b"])
        x = pool(x)
    return jnp.transpose(x, (0, 2, 1))


if __name__ == "__main__":
    num_channel = 4
    N, L = 2, 128                       # L >= 64 so all six maxpools are valid
    key = jax.random.PRNGKey(0)
    kx, kp = jax.random.split(key)
    x = jax.random.normal(kx, (N, num_channel, L), jnp.float32)   # NCL input
    params = init_params(kp, num_channel)

    out = jax.block_until_ready(cnn_forward(x, params))
    assert out.shape == (N, num_channel * 64, L // 64), out.shape

    # Compare against a reference that makes the same bf16-operand /
    # f32-accumulation matmul choice (the bf16 MXU path trades ~1e-2 rel
    # accuracy vs a pure-f32 reference; that is a precision choice, not a bug).
    ref = _ref_forward(x, params, matmul_dtype=jnp.bfloat16)
    max_err = float(jnp.max(jnp.abs(out - ref)))
    assert jnp.allclose(out, ref, atol=2e-2, rtol=2e-2), max_err

    print("KERNEL_OK")
</pallas_src>

<mosaic_0001>
module attributes {stable_mosaic.version = 11 : i64} {
  func.func @kernel(%arg0: memref<256x128xf32, #tpu.memory_space<vmem>>, %arg1: memref<1x128xf32, #tpu.memory_space<vmem>>, %arg2: memref<1x128xf32, #tpu.memory_space<vmem>>, %arg3: memref<3x128x128xbf16, #tpu.memory_space<vmem>>, %arg4: memref<1x128xf32, #tpu.memory_space<vmem>>, %arg5: memref<1x128xf32, #tpu.memory_space<vmem>>, %arg6: memref<1x128xf32, #tpu.memory_space<vmem>>, %arg7: memref<3x128x128xbf16, #tpu.memory_space<vmem>>, %arg8: memref<1x128xf32, #tpu.memory_space<vmem>>, %arg9: memref<1x128xf32, #tpu.memory_space<vmem>>, %arg10: memref<1x128xf32, #tpu.memory_space<vmem>>, %arg11: memref<3x128x128xbf16, #tpu.memory_space<vmem>>, %arg12: memref<1x128xf32, #tpu.memory_space<vmem>>, %arg13: memref<1x128xf32, #tpu.memory_space<vmem>>, %arg14: memref<1x128xf32, #tpu.memory_space<vmem>>, %arg15: memref<3x128x128xbf16, #tpu.memory_space<vmem>>, %arg16: memref<1x128xf32, #tpu.memory_space<vmem>>, %arg17: memref<1x128xf32, #tpu.memory_space<vmem>>, %arg18: memref<1x128xf32, #tpu.memory_space<vmem>>, %arg19: memref<3x128x128xbf16, #tpu.memory_space<any>>, %arg20: memref<1x128xf32, #tpu.memory_space<vmem>>, %arg21: memref<1x128xf32, #tpu.memory_space<vmem>>, %arg22: memref<1x128xf32, #tpu.memory_space<vmem>>, %arg23: memref<3x128x256xbf16, #tpu.memory_space<any>>, %arg24: memref<1x256xf32, #tpu.memory_space<vmem>>, %arg25: memref<1x256xf32, #tpu.memory_space<vmem>>, %arg26: memref<1x256xf32, #tpu.memory_space<vmem>>, %arg27: memref<4x256xf32, #tpu.memory_space<vmem>>, %arg28: memref<3x128x128xbf16, #tpu.memory_space<vmem>>, %arg29: memref<3x128x256xbf16, #tpu.memory_space<vmem>>, %arg30: memref<2x!tpu.dma_semaphore, #tpu.memory_space<semaphore_mem>>) attributes {dimension_semantics = [], scalar_prefetch = 0 : i64, scratch_operands = 3 : i64, tpu.core_type = #tpu.core_type<tc>} {
    %c0_i32 = arith.constant 0 : i32
    %0 = tpu.memref_slice %arg30[%c0_i32] : memref<2x!tpu.dma_semaphore, #tpu.memory_space<semaphore_mem>> -> memref<1x!tpu.dma_semaphore, #tpu.memory_space<semaphore_mem>>
    %1 = tpu.memref_squeeze %0 : memref<1x!tpu.dma_semaphore, #tpu.memory_space<semaphore_mem>> -> memref<!tpu.dma_semaphore, #tpu.memory_space<semaphore_mem>>
    tpu.enqueue_dma source(%arg19 : memref<3x128x128xbf16, #tpu.memory_space<any>>) target(%arg28 : memref<3x128x128xbf16, #tpu.memory_space<vmem>>) target_semaphore(%1 : memref<!tpu.dma_semaphore, #tpu.memory_space<semaphore_mem>>)
    %c1_i32 = arith.constant 1 : i32
    %2 = tpu.memref_slice %arg30[%c1_i32] : memref<2x!tpu.dma_semaphore, #tpu.memory_space<semaphore_mem>> -> memref<1x!tpu.dma_semaphore, #tpu.memory_space<semaphore_mem>>
    %3 = tpu.memref_squeeze %2 : memref<1x!tpu.dma_semaphore, #tpu.memory_space<semaphore_mem>> -> memref<!tpu.dma_semaphore, #tpu.memory_space<semaphore_mem>>
    tpu.enqueue_dma source(%arg23 : memref<3x128x256xbf16, #tpu.memory_space<any>>) target(%arg29 : memref<3x128x256xbf16, #tpu.memory_space<vmem>>) target_semaphore(%3 : memref<!tpu.dma_semaphore, #tpu.memory_space<semaphore_mem>>)
    %c0 = arith.constant 0 : index
    %c0_0 = arith.constant 0 : index
    %4 = vector.load %arg0[%c0, %c0_0] : memref<256x128xf32, #tpu.memory_space<vmem>>, vector<256x128xf32>
    %cst = arith.constant dense<0.000000e+00> : vector<128xf32>
    %5 = vector.multi_reduction <add>, %4, %cst [0] : vector<256x128xf32> to vector<128xf32>
    %6 = vector.shape_cast %5 : vector<128xf32> to vector<1x128xf32>
    %cst_1 = arith.constant 2.560000e+02 : f32
    %7 = vector.broadcast %cst_1 : f32 to vector<1x128xf32>
    %8 = arith.divf %6, %7 : vector<1x128xf32>
    %9 = arith.mulf %4, %4 : vector<256x128xf32>
    %cst_2 = arith.constant dense<0.000000e+00> : vector<128xf32>
    %10 = vector.multi_reduction <add>, %9, %cst_2 [0] : vector<256x128xf32> to vector<128xf32>
    %11 = vector.shape_cast %10 : vector<128xf32> to vector<1x128xf32>
    %cst_3 = arith.constant 2.560000e+02 : f32
    %12 = vector.broadcast %cst_3 : f32 to vector<1x128xf32>
    %13 = arith.divf %11, %12 : vector<1x128xf32>
    %14 = arith.mulf %8, %8 : vector<1x128xf32>
    %15 = arith.subf %13, %14 : vector<1x128xf32>
    %cst_4 = arith.constant 0.000000e+00 : f32
    %16 = vector.broadcast %cst_4 : f32 to vector<1x128xf32>
    %17 = arith.maximumf %15, %16 : vector<1x128xf32>
    %18 = vector.broadcast %8 : vector<1x128xf32> to vector<256x128xf32>
    %19 = arith.subf %4, %18 : vector<256x128xf32>
    %cst_5 = arith.constant 9.99999974E-6 : f32
    %20 = vector.broadcast %cst_5 : f32 to vector<1x128xf32>
    %21 = arith.addf %17, %20 : vector<1x128xf32>
    %22 = math.rsqrt %21 : vector<1x128xf32>
    %23 = vector.broadcast %22 : vector<1x128xf32> to vector<256x128xf32>
    %24 = arith.mulf %19, %23 : vector<256x128xf32>
    %c0_6 = arith.constant 0 : index
    %c0_7 = arith.constant 0 : index
    %25 = vector.load %arg1[%c0_6, %c0_7] : memref<1x128xf32, #tpu.memory_space<vmem>>, vector<1x128xf32>
    %26 = vector.broadcast %25 : vector<1x128xf32> to vector<256x128xf32>
    %27 = arith.mulf %24, %26 : vector<256x128xf32>
    %c0_8 = arith.constant 0 : index
    %c0_9 = arith.constant 0 : index
    %28 = vector.load %arg2[%c0_8, %c0_9] : memref<1x128xf32, #tpu.memory_space<vmem>>, vector<1x128xf32>
    %29 = vector.broadcast %28 : vector<1x128xf32> to vector<256x128xf32>
    %30 = arith.addf %27, %29 : vector<256x128xf32>
    %31 = tpu.iota {dimensions = array<i32: 0>} : vector<256x1xi32>
    %c128_i32 = arith.constant 128 : i32
    %c0_i32_10 = arith.constant 0 : i32
    %32 = arith.cmpi eq, %c128_i32, %c0_i32_10 : i32
    %c1_i32_11 = arith.constant 1 : i32
    %33 = arith.select %32, %c1_i32_11, %c128_i32 : i32
    %34 = vector.broadcast %33 : i32 to vector<256x1xi32>
    %35 = arith.remsi %31, %34 : vector<256x1xi32>
    %c0_i32_12 = arith.constant 0 : i32
    %36 = vector.broadcast %c0_i32_12 : i32 to vector<256x1xi32>
    %37 = arith.cmpi ne, %35, %36 : vector<256x1xi32>
    %c0_i32_13 = arith.constant 0 : i32
    %38 = vector.broadcast %c0_i32_13 : i32 to vector<256x1xi32>
    %39 = arith.cmpi slt, %35, %38 : vector<256x1xi32>
    %c0_i32_14 = arith.constant 0 : i32
    %40 = arith.cmpi slt, %33, %c0_i32_14 : i32
    %41 = vector.broadcast %40 : i1 to vector<256x1xi1>
    %42 = vector.broadcast %41 : vector<256x1xi1> to vector<256x1xi1>
    %43 = arith.xori %39, %42 : vector<256x1xi1>
    %44 = arith.andi %43, %37 : vector<256x1xi1>
    %45 = vector.broadcast %33 : i32 to vector<256x1xi32>
    %46 = arith.addi %35, %45 : vector<256x1xi32>
    %47 = arith.select %44, %46, %35 : vector<256x1xi1>, vector<256x1xi32>
    %48 = vector.shape_cast %47 : vector<256x1xi32> to vector<256x1xi32>
    %49 = vector.broadcast %48 : vector<256x1xi32> to vector<256x128xi32>
    %c0_i32_15 = arith.constant 0 : i32
    %50 = vector.broadcast %c0_i32_15 : i32 to vector<256x128xi32>
    %51 = arith.cmpi eq, %49, %50 : vector<256x128xi32>
    %c1_i32_16 = arith.constant 1 : i32
    %52 = tpu.dynamic_rotate %30 by %c1_i32_16 dim 0 : vector<256x128xf32>, i32 -> vector<256x128xf32>
    %53 = arith.select %51, %30, %52 : vector<256x128xi1>, vector<256x128xf32>
    %c127_i32 = arith.constant 127 : i32
    %54 = vector.broadcast %c127_i32 : i32 to vector<256x128xi32>
    %55 = arith.cmpi eq, %49, %54 : vector<256x128xi32>
    %c255_i32 = arith.constant 255 : i32
    %56 = tpu.dynamic_rotate %30 by %c255_i32 dim 0 : vector<256x128xf32>, i32 -> vector<256x128xf32>
    %57 = arith.select %55, %30, %56 : vector<256x128xi1>, vector<256x128xf32>
    %58 = arith.truncf %53 : vector<256x128xf32> to vector<256x128xbf16>
    %c0_17 = arith.constant 0 : index
    %c0_18 = arith.constant 0 : index
    %c0_19 = arith.constant 0 : index
    %59 = vector.load %arg3[%c0_17, %c0_18, %c0_19] : memref<3x128x128xbf16, #tpu.memory_space<vmem>>, vector<1x128x128xbf16>
    %60 = vector.shape_cast %59 : vector<1x128x128xbf16> to vector<128x128xbf16>
    %cst_20 = arith.constant dense<0.000000e+00> : vector<256x128xf32>
    %61 = tpu.matmul %58, %60, %cst_20 {dimension_numbers = #tpu.dot_dimension_numbers<[1], [0], [0], [1], [0, 0, 1, 1], [], []>} : vector<256x128xbf16>, vector<128x128xbf16>, vector<256x128xf32> -> vector<256x128xf32>
    %62 = arith.truncf %30 : vector<256x128xf32> to vector<256x128xbf16>
    %c1 = arith.constant 1 : index
    %c0_21 = arith.constant 0 : index
    %c0_22 = arith.constant 0 : index
    %63 = vector.load %arg3[%c1, %c0_21, %c0_22] : memref<3x128x128xbf16, #tpu.memory_space<vmem>>, vector<1x128x128xbf16>
    %64 = vector.shape_cast %63 : vector<1x128x128xbf16> to vector<128x128xbf16>
    %cst_23 = arith.constant dense<0.000000e+00> : vector<256x128xf32>
    %65 = tpu.matmul %62, %64, %cst_23 {dimension_numbers = #tpu.dot_dimension_numbers<[1], [0], [0], [1], [0, 0, 1, 1], [], []>} : vector<256x128xbf16>, vector<128x128xbf16>, vector<256x128xf32> -> vector<256x128xf32>
    %66 = arith.addf %61, %65 : vector<256x128xf32>
    %67 = arith.truncf %57 : vector<256x128xf32> to vector<256x128xbf16>
    %c2 = arith.constant 2 : index
    %c0_24 = arith.constant 0 : index
    %c0_25 = arith.constant 0 : index
    %68 = vector.load %arg3[%c2, %c0_24, %c0_25] : memref<3x128x128xbf16, #tpu.memory_space<vmem>>, vector<1x128x128xbf16>
    %69 = vector.shape_cast %68 : vector<1x128x128xbf16> to vector<128x128xbf16>
    %cst_26 = arith.constant dense<0.000000e+00> : vector<256x128xf32>
    %70 = tpu.matmul %67, %69, %cst_26 {dimension_numbers = #tpu.dot_dimension_numbers<[1], [0], [0], [1], [0, 0, 1, 1], [], []>} : vector<256x128xbf16>, vector<128x128xbf16>, vector<256x128xf32> -> vector<256x128xf32>
    %71 = arith.addf %66, %70 : vector<256x128xf32>
    %c0_27 = arith.constant 0 : index
    %c0_28 = arith.constant 0 : index
    %72 = vector.load %arg4[%c0_27, %c0_28] : memref<1x128xf32, #tpu.memory_space<vmem>>, vector<1x128xf32>
    %73 = vector.broadcast %72 : vector<1x128xf32> to vector<256x128xf32>
    %74 = arith.addf %71, %73 : vector<256x128xf32>
    %cst_29 = arith.constant 0.000000e+00 : f32
    %75 = vector.broadcast %cst_29 : f32 to vector<256x128xf32>
    %76 = arith.maximumf %74, %75 : vector<256x128xf32>
    %cst_30 = arith.constant dense<0.000000e+00> : vector<128xf32>
    %77 = vector.multi_reduction <add>, %76, %cst_30 [0] : vector<256x128xf32> to vector<128xf32>
    %78 = vector.shape_cast %77 : vector<128xf32> to vector<1x128xf32>
    %cst_31 = arith.constant 2.560000e+02 : f32
    %79 = vector.broadcast %cst_31 : f32 to vector<1x128xf32>
    %80 = arith.divf %78, %79 : vector<1x128xf32>
    %81 = arith.mulf %76, %76 : vector<256x128xf32>
    %cst_32 = arith.constant dense<0.000000e+00> : vector<128xf32>
    %82 = vector.multi_reduction <add>, %81, %cst_32 [0] : vector<256x128xf32> to vector<128xf32>
    %83 = vector.shape_cast %82 : vector<128xf32> to vector<1x128xf32>
    %cst_33 = arith.constant 2.560000e+02 : f32
    %84 = vector.broadcast %cst_33 : f32 to vector<1x128xf32>
    %85 = arith.divf %83, %84 : vector<1x128xf32>
    %86 = arith.mulf %80, %80 : vector<1x128xf32>
    %87 = arith.subf %85, %86 : vector<1x128xf32>
    %cst_34 = arith.constant 0.000000e+00 : f32
    %88 = vector.broadcast %cst_34 : f32 to vector<1x128xf32>
    %89 = arith.maximumf %87, %88 : vector<1x128xf32>
    %90 = vector.broadcast %80 : vector<1x128xf32> to vector<256x128xf32>
    %91 = arith.subf %76, %90 : vector<256x128xf32>
    %cst_35 = arith.constant 9.99999974E-6 : f32
    %92 = vector.broadcast %cst_35 : f32 to vector<1x128xf32>
    %93 = arith.addf %89, %92 : vector<1x128xf32>
    %94 = math.rsqrt %93 : vector<1x128xf32>
    %95 = vector.broadcast %94 : vector<1x128xf32> to vector<256x128xf32>
    %96 = arith.mulf %91, %95 : vector<256x128xf32>
    %c0_36 = arith.constant 0 : index
    %c0_37 = arith.constant 0 : index
    %97 = vector.load %arg5[%c0_36, %c0_37] : memref<1x128xf32, #tpu.memory_space<vmem>>, vector<1x128xf32>
    %98 = vector.broadcast %97 : vector<1x128xf32> to vector<256x128xf32>
    %99 = arith.mulf %96, %98 : vector<256x128xf32>
    %c0_38 = arith.constant 0 : index
    %c0_39 = arith.constant 0 : index
    %100 = vector.load %arg6[%c0_38, %c0_39] : memref<1x128xf32, #tpu.memory_space<vmem>>, vector<1x128xf32>
    %101 = vector.broadcast %100 : vector<1x128xf32> to vector<256x128xf32>
    %102 = arith.addf %99, %101 : vector<256x128xf32>
    %103 = vector.shape_cast %102 : vector<256x128xf32> to vector<128x2x128xf32>
    %cst_40 = arith.constant dense<0xFF800000> : vector<128x128xf32>
    %104 = vector.multi_reduction <maximumf>, %103, %cst_40 [1] : vector<128x2x128xf32> to vector<128x128xf32>
    %105 = tpu.iota {dimensions = array<i32: 0>} : vector<128x1xi32>
    %c64_i32 = arith.constant 64 : i32
    %c0_i32_41 = arith.constant 0 : i32
    %106 = arith.cmpi eq, %c64_i32, %c0_i32_41 : i32
    %c1_i32_42 = arith.constant 1 : i32
    %107 = arith.select %106, %c1_i32_42, %c64_i32 : i32
    %108 = vector.broadcast %107 : i32 to vector<128x1xi32>
    %109 = arith.remsi %105, %108 : vector<128x1xi32>
    %c0_i32_43 = arith.constant 0 : i32
    %110 = vector.broadcast %c0_i32_43 : i32 to vector<128x1xi32>
    %111 = arith.cmpi ne, %109, %110 : vector<128x1xi32>
    %c0_i32_44 = arith.constant 0 : i32
    %112 = vector.broadcast %c0_i32_44 : i32 to vector<128x1xi32>
    %113 = arith.cmpi slt, %109, %112 : vector<128x1xi32>
    %c0_i32_45 = arith.constant 0 : i32
    %114 = arith.cmpi slt, %107, %c0_i32_45 : i32
    %115 = vector.broadcast %114 : i1 to vector<128x1xi1>
    %116 = vector.broadcast %115 : vector<128x1xi1> to vector<128x1xi1>
    %117 = arith.xori %113, %116 : vector<128x1xi1>
    %118 = arith.andi %117, %111 : vector<128x1xi1>
    %119 = vector.broadcast %107 : i32 to vector<128x1xi32>
    %120 = arith.addi %109, %119 : vector<128x1xi32>
    %121 = arith.select %118, %120, %109 : vector<128x1xi1>, vector<128x1xi32>
    %122 = vector.shape_cast %121 : vector<128x1xi32> to vector<128x1xi32>
    %123 = vector.broadcast %122 : vector<128x1xi32> to vector<128x128xi32>
    %c0_i32_46 = arith.constant 0 : i32
    %124 = vector.broadcast %c0_i32_46 : i32 to vector<128x128xi32>
    %125 = arith.cmpi eq, %123, %124 : vector<128x128xi32>
    %c1_i32_47 = arith.constant 1 : i32
    %126 = tpu.dynamic_rotate %104 by %c1_i32_47 dim 0 : vector<128x128xf32>, i32 -> vector<128x128xf32>
    %127 = arith.select %125, %104, %126 : vector<128x128xi1>, vector<128x128xf32>
    %c63_i32 = arith.constant 63 : i32
    %128 = vector.broadcast %c63_i32 : i32 to vector<128x128xi32>
    %129 = arith.cmpi eq, %123, %128 : vector<128x128xi32>
    %c127_i32_48 = arith.constant 127 : i32
    %130 = tpu.dynamic_rotate %104 by %c127_i32_48 dim 0 : vector<128x128xf32>, i32 -> vector<128x128xf32>
    %131 = arith.select %129, %104, %130 : vector<128x128xi1>, vector<128x128xf32>
    %132 = arith.truncf %127 : vector<128x128xf32> to vector<128x128xbf16>
    %c0_49 = arith.constant 0 : index
    %c0_50 = arith.constant 0 : index
    %c0_51 = arith.constant 0 : index
    %133 = vector.load %arg7[%c0_49, %c0_50, %c0_51] : memref<3x128x128xbf16, #tpu.memory_space<vmem>>, vector<1x128x128xbf16>
    %134 = vector.shape_cast %133 : vector<1x128x128xbf16> to vector<128x128xbf16>
    %cst_52 = arith.constant dense<0.000000e+00> : vector<128x128xf32>
    %135 = tpu.matmul %132, %134, %cst_52 {dimension_numbers = #tpu.dot_dimension_numbers<[1], [0], [0], [1], [0, 0, 1, 1], [], []>} : vector<128x128xbf16>, vector<128x128xbf16>, vector<128x128xf32> -> vector<128x128xf32>
    %136 = arith.truncf %104 : vector<128x128xf32> to vector<128x128xbf16>
    %c1_53 = arith.constant 1 : index
    %c0_54 = arith.constant 0 : index
    %c0_55 = arith.constant 0 : index
    %137 = vector.load %arg7[%c1_53, %c0_54, %c0_55] : memref<3x128x128xbf16, #tpu.memory_space<vmem>>, vector<1x128x128xbf16>
    %138 = vector.shape_cast %137 : vector<1x128x128xbf16> to vector<128x128xbf16>
    %cst_56 = arith.constant dense<0.000000e+00> : vector<128x128xf32>
    %139 = tpu.matmul %136, %138, %cst_56 {dimension_numbers = #tpu.dot_dimension_numbers<[1], [0], [0], [1], [0, 0, 1, 1], [], []>} : vector<128x128xbf16>, vector<128x128xbf16>, vector<128x128xf32> -> vector<128x128xf32>
    %140 = arith.addf %135, %139 : vector<128x128xf32>
    %141 = arith.truncf %131 : vector<128x128xf32> to vector<128x128xbf16>
    %c2_57 = arith.constant 2 : index
    %c0_58 = arith.constant 0 : index
    %c0_59 = arith.constant 0 : index
    %142 = vector.load %arg7[%c2_57, %c0_58, %c0_59] : memref<3x128x128xbf16, #tpu.memory_space<vmem>>, vector<1x128x128xbf16>
    %143 = vector.shape_cast %142 : vector<1x128x128xbf16> to vector<128x128xbf16>
    %cst_60 = arith.constant dense<0.000000e+00> : vector<128x128xf32>
    %144 = tpu.matmul %141, %143, %cst_60 {dimension_numbers = #tpu.dot_dimension_numbers<[1], [0], [0], [1], [0, 0, 1, 1], [], []>} : vector<128x128xbf16>, vector<128x128xbf16>, vector<128x128xf32> -> vector<128x128xf32>
    %145 = arith.addf %140, %144 : vector<128x128xf32>
    %c0_61 = arith.constant 0 : index
    %c0_62 = arith.constant 0 : index
    %146 = vector.load %arg8[%c0_61, %c0_62] : memref<1x128xf32, #tpu.memory_space<vmem>>, vector<1x128xf32>
    %147 = vector.broadcast %146 : vector<1x128xf32> to vector<128x128xf32>
    %148 = arith.addf %145, %147 : vector<128x128xf32>
    %cst_63 = arith.constant 0.000000e+00 : f32
    %149 = vector.broadcast %cst_63 : f32 to vector<128x128xf32>
    %150 = arith.maximumf %148, %149 : vector<128x128xf32>
    %cst_64 = arith.constant dense<0.000000e+00> : vector<128xf32>
    %151 = vector.multi_reduction <add>, %150, %cst_64 [0] : vector<128x128xf32> to vector<128xf32>
    %152 = vector.shape_cast %151 : vector<128xf32> to vector<1x128xf32>
    %cst_65 = arith.constant 1.280000e+02 : f32
    %153 = vector.broadcast %cst_65 : f32 to vector<1x128xf32>
    %154 = arith.divf %152, %153 : vector<1x128xf32>
    %155 = arith.mulf %150, %150 : vector<128x128xf32>
    %cst_66 = arith.constant dense<0.000000e+00> : vector<128xf32>
    %156 = vector.multi_reduction <add>, %155, %cst_66 [0] : vector<128x128xf32> to vector<128xf32>
    %157 = vector.shape_cast %156 : vector<128xf32> to vector<1x128xf32>
    %cst_67 = arith.constant 1.280000e+02 : f32
    %158 = vector.broadcast %cst_67 : f32 to vector<1x128xf32>
    %159 = arith.divf %157, %158 : vector<1x128xf32>
    %160 = arith.mulf %154, %154 : vector<1x128xf32>
    %161 = arith.subf %159, %160 : vector<1x128xf32>
    %cst_68 = arith.constant 0.000000e+00 : f32
    %162 = vector.broadcast %cst_68 : f32 to vector<1x128xf32>
    %163 = arith.maximumf %161, %162 : vector<1x128xf32>
    %164 = vector.broadcast %154 : vector<1x128xf32> to vector<128x128xf32>
    %165 = arith.subf %150, %164 : vector<128x128xf32>
    %cst_69 = arith.constant 9.99999974E-6 : f32
    %166 = vector.broadcast %cst_69 : f32 to vector<1x128xf32>
    %167 = arith.addf %163, %166 : vector<1x128xf32>
    %168 = math.rsqrt %167 : vector<1x128xf32>
    %169 = vector.broadcast %168 : vector<1x128xf32> to vector<128x128xf32>
    %170 = arith.mulf %165, %169 : vector<128x128xf32>
    %c0_70 = arith.constant 0 : index
    %c0_71 = arith.constant 0 : index
    %171 = vector.load %arg9[%c0_70, %c0_71] : memref<1x128xf32, #tpu.memory_space<vmem>>, vector<1x128xf32>
    %172 = vector.broadcast %171 : vector<1x128xf32> to vector<128x128xf32>
    %173 = arith.mulf %170, %172 : vector<128x128xf32>
    %c0_72 = arith.constant 0 : index
    %c0_73 = arith.constant 0 : index
    %174 = vector.load %arg10[%c0_72, %c0_73] : memref<1x128xf32, #tpu.memory_space<vmem>>, vector<1x128xf32>
    %175 = vector.broadcast %174 : vector<1x128xf32> to vector<128x128xf32>
    %176 = arith.addf %173, %175 : vector<128x128xf32>
    %177 = vector.shape_cast %176 : vector<128x128xf32> to vector<64x2x128xf32>
    %cst_74 = arith.constant dense<0xFF800000> : vector<64x128xf32>
    %178 = vector.multi_reduction <maximumf>, %177, %cst_74 [1] : vector<64x2x128xf32> to vector<64x128xf32>
    %179 = tpu.iota {dimensions = array<i32: 0>} : vector<64x1xi32>
    %c32_i32 = arith.constant 32 : i32
    %c0_i32_75 = arith.constant 0 : i32
    %180 = arith.cmpi eq, %c32_i32, %c0_i32_75 : i32
    %c1_i32_76 = arith.constant 1 : i32
    %181 = arith.select %180, %c1_i32_76, %c32_i32 : i32
    %182 = vector.broadcast %181 : i32 to vector<64x1xi32>
    %183 = arith.remsi %179, %182 : vector<64x1xi32>
    %c0_i32_77 = arith.constant 0 : i32
    %184 = vector.broadcast %c0_i32_77 : i32 to vector<64x1xi32>
    %185 = arith.cmpi ne, %183, %184 : vector<64x1xi32>
    %c0_i32_78 = arith.constant 0 : i32
    %186 = vector.broadcast %c0_i32_78 : i32 to vector<64x1xi32>
    %187 = arith.cmpi slt, %183, %186 : vector<64x1xi32>
    %c0_i32_79 = arith.constant 0 : i32
    %188 = arith.cmpi slt, %181, %c0_i32_79 : i32
    %189 = vector.broadcast %188 : i1 to vector<64x1xi1>
    %190 = vector.broadcast %189 : vector<64x1xi1> to vector<64x1xi1>
    %191 = arith.xori %187, %190 : vector<64x1xi1>
    %192 = arith.andi %191, %185 : vector<64x1xi1>
    %193 = vector.broadcast %181 : i32 to vector<64x1xi32>
    %194 = arith.addi %183, %193 : vector<64x1xi32>
    %195 = arith.select %192, %194, %183 : vector<64x1xi1>, vector<64x1xi32>
    %196 = vector.shape_cast %195 : vector<64x1xi32> to vector<64x1xi32>
    %197 = vector.broadcast %196 : vector<64x1xi32> to vector<64x128xi32>
    %c0_i32_80 = arith.constant 0 : i32
    %198 = vector.broadcast %c0_i32_80 : i32 to vector<64x128xi32>
    %199 = arith.cmpi eq, %197, %198 : vector<64x128xi32>
    %c1_i32_81 = arith.constant 1 : i32
    %200 = tpu.dynamic_rotate %178 by %c1_i32_81 dim 0 : vector<64x128xf32>, i32 -> vector<64x128xf32>
    %201 = arith.select %199, %178, %200 : vector<64x128xi1>, vector<64x128xf32>
    %c31_i32 = arith.constant 31 : i32
    %202 = vector.broadcast %c31_i32 : i32 to vector<64x128xi32>
    %203 = arith.cmpi eq, %197, %202 : vector<64x128xi32>
    %c63_i32_82 = arith.constant 63 : i32
    %204 = tpu.dynamic_rotate %178 by %c63_i32_82 dim 0 : vector<64x128xf32>, i32 -> vector<64x128xf32>
    %205 = arith.select %203, %178, %204 : vector<64x128xi1>, vector<64x128xf32>
    %206 = arith.truncf %201 : vector<64x128xf32> to vector<64x128xbf16>
    %c0_83 = arith.constant 0 : index
    %c0_84 = arith.constant 0 : index
    %c0_85 = arith.constant 0 : index
    %207 = vector.load %arg11[%c0_83, %c0_84, %c0_85] : memref<3x128x128xbf16, #tpu.memory_space<vmem>>, vector<1x128x128xbf16>
    %208 = vector.shape_cast %207 : vector<1x128x128xbf16> to vector<128x128xbf16>
    %cst_86 = arith.constant dense<0.000000e+00> : vector<64x128xf32>
    %209 = tpu.matmul %206, %208, %cst_86 {dimension_numbers = #tpu.dot_dimension_numbers<[1], [0], [0], [1], [0, 0, 1, 1], [], []>} : vector<64x128xbf16>, vector<128x128xbf16>, vector<64x128xf32> -> vector<64x128xf32>
    %210 = arith.truncf %178 : vector<64x128xf32> to vector<64x128xbf16>
    %c1_87 = arith.constant 1 : index
    %c0_88 = arith.constant 0 : index
    %c0_89 = arith.constant 0 : index
    %211 = vector.load %arg11[%c1_87, %c0_88, %c0_89] : memref<3x128x128xbf16, #tpu.memory_space<vmem>>, vector<1x128x128xbf16>
    %212 = vector.shape_cast %211 : vector<1x128x128xbf16> to vector<128x128xbf16>
    %cst_90 = arith.constant dense<0.000000e+00> : vector<64x128xf32>
    %213 = tpu.matmul %210, %212, %cst_90 {dimension_numbers = #tpu.dot_dimension_numbers<[1], [0], [0], [1], [0, 0, 1, 1], [], []>} : vector<64x128xbf16>, vector<128x128xbf16>, vector<64x128xf32> -> vector<64x128xf32>
    %214 = arith.addf %209, %213 : vector<64x128xf32>
    %215 = arith.truncf %205 : vector<64x128xf32> to vector<64x128xbf16>
    %c2_91 = arith.constant 2 : index
    %c0_92 = arith.constant 0 : index
    %c0_93 = arith.constant 0 : index
    %216 = vector.load %arg11[%c2_91, %c0_92, %c0_93] : memref<3x128x128xbf16, #tpu.memory_space<vmem>>, vector<1x128x128xbf16>
    %217 = vector.shape_cast %216 : vector<1x128x128xbf16> to vector<128x128xbf16>
    %cst_94 = arith.constant dense<0.000000e+00> : vector<64x128xf32>
    %218 = tpu.matmul %215, %217, %cst_94 {dimension_numbers = #tpu.dot_dimension_numbers<[1], [0], [0], [1], [0, 0, 1, 1], [], []>} : vector<64x128xbf16>, vector<128x128xbf16>, vector<64x128xf32> -> vector<64x128xf32>
    %219 = arith.addf %214, %218 : vector<64x128xf32>
    %c0_95 = arith.constant 0 : index
    %c0_96 = arith.constant 0 : index
    %220 = vector.load %arg12[%c0_95, %c0_96] : memref<1x128xf32, #tpu.memory_space<vmem>>, vector<1x128xf32>
    %221 = vector.broadcast %220 : vector<1x128xf32> to vector<64x128xf32>
    %222 = arith.addf %219, %221 : vector<64x128xf32>
    %cst_97 = arith.constant 0.000000e+00 : f32
    %223 = vector.broadcast %cst_97 : f32 to vector<64x128xf32>
    %224 = arith.maximumf %222, %223 : vector<64x128xf32>
    %cst_98 = arith.constant dense<0.000000e+00> : vector<128xf32>
    %225 = vector.multi_reduction <add>, %224, %cst_98 [0] : vector<64x128xf32> to vector<128xf32>
    %226 = vector.shape_cast %225 : vector<128xf32> to vector<1x128xf32>
    %cst_99 = arith.constant 6.400000e+01 : f32
    %227 = vector.broadcast %cst_99 : f32 to vector<1x128xf32>
    %228 = arith.divf %226, %227 : vector<1x128xf32>
    %229 = arith.mulf %224, %224 : vector<64x128xf32>
    %cst_100 = arith.constant dense<0.000000e+00> : vector<128xf32>
    %230 = vector.multi_reduction <add>, %229, %cst_100 [0] : vector<64x128xf32> to vector<128xf32>
    %231 = vector.shape_cast %230 : vector<128xf32> to vector<1x128xf32>
    %cst_101 = arith.constant 6.400000e+01 : f32
    %232 = vector.broadcast %cst_101 : f32 to vector<1x128xf32>
    %233 = arith.divf %231, %232 : vector<1x128xf32>
    %234 = arith.mulf %228, %228 : vector<1x128xf32>
    %235 = arith.subf %233, %234 : vector<1x128xf32>
    %cst_102 = arith.constant 0.000000e+00 : f32
    %236 = vector.broadcast %cst_102 : f32 to vector<1x128xf32>
    %237 = arith.maximumf %235, %236 : vector<1x128xf32>
    %238 = vector.broadcast %228 : vector<1x128xf32> to vector<64x128xf32>
    %239 = arith.subf %224, %238 : vector<64x128xf32>
    %cst_103 = arith.constant 9.99999974E-6 : f32
    %240 = vector.broadcast %cst_103 : f32 to vector<1x128xf32>
    %241 = arith.addf %237, %240 : vector<1x128xf32>
    %242 = math.rsqrt %241 : vector<1x128xf32>
    %243 = vector.broadcast %242 : vector<1x128xf32> to vector<64x128xf32>
    %244 = arith.mulf %239, %243 : vector<64x128xf32>
    %c0_104 = arith.constant 0 : index
    %c0_105 = arith.constant 0 : index
    %245 = vector.load %arg13[%c0_104, %c0_105] : memref<1x128xf32, #tpu.memory_space<vmem>>, vector<1x128xf32>
    %246 = vector.broadcast %245 : vector<1x128xf32> to vector<64x128xf32>
    %247 = arith.mulf %244, %246 : vector<64x128xf32>
    %c0_106 = arith.constant 0 : index
    %c0_107 = arith.constant 0 : index
    %248 = vector.load %arg14[%c0_106, %c0_107] : memref<1x128xf32, #tpu.memory_space<vmem>>, vector<1x128xf32>
    %249 = vector.broadcast %248 : vector<1x128xf32> to vector<64x128xf32>
    %250 = arith.addf %247, %249 : vector<64x128xf32>
    %251 = vector.shape_cast %250 : vector<64x128xf32> to vector<32x2x128xf32>
    %cst_108 = arith.constant dense<0xFF800000> : vector<32x128xf32>
    %252 = vector.multi_reduction <maximumf>, %251, %cst_108 [1] : vector<32x2x128xf32> to vector<32x128xf32>
    %253 = tpu.iota {dimensions = array<i32: 0>} : vector<32x1xi32>
    %c16_i32 = arith.constant 16 : i32
    %c0_i32_109 = arith.constant 0 : i32
    %254 = arith.cmpi eq, %c16_i32, %c0_i32_109 : i32
    %c1_i32_110 = arith.constant 1 : i32
    %255 = arith.select %254, %c1_i32_110, %c16_i32 : i32
    %256 = vector.broadcast %255 : i32 to vector<32x1xi32>
    %257 = arith.remsi %253, %256 : vector<32x1xi32>
    %c0_i32_111 = arith.constant 0 : i32
    %258 = vector.broadcast %c0_i32_111 : i32 to vector<32x1xi32>
    %259 = arith.cmpi ne, %257, %258 : vector<32x1xi32>
    %c0_i32_112 = arith.constant 0 : i32
    %260 = vector.broadcast %c0_i32_112 : i32 to vector<32x1xi32>
    %261 = arith.cmpi slt, %257, %260 : vector<32x1xi32>
    %c0_i32_113 = arith.constant 0 : i32
    %262 = arith.cmpi slt, %255, %c0_i32_113 : i32
    %263 = vector.broadcast %262 : i1 to vector<32x1xi1>
    %264 = vector.broadcast %263 : vector<32x1xi1> to vector<32x1xi1>
    %265 = arith.xori %261, %264 : vector<32x1xi1>
    %266 = arith.andi %265, %259 : vector<32x1xi1>
    %267 = vector.broadcast %255 : i32 to vector<32x1xi32>
    %268 = arith.addi %257, %267 : vector<32x1xi32>
    %269 = arith.select %266, %268, %257 : vector<32x1xi1>, vector<32x1xi32>
    %270 = vector.shape_cast %269 : vector<32x1xi32> to vector<32x1xi32>
    %271 = vector.broadcast %270 : vector<32x1xi32> to vector<32x128xi32>
    %c0_i32_114 = arith.constant 0 : i32
    %272 = vector.broadcast %c0_i32_114 : i32 to vector<32x128xi32>
    %273 = arith.cmpi eq, %271, %272 : vector<32x128xi32>
    %c1_i32_115 = arith.constant 1 : i32
    %274 = tpu.dynamic_rotate %252 by %c1_i32_115 dim 0 : vector<32x128xf32>, i32 -> vector<32x128xf32>
    %275 = arith.select %273, %252, %274 : vector<32x128xi1>, vector<32x128xf32>
    %c15_i32 = arith.constant 15 : i32
    %276 = vector.broadcast %c15_i32 : i32 to vector<32x128xi32>
    %277 = arith.cmpi eq, %271, %276 : vector<32x128xi32>
    %c31_i32_116 = arith.constant 31 : i32
    %278 = tpu.dynamic_rotate %252 by %c31_i32_116 dim 0 : vector<32x128xf32>, i32 -> vector<32x128xf32>
    %279 = arith.select %277, %252, %278 : vector<32x128xi1>, vector<32x128xf32>
    %280 = arith.truncf %275 : vector<32x128xf32> to vector<32x128xbf16>
    %c0_117 = arith.constant 0 : index
    %c0_118 = arith.constant 0 : index
    %c0_119 = arith.constant 0 : index
    %281 = vector.load %arg15[%c0_117, %c0_118, %c0_119] : memref<3x128x128xbf16, #tpu.memory_space<vmem>>, vector<1x128x128xbf16>
    %282 = vector.shape_cast %281 : vector<1x128x128xbf16> to vector<128x128xbf16>
    %cst_120 = arith.constant dense<0.000000e+00> : vector<32x128xf32>
    %283 = tpu.matmul %280, %282, %cst_120 {dimension_numbers = #tpu.dot_dimension_numbers<[1], [0], [0], [1], [0, 0, 1, 1], [], []>} : vector<32x128xbf16>, vector<128x128xbf16>, vector<32x128xf32> -> vector<32x128xf32>
    %284 = arith.truncf %252 : vector<32x128xf32> to vector<32x128xbf16>
    %c1_121 = arith.constant 1 : index
    %c0_122 = arith.constant 0 : index
    %c0_123 = arith.constant 0 : index
    %285 = vector.load %arg15[%c1_121, %c0_122, %c0_123] : memref<3x128x128xbf16, #tpu.memory_space<vmem>>, vector<1x128x128xbf16>
    %286 = vector.shape_cast %285 : vector<1x128x128xbf16> to vector<128x128xbf16>
    %cst_124 = arith.constant dense<0.000000e+00> : vector<32x128xf32>
    %287 = tpu.matmul %284, %286, %cst_124 {dimension_numbers = #tpu.dot_dimension_numbers<[1], [0], [0], [1], [0, 0, 1, 1], [], []>} : vector<32x128xbf16>, vector<128x128xbf16>, vector<32x128xf32> -> vector<32x128xf32>
    %288 = arith.addf %283, %287 : vector<32x128xf32>
    %289 = arith.truncf %279 : vector<32x128xf32> to vector<32x128xbf16>
    %c2_125 = arith.constant 2 : index
    %c0_126 = arith.constant 0 : index
    %c0_127 = arith.constant 0 : index
    %290 = vector.load %arg15[%c2_125, %c0_126, %c0_127] : memref<3x128x128xbf16, #tpu.memory_space<vmem>>, vector<1x128x128xbf16>
    %291 = vector.shape_cast %290 : vector<1x128x128xbf16> to vector<128x128xbf16>
    %cst_128 = arith.constant dense<0.000000e+00> : vector<32x128xf32>
    %292 = tpu.matmul %289, %291, %cst_128 {dimension_numbers = #tpu.dot_dimension_numbers<[1], [0], [0], [1], [0, 0, 1, 1], [], []>} : vector<32x128xbf16>, vector<128x128xbf16>, vector<32x128xf32> -> vector<32x128xf32>
    %293 = arith.addf %288, %292 : vector<32x128xf32>
    %c0_129 = arith.constant 0 : index
    %c0_130 = arith.constant 0 : index
    %294 = vector.load %arg16[%c0_129, %c0_130] : memref<1x128xf32, #tpu.memory_space<vmem>>, vector<1x128xf32>
    %295 = vector.broadcast %294 : vector<1x128xf32> to vector<32x128xf32>
    %296 = arith.addf %293, %295 : vector<32x128xf32>
    %cst_131 = arith.constant 0.000000e+00 : f32
    %297 = vector.broadcast %cst_131 : f32 to vector<32x128xf32>
    %298 = arith.maximumf %296, %297 : vector<32x128xf32>
    %cst_132 = arith.constant dense<0.000000e+00> : vector<128xf32>
    %299 = vector.multi_reduction <add>, %298, %cst_132 [0] : vector<32x128xf32> to vector<128xf32>
    %300 = vector.shape_cast %299 : vector<128xf32> to vector<1x128xf32>
    %cst_133 = arith.constant 3.200000e+01 : f32
    %301 = vector.broadcast %cst_133 : f32 to vector<1x128xf32>
    %302 = arith.divf %300, %301 : vector<1x128xf32>
    %303 = arith.mulf %298, %298 : vector<32x128xf32>
    %cst_134 = arith.constant dense<0.000000e+00> : vector<128xf32>
    %304 = vector.multi_reduction <add>, %303, %cst_134 [0] : vector<32x128xf32> to vector<128xf32>
    %305 = vector.shape_cast %304 : vector<128xf32> to vector<1x128xf32>
    %cst_135 = arith.constant 3.200000e+01 : f32
    %306 = vector.broadcast %cst_135 : f32 to vector<1x128xf32>
    %307 = arith.divf %305, %306 : vector<1x128xf32>
    %308 = arith.mulf %302, %302 : vector<1x128xf32>
    %309 = arith.subf %307, %308 : vector<1x128xf32>
    %cst_136 = arith.constant 0.000000e+00 : f32
    %310 = vector.broadcast %cst_136 : f32 to vector<1x128xf32>
    %311 = arith.maximumf %309, %310 : vector<1x128xf32>
    %312 = vector.broadcast %302 : vector<1x128xf32> to vector<32x128xf32>
    %313 = arith.subf %298, %312 : vector<32x128xf32>
    %cst_137 = arith.constant 9.99999974E-6 : f32
    %314 = vector.broadcast %cst_137 : f32 to vector<1x128xf32>
    %315 = arith.addf %311, %314 : vector<1x128xf32>
    %316 = math.rsqrt %315 : vector<1x128xf32>
    %317 = vector.broadcast %316 : vector<1x128xf32> to vector<32x128xf32>
    %318 = arith.mulf %313, %317 : vector<32x128xf32>
    %c0_138 = arith.constant 0 : index
    %c0_139 = arith.constant 0 : index
    %319 = vector.load %arg17[%c0_138, %c0_139] : memref<1x128xf32, #tpu.memory_space<vmem>>, vector<1x128xf32>
    %320 = vector.broadcast %319 : vector<1x128xf32> to vector<32x128xf32>
    %321 = arith.mulf %318, %320 : vector<32x128xf32>
    %c0_140 = arith.constant 0 : index
    %c0_141 = arith.constant 0 : index
    %322 = vector.load %arg18[%c0_140, %c0_141] : memref<1x128xf32, #tpu.memory_space<vmem>>, vector<1x128xf32>
    %323 = vector.broadcast %322 : vector<1x128xf32> to vector<32x128xf32>
    %324 = arith.addf %321, %323 : vector<32x128xf32>
    %325 = vector.shape_cast %324 : vector<32x128xf32> to vector<16x2x128xf32>
    %cst_142 = arith.constant dense<0xFF800000> : vector<16x128xf32>
    %326 = vector.multi_reduction <maximumf>, %325, %cst_142 [1] : vector<16x2x128xf32> to vector<16x128xf32>
    %c0_i32_143 = arith.constant 0 : i32
    %327 = tpu.memref_slice %arg30[%c0_i32_143] : memref<2x!tpu.dma_semaphore, #tpu.memory_space<semaphore_mem>> -> memref<1x!tpu.dma_semaphore, #tpu.memory_space<semaphore_mem>>
    %328 = tpu.memref_squeeze %327 : memref<1x!tpu.dma_semaphore, #tpu.memory_space<semaphore_mem>> -> memref<!tpu.dma_semaphore, #tpu.memory_space<semaphore_mem>>
    tpu.wait_dma2 semaphore(%328 : memref<!tpu.dma_semaphore, #tpu.memory_space<semaphore_mem>>) src(%arg19 : memref<3x128x128xbf16, #tpu.memory_space<any>>) dst(%arg28 : memref<3x128x128xbf16, #tpu.memory_space<vmem>>)
    %329 = tpu.iota {dimensions = array<i32: 0>} : vector<16x1xi32>
    %c8_i32 = arith.constant 8 : i32
    %c0_i32_144 = arith.constant 0 : i32
    %330 = arith.cmpi eq, %c8_i32, %c0_i32_144 : i32
    %c1_i32_145 = arith.constant 1 : i32
    %331 = arith.select %330, %c1_i32_145, %c8_i32 : i32
    %332 = vector.broadcast %331 : i32 to vector<16x1xi32>
    %333 = arith.remsi %329, %332 : vector<16x1xi32>
    %c0_i32_146 = arith.constant 0 : i32
    %334 = vector.broadcast %c0_i32_146 : i32 to vector<16x1xi32>
    %335 = arith.cmpi ne, %333, %334 : vector<16x1xi32>
    %c0_i32_147 = arith.constant 0 : i32
    %336 = vector.broadcast %c0_i32_147 : i32 to vector<16x1xi32>
    %337 = arith.cmpi slt, %333, %336 : vector<16x1xi32>
    %c0_i32_148 = arith.constant 0 : i32
    %338 = arith.cmpi slt, %331, %c0_i32_148 : i32
    %339 = vector.broadcast %338 : i1 to vector<16x1xi1>
    %340 = vector.broadcast %339 : vector<16x1xi1> to vector<16x1xi1>
    %341 = arith.xori %337, %340 : vector<16x1xi1>
    %342 = arith.andi %341, %335 : vector<16x1xi1>
    %343 = vector.broadcast %331 : i32 to vector<16x1xi32>
    %344 = arith.addi %333, %343 : vector<16x1xi32>
    %345 = arith.select %342, %344, %333 : vector<16x1xi1>, vector<16x1xi32>
    %346 = vector.shape_cast %345 : vector<16x1xi32> to vector<16x1xi32>
    %347 = vector.broadcast %346 : vector<16x1xi32> to vector<16x128xi32>
    %c0_i32_149 = arith.constant 0 : i32
    %348 = vector.broadcast %c0_i32_149 : i32 to vector<16x128xi32>
    %349 = arith.cmpi eq, %347, %348 : vector<16x128xi32>
    %c1_i32_150 = arith.constant 1 : i32
    %350 = tpu.dynamic_rotate %326 by %c1_i32_150 dim 0 : vector<16x128xf32>, i32 -> vector<16x128xf32>
    %351 = arith.select %349, %326, %350 : vector<16x128xi1>, vector<16x128xf32>
    %c7_i32 = arith.constant 7 : i32
    %352 = vector.broadcast %c7_i32 : i32 to vector<16x128xi32>
    %353 = arith.cmpi eq, %347, %352 : vector<16x128xi32>
    %c15_i32_151 = arith.constant 15 : i32
    %354 = tpu.dynamic_rotate %326 by %c15_i32_151 dim 0 : vector<16x128xf32>, i32 -> vector<16x128xf32>
    %355 = arith.select %353, %326, %354 : vector<16x128xi1>, vector<16x128xf32>
    %356 = arith.truncf %351 : vector<16x128xf32> to vector<16x128xbf16>
    %c0_152 = arith.constant 0 : index
    %c0_153 = arith.constant 0 : index
    %c0_154 = arith.constant 0 : index
    %357 = vector.load %arg28[%c0_152, %c0_153, %c0_154] : memref<3x128x128xbf16, #tpu.memory_space<vmem>>, vector<1x128x128xbf16>
    %358 = vector.shape_cast %357 : vector<1x128x128xbf16> to vector<128x128xbf16>
    %cst_155 = arith.constant dense<0.000000e+00> : vector<16x128xf32>
    %359 = tpu.matmul %356, %358, %cst_155 {dimension_numbers = #tpu.dot_dimension_numbers<[1], [0], [0], [1], [0, 0, 1, 1], [], []>} : vector<16x128xbf16>, vector<128x128xbf16>, vector<16x128xf32> -> vector<16x128xf32>
    %360 = arith.truncf %326 : vector<16x128xf32> to vector<16x128xbf16>
    %c1_156 = arith.constant 1 : index
    %c0_157 = arith.constant 0 : index
    %c0_158 = arith.constant 0 : index
    %361 = vector.load %arg28[%c1_156, %c0_157, %c0_158] : memref<3x128x128xbf16, #tpu.memory_space<vmem>>, vector<1x128x128xbf16>
    %362 = vector.shape_cast %361 : vector<1x128x128xbf16> to vector<128x128xbf16>
    %cst_159 = arith.constant dense<0.000000e+00> : vector<16x128xf32>
    %363 = tpu.matmul %360, %362, %cst_159 {dimension_numbers = #tpu.dot_dimension_numbers<[1], [0], [0], [1], [0, 0, 1, 1], [], []>} : vector<16x128xbf16>, vector<128x128xbf16>, vector<16x128xf32> -> vector<16x128xf32>
    %364 = arith.addf %359, %363 : vector<16x128xf32>
    %365 = arith.truncf %355 : vector<16x128xf32> to vector<16x128xbf16>
    %c2_160 = arith.constant 2 : index
    %c0_161 = arith.constant 0 : index
    %c0_162 = arith.constant 0 : index
    %366 = vector.load %arg28[%c2_160, %c0_161, %c0_162] : memref<3x128x128xbf16, #tpu.memory_space<vmem>>, vector<1x128x128xbf16>
    %367 = vector.shape_cast %366 : vector<1x128x128xbf16> to vector<128x128xbf16>
    %cst_163 = arith.constant dense<0.000000e+00> : vector<16x128xf32>
    %368 = tpu.matmul %365, %367, %cst_163 {dimension_numbers = #tpu.dot_dimension_numbers<[1], [0], [0], [1], [0, 0, 1, 1], [], []>} : vector<16x128xbf16>, vector<128x128xbf16>, vector<16x128xf32> -> vector<16x128xf32>
    %369 = arith.addf %364, %368 : vector<16x128xf32>
    %c0_164 = arith.constant 0 : index
    %c0_165 = arith.constant 0 : index
    %370 = vector.load %arg20[%c0_164, %c0_165] : memref<1x128xf32, #tpu.memory_space<vmem>>, vector<1x128xf32>
    %371 = vector.broadcast %370 : vector<1x128xf32> to vector<16x128xf32>
    %372 = arith.addf %369, %371 : vector<16x128xf32>
    %cst_166 = arith.constant 0.000000e+00 : f32
    %373 = vector.broadcast %cst_166 : f32 to vector<16x128xf32>
    %374 = arith.maximumf %372, %373 : vector<16x128xf32>
    %cst_167 = arith.constant dense<0.000000e+00> : vector<128xf32>
    %375 = vector.multi_reduction <add>, %374, %cst_167 [0] : vector<16x128xf32> to vector<128xf32>
    %376 = vector.shape_cast %375 : vector<128xf32> to vector<1x128xf32>
    %cst_168 = arith.constant 1.600000e+01 : f32
    %377 = vector.broadcast %cst_168 : f32 to vector<1x128xf32>
    %378 = arith.divf %376, %377 : vector<1x128xf32>
    %379 = arith.mulf %374, %374 : vector<16x128xf32>
    %cst_169 = arith.constant dense<0.000000e+00> : vector<128xf32>
    %380 = vector.multi_reduction <add>, %379, %cst_169 [0] : vector<16x128xf32> to vector<128xf32>
    %381 = vector.shape_cast %380 : vector<128xf32> to vector<1x128xf32>
    %cst_170 = arith.constant 1.600000e+01 : f32
    %382 = vector.broadcast %cst_170 : f32 to vector<1x128xf32>
    %383 = arith.divf %381, %382 : vector<1x128xf32>
    %384 = arith.mulf %378, %378 : vector<1x128xf32>
    %385 = arith.subf %383, %384 : vector<1x128xf32>
    %cst_171 = arith.constant 0.000000e+00 : f32
    %386 = vector.broadcast %cst_171 : f32 to vector<1x128xf32>
    %387 = arith.maximumf %385, %386 : vector<1x128xf32>
    %388 = vector.broadcast %378 : vector<1x128xf32> to vector<16x128xf32>
    %389 = arith.subf %374, %388 : vector<16x128xf32>
    %cst_172 = arith.constant 9.99999974E-6 : f32
    %390 = vector.broadcast %cst_172 : f32 to vector<1x128xf32>
    %391 = arith.addf %387, %390 : vector<1x128xf32>
    %392 = math.rsqrt %391 : vector<1x128xf32>
    %393 = vector.broadcast %392 : vector<1x128xf32> to vector<16x128xf32>
    %394 = arith.mulf %389, %393 : vector<16x128xf32>
    %c0_173 = arith.constant 0 : index
    %c0_174 = arith.constant 0 : index
    %395 = vector.load %arg21[%c0_173, %c0_174] : memref<1x128xf32, #tpu.memory_space<vmem>>, vector<1x128xf32>
    %396 = vector.broadcast %395 : vector<1x128xf32> to vector<16x128xf32>
    %397 = arith.mulf %394, %396 : vector<16x128xf32>
    %c0_175 = arith.constant 0 : index
    %c0_176 = arith.constant 0 : index
    %398 = vector.load %arg22[%c0_175, %c0_176] : memref<1x128xf32, #tpu.memory_space<vmem>>, vector<1x128xf32>
    %399 = vector.broadcast %398 : vector<1x128xf32> to vector<16x128xf32>
    %400 = arith.addf %397, %399 : vector<16x128xf32>
    %401 = vector.shape_cast %400 : vector<16x128xf32> to vector<8x2x128xf32>
    %cst_177 = arith.constant dense<0xFF800000> : vector<8x128xf32>
    %402 = vector.multi_reduction <maximumf>, %401, %cst_177 [1] : vector<8x2x128xf32> to vector<8x128xf32>
    %c1_i32_178 = arith.constant 1 : i32
    %403 = tpu.memref_slice %arg30[%c1_i32_178] : memref<2x!tpu.dma_semaphore, #tpu.memory_space<semaphore_mem>> -> memref<1x!tpu.dma_semaphore, #tpu.memory_space<semaphore_mem>>
    %404 = tpu.memref_squeeze %403 : memref<1x!tpu.dma_semaphore, #tpu.memory_space<semaphore_mem>> -> memref<!tpu.dma_semaphore, #tpu.memory_space<semaphore_mem>>
    tpu.wait_dma2 semaphore(%404 : memref<!tpu.dma_semaphore, #tpu.memory_space<semaphore_mem>>) src(%arg23 : memref<3x128x256xbf16, #tpu.memory_space<any>>) dst(%arg29 : memref<3x128x256xbf16, #tpu.memory_space<vmem>>)
    %405 = tpu.iota {dimensions = array<i32: 0>} : vector<8x1xi32>
    %c4_i32 = arith.constant 4 : i32
    %c0_i32_179 = arith.constant 0 : i32
    %406 = arith.cmpi eq, %c4_i32, %c0_i32_179 : i32
    %c1_i32_180 = arith.constant 1 : i32
    %407 = arith.select %406, %c1_i32_180, %c4_i32 : i32
    %408 = vector.broadcast %407 : i32 to vector<8x1xi32>
    %409 = arith.remsi %405, %408 : vector<8x1xi32>
    %c0_i32_181 = arith.constant 0 : i32
    %410 = vector.broadcast %c0_i32_181 : i32 to vector<8x1xi32>
    %411 = arith.cmpi ne, %409, %410 : vector<8x1xi32>
    %c0_i32_182 = arith.constant 0 : i32
    %412 = vector.broadcast %c0_i32_182 : i32 to vector<8x1xi32>
    %413 = arith.cmpi slt, %409, %412 : vector<8x1xi32>
    %c0_i32_183 = arith.constant 0 : i32
    %414 = arith.cmpi slt, %407, %c0_i32_183 : i32
    %415 = vector.broadcast %414 : i1 to vector<8x1xi1>
    %416 = vector.broadcast %415 : vector<8x1xi1> to vector<8x1xi1>
    %417 = arith.xori %413, %416 : vector<8x1xi1>
    %418 = arith.andi %417, %411 : vector<8x1xi1>
    %419 = vector.broadcast %407 : i32 to vector<8x1xi32>
    %420 = arith.addi %409, %419 : vector<8x1xi32>
    %421 = arith.select %418, %420, %409 : vector<8x1xi1>, vector<8x1xi32>
    %422 = vector.shape_cast %421 : vector<8x1xi32> to vector<8x1xi32>
    %423 = vector.broadcast %422 : vector<8x1xi32> to vector<8x128xi32>
    %c0_i32_184 = arith.constant 0 : i32
    %424 = vector.broadcast %c0_i32_184 : i32 to vector<8x128xi32>
    %425 = arith.cmpi eq, %423, %424 : vector<8x128xi32>
    %c1_i32_185 = arith.constant 1 : i32
    %426 = tpu.dynamic_rotate %402 by %c1_i32_185 dim 0 : vector<8x128xf32>, i32 -> vector<8x128xf32>
    %427 = arith.select %425, %402, %426 : vector<8x128xi1>, vector<8x128xf32>
    %c3_i32 = arith.constant 3 : i32
    %428 = vector.broadcast %c3_i32 : i32 to vector<8x128xi32>
    %429 = arith.cmpi eq, %423, %428 : vector<8x128xi32>
    %c7_i32_186 = arith.constant 7 : i32
    %430 = tpu.dynamic_rotate %402 by %c7_i32_186 dim 0 : vector<8x128xf32>, i32 -> vector<8x128xf32>
    %431 = arith.select %429, %402, %430 : vector<8x128xi1>, vector<8x128xf32>
    %432 = arith.truncf %427 : vector<8x128xf32> to vector<8x128xbf16>
    %c0_187 = arith.constant 0 : index
    %c0_188 = arith.constant 0 : index
    %c0_189 = arith.constant 0 : index
    %433 = vector.load %arg29[%c0_187, %c0_188, %c0_189] : memref<3x128x256xbf16, #tpu.memory_space<vmem>>, vector<1x128x256xbf16>
    %434 = vector.shape_cast %433 : vector<1x128x256xbf16> to vector<128x256xbf16>
    %cst_190 = arith.constant dense<0.000000e+00> : vector<8x256xf32>
    %435 = tpu.matmul %432, %434, %cst_190 {dimension_numbers = #tpu.dot_dimension_numbers<[1], [0], [0], [1], [0, 0, 1, 1], [], []>} : vector<8x128xbf16>, vector<128x256xbf16>, vector<8x256xf32> -> vector<8x256xf32>
    %436 = arith.truncf %402 : vector<8x128xf32> to vector<8x128xbf16>
    %c1_191 = arith.constant 1 : index
    %c0_192 = arith.constant 0 : index
    %c0_193 = arith.constant 0 : index
    %437 = vector.load %arg29[%c1_191, %c0_192, %c0_193] : memref<3x128x256xbf16, #tpu.memory_space<vmem>>, vector<1x128x256xbf16>
    %438 = vector.shape_cast %437 : vector<1x128x256xbf16> to vector<128x256xbf16>
    %cst_194 = arith.constant dense<0.000000e+00> : vector<8x256xf32>
    %439 = tpu.matmul %436, %438, %cst_194 {dimension_numbers = #tpu.dot_dimension_numbers<[1], [0], [0], [1], [0, 0, 1, 1], [], []>} : vector<8x128xbf16>, vector<128x256xbf16>, vector<8x256xf32> -> vector<8x256xf32>
    %440 = arith.addf %435, %439 : vector<8x256xf32>
    %441 = arith.truncf %431 : vector<8x128xf32> to vector<8x128xbf16>
    %c2_195 = arith.constant 2 : index
    %c0_196 = arith.constant 0 : index
    %c0_197 = arith.constant 0 : index
    %442 = vector.load %arg29[%c2_195, %c0_196, %c0_197] : memref<3x128x256xbf16, #tpu.memory_space<vmem>>, vector<1x128x256xbf16>
    %443 = vector.shape_cast %442 : vector<1x128x256xbf16> to vector<128x256xbf16>
    %cst_198 = arith.constant dense<0.000000e+00> : vector<8x256xf32>
    %444 = tpu.matmul %441, %443, %cst_198 {dimension_numbers = #tpu.dot_dimension_numbers<[1], [0], [0], [1], [0, 0, 1, 1], [], []>} : vector<8x128xbf16>, vector<128x256xbf16>, vector<8x256xf32> -> vector<8x256xf32>
    %445 = arith.addf %440, %444 : vector<8x256xf32>
    %c0_199 = arith.constant 0 : index
    %c0_200 = arith.constant 0 : index
    %446 = vector.load %arg24[%c0_199, %c0_200] : memref<1x256xf32, #tpu.memory_space<vmem>>, vector<1x256xf32>
    %447 = vector.broadcast %446 : vector<1x256xf32> to vector<8x256xf32>
    %448 = arith.addf %445, %447 : vector<8x256xf32>
    %cst_201 = arith.constant 0.000000e+00 : f32
    %449 = vector.broadcast %cst_201 : f32 to vector<8x256xf32>
    %450 = arith.maximumf %448, %449 : vector<8x256xf32>
    %cst_202 = arith.constant dense<0.000000e+00> : vector<256xf32>
    %451 = vector.multi_reduction <add>, %450, %cst_202 [0] : vector<8x256xf32> to vector<256xf32>
    %452 = vector.shape_cast %451 : vector<256xf32> to vector<1x256xf32>
    %cst_203 = arith.constant 8.000000e+00 : f32
    %453 = vector.broadcast %cst_203 : f32 to vector<1x256xf32>
    %454 = arith.divf %452, %453 : vector<1x256xf32>
    %455 = arith.mulf %450, %450 : vector<8x256xf32>
    %cst_204 = arith.constant dense<0.000000e+00> : vector<256xf32>
    %456 = vector.multi_reduction <add>, %455, %cst_204 [0] : vector<8x256xf32> to vector<256xf32>
    %457 = vector.shape_cast %456 : vector<256xf32> to vector<1x256xf32>
    %cst_205 = arith.constant 8.000000e+00 : f32
    %458 = vector.broadcast %cst_205 : f32 to vector<1x256xf32>
    %459 = arith.divf %457, %458 : vector<1x256xf32>
    %460 = arith.mulf %454, %454 : vector<1x256xf32>
    %461 = arith.subf %459, %460 : vector<1x256xf32>
    %cst_206 = arith.constant 0.000000e+00 : f32
    %462 = vector.broadcast %cst_206 : f32 to vector<1x256xf32>
    %463 = arith.maximumf %461, %462 : vector<1x256xf32>
    %464 = vector.broadcast %454 : vector<1x256xf32> to vector<8x256xf32>
    %465 = arith.subf %450, %464 : vector<8x256xf32>
    %cst_207 = arith.constant 9.99999974E-6 : f32
    %466 = vector.broadcast %cst_207 : f32 to vector<1x256xf32>
    %467 = arith.addf %463, %466 : vector<1x256xf32>
    %468 = math.rsqrt %467 : vector<1x256xf32>
    %469 = vector.broadcast %468 : vector<1x256xf32> to vector<8x256xf32>
    %470 = arith.mulf %465, %469 : vector<8x256xf32>
    %c0_208 = arith.constant 0 : index
    %c0_209 = arith.constant 0 : index
    %471 = vector.load %arg25[%c0_208, %c0_209] : memref<1x256xf32, #tpu.memory_space<vmem>>, vector<1x256xf32>
    %472 = vector.broadcast %471 : vector<1x256xf32> to vector<8x256xf32>
    %473 = arith.mulf %470, %472 : vector<8x256xf32>
    %c0_210 = arith.constant 0 : index
    %c0_211 = arith.constant 0 : index
    %474 = vector.load %arg26[%c0_210, %c0_211] : memref<1x256xf32, #tpu.memory_space<vmem>>, vector<1x256xf32>
    %475 = vector.broadcast %474 : vector<1x256xf32> to vector<8x256xf32>
    %476 = arith.addf %473, %475 : vector<8x256xf32>
    %477 = vector.shape_cast %476 : vector<8x256xf32> to vector<4x2x256xf32>
    %cst_212 = arith.constant dense<0xFF800000> : vector<4x256xf32>
    %478 = vector.multi_reduction <maximumf>, %477, %cst_212 [1] : vector<4x2x256xf32> to vector<4x256xf32>
    %c0_213 = arith.constant 0 : index
    %c0_214 = arith.constant 0 : index
    %479 = vector.load %arg27[%c0_213, %c0_214] : memref<4x256xf32, #tpu.memory_space<vmem>>, vector<4x256xf32>
    tpu.vector_store %arg27[%c0_213, %c0_214], %478 {strides = array<i32>} : memref<4x256xf32, #tpu.memory_space<vmem>>, vector<4x256xf32>,
    return
  }
}

</mosaic_0001>

<bundles_post_ra>
// kernel: cnn_forward.1
= control target key start
LH: loop header
LB: loop body
LE: loop exit
PB: predicated region body
PF: predicated region fallthrough
CT: control target
= control target key end

     0   :  { %s14922_s0 = inlined_call_operand.vmem [shape: f32[256,128], index: 0, kind: input, shape index: {}]   ;;  %s14923_s1 = inlined_call_operand.vmem [shape: f32[1,128], index: 1, kind: input, shape index: {}]   ;;  %s14924_s2 = inlined_call_operand.vmem [shape: f32[1,128], index: 2, kind: input, shape index: {}]   ;;  %s14925_s3 = inlined_call_operand.vmem [shape: bf16[3,128,128], index: 3, kind: input, shape index: {}]   ;;  %s14926_s4 = inlined_call_operand.vmem [shape: f32[1,128], index: 4, kind: input, shape index: {}]   ;;  %s14927_s5 = inlined_call_operand.vmem [shape: f32[1,128], index: 5, kind: input, shape index: {}]   ;;  %s14928_s6 = inlined_call_operand.vmem [shape: f32[1,128], index: 6, kind: input, shape index: {}]   ;;  %s14929_s7 = inlined_call_operand.vmem [shape: bf16[3,128,128], index: 7, kind: input, shape index: {}]   ;;  %s14930_s8 = inlined_call_operand.vmem [shape: f32[1,128], index: 8, kind: input, shape index: {}]   ;;  %s14931_s9 = inlined_call_operand.vmem [shape: f32[1,128], index: 9, kind: input, shape index: {}]   ;;  %s14932_s10 = inlined_call_operand.vmem [shape: f32[1,128], index: 10, kind: input, shape index: {}]   ;;  %s14933_s11 = inlined_call_operand.vmem [shape: bf16[3,128,128], index: 11, kind: input, shape index: {}]   ;;  %s14934_s12 = inlined_call_operand.vmem [shape: f32[1,128], index: 12, kind: input, shape index: {}]   ;;  %s14935_s13 = inlined_call_operand.vmem [shape: f32[1,128], index: 13, kind: input, shape index: {}]   ;;  %s14936_s14 = inlined_call_operand.vmem [shape: f32[1,128], index: 14, kind: input, shape index: {}]   ;;  %s14937_s15 = inlined_call_operand.vmem [shape: bf16[3,128,128], index: 15, kind: input, shape index: {}]   ;;  %s14938_s16 = inlined_call_operand.vmem [shape: f32[1,128], index: 16, kind: input, shape index: {}]   ;;  %s14939_s17 = inlined_call_operand.vmem [shape: f32[1,128], index: 17, kind: input, shape index: {}]   ;;  %s14940_s18 = inlined_call_operand.vmem [shape: f32[1,128], index: 18, kind: input, shape index: {}]   ;;  %s14941_s19 = inlined_call_operand.vmem [shape: bf16[3,128,128], index: 19, kind: input, shape index: {}]   ;;  %s14942_s20 = inlined_call_operand.vmem [shape: f32[1,128], index: 20, kind: input, shape index: {}]   ;;  %s14943_s21 = inlined_call_operand.vmem [shape: f32[1,128], index: 21, kind: input, shape index: {}]   ;;  %s14944_s22 = inlined_call_operand.vmem [shape: f32[1,128], index: 22, kind: input, shape index: {}]   ;;  %s14945_s23 = inlined_call_operand.vmem [shape: bf16[3,128,256], index: 23, kind: input, shape index: {}]   ;;  %s14946_s24 = inlined_call_operand.vmem [shape: f32[1,256], index: 24, kind: input, shape index: {}]   ;;  %s14947_s25 = inlined_call_operand.vmem [shape: f32[1,256], index: 25, kind: input, shape index: {}]   ;;  %s14948_s26 = inlined_call_operand.vmem [shape: f32[1,256], index: 26, kind: input, shape index: {}]   ;;  %s14949_s27 = inlined_call_operand.vmem [shape: f32[4,256], index: 27, kind: output, shape index: {}]  }
   0x1   :  { %15088 = sst [smem:[#allocation85_spill]] %s14922_s0  ;;  %v92_v0 = vld [vmem:[%s14941_s19] sm:$0xff]  ;;  %v94_v1 = vld [vmem:[%s14941_s19 + $0x8] sm:$0xff]  ;;  %v96_v2 = vld [vmem:[%s14941_s19 + $0x10] sm:$0xff] }
   0x2   :  { %15089 = sst [smem:[#allocation86_spill]] %s14923_s1  ;;  %93 = vst [vmem:[#allocation2 + $0xb0] sm:$0xff] %v92_v0  ;;  %v98_v3 = vld [vmem:[%s14941_s19 + $0x18] sm:$0xff]  ;;  %v100_v4 = vld [vmem:[%s14941_s19 + $0x20] sm:$0xff]  ;;  %v102_v5 = vld [vmem:[%s14941_s19 + $0x28] sm:$0xff] }
   0x3   :  { %15090 = sst [smem:[#allocation87_spill]] %s14924_s2  ;;  %95 = vst [vmem:[#allocation2] sm:$0xff] %v94_v1  ;;  %v104_v6 = vld [vmem:[%s14941_s19 + $0x30] sm:$0xff]  ;;  %v106_v7 = vld [vmem:[%s14941_s19 + $0x38] sm:$0xff]  ;;  %v108_v8 = vld [vmem:[%s14941_s19 + $0x40] sm:$0xff] }
   0x4   :  { %15091 = sst [smem:[#allocation88_spill]] %s14925_s3  ;;  %97 = vst [vmem:[#allocation2 + $0x10] sm:$0xff] %v96_v2  ;;  %v110_v9 = vld [vmem:[%s14941_s19 + $0x48] sm:$0xff]  ;;  %v112_v10 = vld [vmem:[%s14941_s19 + $0x50] sm:$0xff]  ;;  %v114_v11 = vld [vmem:[%s14941_s19 + $0x58] sm:$0xff] }
   0x5   :  { %15092 = sst [smem:[#allocation89_spill]] %s14926_s4  ;;  %99 = vst [vmem:[#allocation2 + $0x48] sm:$0xff] %v98_v3  ;;  %v116_v12 = vld [vmem:[%s14941_s19 + $0x60] sm:$0xff]  ;;  %v118_v13 = vld [vmem:[%s14941_s19 + $0x68] sm:$0xff]  ;;  %v120_v14 = vld [vmem:[%s14941_s19 + $0x70] sm:$0xff] }
   0x6   :  { %15093 = sst [smem:[#allocation90_spill]] %s14927_s5  ;;  %101 = vst [vmem:[#allocation2 + $0x60] sm:$0xff] %v100_v4  ;;  %v122_v15 = vld [vmem:[%s14941_s19 + $0x78] sm:$0xff]  ;;  %v124_v16 = vld [vmem:[%s14941_s19 + $0x80] sm:$0xff]  ;;  %v126_v17 = vld [vmem:[%s14941_s19 + $0x88] sm:$0xff] }
   0x7   :  { %15094 = sst [smem:[#allocation91_spill]] %s14928_s6  ;;  %103 = vst [vmem:[#allocation2 + $0x28] sm:$0xff] %v102_v5  ;;  %v128_v18 = vld [vmem:[%s14941_s19 + $0x90] sm:$0xff]  ;;  %v130_v19 = vld [vmem:[%s14941_s19 + $0x98] sm:$0xff]  ;;  %v132_v20 = vld [vmem:[%s14941_s19 + $0xa0] sm:$0xff] }
   0x8   :  { %15095 = sst [smem:[#allocation92_spill]] %s14929_s7  ;;  %105 = vst [vmem:[#allocation2 + $0x40] sm:$0xff] %v104_v6  ;;  %v134_v21 = vld [vmem:[%s14941_s19 + $0xa8] sm:$0xff]  ;;  %v136_v22 = vld [vmem:[%s14941_s19 + $0xb0] sm:$0xff]  ;;  %v138_v23 = vld [vmem:[%s14941_s19 + $0xb8] sm:$0xff] }
   0x9   :  { %15096 = sst [smem:[#allocation93_spill]] %s14930_s8  ;;  %107 = vst [vmem:[#allocation2 + $0x78] sm:$0xff] %v106_v7 }
   0xa   :  { %15097 = sst [smem:[#allocation94_spill]] %s14931_s9  ;;  %109 = vst [vmem:[#allocation2 + $0x88] sm:$0xff] %v108_v8 }
   0xb   :  { %15098 = sst [smem:[#allocation95_spill]] %s14932_s10  ;;  %111 = vst [vmem:[#allocation2 + $0x90] sm:$0xff] %v110_v9 }
   0xc   :  { %15099 = sst [smem:[#allocation96_spill]] %s14933_s11  ;;  %113 = vst [vmem:[#allocation2 + $0x18] sm:$0xff] %v112_v10 }
   0xd   :  { %115 = vst [vmem:[#allocation2 + $0x98] sm:$0xff] %v114_v11 }
   0xe   :  { %117 = vst [vmem:[#allocation2 + $0x38] sm:$0xff] %v116_v12 }
   0xf   :  { %119 = vst [vmem:[#allocation2 + $0x50] sm:$0xff] %v118_v13 }
  0x10   :  { %121 = vst [vmem:[#allocation2 + $0x70] sm:$0xff] %v120_v14 }
  0x11   :  { %123 = vst [vmem:[#allocation2 + $0xa0] sm:$0xff] %v122_v15 }
  0x12   :  { %125 = vst [vmem:[#allocation2 + $0xa8] sm:$0xff] %v124_v16 }
  0x13   :  { %127 = vst [vmem:[#allocation2 + $0x68] sm:$0xff] %v126_v17 }
  0x14   :  { %129 = vst [vmem:[#allocation2 + $0x30] sm:$0xff] %v128_v18 }
  0x15   :  { %131 = vst [vmem:[#allocation2 + $0x58] sm:$0xff] %v130_v19 }
  0x16   :  { %133 = vst [vmem:[#allocation2 + $0x80] sm:$0xff] %v132_v20 }
  0x17   :  { %135 = vst [vmem:[#allocation2 + $0xb8] sm:$0xff] %v134_v21 }
  0x18   :  { %137 = vst [vmem:[#allocation2 + $0x20] sm:$0xff] %v136_v22 }
  0x19   :  { %139 = vst [vmem:[#allocation2 + $0x8] sm:$0xff] %v138_v23 }
  0x1a   :  { %145 = vsyncadd [#allocation4], 3072  ;;  %v157_v24 = vld [vmem:[%s14945_s23] sm:$0xff]  ;;  %v159_v25 = vld [vmem:[%s14945_s23 + $0x8] sm:$0xff] }
  0x1b   :  { %158 = vst [vmem:[#allocation3] sm:$0xff] %v157_v24  ;;  %v161_v26 = vld [vmem:[%s14945_s23 + $0x10] sm:$0xff]  ;;  %v163_v27 = vld [vmem:[%s14945_s23 + $0x18] sm:$0xff]  ;;  %v165_v28 = vld [vmem:[%s14945_s23 + $0x20] sm:$0xff] }
  0x1c   :  { %160 = vst [vmem:[#allocation3 + $0x8] sm:$0xff] %v159_v25  ;;  %v167_v29 = vld [vmem:[%s14945_s23 + $0x28] sm:$0xff]  ;;  %v169_v30 = vld [vmem:[%s14945_s23 + $0x30] sm:$0xff]  ;;  %v171_v31 = vld [vmem:[%s14945_s23 + $0x38] sm:$0xff] }
  0x1d   :  { %162 = vst [vmem:[#allocation3 + $0x10] sm:$0xff] %v161_v26  ;;  %v173_v32 = vld [vmem:[%s14945_s23 + $0x40] sm:$0xff]  ;;  %v175_v33 = vld [vmem:[%s14945_s23 + $0x48] sm:$0xff]  ;;  %v177_v34 = vld [vmem:[%s14945_s23 + $0x50] sm:$0xff] }
  0x1e   :  { %164 = vst [vmem:[#allocation3 + $0x18] sm:$0xff] %v163_v27  ;;  %v179_v35 = vld [vmem:[%s14945_s23 + $0x58] sm:$0xff]  ;;  %v181_v36 = vld [vmem:[%s14945_s23 + $0x60] sm:$0xff]  ;;  %v183_v37 = vld [vmem:[%s14945_s23 + $0x68] sm:$0xff] }
  0x1f   :  { %166 = vst [vmem:[#allocation3 + $0x20] sm:$0xff] %v165_v28  ;;  %v185_v38 = vld [vmem:[%s14945_s23 + $0x70] sm:$0xff]  ;;  %v187_v39 = vld [vmem:[%s14945_s23 + $0x78] sm:$0xff]  ;;  %v189_v40 = vld [vmem:[%s14945_s23 + $0x80] sm:$0xff] }
  0x20   :  { %168 = vst [vmem:[#allocation3 + $0x28] sm:$0xff] %v167_v29  ;;  %v191_v41 = vld [vmem:[%s14945_s23 + $0x88] sm:$0xff]  ;;  %v193_v42 = vld [vmem:[%s14945_s23 + $0x90] sm:$0xff]  ;;  %v195_v43 = vld [vmem:[%s14945_s23 + $0x98] sm:$0xff] }
  0x21   :  { %170 = vst [vmem:[#allocation3 + $0x30] sm:$0xff] %v169_v30  ;;  %v197_v44 = vld [vmem:[%s14945_s23 + $0xa0] sm:$0xff]  ;;  %v199_v45 = vld [vmem:[%s14945_s23 + $0xa8] sm:$0xff]  ;;  %v201_v46 = vld [vmem:[%s14945_s23 + $0xb0] sm:$0xff] }
  0x22   :  { %172 = vst [vmem:[#allocation3 + $0x38] sm:$0xff] %v171_v31  ;;  %v203_v47 = vld [vmem:[%s14945_s23 + $0xb8] sm:$0xff]  ;;  %v205_v48 = vld [vmem:[%s14945_s23 + $0xc0] sm:$0xff]  ;;  %v207_v49 = vld [vmem:[%s14945_s23 + $0xc8] sm:$0xff] }
  0x23   :  { %174 = vst [vmem:[#allocation3 + $0x40] sm:$0xff] %v173_v32  ;;  %v209_v50 = vld [vmem:[%s14945_s23 + $0xd0] sm:$0xff]  ;;  %v211_v51 = vld [vmem:[%s14945_s23 + $0xd8] sm:$0xff]  ;;  %v213_v52 = vld [vmem:[%s14945_s23 + $0xe0] sm:$0xff] }
  0x24   :  { %176 = vst [vmem:[#allocation3 + $0x48] sm:$0xff] %v175_v33  ;;  %v215_v53 = vld [vmem:[%s14945_s23 + $0xe8] sm:$0xff]  ;;  %v217_v54 = vld [vmem:[%s14945_s23 + $0xf0] sm:$0xff]  ;;  %v219_v55 = vld [vmem:[%s14945_s23 + $0xf8] sm:$0xff] }
  0x25   :  { %178 = vst [vmem:[#allocation3 + $0x50] sm:$0xff] %v177_v34  ;;  %v221_v56 = vld [vmem:[%s14945_s23 + $0x100] sm:$0xff]  ;;  %v223_v57 = vld [vmem:[%s14945_s23 + $0x108] sm:$0xff]  ;;  %v225_v58 = vld [vmem:[%s14945_s23 + $0x110] sm:$0xff] }
  0x26   :  { %180 = vst [vmem:[#allocation3 + $0x58] sm:$0xff] %v179_v35  ;;  %v227_v59 = vld [vmem:[%s14945_s23 + $0x118] sm:$0xff]  ;;  %v229_v60 = vld [vmem:[%s14945_s23 + $0x120] sm:$0xff]  ;;  %v231_v61 = vld [vmem:[%s14945_s23 + $0x128] sm:$0xff] }
  0x27   :  { %182 = vst [vmem:[#allocation3 + $0x60] sm:$0xff] %v181_v36  ;;  %v233_v62 = vld [vmem:[%s14945_s23 + $0x130] sm:$0xff]  ;;  %v235_v63 = vld [vmem:[%s14945_s23 + $0x138] sm:$0xff]  ;;  %v237_v0 = vld [vmem:[%s14945_s23 + $0x140] sm:$0xff] }
  0x28   :  { %184 = vst [vmem:[#allocation3 + $0x68] sm:$0xff] %v183_v37  ;;  %v239_v1 = vld [vmem:[%s14945_s23 + $0x148] sm:$0xff]  ;;  %v241_v2 = vld [vmem:[%s14945_s23 + $0x150] sm:$0xff]  ;;  %v243_v3 = vld [vmem:[%s14945_s23 + $0x158] sm:$0xff] }
  0x29   :  { %186 = vst [vmem:[#allocation3 + $0x70] sm:$0xff] %v185_v38  ;;  %v245_v4 = vld [vmem:[%s14945_s23 + $0x160] sm:$0xff]  ;;  %v247_v5 = vld [vmem:[%s14945_s23 + $0x168] sm:$0xff]  ;;  %v249_v6 = vld [vmem:[%s14945_s23 + $0x170] sm:$0xff] }
  0x2a   :  { %188 = vst [vmem:[#allocation3 + $0x78] sm:$0xff] %v187_v39  ;;  %v251_v7 = vld [vmem:[%s14945_s23 + $0x178] sm:$0xff] }
  0x2b   :  { %190 = vst [vmem:[#allocation3 + $0x80] sm:$0xff] %v189_v40 }
  0x2c   :  { %192 = vst [vmem:[#allocation3 + $0x88] sm:$0xff] %v191_v41 }
  0x2d   :  { %194 = vst [vmem:[#allocation3 + $0x90] sm:$0xff] %v193_v42 }
  0x2e   :  { %196 = vst [vmem:[#allocation3 + $0x98] sm:$0xff] %v195_v43 }
  0x2f   :  { %198 = vst [vmem:[#allocation3 + $0xa0] sm:$0xff] %v197_v44 }
  0x30   :  { %200 = vst [vmem:[#allocation3 + $0xa8] sm:$0xff] %v199_v45 }
  0x31   :  { %202 = vst [vmem:[#allocation3 + $0xb0] sm:$0xff] %v201_v46 }
  0x32   :  { %204 = vst [vmem:[#allocation3 + $0xb8] sm:$0xff] %v203_v47 }
  0x33   :  { %206 = vst [vmem:[#allocation3 + $0xc0] sm:$0xff] %v205_v48 }
  0x34   :  { %208 = vst [vmem:[#allocation3 + $0xc8] sm:$0xff] %v207_v49 }
  0x35   :  { %210 = vst [vmem:[#allocation3 + $0xd0] sm:$0xff] %v209_v50 }
  0x36   :  { %212 = vst [vmem:[#allocation3 + $0xd8] sm:$0xff] %v211_v51 }
  0x37   :  { %214 = vst [vmem:[#allocation3 + $0xe0] sm:$0xff] %v213_v52 }
  0x38   :  { %216 = vst [vmem:[#allocation3 + $0xe8] sm:$0xff] %v215_v53 }
  0x39   :  { %218 = vst [vmem:[#allocation3 + $0xf0] sm:$0xff] %v217_v54 }
  0x3a   :  { %220 = vst [vmem:[#allocation3 + $0xf8] sm:$0xff] %v219_v55 }
  0x3b   :  { %222 = vst [vmem:[#allocation3 + $0x100] sm:$0xff] %v221_v56 }
  0x3c   :  { %224 = vst [vmem:[#allocation3 + $0x108] sm:$0xff] %v223_v57 }
  0x3d   :  { %226 = vst [vmem:[#allocation3 + $0x110] sm:$0xff] %v225_v58 }
  0x3e   :  { %228 = vst [vmem:[#allocation3 + $0x118] sm:$0xff] %v227_v59 }
  0x3f   :  { %230 = vst [vmem:[#allocation3 + $0x120] sm:$0xff] %v229_v60 }
  0x40   :  { %232 = vst [vmem:[#allocation3 + $0x128] sm:$0xff] %v231_v61 }
  0x41   :  { %234 = vst [vmem:[#allocation3 + $0x130] sm:$0xff] %v233_v62 }
  0x42   :  { %236 = vst [vmem:[#allocation3 + $0x138] sm:$0xff] %v235_v63 }
  0x43   :  { %238 = vst [vmem:[#allocation3 + $0x140] sm:$0xff] %v237_v0 }
  0x44   :  { %240 = vst [vmem:[#allocation3 + $0x148] sm:$0xff] %v239_v1 }
  0x45   :  { %242 = vst [vmem:[#allocation3 + $0x150] sm:$0xff] %v241_v2 }
  0x46   :  { %244 = vst [vmem:[#allocation3 + $0x158] sm:$0xff] %v243_v3 }
  0x47   :  { %246 = vst [vmem:[#allocation3 + $0x160] sm:$0xff] %v245_v4 }
  0x48   :  { %248 = vst [vmem:[#allocation3 + $0x168] sm:$0xff] %v247_v5 }
  0x49   :  { %250 = vst [vmem:[#allocation3 + $0x170] sm:$0xff] %v249_v6 }
  0x4a   :  { %252 = vst [vmem:[#allocation3 + $0x178] sm:$0xff] %v251_v7 }
  0x4b   :  { %258 = vsyncadd [#allocation4 + $0x1], 6144  ;;  %s15100_s5 = sld [smem:[#allocation88_spill]]  ;;  %vm2322_vm10 = vcmask 1041408   ;;  %vm3555_vm14 = vcmask 1041409   ;;  %vm3557_vm15 = vcmask 1042434  }
  0x4c   :  { %s15101_s10 = sld [smem:[#allocation85_spill]] }
  0x4d   :  { %s15102_s23 = sld [smem:[#allocation86_spill]] }
  0x4e   :  { %s15104_s11 = sld [smem:[#allocation87_spill]] }
  0x4f   :  { %s15106_s7 = sld [smem:[#allocation89_spill]] }
  0x50   :  { %s15107_s30 = sld [smem:[#allocation92_spill]] }
  0x51   :  { %v9437_v8 = vld [vmem:[%s15100_s5 + $0x78] sm:$0xff]  ;;  %v9436_v11 = vld [vmem:[%s15100_s5 + $0x70] sm:$0xff]  ;;  %v9435_v14 = vld [vmem:[%s15100_s5 + $0x68] sm:$0xff]  ;;  %s15108_s1 = sld [smem:[#allocation90_spill]] }
  0x52   :  { %v9445_v9 = vld [vmem:[%s15100_s5 + $0xb8] sm:$0xff]  ;;  %1344 = vmatpush.bf16.msra.mxu0 %v9437_v8  ;;  %v9444_v12 = vld [vmem:[%s15100_s5 + $0xb0] sm:$0xff]  ;;  %v9443_v15 = vld [vmem:[%s15100_s5 + $0xa8] sm:$0xff]  ;;  %s15109_s6 = sld [smem:[#allocation91_spill]] }
  0x53   :  { %v9429_v10 = vld [vmem:[%s15100_s5 + $0x38] sm:$0xff]  ;;  %1651 = vmatpush.bf16.msra.mxu2 %v9445_v9  ;;  %v9428_v13 = vld [vmem:[%s15100_s5 + $0x30] sm:$0xff]  ;;  %v9427_v16 = vld [vmem:[%s15100_s5 + $0x28] sm:$0xff]  ;;  %s15396_s28 = sld [smem:[#allocation93_spill]] }
  0x54   :  { %1481 = vmatpush.bf16.msra.mxu1 %v9429_v10  ;;  %v10039_v17 = vld [vmem:[%s15101_s10] sm:$0xff]  ;;  %v10044_v18 = vld [vmem:[%s15101_s10 + $0x8] sm:$0xff]  ;;  %v10049_v19 = vld [vmem:[%s15101_s10 + $0x10] sm:$0xff]  ;;  %s15399_s3 = sld [smem:[#allocation95_spill]] }
  0x55   :  { %v336_v20 = vmul.f32 %v10039_v17, %v10039_v17  ;;  %v291_v21 = vadd.f32 %v10044_v18, %v10039_v17  ;;  %v337_v22 = vmul.f32 %v10044_v18, %v10044_v18  ;;  %v9434_v23 = vld [vmem:[%s15100_s5 + $0x60] sm:$0xff]  ;;  %v10066_v25 = vld [vmem:[%s15101_s10 + $0x18] sm:$0xff]  ;;  %v338_v28 = vmul.f32 %v10049_v19, %v10049_v19  ;;  %v10091_v35 = vld [vmem:[%s15101_s10 + $0x28] sm:$0xff] }
  0x56   :  { %1345 = vmatpush.bf16.msra.mxu0 %v9436_v11  ;;  %v9442_v24 = vld [vmem:[%s15100_s5 + $0xa0] sm:$0xff]  ;;  %v339_v32 = vmul.f32 %v10066_v25, %v10066_v25  ;;  %v9433_v33 = vld [vmem:[%s15100_s5 + $0x58] sm:$0xff]  ;;  %v9432_v40 = vld [vmem:[%s15100_s5 + $0x50] sm:$0xff]  ;;  %v341_v46 = vmul.f32 %v10091_v35, %v10091_v35 }
  0x57   :  { %1652 = vmatpush.bf16.msra.mxu2 %v9444_v12  ;;  %v9426_v26 = vld [vmem:[%s15100_s5 + $0x20] sm:$0xff]  ;;  %v292_v27 = vadd.f32 %v291_v21, %v10049_v19  ;;  %v368_v30 = vadd.f32 %v337_v22, %v336_v20  ;;  %v9441_v34 = vld [vmem:[%s15100_s5 + $0x98] sm:$0xff]  ;;  %v10105_v41 = vld [vmem:[%s15101_s10 + $0x30] sm:$0xff] }
  0x58   :  { %1482 = vmatpush.bf16.msra.mxu1 %v9428_v13  ;;  %v10077_v29 = vld [vmem:[%s15101_s10 + $0x20] sm:$0xff]  ;;  %v9425_v36 = vld [vmem:[%s15100_s5 + $0x18] sm:$0xff]  ;;  %v9440_v42 = vld [vmem:[%s15100_s5 + $0x90] sm:$0xff]  ;;  %v342_v50 = vmul.f32 %v10105_v41, %v10105_v41 }
  0x59   :  { %v293_v31 = vadd.f32 %v292_v27, %v10066_v25  ;;  %v340_v38 = vmul.f32 %v10077_v29, %v10077_v29  ;;  %v369_v39 = vadd.f32 %v368_v30, %v338_v28  ;;  %v9424_v43 = vld [vmem:[%s15100_s5 + $0x10] sm:$0xff]  ;;  %v10116_v44 = vld [vmem:[%s15101_s10 + $0x38] sm:$0xff]  ;;  %v10124_v48 = vld [vmem:[%s15101_s10 + $0x40] sm:$0xff] }
  0x5a   :  { %1346 = vmatpush.bf16.msra.mxu0 %v9435_v14  ;;  %v9431_v52 = vld [vmem:[%s15100_s5 + $0x48] sm:$0xff]  ;;  %v343_v56 = vmul.f32 %v10116_v44, %v10116_v44  ;;  %v344_v60 = vmul.f32 %v10124_v48, %v10124_v48  ;;  %v10152_v62 = vld [vmem:[%s15101_s10 + $0x50] sm:$0xff]  ;;  %v9430_v2 = vld [vmem:[%s15100_s5 + $0x40] sm:$0xff] }
  0x5b   :  { %1653 = vmatpush.bf16.msra.mxu2 %v9443_v15  ;;  %v294_v37 = vadd.f32 %v293_v31, %v10077_v29  ;;  %v370_v47 = vadd.f32 %v369_v39, %v339_v32  ;;  %v9439_v53 = vld [vmem:[%s15100_s5 + $0x88] sm:$0xff]  ;;  %v10163_v3 = vld [vmem:[%s15101_s10 + $0x58] sm:$0xff]  ;;  %v346_v5 = vmul.f32 %v10152_v62, %v10152_v62  ;;  %v10171_v7 = vld [vmem:[%s15101_s10 + $0x60] sm:$0xff] }
  0x5c   :  { %1483 = vmatpush.bf16.msra.mxu1 %v9427_v16  ;;  %v10138_v54 = vld [vmem:[%s15101_s10 + $0x48] sm:$0xff]  ;;  %v347_v9 = vmul.f32 %v10163_v3, %v10163_v3  ;;  %v348_v13 = vmul.f32 %v10171_v7, %v10171_v7  ;;  %v10187_v15 = vld [vmem:[%s15101_s10 + $0x70] sm:$0xff]  ;;  %v10195_v22 = vld [vmem:[%s15101_s10 + $0x78] sm:$0xff] }
  0x5d   :  { %v295_v45 = vadd.f32 %v294_v37, %v10091_v35  ;;  %v371_v51 = vadd.f32 %v370_v47, %v340_v38  ;;  %v9423_v58 = vld [vmem:[%s15100_s5 + $0x8] sm:$0xff]  ;;  %v345_v0 = vmul.f32 %v10138_v54, %v10138_v54  ;;  %v10203_v27 = vld [vmem:[%s15101_s10 + $0x80] sm:$0xff]  ;;  %v351_v30 = vmul.f32 %v10195_v22, %v10195_v22  ;;  %v10219_v37 = vld [vmem:[%s15101_s10 + $0x90] sm:$0xff] }
  0x5e   :  { %1347 = vmatpush.bf16.msra.mxu0 %v9434_v23  ;;  %v10179_v11 = vld [vmem:[%s15101_s10 + $0x68] sm:$0xff]  ;;  %v10235_v47 = vld [vmem:[%s15101_s10 + $0xa0] sm:$0xff] }
  0x5f   :  { %1654 = vmatpush.bf16.msra.mxu2 %v9442_v24  ;;  %v296_v49 = vadd.f32 %v295_v45, %v10105_v41  ;;  %v372_v57 = vadd.f32 %v371_v51, %v341_v46  ;;  %v349_v20 = vmul.f32 %v10179_v11, %v10179_v11  ;;  %v350_v24 = vmul.f32 %v10187_v15, %v10187_v15  ;;  %v10211_v32 = vld [vmem:[%s15101_s10 + $0x88] sm:$0xff] }
  0x60   :  { %1484 = vmatpush.bf16.msra.mxu1 %v9426_v26  ;;  %v353_v39 = vmul.f32 %v10211_v32, %v10211_v32  ;;  %v354_v45 = vmul.f32 %v10219_v37, %v10219_v37 }
  0x61   :  { %v297_v55 = vadd.f32 %v296_v49, %v10116_v44  ;;  %v373_v61 = vadd.f32 %v372_v57, %v342_v50  ;;  %v10251_v57 = vld [vmem:[%s15101_s10 + $0xb0] sm:$0xff] }
  0x62   :  { %1348 = vmatpush.bf16.msra.mxu0 %v9433_v33 }
  0x63   :  { %1655 = vmatpush.bf16.msra.mxu2 %v9441_v34  ;;  %v298_v59 = vadd.f32 %v297_v55, %v10124_v48  ;;  %v374_v1 = vadd.f32 %v373_v61, %v343_v56  ;;  %v352_v34 = vmul.f32 %v10203_v27, %v10203_v27  ;;  %v356_v55 = vmul.f32 %v10235_v47, %v10235_v47  ;;  %v10259_v61 = vld [vmem:[%s15101_s10 + $0xb8] sm:$0xff] }
  0x64   :  { %1485 = vmatpush.bf16.msra.mxu1 %v9425_v36 }
  0x65   :  { %v299_v63 = vadd.f32 %v298_v59, %v10138_v54  ;;  %v375_v6 = vadd.f32 %v374_v1, %v344_v60 }
  0x66   :  { %1349 = vmatpush.bf16.msra.mxu0 %v9432_v40 }
  0x67   :  { %1656 = vmatpush.bf16.msra.mxu2 %v9440_v42  ;;  %v300_v4 = vadd.f32 %v299_v63, %v10152_v62  ;;  %v376_v10 = vadd.f32 %v375_v6, %v345_v0  ;;  %v10227_v42 = vld [vmem:[%s15101_s10 + $0x98] sm:$0xff]  ;;  %v358_v0 = vmul.f32 %v10251_v57, %v10251_v57 }
  0x68   :  { %1486 = vmatpush.bf16.msra.mxu1 %v9424_v43  ;;  %v355_v50 = vmul.f32 %v10227_v42, %v10227_v42 }
  0x69   :  { %v301_v8 = vadd.f32 %v300_v4, %v10163_v3  ;;  %v377_v14 = vadd.f32 %v376_v10, %v346_v5  ;;  %v359_v5 = vmul.f32 %v10259_v61, %v10259_v61  ;;  %v9647_v10 = vmov 256.0  }
  0x6a   :  { %1350 = vmatpush.bf16.msra.mxu0 %v9431_v52  ;;  %v10243_v52 = vld [vmem:[%s15101_s10 + $0xa8] sm:$0xff]  ;;  %9610 = vrcp.f32 %v9647_v10 }
  0x6b   :  { %1657 = vmatpush.bf16.msra.mxu2 %v9439_v53  ;;  %v302_v12 = vadd.f32 %v301_v8, %v10171_v7  ;;  %v378_v21 = vadd.f32 %v377_v14, %v347_v9  ;;  %v357_v59 = vmul.f32 %v10243_v52, %v10243_v52  ;;  %v10275_v8 = vld [vmem:[%s15101_s10 + $0xc8] sm:$0xff]  ;;  %v10283_v14 = vld [vmem:[%s15101_s10 + $0xd0] sm:$0xff] }
  0x6c   :  { %1487 = vmatpush.bf16.msra.mxu1 %v9423_v58 }
  0x6d   :  { %v303_v16 = vadd.f32 %v302_v12, %v10179_v11  ;;  %v379_v26 = vadd.f32 %v378_v21, %v348_v13 }
  0x6e   :  { %1351 = vmatpush.bf16.msra.mxu0 %v9430_v2  ;;  %v10267_v2 = vld [vmem:[%s15101_s10 + $0xc0] sm:$0xff] }
  0x6f   :  { %v304_v23 = vadd.f32 %v303_v16, %v10187_v15  ;;  %v380_v31 = vadd.f32 %v379_v26, %v349_v20  ;;  %v360_v12 = vmul.f32 %v10267_v2, %v10267_v2  ;;  %v361_v20 = vmul.f32 %v10275_v8, %v10275_v8 }
  0x70   :  { %v362_v26 = vmul.f32 %v10283_v14, %v10283_v14 }
  0x71   :  { %v305_v28 = vadd.f32 %v304_v23, %v10195_v22  ;;  %v381_v36 = vadd.f32 %v380_v31, %v350_v24  ;;  %v10291_v23 = vld [vmem:[%s15101_s10 + $0xd8] sm:$0xff]  ;;  %v9611_v31 = vpop.eup %9610 }
  0x72   :  { %vm333_vm0 = vweird.f32 %v9611_v31 }
  0x73   :  { %v306_v33 = vadd.f32 %v305_v28, %v10203_v27  ;;  %v382_v40 = vadd.f32 %v381_v36, %v351_v30  ;;  %v10299_v30 = vld [vmem:[%s15101_s10 + $0xe0] sm:$0xff] }
  0x75   :  { %v307_v38 = vadd.f32 %v306_v33, %v10211_v32  ;;  %v383_v46 = vadd.f32 %v382_v40, %v352_v34  ;;  %v363_v34 = vmul.f32 %v10291_v23, %v10291_v23  ;;  %v364_v40 = vmul.f32 %v10299_v30, %v10299_v30 }
  0x77   :  { %v308_v43 = vadd.f32 %v307_v38, %v10219_v37  ;;  %v384_v51 = vadd.f32 %v383_v46, %v353_v39  ;;  %v10307_v38 = vld [vmem:[%s15101_s10 + $0xe8] sm:$0xff]  ;;  %v329_v46 = vmul.f32 256.0, %v9611_v31 }
  0x79   :  { %v309_v49 = vadd.f32 %v308_v43, %v10227_v42  ;;  %v385_v56 = vadd.f32 %v384_v51, %v354_v45  ;;  %v10315_v45 = vld [vmem:[%s15101_s10 + $0xf0] sm:$0xff] }
  0x7b   :  { %v310_v53 = vadd.f32 %v309_v49, %v10235_v47  ;;  %v386_v60 = vadd.f32 %v385_v56, %v355_v50  ;;  %v365_v50 = vmul.f32 %v10307_v38, %v10307_v38  ;;  %v366_v56 = vmul.f32 %v10315_v45, %v10315_v45 }
  0x7d   :  { %v311_v58 = vadd.f32 %v310_v53, %v10243_v52  ;;  %v387_v1 = vadd.f32 %v386_v60, %v356_v55  ;;  %v290_v53 = vld [vmem:[%s15101_s10 + $0xf8] sm:$0xff] }
  0x7f   :  { %v312_v63 = vadd.f32 %v311_v58, %v10251_v57  ;;  %v388_v6 = vadd.f32 %v387_v1, %v357_v59  ;;  %v330_v59 = vsub.f32 1.0, %v329_v46  ;;  %v9438_v46 = vld [vmem:[%s15100_s5 + $0x80] sm:$0xff] }
  0x80   :  { %1658 = vmatpush.bf16.msra.mxu2 %v9438_v46 }
  0x81   :  { %v313_v4 = vadd.f32 %v312_v63, %v10259_v61  ;;  %v389_v13 = vadd.f32 %v388_v6, %v358_v0  ;;  %v367_v63 = vmul.f32 %v290_v53, %v290_v53 }
  0x83   :  { %v314_v9 = vadd.f32 %v313_v4, %v10267_v2  ;;  %v390_v21 = vadd.f32 %v389_v13, %v359_v5  ;;  %v331_v5 = vmul.f32 %v9611_v31, %v330_v59 }
  0x85   :  { %v315_v16 = vadd.f32 %v314_v9, %v10275_v8  ;;  %v391_v28 = vadd.f32 %v390_v21, %v360_v12  ;;  %v332_v13 = vadd.f32 %v9611_v31, %v331_v5 }
  0x87   :  { %v316_v24 = vadd.f32 %v315_v16, %v10283_v14  ;;  %v392_v36 = vadd.f32 %v391_v28, %v361_v20 }
  0x89   :  { %v317_v33 = vadd.f32 %v316_v24, %v10291_v23  ;;  %v393_v43 = vadd.f32 %v392_v36, %v362_v26  ;;  %v10326_v26 = vsel %vm333_vm0, %v9611_v31, %v332_v13  ;;  %v9422_v31 = vld [vmem:[%s15100_s5] sm:$0xff]  ;;  %vm3559_vm0 = vcmask 1043459   ;;  %s15395_s5 = sld [smem:[#allocation96_spill]] }
  0x8a   :  { %1488 = vmatpush.bf16.msra.mxu1 %v9422_v31  ;;  %v10365_v13 = vld [vmem:[%s15104_s11] ss:$0 sm:$0xff] }
  0x8b   :  { %v318_v39 = vadd.f32 %v317_v33, %v10299_v30  ;;  %v394_v51 = vadd.f32 %v393_v43, %v363_v34 }
  0x8d   :  { %v319_v49 = vadd.f32 %v318_v39, %v10307_v38  ;;  %v395_v58 = vadd.f32 %v394_v51, %v364_v40 }
  0x8f   :  { %v320_v55 = vadd.f32 %v319_v49, %v10315_v45  ;;  %v396_v0 = vadd.f32 %v395_v58, %v365_v50 }
  0x91   :  { %v321_v60 = vadd.f32 %v320_v55, %v290_v53  ;;  %v397_v4 = vadd.f32 %v396_v0, %v366_v56 }
  0x93   :  { %v322_v1 = vrot.slane %v321_v60, 4  ;;  %v398_v9 = vadd.f32 %v397_v4, %v367_v63  ;;  %v556_v63 = vlaneseq }
  0x95   :  { %v323_v6 = vadd.f32 %v322_v1, %v321_v60  ;;  %v399_v12 = vrot.slane %v398_v9, 4 }
  0x97   :  { %v324_v10 = vrot.slane %v323_v6, 2  ;;  %v400_v20 = vadd.f32 %v399_v12, %v398_v9  ;;  %v10350_v9 = vld [vmem:[%s15102_s23] ss:$0 sm:$0xff]  ;;  %v10354_v12 = vshrl.u32 %v556_v63, 7  ;;  %s15398_s23 = sld [smem:[#allocation94_spill]] }
  0x99   :  { %v325_v16 = vadd.f32 %v324_v10, %v323_v6  ;;  %v401_v24 = vrot.slane %v400_v20, 2  ;;  %15103 = vst [vmem:[#allocation9_spill] sm:$0xff] %v10354_v12  ;;  %vm1166_vm4 = vcmp.lt.s32.totalorder %v10354_v12, 7  ;;  %vm1037_vm5 = vcmp.lt.s32.totalorder %v10354_v12, 1 }
  0x9b   :  { %v326_v21 = vrot.slane %v325_v16, 1  ;;  %v402_v33 = vadd.f32 %v401_v24, %v400_v20 }
  0x9d   :  { %v327_v28 = vadd.f32 %v326_v21, %v325_v16  ;;  %v403_v36 = vrot.slane %v402_v33, 1 }
  0x9f   :  { %v10329_v34 = vmul.f32 %v10326_v26, %v327_v28  ;;  %v404_v39 = vadd.f32 %v403_v36, %v402_v33  ;;  %v593_v28 = vand.u32 127, %v10354_v12 }
  0xa1   :  { %v406_v40 = vmul.f32 %v10329_v34, %v10329_v34  ;;  %v405_v43 = vmul.f32 %v404_v39, %v10326_v26  ;;  %v409_v0 = vsub.f32 %v10039_v17, %v10329_v34  ;;  %v410_v1 = vsub.f32 %v10044_v18, %v10329_v34 }
  0xa2   :  { %v411_v4 = vsub.f32 %v10049_v19, %v10329_v34  ;;  %v440_v5 = vsub.f32 %v290_v53, %v10329_v34  ;;  %v412_v17 = vsub.f32 %v10066_v25, %v10329_v34  ;;  %v413_v18 = vsub.f32 %v10077_v29, %v10329_v34 }
  0xa3   :  { %v407_v49 = vsub.f32 %v405_v43, %v406_v40  ;;  %vm973_vm6 = vcmp.eq.s32.totalorder %v593_v28, 0 }
  0xa5   :  { %v408_v50 = vmax.f32 %v407_v49, 0.0 }
  0xa7   :  { %v441_v51 = vadd.f32 1e-05, %v408_v50 }
  0xa9   :  { %9612 = vrsqrt.f32 %v441_v51  ;;  %vm448_vm1 = vweird.f32 %v441_v51 }
  0xaf   :  { %v9613_v55 = vpop.eup %9612 }
  0xb0   :  { %v443_v56 = vmul.f32 %v9613_v55, %v441_v51  ;;  %vm449_vm2 = vweird.f32 %v9613_v55 }
  0xb1   :  { %vm450_vm3 = vmor %vm448_vm1, %vm449_vm2  ;;  %vm3561_vm1 = vcmask 1044484   ;;  %vm3563_vm2 = vcmask 1045509  }
  0xb2   :  { %v444_v58 = vmul.f32 %v9613_v55, %v443_v56 }
  0xb4   :  { %v445_v59 = vmul.f32 0.5, %v444_v58 }
  0xb6   :  { %v446_v60 = vsub.f32 1.5, %v445_v59 }
  0xb8   :  { %v447_v6 = vmul.f32 %v9613_v55, %v446_v60 }
  0xba   :  { %v10352_v10 = vsel %vm450_vm3, %v9613_v55, %v447_v6  ;;  %vm3565_vm3 = vcmask 1046534  }
  0xbb   :  { %v452_v19 = vmul.f32 %v10352_v10, %v409_v0  ;;  %v453_v53 = vmul.f32 %v10352_v10, %v410_v1  ;;  %v454_v16 = vmul.f32 %v10352_v10, %v411_v4  ;;  %v483_v20 = vmul.f32 %v10352_v10, %v440_v5 }
  0xbc   :  { %v455_v33 = vmul.f32 %v10352_v10, %v412_v17  ;;  %v456_v36 = vmul.f32 %v10352_v10, %v413_v18 }
  0xbd   :  { %v488_v21 = vmul.f32 %v10350_v9, %v452_v19  ;;  %v489_v25 = vmul.f32 %v10350_v9, %v453_v53  ;;  %v490_v24 = vmul.f32 %v10350_v9, %v454_v16  ;;  %v519_v29 = vmul.f32 %v10350_v9, %v483_v20 }
  0xbe   :  { %v491_v63 = vmul.f32 %v10350_v9, %v455_v33  ;;  %v492_v0 = vmul.f32 %v10350_v9, %v456_v36  ;;  %v414_v53 = vsub.f32 %v10091_v35, %v10329_v34 }
  0xbf   :  { %v10377_v39 = vadd.f32 %v10365_v13, %v488_v21  ;;  %v525_v40 = vadd.f32 %v10365_v13, %v489_v25  ;;  %v526_v43 = vadd.f32 %v10365_v13, %v490_v24  ;;  %v10382_v46 = vadd.f32 %v10365_v13, %v519_v29 }
  0xc0   :  { %v527_v18 = vadd.f32 %v10365_v13, %v491_v63  ;;  %v528_v19 = vadd.f32 %v10365_v13, %v492_v0  ;;  %v415_v21 = vsub.f32 %v10105_v41, %v10329_v34  ;;  %v457_v29 = vmul.f32 %v10352_v10, %v414_v53 }
  0xc1   :  { %v1263_v31 = vpack.c.bf16 %v525_v40, %v10377_v39  ;;  %v1134_v49 = vrot.slane %v10377_v39, 1  ;;  %v1135_v50 = vrot.slane %v525_v40, 1  ;;  %v1136_v51 = vrot.slane %v526_v43, 1 }
  0xc2   :  { %v1005_v55 = vrot.slane %v10377_v39, 7  ;;  %v1006_v56 = vrot.slane %v525_v40, 7  ;;  %v1036_v58 = vrot.slane %v10382_v46, 7  ;;  %v1137_v16 = vrot.slane %v527_v18, 1 }
  0xc3   :  { %1352 = vmatmul.bf16.vlgmr.msra.gmra.mxu0 %v1263_v31  ;;  %v1196_v59 = vsel %vm1166_vm4, %v1135_v50, %v1136_v51  ;;  %v1197_v60 = vsel %vm1166_vm4, %v1134_v49, %v1135_v50  ;;  %v1138_v20 = vrot.slane %v528_v19, 1  ;;  %v1007_v25 = vrot.slane %v526_v43, 7 }
  0xc4   :  { %v1570_v1 = vpack.c.bf16 %v1196_v59, %v1197_v60  ;;  %v1068_v4 = vsel %vm1037_vm5, %v1005_v55, %v1006_v56  ;;  %v1069_v5 = vsel %vm1037_vm5, %v1036_v58, %v1005_v55  ;;  %v1008_v24 = vrot.slane %v527_v18, 7 }
  0xc5   :  { %v1070_v6 = vsel %vm973_vm6, %v10377_v39, %v1069_v5  ;;  %v1264_v28 = vpack.c.bf16 %v527_v18, %v526_v43  ;;  %v1194_v33 = vsel %vm1166_vm4, %v1137_v16, %v1138_v20  ;;  %v1195_v36 = vsel %vm1166_vm4, %v1136_v51, %v1137_v16 }
  0xc6   :  { %1659 = vmatmul.bf16.vlgmr.msra.gmra.mxu2 %v1570_v1  ;;  %v1231_v17 = vpack.c.bf16 %v1068_v4, %v1070_v6  ;;  %v458_v40 = vmul.f32 %v10352_v10, %v415_v21  ;;  %v1066_v35 = vsel %vm1037_vm5, %v1007_v25, %v1008_v24  ;;  %v1067_v31 = vsel %vm1037_vm5, %v1006_v56, %v1007_v25 }
  0xc7   :  { %v1571_v41 = vpack.c.bf16 %v1194_v33, %v1195_v36  ;;  %v493_v50 = vmul.f32 %v10350_v9, %v457_v29  ;;  %v1232_v55 = vpack.c.bf16 %v1066_v35, %v1067_v31  ;;  %v416_v0 = vsub.f32 %v10116_v44, %v10329_v34 }
  0xc8   :  { %1489 = vmatmul.bf16.vlgmr.msra.gmra.mxu1 %v1231_v17  ;;  %v494_v43 = vmul.f32 %v10350_v9, %v458_v40  ;;  %v417_v56 = vsub.f32 %v10124_v48, %v10329_v34  ;;  %v1009_v1 = vrot.slane %v528_v19, 7  ;;  %v418_v36 = vsub.f32 %v10138_v54, %v10329_v34 }
  0xc9   :  { %v529_v59 = vadd.f32 %v10365_v13, %v493_v50  ;;  %v459_v18 = vmul.f32 %v10352_v10, %v416_v0  ;;  %vm3567_vm6 = vcmask 1047559  }
  0xca   :  { %v530_v51 = vadd.f32 %v10365_v13, %v494_v43  ;;  %v460_v53 = vmul.f32 %v10352_v10, %v417_v56  ;;  %v1065_v44 = vsel %vm1037_vm5, %v1008_v24, %v1009_v1  ;;  %v419_v24 = vsub.f32 %v10152_v62, %v10329_v34 }
  0xcb   :  { %v1139_v60 = vrot.slane %v529_v59, 1  ;;  %v1010_v4 = vrot.slane %v529_v59, 7  ;;  %v1265_v5 = vpack.c.bf16 %v529_v59, %v528_v19  ;;  %v495_v19 = vmul.f32 %v10350_v9, %v459_v18 }
  0xcc   :  { %v1140_v63 = vrot.slane %v530_v51, 1  ;;  %v496_v21 = vmul.f32 %v10350_v9, %v460_v53  ;;  %v1011_v40 = vrot.slane %v530_v51, 7  ;;  %v461_v43 = vmul.f32 %v10352_v10, %v418_v36 }
  0xcd   :  { %v1193_v17 = vsel %vm1166_vm4, %v1138_v20, %v1139_v60  ;;  %v1064_v16 = vsel %vm1037_vm5, %v1009_v1, %v1010_v4  ;;  %v531_v20 = vadd.f32 %v10365_v13, %v495_v19 }
  0xce   :  { %v1192_v6 = vsel %vm1166_vm4, %v1139_v60, %v1140_v63  ;;  %v1233_v25 = vpack.c.bf16 %v1064_v16, %v1065_v44  ;;  %v532_v29 = vadd.f32 %v10365_v13, %v496_v21  ;;  %v1063_v54 = vsel %vm1037_vm5, %v1010_v4, %v1011_v40 }
  0xcf   :  { %v1572_v48 = vpack.c.bf16 %v1192_v6, %v1193_v17  ;;  %v1012_v35 = vrot.slane %v531_v20, 7  ;;  %v1266_v31 = vpack.c.bf16 %v531_v20, %v530_v51  ;;  %v497_v51 = vmul.f32 %v10350_v9, %v461_v43 }
  0xd0   :  { %v1142_v33 = vrot.slane %v532_v29, 1  ;;  %v420_v6 = vsub.f32 %v10163_v3, %v10329_v34  ;;  %v421_v4 = vsub.f32 %v10171_v7, %v10329_v34  ;;  %v1013_v17 = vrot.slane %v532_v29, 7 }
  0xd1   :  { %v1062_v59 = vsel %vm1037_vm5, %v1011_v40, %v1012_v35  ;;  %v422_v40 = vsub.f32 %v10179_v11, %v10329_v34 }
  0xd2   :  { %v1234_v0 = vpack.c.bf16 %v1062_v59, %v1063_v54  ;;  %v464_v19 = vmul.f32 %v10352_v10, %v421_v4  ;;  %v1061_v3 = vsel %vm1037_vm5, %v1012_v35, %v1013_v17  ;;  %v423_v35 = vsub.f32 %v10187_v15, %v10329_v34 }
  0xd3   :  { %1357 = vmatmul.bf16.gmra.mxu0 %v1264_v28  ;;  %v1141_v28 = vrot.slane %v531_v20, 1  ;;  %v465_v59 = vmul.f32 %v10352_v10, %v422_v40  ;;  %v426_v40 = vsub.f32 %v10211_v32, %v10329_v34 }
  0xd4   :  { %v500_v20 = vmul.f32 %v10350_v9, %v464_v19  ;;  %v466_v54 = vmul.f32 %v10352_v10, %v423_v35  ;;  %v427_v35 = vsub.f32 %v10219_v37, %v10329_v34 }
  0xd5   :  { %v1191_v50 = vsel %vm1166_vm4, %v1140_v63, %v1141_v28  ;;  %v533_v63 = vadd.f32 %v10365_v13, %v497_v51  ;;  %v501_v51 = vmul.f32 %v10350_v9, %v465_v59 }
  0xd6   :  { %1664 = vmatmul.bf16.gmra.mxu2 %v1571_v41  ;;  %v1190_v41 = vsel %vm1166_vm4, %v1141_v28, %v1142_v33 }
  0xd7   :  { %v1573_v62 = vpack.c.bf16 %v1190_v41, %v1191_v50  ;;  %v1143_v1 = vrot.slane %v533_v63, 1  ;;  %v1014_v18 = vrot.slane %v533_v63, 7  ;;  %v1267_v53 = vpack.c.bf16 %v533_v63, %v532_v29 }
  0xd8   :  { %1494 = vmatmul.bf16.gmra.mxu1 %v1232_v55  ;;  %v462_v55 = vmul.f32 %v10352_v10, %v419_v24  ;;  %v537_v63 = vadd.f32 %v10365_v13, %v501_v51 }
  0xd9   :  { %v1189_v44 = vsel %vm1166_vm4, %v1142_v33, %v1143_v1  ;;  %v1060_v21 = vsel %vm1037_vm5, %v1013_v17, %v1014_v18  ;;  %v536_v33 = vadd.f32 %v10365_v13, %v500_v20 }
  0xda   :  { %v498_v60 = vmul.f32 %v10350_v9, %v462_v55  ;;  %v1235_v29 = vpack.c.bf16 %v1060_v21, %v1061_v3 }
  0xdb   :  { %v1146_v24 = vrot.slane %v536_v33, 1 }
  0xdc   :  { %v534_v56 = vadd.f32 %v10365_v13, %v498_v60  ;;  %v502_v60 = vmul.f32 %v10350_v9, %v466_v54  ;;  %v469_v54 = vmul.f32 %v10352_v10, %v426_v40 }
  0xe3   :  { %1362 = vmatmul.bf16.gmra.mxu0 %v1265_v5  ;;  %v1144_v5 = vrot.slane %v534_v56, 1 }
  0xe5   :  { %v1188_v16 = vsel %vm1166_vm4, %v1143_v1, %v1144_v5  ;;  %v424_v1 = vsub.f32 %v10195_v22, %v10329_v34 }
  0xe6   :  { %1669 = vmatmul.bf16.gmra.mxu2 %v1572_v48  ;;  %v463_v48 = vmul.f32 %v10352_v10, %v420_v6  ;;  %v1574_v7 = vpack.c.bf16 %v1188_v16, %v1189_v44  ;;  %v1147_v6 = vrot.slane %v537_v63, 1  ;;  %v1018_v16 = vrot.slane %v537_v63, 7 }
  0xe7   :  { %v467_v17 = vmul.f32 %v10352_v10, %v424_v1  ;;  %v1269_v44 = vpack.c.bf16 %v537_v63, %v536_v33 }
  0xe8   :  { %1499 = vmatmul.bf16.gmra.mxu1 %v1233_v25  ;;  %v499_v25 = vmul.f32 %v10350_v9, %v463_v48  ;;  %v1185_v19 = vsel %vm1166_vm4, %v1146_v24, %v1147_v6 }
  0xe9   :  { %v503_v22 = vmul.f32 %v10350_v9, %v467_v17  ;;  %v428_v17 = vsub.f32 %v10227_v42, %v10329_v34 }
  0xea   :  { %v535_v28 = vadd.f32 %v10365_v13, %v499_v25 }
  0xeb   :  { %v539_v20 = vadd.f32 %v10365_v13, %v503_v22  ;;  %v471_v22 = vmul.f32 %v10352_v10, %v428_v17 }
  0xec   :  { %v1145_v36 = vrot.slane %v535_v28, 1  ;;  %v1016_v41 = vrot.slane %v535_v28, 7  ;;  %v1268_v50 = vpack.c.bf16 %v535_v28, %v534_v56  ;;  %v10516_v28 = vadd.s32 120, %v10354_v12 }
  0xee   :  { %v1186_v43 = vsel %vm1166_vm4, %v1145_v36, %v1146_v24  ;;  %v1187_v55 = vsel %vm1166_vm4, %v1144_v5, %v1145_v36  ;;  %v425_v5 = vsub.f32 %v10203_v27, %v10329_v34  ;;  %15105 = vst [vmem:[#allocation10_spill] sm:$0xff] %v10516_v28  ;;  %v1149_v36 = vrot.slane %v539_v20, 1 }
  0xef   :  { %v1575_v15 = vpack.c.bf16 %v1186_v43, %v1187_v55 }
  0xf3   :  { %1367 = vmatmul.bf16.gmra.mxu0 %v1266_v31  ;;  %v1015_v31 = vrot.slane %v534_v56, 7  ;;  %v538_v56 = vadd.f32 %v10365_v13, %v502_v60 }
  0xf5   :  { %v1059_v11 = vsel %vm1037_vm5, %v1014_v18, %v1015_v31  ;;  %v1148_v4 = vrot.slane %v538_v56, 1  ;;  %v468_v18 = vmul.f32 %v10352_v10, %v425_v5  ;;  %v1270_v43 = vpack.c.bf16 %v539_v20, %v538_v56 }
  0xf6   :  { %1674 = vmatmul.bf16.gmra.mxu2 %v1573_v62  ;;  %v1058_v62 = vsel %vm1037_vm5, %v1015_v31, %v1016_v41 }
  0xf7   :  { %v1184_v48 = vsel %vm1166_vm4, %v1147_v6, %v1148_v4  ;;  %v504_v21 = vmul.f32 %v10350_v9, %v468_v18  ;;  %v1183_v55 = vsel %vm1166_vm4, %v1148_v4, %v1149_v36  ;;  %v429_v18 = vsub.f32 %v10235_v47, %v10329_v34 }
  0xf8   :  { %1504 = vmatmul.bf16.gmra.mxu1 %v1234_v0  ;;  %v1236_v0 = vpack.c.bf16 %v1058_v62, %v1059_v11  ;;  %v470_v62 = vmul.f32 %v10352_v10, %v427_v35 }
  0xfa   :  { %v506_v51 = vmul.f32 %v10350_v9, %v470_v62 }
 0x103   :  { %1372 = vmatmul.bf16.gmra.mxu0 %v1267_v53  ;;  %v1017_v53 = vrot.slane %v536_v33, 7  ;;  %v698_v33 = vand.u32 127, %v10516_v28 }
 0x105   :  { %v1056_v27 = vsel %vm1037_vm5, %v1017_v53, %v1018_v16  ;;  %v1057_v3 = vsel %vm1037_vm5, %v1016_v41, %v1017_v53  ;;  %vm1117_vm7 = vcmp.eq.s32.totalorder %v698_v33, 127  ;;  %v1019_v41 = vrot.slane %v538_v56, 7 }
 0x106   :  { %1679 = vmatmul.bf16.gmra.mxu2 %v1574_v7  ;;  %v1576_v7 = vpack.c.bf16 %v1184_v48, %v1185_v19  ;;  %v1237_v25 = vpack.c.bf16 %v1056_v27, %v1057_v3  ;;  %v542_v56 = vadd.f32 %v10365_v13, %v506_v51 }
 0x107   :  { %v1055_v37 = vsel %vm1037_vm5, %v1018_v16, %v1019_v41 }
 0x108   :  { %1509 = vmatmul.bf16.gmra.mxu1 %v1235_v29  ;;  %v540_v29 = vadd.f32 %v10365_v13, %v504_v21  ;;  %v1152_v4 = vrot.slane %v542_v56, 1  ;;  %v472_v21 = vmul.f32 %v10352_v10, %v429_v18 }
 0x10a   :  { %v1150_v24 = vrot.slane %v540_v29, 1  ;;  %v1021_v5 = vrot.slane %v540_v29, 7 }
 0x10c   :  { %v1182_v31 = vsel %vm1166_vm4, %v1149_v36, %v1150_v24 }
 0x10d   :  { %v1214_v59 = vsel %vm1117_vm7, %v539_v20, %v1182_v31 }
 0x10e   :  { %v1577_v11 = vpack.c.bf16 %v1214_v59, %v1183_v55  ;;  %v431_v55 = vsub.f32 %v10251_v57, %v10329_v34 }
 0x113   :  { %1377 = vmatmul.bf16.gmra.mxu0 %v1268_v50  ;;  %v1020_v50 = vrot.slane %v539_v20, 7 }
 0x115   :  { %v1054_v32 = vsel %vm1037_vm5, %v1019_v41, %v1020_v50 }
 0x116   :  { %1684 = vmatmul.bf16.gmra.mxu2 %v1575_v15  ;;  %v505_v15 = vmul.f32 %v10350_v9, %v469_v54  ;;  %v1238_v60 = vpack.c.bf16 %v1054_v32, %v1055_v37  ;;  %v1023_v54 = vrot.slane %v542_v56, 7 }
 0x118   :  { %1514 = vmatmul.bf16.gmra.mxu1 %v1236_v0  ;;  %v573_v0 = vadd.s32 128, %v10354_v12  ;;  %v541_v63 = vadd.f32 %v10365_v13, %v505_v15 }
 0x11a   :  { %v705_v1 = vand.u32 127, %v573_v0  ;;  %v1151_v6 = vrot.slane %v541_v63, 1  ;;  %v1022_v53 = vrot.slane %v541_v63, 7  ;;  %v1271_v16 = vpack.c.bf16 %v541_v63, %v540_v29 }
 0x11c   :  { %vm989_vm8 = vcmp.eq.s32.totalorder %v705_v1, 0  ;;  %v1180_v48 = vsel %vm1166_vm4, %v1151_v6, %v1152_v4  ;;  %v1181_v19 = vsel %vm1166_vm4, %v1150_v24, %v1151_v6  ;;  %v1052_v47 = vsel %vm1037_vm5, %v1021_v5, %v1022_v53 }
 0x11d   :  { %v1578_v3 = vpack.c.bf16 %v1180_v48, %v1181_v19  ;;  %v1051_v63 = vsel %vm1037_vm5, %v1022_v53, %v1023_v54 }
 0x123   :  { %1382 = vmatmul.bf16.gmra.mxu0 %v1269_v44  ;;  %v1053_v44 = vsel %vm1037_vm5, %v1020_v50, %v1021_v5 }
 0x124   :  { %v1086_v27 = vsel %vm989_vm8, %v540_v29, %v1053_v44 }
 0x125   :  { %v1239_v20 = vpack.c.bf16 %v1052_v47, %v1086_v27  ;;  %v433_v47 = vsub.f32 %v10267_v2, %v10329_v34 }
 0x126   :  { %1689 = vmatmul.bf16.gmra.mxu2 %v1576_v7  ;;  %v507_v7 = vmul.f32 %v10350_v9, %v471_v22 }
 0x128   :  { %1519 = vmatmul.bf16.gmra.mxu1 %v1237_v25  ;;  %v508_v25 = vmul.f32 %v10350_v9, %v472_v21  ;;  %v543_v24 = vadd.f32 %v10365_v13, %v507_v7 }
 0x12a   :  { %v544_v40 = vadd.f32 %v10365_v13, %v508_v25  ;;  %v1153_v29 = vrot.slane %v543_v24, 1  ;;  %v1024_v62 = vrot.slane %v543_v24, 7  ;;  %v1272_v37 = vpack.c.bf16 %v543_v24, %v542_v56 }
 0x12c   :  { %v1154_v50 = vrot.slane %v544_v40, 1  ;;  %v1179_v15 = vsel %vm1166_vm4, %v1152_v4, %v1153_v29  ;;  %v1050_v57 = vsel %vm1037_vm5, %v1023_v54, %v1024_v62 }
 0x12d   :  { %v1240_v4 = vpack.c.bf16 %v1050_v57, %v1051_v63  ;;  %v435_v57 = vsub.f32 %v10283_v14, %v10329_v34 }
 0x133   :  { %1387 = vmatmul.bf16.gmra.mxu0 %v1270_v43  ;;  %v430_v43 = vsub.f32 %v10243_v52, %v10329_v34 }
 0x135   :  { %v473_v51 = vmul.f32 %v10352_v10, %v430_v43 }
 0x136   :  { %1694 = vmatmul.bf16.gmra.mxu2 %v1577_v11  ;;  %v1178_v11 = vsel %vm1166_vm4, %v1153_v29, %v1154_v50 }
 0x137   :  { %v1579_v56 = vpack.c.bf16 %v1178_v11, %v1179_v15  ;;  %v509_v5 = vmul.f32 %v10350_v9, %v473_v51 }
 0x138   :  { %1524 = vmatmul.bf16.gmra.mxu1 %v1238_v60  ;;  %v474_v60 = vmul.f32 %v10352_v10, %v431_v55 }
 0x13a   :  { %v510_v6 = vmul.f32 %v10350_v9, %v474_v60 }
 0x13c   :  { %v546_v44 = vadd.f32 %v10365_v13, %v510_v6 }
 0x13e   :  { %v1156_v21 = vrot.slane %v546_v44, 1 }
 0x140   :  { %v1353_v42 = vpop.f32.mrf.mxu0 }
 0x143   :  { %1392 = vmatmul.bf16.gmra.mxu0 %v1271_v16  ;;  %v545_v16 = vadd.f32 %v10365_v13, %v509_v5 }
 0x145   :  { %v1490_v33 = vpop.f32.mrf.mxu1  ;;  %v1155_v22 = vrot.slane %v545_v16, 1  ;;  %v1026_v7 = vrot.slane %v545_v16, 7 }
 0x146   :  { %v1491_v36 = vadd.f32 %v1490_v33, %v1353_v42  ;;  %1699 = vmatmul.bf16.gmra.mxu2 %v1578_v3  ;;  %v432_v42 = vsub.f32 %v10259_v61, %v10329_v34  ;;  %v1025_v3 = vrot.slane %v544_v40, 7 }
 0x147   :  { %v1176_v33 = vsel %vm1166_vm4, %v1155_v22, %v1156_v21 }
 0x148   :  { %1529 = vmatmul.bf16.gmra.mxu1 %v1239_v20  ;;  %v1355_v35 = vpop.f32.mrf.mxu0  ;;  %v1273_v20 = vpack.c.bf16 %v545_v16, %v544_v40  ;;  %v475_v24 = vmul.f32 %v10352_v10, %v432_v42  ;;  %v1048_v2 = vsel %vm1037_vm5, %v1025_v3, %v1026_v7  ;;  %v1049_v29 = vsel %vm1037_vm5, %v1024_v62, %v1025_v3 }
 0x149   :  { %v1660_v31 = vpop.f32.mrf.mxu2 }
 0x14a   :  { %v10556_v41 = vadd.f32 %v1660_v31, %v1491_v36  ;;  %v1177_v36 = vsel %vm1166_vm4, %v1154_v50, %v1155_v22  ;;  %v511_v55 = vmul.f32 %v10350_v9, %v475_v24 }
 0x14b   :  { %v1580_v40 = vpack.c.bf16 %v1176_v33, %v1177_v36 }
 0x14d   :  { %v1492_v59 = vpop.f32.mrf.mxu1 }
 0x14e   :  { %v1493_v32 = vadd.f32 %v1492_v59, %v1355_v35  ;;  %v476_v35 = vmul.f32 %v10352_v10, %v433_v47  ;;  %v1241_v59 = vpack.c.bf16 %v1048_v2, %v1049_v29  ;;  %v437_v2 = vsub.f32 %v10299_v30, %v10329_v34 }
 0x150   :  { %v1358_v0 = vpop.f32.mrf.mxu0  ;;  %v512_v50 = vmul.f32 %v10350_v9, %v476_v35 }
 0x151   :  { %v1662_v52 = vpop.f32.mrf.mxu2 }
 0x152   :  { %v10572_v1 = vadd.f32 %v1662_v52, %v1493_v32  ;;  %v548_v11 = vadd.f32 %v10365_v13, %v512_v50  ;;  %v434_v52 = vsub.f32 %v10275_v8, %v10329_v34 }
 0x153   :  { %1397 = vmatmul.bf16.gmra.mxu0 %v1272_v37  ;;  %v547_v37 = vadd.f32 %v10365_v13, %v511_v55 }
 0x154   :  { %v477_v16 = vmul.f32 %v10352_v10, %v434_v52 }
 0x155   :  { %v1495_v17 = vpop.f32.mrf.mxu1  ;;  %v1157_v60 = vrot.slane %v547_v37, 1  ;;  %v1028_v5 = vrot.slane %v547_v37, 7 }
 0x156   :  { %v1496_v18 = vadd.f32 %v1495_v17, %v1358_v0  ;;  %1704 = vmatmul.bf16.gmra.mxu2 %v1579_v56  ;;  %v1158_v0 = vrot.slane %v548_v11, 1  ;;  %v1027_v56 = vrot.slane %v546_v44, 7  ;;  %v513_v47 = vmul.f32 %v10350_v9, %v477_v16 }
 0x158   :  { %1534 = vmatmul.bf16.gmra.mxu1 %v1240_v4  ;;  %v1360_v48 = vpop.f32.mrf.mxu0  ;;  %v1274_v4 = vpack.c.bf16 %v547_v37, %v546_v44  ;;  %v1174_v17 = vsel %vm1166_vm4, %v1157_v60, %v1158_v0  ;;  %v1046_v14 = vsel %vm1037_vm5, %v1027_v56, %v1028_v5  ;;  %v1047_v22 = vsel %vm1037_vm5, %v1026_v7, %v1027_v56 }
 0x159   :  { %v1665_v19 = vpop.f32.mrf.mxu2 }
 0x15a   :  { %v10578_v53 = vadd.f32 %v1665_v19, %v1496_v18  ;;  %v1175_v18 = vsel %vm1166_vm4, %v1156_v21, %v1157_v60 }
 0x15b   :  { %v1581_v44 = vpack.c.bf16 %v1174_v17, %v1175_v18 }
 0x15d   :  { %v1497_v27 = vpop.f32.mrf.mxu1 }
 0x15e   :  { %v1498_v25 = vadd.f32 %v1497_v27, %v1360_v48  ;;  %v478_v48 = vmul.f32 %v10352_v10, %v435_v57  ;;  %v1242_v27 = vpack.c.bf16 %v1046_v14, %v1047_v22  ;;  %v439_v14 = vsub.f32 %v10315_v45, %v10329_v34 }
 0x160   :  { %v1363_v31 = vpop.f32.mrf.mxu0  ;;  %v514_v21 = vmul.f32 %v10350_v9, %v478_v48 }
 0x161   :  { %v1667_v61 = vpop.f32.mrf.mxu2 }
 0x162   :  { %v10594_v43 = vadd.f32 %v1667_v61, %v1498_v25  ;;  %v550_v33 = vadd.f32 %v10365_v13, %v514_v21  ;;  %v436_v61 = vsub.f32 %v10291_v23, %v10329_v34 }
 0x163   :  { %1402 = vmatmul.bf16.gmra.mxu0 %v1273_v20  ;;  %v549_v20 = vadd.f32 %v10365_v13, %v513_v47 }
 0x164   :  { %v479_v37 = vmul.f32 %v10352_v10, %v436_v61 }
 0x165   :  { %v1500_v54 = vpop.f32.mrf.mxu1  ;;  %v1159_v35 = vrot.slane %v549_v20, 1  ;;  %v1030_v55 = vrot.slane %v549_v20, 7 }
 0x166   :  { %v1501_v32 = vadd.f32 %v1500_v54, %v1363_v31  ;;  %1709 = vmatmul.bf16.gmra.mxu2 %v1580_v40  ;;  %v1160_v31 = vrot.slane %v550_v33, 1  ;;  %v1029_v40 = vrot.slane %v548_v11, 7  ;;  %v515_v57 = vmul.f32 %v10350_v9, %v479_v37 }
 0x168   :  { %1539 = vmatmul.bf16.gmra.mxu1 %v1241_v59  ;;  %v1365_v15 = vpop.f32.mrf.mxu0  ;;  %v1275_v59 = vpack.c.bf16 %v549_v20, %v548_v11  ;;  %v1172_v54 = vsel %vm1166_vm4, %v1159_v35, %v1160_v31  ;;  %v1044_v30 = vsel %vm1037_vm5, %v1029_v40, %v1030_v55  ;;  %v1045_v60 = vsel %vm1037_vm5, %v1028_v5, %v1029_v40 }
 0x169   :  { %v1670_v51 = vpop.f32.mrf.mxu2  ;;  %v482_v20 = vmul.f32 %v10352_v10, %v439_v14 }
 0x16a   :  { %v10600_v62 = vadd.f32 %v1670_v51, %v1501_v32  ;;  %v1173_v32 = vsel %vm1166_vm4, %v1158_v0, %v1159_v35 }
 0x16b   :  { %v1582_v11 = vpack.c.bf16 %v1172_v54, %v1173_v32  ;;  %v518_v35 = vmul.f32 %v10350_v9, %v482_v20 }
 0x16d   :  { %v1502_v63 = vpop.f32.mrf.mxu1 }
 0x16e   :  { %v1503_v6 = vadd.f32 %v1502_v63, %v1365_v15  ;;  %v480_v15 = vmul.f32 %v10352_v10, %v437_v2  ;;  %v1243_v63 = vpack.c.bf16 %v1044_v30, %v1045_v60 }
 0x170   :  { %v1368_v19 = vpop.f32.mrf.mxu0  ;;  %v516_v0 = vmul.f32 %v10350_v9, %v480_v15 }
 0x171   :  { %v1672_v8 = vpop.f32.mrf.mxu2 }
 0x172   :  { %v10616_v42 = vadd.f32 %v1672_v8, %v1503_v6  ;;  %v552_v17 = vadd.f32 %v10365_v13, %v516_v0  ;;  %v438_v8 = vsub.f32 %v10307_v38, %v10329_v34 }
 0x173   :  { %1407 = vmatmul.bf16.gmra.mxu0 %v1274_v4  ;;  %v551_v4 = vadd.f32 %v10365_v13, %v515_v57 }
 0x174   :  { %v1033_v37 = vrot.slane %v552_v17, 7 }
 0x175   :  { %v1505_v3 = vpop.f32.mrf.mxu1  ;;  %v1161_v48 = vrot.slane %v551_v4, 1  ;;  %v1032_v47 = vrot.slane %v551_v4, 7  ;;  %v1276_v21 = vpack.c.bf16 %v551_v4, %v550_v33 }
 0x176   :  { %v1506_v25 = vadd.f32 %v1505_v3, %v1368_v19  ;;  %1714 = vmatmul.bf16.gmra.mxu2 %v1581_v44  ;;  %v1162_v19 = vrot.slane %v552_v17, 1  ;;  %v1031_v44 = vrot.slane %v550_v33, 7 }
 0x177   :  { %v1171_v3 = vsel %vm1166_vm4, %v1160_v31, %v1161_v48 }
 0x178   :  { %1544 = vmatmul.bf16.gmra.mxu1 %v1242_v27  ;;  %v1370_v36 = vpop.f32.mrf.mxu0  ;;  %v1170_v27 = vsel %vm1166_vm4, %v1161_v48, %v1162_v19  ;;  %v1042_v45 = vsel %vm1037_vm5, %v1031_v44, %v1032_v47  ;;  %v1043_v34 = vsel %vm1037_vm5, %v1030_v55, %v1031_v44 }
 0x179   :  { %v1675_v24 = vpop.f32.mrf.mxu2  ;;  %v1583_v33 = vpack.c.bf16 %v1170_v27, %v1171_v3  ;;  %v1244_v31 = vpack.c.bf16 %v1042_v45, %v1043_v34 }
 0x17a   :  { %v10622_v7 = vadd.f32 %v1675_v24, %v1506_v25  ;;  %v481_v25 = vmul.f32 %v10352_v10, %v438_v8 }
 0x17c   :  { %v517_v24 = vmul.f32 %v10350_v9, %v481_v25 }
 0x17d   :  { %v1507_v29 = vpop.f32.mrf.mxu1 }
 0x17e   :  { %v1508_v50 = vadd.f32 %v1507_v29, %v1370_v36  ;;  %v553_v10 = vadd.f32 %v10365_v13, %v517_v24  ;;  %v554_v29 = vadd.f32 %v10365_v13, %v518_v35 }
 0x180   :  { %v1373_v51 = vpop.f32.mrf.mxu0  ;;  %v1163_v55 = vrot.slane %v553_v10, 1  ;;  %v1164_v54 = vrot.slane %v554_v29, 1  ;;  %v1034_v9 = vrot.slane %v553_v10, 7  ;;  %v1277_v15 = vpack.c.bf16 %v553_v10, %v552_v17 }
 0x181   :  { %v1677_v23 = vpop.f32.mrf.mxu2  ;;  %v1035_v44 = vrot.slane %v554_v29, 7 }
 0x182   :  { %v10638_v52 = vadd.f32 %v1677_v23, %v1508_v50  ;;  %v1169_v23 = vsel %vm1166_vm4, %v1162_v19, %v1163_v55  ;;  %v1040_v60 = vsel %vm1037_vm5, %v1033_v37, %v1034_v9 }
 0x183   :  { %1412 = vmatmul.bf16.gmra.mxu0 %v1275_v59  ;;  %v1038_v39 = vsel %vm1037_vm5, %v1035_v44, %v1036_v58 }
 0x185   :  { %v1510_v56 = vpop.f32.mrf.mxu1 }
 0x186   :  { %v1511_v6 = vadd.f32 %v1510_v56, %v1373_v51  ;;  %1719 = vmatmul.bf16.gmra.mxu2 %v1582_v11  ;;  %v1168_v51 = vsel %vm1166_vm4, %v1163_v55, %v1164_v54  ;;  %v1041_v11 = vsel %vm1037_vm5, %v1032_v47, %v1033_v37  ;;  %v1278_v47 = vpack.c.bf16 %v10382_v46, %v554_v29 }
 0x187   :  { %v1584_v57 = vpack.c.bf16 %v1168_v51, %v1169_v23  ;;  %v1245_v0 = vpack.c.bf16 %v1040_v60, %v1041_v11 }
 0x188   :  { %1549 = vmatmul.bf16.gmra.mxu1 %v1243_v63  ;;  %v10644_v18 = vpop.f32.mrf.mxu0  ;;  %v588_v63 = vadd.s32 248, %v10354_v12 }
 0x189   :  { %v1680_v5 = vpop.f32.mrf.mxu2 }
 0x18a   :  { %v10646_v16 = vadd.f32 %v1680_v5, %v1511_v6  ;;  %v810_v17 = vand.u32 127, %v588_v63  ;;  %v1165_v5 = vrot.slane %v10382_v46, 1 }
 0x18c   :  { %vm1133_vm9 = vcmp.eq.s32.totalorder %v810_v17, 127  ;;  %v1198_v8 = vsel %vm1166_vm4, %v1165_v5, %v1134_v49  ;;  %v1039_v49 = vsel %vm1037_vm5, %v1034_v9, %v1035_v44 }
 0x18d   :  { %v10652_v22 = vpop.f32.mrf.mxu1  ;;  %v1230_v27 = vsel %vm1133_vm9, %v10382_v46, %v1198_v8 }
 0x190   :  { %v1378_v36 = vpop.f32.mrf.mxu0 }
 0x191   :  { %v10660_v38 = vpop.f32.mrf.mxu2 }
 0x193   :  { %1417 = vmatmul.bf16.gmra.mxu0 %v1276_v21  ;;  %v1167_v21 = vsel %vm1166_vm4, %v1164_v54, %v1165_v5 }
 0x194   :  { %v1585_v20 = vpack.c.bf16 %v1230_v27, %v1167_v21  ;;  %v10753_v27 = vld [vmem:[%s15106_s7] ss:$0 sm:$0xff] }
 0x195   :  { %v1515_v61 = vpop.f32.mrf.mxu1 }
 0x196   :  { %v1516_v2 = vadd.f32 %v1515_v61, %v1378_v36  ;;  %1724 = vmatmul.bf16.gmra.mxu2 %v1583_v33  ;;  %v1246_v36 = vpack.c.bf16 %v1038_v39, %v1039_v49  ;;  %v1777_v39 = vadd.f32 %v10753_v27, %v10572_v1  ;;  %v1776_v49 = vadd.f32 %v10753_v27, %v10556_v41 }
 0x198   :  { %1554 = vmatmul.bf16.gmra.mxu1 %v1244_v31  ;;  %v10670_v40 = vpop.f32.mrf.mxu0  ;;  %v10774_v1 = vmax.f32 %v1776_v49, 0.0  ;;  %v1783_v49 = vadd.f32 %v10753_v27, %v10638_v52 }
 0x199   :  { %v1685_v50 = vpop.f32.mrf.mxu2 }
 0x19a   :  { %v10672_v59 = vadd.f32 %v1685_v50, %v1516_v2 }
 0x19d   :  { %v10674_v32 = vpop.f32.mrf.mxu1 }
 0x19e   :  { %v1518_v52 = vadd.f32 %v10674_v32, %v10670_v40  ;;  %v1786_v32 = vadd.f32 %v10753_v27, %v10672_v59 }
 0x1a0   :  { %v1383_v13 = vpop.f32.mrf.mxu0 }
 0x1a1   :  { %v10680_v30 = vpop.f32.mrf.mxu2 }
 0x1a3   :  { %1422 = vmatmul.bf16.gmra.mxu0 %v1277_v15 }
 0x1a5   :  { %v1520_v56 = vpop.f32.mrf.mxu1 }
 0x1a6   :  { %v1521_v6 = vadd.f32 %v1520_v56, %v1383_v13  ;;  %1729 = vmatmul.bf16.gmra.mxu2 %v1584_v57 }
 0x1a8   :  { %1559 = vmatmul.bf16.gmra.mxu1 %v1245_v0  ;;  %v10687_v4 = vpop.f32.mrf.mxu0 }
 0x1a9   :  { %v1690_v48 = vpop.f32.mrf.mxu2 }
 0x1aa   :  { %v10690_v19 = vadd.f32 %v1690_v48, %v1521_v6 }
 0x1ad   :  { %v10696_v14 = vpop.f32.mrf.mxu1 }
 0x1b0   :  { %v1388_v3 = vpop.f32.mrf.mxu0 }
 0x1b1   :  { %v10702_v25 = vpop.f32.mrf.mxu2 }
 0x1b3   :  { %1427 = vmatmul.bf16.gmra.mxu0 %v1278_v47 }
 0x1b5   :  { %v1525_v45 = vpop.f32.mrf.mxu1 }
 0x1b6   :  { %v1526_v34 = vadd.f32 %v1525_v45, %v1388_v3  ;;  %1734 = vmatmul.bf16.gmra.mxu2 %v1585_v20 }
 0x1b8   :  { %1564 = vmatmul.bf16.gmra.mxu1 %v1246_v36  ;;  %v10710_v33 = vpop.f32.mrf.mxu0  ;;  %v1778_v36 = vadd.f32 %v10753_v27, %v10578_v53 }
 0x1b9   :  { %v1695_v24 = vpop.f32.mrf.mxu2 }
 0x1ba   :  { %v10712_v35 = vadd.f32 %v1695_v24, %v1526_v34  ;;  %v10767_v34 = vmax.f32 %v1777_v39, 0.0  ;;  %v9469_v24 = vld [vmem:[%s15107_s30 + $0xb8] sm:$0xff]  ;;  %v10776_v41 = vmax.f32 %v1778_v36, 0.0 }
 0x1bb   :  { %4622 = vmatpush.bf16.msrb.mxu0 %v9469_v24 }
 0x1bd   :  { %v10714_v31 = vpop.f32.mrf.mxu1 }
 0x1c0   :  { %v1393_v46 = vpop.f32.mrf.mxu0 }
 0x1c1   :  { %v10716_v61 = vpop.f32.mrf.mxu2 }
 0x1c5   :  { %v1530_v58 = vpop.f32.mrf.mxu1 }
 0x1c6   :  { %v1531_v2 = vadd.f32 %v1530_v58, %v1393_v46  ;;  %v1779_v46 = vadd.f32 %v10753_v27, %v10594_v43  ;;  %v1780_v58 = vadd.f32 %v10753_v27, %v10600_v62  ;;  %v1878_v43 = vmul.f32 %v10774_v1, %v10774_v1 }
 0x1c7   :  { %v1782_v62 = vadd.f32 %v10753_v27, %v10622_v7 }
 0x1c8   :  { %v10718_v10 = vpop.f32.mrf.mxu0 }
 0x1c9   :  { %v1700_v29 = vpop.f32.mrf.mxu2 }
 0x1ca   :  { %v10720_v50 = vadd.f32 %v1700_v29, %v1531_v2  ;;  %v1879_v2 = vmul.f32 %v10767_v34, %v10767_v34  ;;  %v10784_v29 = vmax.f32 %v1779_v46, 0.0  ;;  %v1784_v46 = vadd.f32 %v10753_v27, %v10646_v16 }
 0x1cd   :  { %v10722_v55 = vpop.f32.mrf.mxu1 }
 0x1d0   :  { %v1398_v54 = vpop.f32.mrf.mxu0 }
 0x1d1   :  { %v10724_v37 = vpop.f32.mrf.mxu2 }
 0x1d5   :  { %v1535_v9 = vpop.f32.mrf.mxu1 }
 0x1d6   :  { %v1536_v15 = vadd.f32 %v1535_v9, %v1398_v54  ;;  %v1781_v54 = vadd.f32 %v10753_v27, %v10616_v42  ;;  %v1840_v42 = vadd.f32 %v10767_v34, %v10774_v1 }
 0x1d8   :  { %v10726_v51 = vpop.f32.mrf.mxu0  ;;  %v10806_v39 = vmax.f32 %v1781_v54, 0.0  ;;  %v1841_v7 = vadd.f32 %v1840_v42, %v10776_v41 }
 0x1d9   :  { %v1705_v23 = vpop.f32.mrf.mxu2 }
 0x1da   :  { %v10728_v13 = vadd.f32 %v1705_v23, %v1536_v15  ;;  %v1880_v15 = vmul.f32 %v10776_v41, %v10776_v41  ;;  %v10794_v23 = vmax.f32 %v1780_v58, 0.0 }
 0x1dd   :  { %v10730_v60 = vpop.f32.mrf.mxu1 }
 0x1e0   :  { %v1403_v11 = vpop.f32.mrf.mxu0 }
 0x1e1   :  { %v10732_v57 = vpop.f32.mrf.mxu2 }
 0x1e5   :  { %v1540_v0 = vpop.f32.mrf.mxu1 }
 0x1e6   :  { %v1541_v63 = vadd.f32 %v1540_v0, %v1403_v11  ;;  %v1513_v11 = vadd.f32 %v10652_v22, %v10644_v18  ;;  %v1882_v18 = vmul.f32 %v10794_v23, %v10794_v23  ;;  %v10814_v22 = vmax.f32 %v1782_v62, 0.0 }
 0x1e7   :  { %v1751_v62 = vadd.f32 %v10680_v30, %v1518_v52 }
 0x1e8   :  { %v10734_v56 = vpop.f32.mrf.mxu0  ;;  %v1749_v36 = vadd.f32 %v10660_v38, %v1513_v11  ;;  %v1883_v38 = vmul.f32 %v10806_v39, %v10806_v39 }
 0x1e9   :  { %v1710_v6 = vpop.f32.mrf.mxu2 }
 0x1ea   :  { %v10736_v17 = vadd.f32 %v1710_v6, %v1541_v63  ;;  %v1910_v63 = vadd.f32 %v1879_v2, %v1878_v43  ;;  %v1881_v6 = vmul.f32 %v10784_v29, %v10784_v29  ;;  %v1842_v2 = vadd.f32 %v1841_v7, %v10784_v29 }
 0x1eb   :  { %v10825_v43 = vmax.f32 %v1783_v49, 0.0  ;;  %v10834_v7 = vmax.f32 %v1784_v46, 0.0 }
 0x1ec   :  { %v1911_v24 = vadd.f32 %v1910_v63, %v1880_v15  ;;  %v1785_v15 = vadd.f32 %v10753_v27, %v1749_v36  ;;  %v1843_v16 = vadd.f32 %v1842_v2, %v10794_v23  ;;  %v1884_v63 = vmul.f32 %v10814_v22, %v10814_v22 }
 0x1ed   :  { %v10738_v5 = vpop.f32.mrf.mxu1  ;;  %v1885_v36 = vmul.f32 %v10825_v43, %v10825_v43  ;;  %v1886_v59 = vmul.f32 %v10834_v7, %v10834_v7 }
 0x1ee   :  { %v1912_v54 = vadd.f32 %v1911_v24, %v1881_v6  ;;  %v1523_v6 = vadd.f32 %v10696_v14, %v10687_v4  ;;  %v1844_v30 = vadd.f32 %v1843_v16, %v10806_v39  ;;  %v10845_v24 = vmax.f32 %v1785_v15, 0.0 }
 0x1ef   :  { %v10854_v4 = vmax.f32 %v1786_v32, 0.0  ;;  %v1788_v14 = vadd.f32 %v10753_v27, %v10690_v19 }
 0x1f0   :  { %v10740_v48 = vpop.f32.mrf.mxu0  ;;  %v1913_v42 = vadd.f32 %v1912_v54, %v1882_v18  ;;  %v1787_v18 = vadd.f32 %v10753_v27, %v1751_v62  ;;  %v1753_v46 = vadd.f32 %v10702_v25, %v1523_v6  ;;  %v1845_v2 = vadd.f32 %v1844_v30, %v10814_v22 }
 0x1f1   :  { %v10742_v8 = vpop.f32.mrf.mxu2  ;;  %v1887_v25 = vmul.f32 %v10845_v24, %v10845_v24 }
 0x1f2   :  { %v1914_v49 = vadd.f32 %v1913_v42, %v1883_v38  ;;  %v1528_v38 = vadd.f32 %v10714_v31, %v10710_v33  ;;  %v1846_v15 = vadd.f32 %v1845_v2, %v10825_v43  ;;  %v10863_v16 = vmax.f32 %v1787_v18, 0.0 }
 0x1f3   :  { %v1789_v42 = vadd.f32 %v10753_v27, %v1753_v46  ;;  %v1888_v33 = vmul.f32 %v10854_v4, %v10854_v4  ;;  %v10874_v31 = vmax.f32 %v1788_v14, 0.0 }
 0x1f4   :  { %v1915_v52 = vadd.f32 %v1914_v49, %v1884_v63  ;;  %v1755_v63 = vadd.f32 %v10716_v61, %v1528_v38  ;;  %v1847_v6 = vadd.f32 %v1846_v15, %v10834_v7  ;;  %v1790_v49 = vadd.f32 %v10753_v27, %v10712_v35 }
 0x1f5   :  { %v10744_v44 = vpop.f32.mrf.mxu1  ;;  %v1889_v46 = vmul.f32 %v10863_v16, %v10863_v16  ;;  %v10883_v2 = vmax.f32 %v1789_v42, 0.0  ;;  %v1792_v15 = vadd.f32 %v10753_v27, %v10720_v50 }
 0x1f6   :  { %v1916_v62 = vadd.f32 %v1915_v52, %v1885_v36  ;;  %v1533_v36 = vadd.f32 %v10722_v55, %v10718_v10  ;;  %v1848_v61 = vadd.f32 %v1847_v6, %v10845_v24  ;;  %v1791_v52 = vadd.f32 %v10753_v27, %v1755_v63 }
 0x1f7   :  { %v1890_v10 = vmul.f32 %v10874_v31, %v10874_v31  ;;  %v10892_v55 = vmax.f32 %v1790_v49, 0.0 }
 0x1f8   :  { %v10746_v47 = vpop.f32.mrf.mxu0  ;;  %v1917_v19 = vadd.f32 %v1916_v62, %v1886_v59  ;;  %v1757_v59 = vadd.f32 %v10724_v37, %v1533_v36  ;;  %v1849_v14 = vadd.f32 %v1848_v61, %v10854_v4  ;;  %v1891_v37 = vmul.f32 %v10883_v2, %v10883_v2 }
 0x1f9   :  { %v10748_v21 = vpop.f32.mrf.mxu2  ;;  %v10901_v63 = vmax.f32 %v1791_v52, 0.0  ;;  %v1892_v61 = vmul.f32 %v10892_v55, %v10892_v55  ;;  %v1546_v52 = vadd.f32 %v10744_v44, %v10740_v48  ;;  %v1796_v48 = vadd.f32 %v10753_v27, %v10736_v17 }
 0x1fa   :  { %v1918_v18 = vadd.f32 %v1917_v19, %v1887_v25  ;;  %v1850_v62 = vadd.f32 %v1849_v14, %v10863_v16  ;;  %v1538_v25 = vadd.f32 %v10730_v60, %v10726_v51  ;;  %v1793_v6 = vadd.f32 %v10753_v27, %v1757_v59  ;;  %v9468_v60 = vld [vmem:[%s15107_s30 + $0xb0] sm:$0xff] }
 0x1fb   :  { %v1794_v51 = vadd.f32 %v10753_v27, %v10728_v13  ;;  %v1893_v14 = vmul.f32 %v10901_v63, %v10901_v63  ;;  %4623 = vmatpush.bf16.msrb.mxu0 %v9468_v60  ;;  %v1762_v44 = vadd.f32 %v10748_v21, %v1546_v52 }
 0x1fc   :  { %v1919_v35 = vadd.f32 %v1918_v18, %v1888_v33  ;;  %v1851_v19 = vadd.f32 %v1850_v62, %v10874_v31  ;;  %v1759_v33 = vadd.f32 %v10732_v57, %v1538_v25  ;;  %v10908_v18 = vmax.f32 %v1792_v15, 0.0 }
 0x1fd   :  { %v10755_v3 = vpop.f32.mrf.mxu1  ;;  %v1543_v57 = vadd.f32 %v10738_v5, %v10734_v56  ;;  %v10929_v5 = vmax.f32 %v1794_v51, 0.0 }
 0x1fe   :  { %v1920_v42 = vadd.f32 %v1919_v35, %v1889_v46  ;;  %v1852_v46 = vadd.f32 %v1851_v19, %v10883_v2  ;;  %v10922_v35 = vmax.f32 %v1793_v6, 0.0  ;;  %v1894_v56 = vmul.f32 %v10908_v18, %v10908_v18 }
 0x1ff   :  { %v1761_v15 = vadd.f32 %v10742_v8, %v1543_v57 }
 0x200   :  { %v10761_v20 = vpop.f32.mrf.mxu0  ;;  %v1921_v50 = vadd.f32 %v1920_v42, %v1890_v10  ;;  %v1853_v13 = vadd.f32 %v1852_v46, %v10892_v55  ;;  %v1795_v10 = vadd.f32 %v10753_v27, %v1759_v33  ;;  %v1548_v42 = vadd.f32 %v10755_v3, %v10746_v47 }
 0x201   :  { %v10765_v45 = vpop.f32.mrf.mxu2  ;;  %v1895_v19 = vmul.f32 %v10922_v35, %v10922_v35  ;;  %v1896_v47 = vmul.f32 %v10929_v5, %v10929_v5  ;;  %v10948_v3 = vmax.f32 %v1796_v48, 0.0 }
 0x202   :  { %v1922_v59 = vadd.f32 %v1921_v50, %v1891_v37  ;;  %v1854_v8 = vadd.f32 %v1853_v13, %v10901_v63  ;;  %v10941_v33 = vmax.f32 %v1795_v10, 0.0  ;;  %v1797_v50 = vadd.f32 %v10753_v27, %v1761_v15 }
 0x203   :  { %v1763_v17 = vadd.f32 %v10765_v45, %v1548_v42 }
 0x204   :  { %v1923_v25 = vadd.f32 %v1922_v59, %v1892_v61  ;;  %v1855_v21 = vadd.f32 %v1854_v8, %v10908_v18  ;;  %v1897_v59 = vmul.f32 %v10941_v33, %v10941_v33 }
 0x205   :  { %v10780_v53 = vpop.f32.mrf.mxu1  ;;  %v1799_v13 = vadd.f32 %v10753_v27, %v1763_v17 }
 0x206   :  { %v1551_v37 = vadd.f32 %v10780_v53, %v10761_v20  ;;  %v1924_v6 = vadd.f32 %v1923_v25, %v1893_v14  ;;  %v1798_v20 = vadd.f32 %v10753_v27, %v1762_v44  ;;  %v1856_v57 = vadd.f32 %v1855_v21, %v10922_v35 }
 0x207   :  { %v10959_v14 = vmax.f32 %v1797_v50, 0.0 }
 0x208   :  { %v10790_v9 = vpop.f32.mrf.mxu0  ;;  %v1925_v51 = vadd.f32 %v1924_v6, %v1894_v56  ;;  %v1857_v15 = vadd.f32 %v1856_v57, %v10929_v5 }
 0x209   :  { %v10800_v0 = vpop.f32.mrf.mxu2  ;;  %v1899_v42 = vmul.f32 %v10959_v14, %v10959_v14 }
 0x20a   :  { %v1764_v53 = vadd.f32 %v10800_v0, %v1551_v37  ;;  %v1926_v52 = vadd.f32 %v1925_v51, %v1895_v19  ;;  %v1858_v56 = vadd.f32 %v1857_v15, %v10941_v33  ;;  %v10975_v37 = vmax.f32 %v1799_v13, 0.0 }
 0x20c   :  { %v1859_v19 = vadd.f32 %v1858_v56, %v10948_v3 }
 0x20d   :  { %v10818_v58 = vpop.f32.mrf.mxu1 }
 0x20e   :  { %v1553_v60 = vadd.f32 %v10818_v58, %v10790_v9  ;;  %v1927_v9 = vadd.f32 %v1926_v52, %v1896_v47  ;;  %v1898_v58 = vmul.f32 %v10948_v3, %v10948_v3  ;;  %v1901_v47 = vmul.f32 %v10975_v37, %v10975_v37 }
 0x210   :  { %v10829_v11 = vpop.f32.mrf.mxu0 }
 0x211   :  { %v10836_v40 = vpop.f32.mrf.mxu2 }
 0x212   :  { %v1765_v10 = vadd.f32 %v10836_v40, %v1553_v60  ;;  %v1928_v40 = vadd.f32 %v1927_v9, %v1897_v59 }
 0x214   :  { %v1801_v8 = vadd.f32 %v10753_v27, %v1765_v10  ;;  %v1929_v17 = vadd.f32 %v1928_v40, %v1898_v58 }
 0x215   :  { %v10852_v54 = vpop.f32.mrf.mxu1 }
 0x216   :  { %v1556_v46 = vadd.f32 %v10852_v54, %v10829_v11  ;;  %v10966_v11 = vmax.f32 %v1798_v20, 0.0  ;;  %v1800_v54 = vadd.f32 %v10753_v27, %v1764_v53  ;;  %v1930_v51 = vadd.f32 %v1929_v17, %v1899_v42 }
 0x217   :  { %v10987_v20 = vmax.f32 %v1801_v8, 0.0 }
 0x218   :  { %v10867_v32 = vpop.f32.mrf.mxu0  ;;  %v10981_v21 = vmax.f32 %v1800_v54, 0.0 }
 0x219   :  { %v10870_v30 = vpop.f32.mrf.mxu2  ;;  %v1903_v15 = vmul.f32 %v10987_v20, %v10987_v20 }
 0x21a   :  { %v1766_v25 = vadd.f32 %v10870_v30, %v1556_v46  ;;  %v1900_v30 = vmul.f32 %v10966_v11, %v10966_v11  ;;  %v1902_v13 = vmul.f32 %v10981_v21, %v10981_v21 }
 0x21c   :  { %v1931_v59 = vadd.f32 %v1930_v51, %v1900_v30 }
 0x21d   :  { %v10888_v38 = vpop.f32.mrf.mxu1 }
 0x21e   :  { %v1558_v48 = vadd.f32 %v10888_v38, %v10867_v32  ;;  %v1802_v32 = vadd.f32 %v10753_v27, %v1766_v25  ;;  %v1860_v38 = vadd.f32 %v1859_v19, %v10959_v14 }
 0x220   :  { %v1423_v49 = vpop.f32.mrf.mxu0  ;;  %v1861_v60 = vadd.f32 %v1860_v38, %v10966_v11 }
 0x221   :  { %v1727_v36 = vpop.f32.mrf.mxu2 }
 0x222   :  { %v1767_v50 = vadd.f32 %v1727_v36, %v1558_v48 }
 0x224   :  { %v1803_v46 = vadd.f32 %v10753_v27, %v1767_v50 }
 0x225   :  { %v1560_v62 = vpop.f32.mrf.mxu1 }
 0x226   :  { %v1561_v44 = vadd.f32 %v1560_v62, %v1423_v49  ;;  %v11000_v54 = vmax.f32 %v1803_v46, 0.0 }
 0x228   :  { %v1425_v45 = vpop.f32.mrf.mxu0  ;;  %v1905_v17 = vmul.f32 %v11000_v54, %v11000_v54 }
 0x229   :  { %v1730_v61 = vpop.f32.mrf.mxu2 }
 0x22a   :  { %v1768_v49 = vadd.f32 %v1730_v61, %v1561_v44  ;;  %v10993_v61 = vmax.f32 %v1802_v32, 0.0 }
 0x22c   :  { %v1804_v10 = vadd.f32 %v10753_v27, %v1768_v49  ;;  %v1904_v44 = vmul.f32 %v10993_v61, %v10993_v61 }
 0x22d   :  { %v1562_v0 = vpop.f32.mrf.mxu1 }
 0x22e   :  { %v1563_v62 = vadd.f32 %v1562_v0, %v1425_v45  ;;  %v1862_v45 = vadd.f32 %v1861_v60, %v10975_v37  ;;  %v1932_v0 = vadd.f32 %v1931_v59, %v1901_v47  ;;  %v11006_v42 = vmax.f32 %v1804_v10, 0.0 }
 0x230   :  { %v1428_v53 = vpop.f32.mrf.mxu0  ;;  %v1863_v58 = vadd.f32 %v1862_v45, %v10981_v21  ;;  %v1933_v48 = vadd.f32 %v1932_v0, %v1902_v13 }
 0x231   :  { %v1732_v6 = vpop.f32.mrf.mxu2 }
 0x232   :  { %v1769_v57 = vadd.f32 %v1732_v6, %v1563_v62  ;;  %v1864_v40 = vadd.f32 %v1863_v58, %v10987_v20  ;;  %v1934_v6 = vadd.f32 %v1933_v48, %v1903_v15  ;;  %v1906_v62 = vmul.f32 %v11006_v42, %v11006_v42 }
 0x234   :  { %v1805_v25 = vadd.f32 %v10753_v27, %v1769_v57  ;;  %v1865_v50 = vadd.f32 %v1864_v40, %v10993_v61  ;;  %v1935_v32 = vadd.f32 %v1934_v6, %v1904_v44 }
 0x235   :  { %v1565_v36 = vpop.f32.mrf.mxu1 }
 0x236   :  { %v1566_v52 = vadd.f32 %v1565_v36, %v1428_v53  ;;  %v11012_v30 = vmax.f32 %v1805_v25, 0.0  ;;  %v1866_v49 = vadd.f32 %v1865_v50, %v11000_v54  ;;  %v1936_v36 = vadd.f32 %v1935_v32, %v1905_v17 }
 0x238   :  { %v1430_v38 = vpop.f32.mrf.mxu0  ;;  %v1867_v60 = vadd.f32 %v1866_v49, %v11006_v42  ;;  %v1907_v46 = vmul.f32 %v11012_v30, %v11012_v30 }
 0x239   :  { %v1735_v9 = vpop.f32.mrf.mxu2 }
 0x23a   :  { %v1770_v56 = vadd.f32 %v1735_v9, %v1566_v52  ;;  %v1937_v52 = vadd.f32 %v1936_v36, %v1906_v62  ;;  %v1868_v59 = vadd.f32 %v1867_v60, %v11012_v30  ;;  %v9467_v60 = vld [vmem:[%s15107_s30 + $0xa8] sm:$0xff] }
 0x23b   :  { %4624 = vmatpush.bf16.msrb.mxu0 %v9467_v60 }
 0x23c   :  { %v1806_v8 = vadd.f32 %v10753_v27, %v1770_v56  ;;  %v1938_v10 = vadd.f32 %v1937_v52, %v1907_v46 }
 0x23d   :  { %v1567_v19 = vpop.f32.mrf.mxu1 }
 0x23e   :  { %v11017_v51 = vmax.f32 %v1806_v8, 0.0  ;;  %v1568_v47 = vadd.f32 %v1567_v19, %v1430_v38 }
 0x240   :  { %v1908_v13 = vmul.f32 %v11017_v51, %v11017_v51  ;;  %v1869_v0 = vadd.f32 %v1868_v59, %v11017_v51 }
 0x241   :  { %v1737_v53 = vpop.f32.mrf.mxu2 }
 0x242   :  { %v1771_v57 = vadd.f32 %v1737_v53, %v1568_v47  ;;  %v1939_v9 = vadd.f32 %v1938_v10, %v1908_v13 }
 0x244   :  { %v1807_v45 = vadd.f32 %v10753_v27, %v1771_v57 }
 0x246   :  { %v11027_v15 = vmax.f32 %v1807_v45, 0.0 }
 0x248   :  { %v1870_v58 = vadd.f32 %v1869_v0, %v11027_v15  ;;  %v1909_v25 = vmul.f32 %v11027_v15, %v11027_v15 }
 0x24a   :  { %v1871_v56 = vrot.slane %v1870_v58, 4  ;;  %v1940_v48 = vadd.f32 %v1939_v9, %v1909_v25 }
 0x24c   :  { %v1872_v44 = vadd.f32 %v1871_v56, %v1870_v58  ;;  %v1941_v40 = vrot.slane %v1940_v48, 4 }
 0x24e   :  { %v1873_v8 = vrot.slane %v1872_v44, 2  ;;  %v1942_v6 = vadd.f32 %v1941_v40, %v1940_v48 }
 0x250   :  { %v1874_v19 = vadd.f32 %v1873_v8, %v1872_v44  ;;  %v1943_v50 = vrot.slane %v1942_v6, 2 }
 0x252   :  { %v1875_v27 = vrot.slane %v1874_v19, 1  ;;  %v1944_v17 = vadd.f32 %v1943_v50, %v1942_v6 }
 0x254   :  { %v1876_v32 = vadd.f32 %v1875_v27, %v1874_v19  ;;  %v1945_v38 = vrot.slane %v1944_v17, 1 }
 0x256   :  { %v11033_v49 = vmul.f32 %v1876_v32, %v10326_v26  ;;  %v1946_v62 = vadd.f32 %v1945_v38, %v1944_v17 }
 0x258   :  { %v1947_v47 = vmul.f32 %v1946_v62, %v10326_v26  ;;  %v1948_v53 = vmul.f32 %v11033_v49, %v11033_v49  ;;  %v1982_v36 = vsub.f32 %v11027_v15, %v11033_v49  ;;  %v1977_v59 = vsub.f32 %v10993_v61, %v11033_v49 }
 0x259   :  { %v1978_v26 = vsub.f32 %v11000_v54, %v11033_v49  ;;  %v1979_v13 = vsub.f32 %v11006_v42, %v11033_v49  ;;  %v1980_v45 = vsub.f32 %v11012_v30, %v11033_v49  ;;  %v1981_v10 = vsub.f32 %v11017_v51, %v11033_v49 }
 0x25a   :  { %v1949_v46 = vsub.f32 %v1947_v47, %v1948_v53  ;;  %v1951_v58 = vsub.f32 %v10774_v1, %v11033_v49  ;;  %v1952_v25 = vsub.f32 %v10767_v34, %v11033_v49  ;;  %v1953_v56 = vsub.f32 %v10776_v41, %v11033_v49 }
 0x25b   :  { %v1954_v48 = vsub.f32 %v10784_v29, %v11033_v49  ;;  %v1955_v40 = vsub.f32 %v10794_v23, %v11033_v49  ;;  %v1956_v8 = vsub.f32 %v10806_v39, %v11033_v49  ;;  %v1957_v6 = vsub.f32 %v10814_v22, %v11033_v49 }
 0x25c   :  { %v1950_v57 = vmax.f32 %v1949_v46, 0.0  ;;  %v1958_v1 = vsub.f32 %v10825_v43, %v11033_v49  ;;  %v1959_v34 = vsub.f32 %v10834_v7, %v11033_v49  ;;  %v1960_v41 = vsub.f32 %v10845_v24, %v11033_v49 }
 0x25d   :  { %v1961_v29 = vsub.f32 %v10854_v4, %v11033_v49  ;;  %v1962_v39 = vsub.f32 %v10863_v16, %v11033_v49  ;;  %v1963_v22 = vsub.f32 %v10874_v31, %v11033_v49  ;;  %v1964_v43 = vsub.f32 %v10883_v2, %v11033_v49  ;;  %v11094_v2 = vld [vmem:[%s15108_s1] ss:$0 sm:$0xff] }
 0x25e   :  { %v1983_v52 = vadd.f32 1e-05, %v1950_v57  ;;  %v1965_v7 = vsub.f32 %v10892_v55, %v11033_v49  ;;  %v1966_v24 = vsub.f32 %v10901_v63, %v11033_v49  ;;  %v1967_v4 = vsub.f32 %v10908_v18, %v11033_v49 }
 0x25f   :  { %v1968_v16 = vsub.f32 %v10922_v35, %v11033_v49  ;;  %v1969_v31 = vsub.f32 %v10929_v5, %v11033_v49  ;;  %v1970_v55 = vsub.f32 %v10941_v33, %v11033_v49  ;;  %v1971_v63 = vsub.f32 %v10948_v3, %v11033_v49  ;;  %v11113_v33 = vld [vmem:[%s15109_s6] ss:$0 sm:$0xff] }
 0x260   :  { %9614 = vrsqrt.f32 %v1983_v52  ;;  %vm1990_vm12 = vweird.f32 %v1983_v52  ;;  %v1972_v18 = vsub.f32 %v10959_v14, %v11033_v49  ;;  %v1973_v35 = vsub.f32 %v10966_v11, %v11033_v49 }
 0x261   :  { %v1974_v5 = vsub.f32 %v10975_v37, %v11033_v49  ;;  %v1975_v27 = vsub.f32 %v10981_v21, %v11033_v49  ;;  %v1976_v17 = vsub.f32 %v10987_v20, %v11033_v49 }
 0x266   :  { %v9615_v0 = vpop.eup %9614 }
 0x267   :  { %v1985_v15 = vmul.f32 %v9615_v0, %v1983_v52  ;;  %vm1991_vm11 = vweird.f32 %v9615_v0 }
 0x268   :  { %vm1992_vm13 = vmor %vm1990_vm12, %vm1991_vm11 }
 0x269   :  { %v1986_v9 = vmul.f32 %v9615_v0, %v1985_v15 }
 0x26b   :  { %v1987_v44 = vmul.f32 0.5, %v1986_v9 }
 0x26d   :  { %v1988_v23 = vsub.f32 1.5, %v1987_v44 }
 0x26f   :  { %v1989_v19 = vmul.f32 %v9615_v0, %v1988_v23 }
 0x271   :  { %v1993_v50 = vsel %vm1992_vm13, %v9615_v0, %v1989_v19 }
 0x272   :  { %v2025_v3 = vmul.f32 %v1993_v50, %v1982_v36  ;;  %v1994_v14 = vmul.f32 %v1993_v50, %v1951_v58  ;;  %v1995_v32 = vmul.f32 %v1993_v50, %v1952_v25  ;;  %v1996_v38 = vmul.f32 %v1993_v50, %v1953_v56 }
 0x273   :  { %v1997_v11 = vmul.f32 %v1993_v50, %v1954_v48  ;;  %v1998_v62 = vmul.f32 %v1993_v50, %v1955_v40  ;;  %v1999_v47 = vmul.f32 %v1993_v50, %v1956_v8  ;;  %v2000_v53 = vmul.f32 %v1993_v50, %v1957_v6 }
 0x274   :  { %v2061_v37 = vmul.f32 %v11094_v2, %v2025_v3  ;;  %v2001_v60 = vmul.f32 %v1993_v50, %v1958_v1  ;;  %v2002_v21 = vmul.f32 %v1993_v50, %v1959_v34  ;;  %v2003_v46 = vmul.f32 %v1993_v50, %v1960_v41 }
 0x275   :  { %v2004_v57 = vmul.f32 %v1993_v50, %v1961_v29  ;;  %v2005_v20 = vmul.f32 %v1993_v50, %v1962_v39  ;;  %v2006_v52 = vmul.f32 %v1993_v50, %v1963_v22  ;;  %v2007_v0 = vmul.f32 %v1993_v50, %v1964_v43 }
 0x276   :  { %v11117_v15 = vadd.f32 %v11113_v33, %v2061_v37  ;;  %v2008_v36 = vmul.f32 %v1993_v50, %v1965_v7  ;;  %v2009_v9 = vmul.f32 %v1993_v50, %v1966_v24  ;;  %v2010_v58 = vmul.f32 %v1993_v50, %v1967_v4 }
 0x277   :  { %v2011_v25 = vmul.f32 %v1993_v50, %v1968_v16  ;;  %v2012_v56 = vmul.f32 %v1993_v50, %v1969_v31  ;;  %v2013_v48 = vmul.f32 %v1993_v50, %v1970_v55  ;;  %v2014_v44 = vmul.f32 %v1993_v50, %v1971_v63 }
 0x278   :  { %15110 = vst [vmem:[#allocation11_spill] sm:$0xff] %v11117_v15  ;;  %v11122_v8 = vsel %vm2322_vm10, %v11117_v15, -inf  ;;  %v2015_v6 = vmul.f32 %v1993_v50, %v1972_v18  ;;  %v2016_v1 = vmul.f32 %v1993_v50, %v1973_v35  ;;  %v2017_v41 = vmul.f32 %v1993_v50, %v1974_v5 }
 0x279   :  { %15111 = vst [vmem:[#allocation12_spill] sm:$0xff] %v11122_v8  ;;  %v2018_v29 = vmul.f32 %v1993_v50, %v1975_v27  ;;  %v2019_v23 = vmul.f32 %v1993_v50, %v1976_v17  ;;  %v2020_v39 = vmul.f32 %v1993_v50, %v1977_v59  ;;  %v2021_v22 = vmul.f32 %v1993_v50, %v1978_v26 }
 0x27a   :  { %v2022_v43 = vmul.f32 %v1993_v50, %v1979_v13  ;;  %v2023_v7 = vmul.f32 %v1993_v50, %v1980_v45  ;;  %v2024_v24 = vmul.f32 %v1993_v50, %v1981_v10  ;;  %v2030_v4 = vmul.f32 %v11094_v2, %v1994_v14 }
 0x27b   :  { %v2031_v61 = vmul.f32 %v11094_v2, %v1995_v32  ;;  %v2032_v59 = vmul.f32 %v11094_v2, %v1996_v38  ;;  %v2033_v54 = vmul.f32 %v11094_v2, %v1997_v11  ;;  %v2034_v26 = vmul.f32 %v11094_v2, %v1998_v62 }
 0x27c   :  { %v2035_v42 = vmul.f32 %v11094_v2, %v1999_v47  ;;  %v2036_v13 = vmul.f32 %v11094_v2, %v2000_v53  ;;  %v2037_v30 = vmul.f32 %v11094_v2, %v2001_v60  ;;  %v2038_v45 = vmul.f32 %v11094_v2, %v2002_v21 }
 0x27d   :  { %v2039_v51 = vmul.f32 %v11094_v2, %v2003_v46  ;;  %v2040_v49 = vmul.f32 %v11094_v2, %v2004_v57  ;;  %v2041_v10 = vmul.f32 %v11094_v2, %v2005_v20  ;;  %v2042_v19 = vmul.f32 %v11094_v2, %v2006_v52 }
 0x27e   :  { %v2043_v16 = vmul.f32 %v11094_v2, %v2007_v0  ;;  %v2044_v31 = vmul.f32 %v11094_v2, %v2008_v36  ;;  %v2045_v55 = vmul.f32 %v11094_v2, %v2009_v9  ;;  %v2046_v63 = vmul.f32 %v11094_v2, %v2010_v58 }
 0x27f   :  { %v2047_v18 = vmul.f32 %v11094_v2, %v2011_v25  ;;  %v2048_v35 = vmul.f32 %v11094_v2, %v2012_v56  ;;  %v2049_v50 = vmul.f32 %v11094_v2, %v2013_v48  ;;  %v2050_v5 = vmul.f32 %v11094_v2, %v2014_v44 }
 0x280   :  { %v2051_v27 = vmul.f32 %v11094_v2, %v2015_v6  ;;  %v2052_v17 = vmul.f32 %v11094_v2, %v2016_v1  ;;  %v2053_v3 = vmul.f32 %v11094_v2, %v2017_v41  ;;  %v2054_v14 = vmul.f32 %v11094_v2, %v2018_v29 }
 0x281   :  { %v2055_v32 = vmul.f32 %v11094_v2, %v2019_v23  ;;  %v2056_v38 = vmul.f32 %v11094_v2, %v2020_v39  ;;  %v2057_v11 = vmul.f32 %v11094_v2, %v2021_v22  ;;  %v2058_v62 = vmul.f32 %v11094_v2, %v2022_v43 }
 0x282   :  { %v2059_v47 = vmul.f32 %v11094_v2, %v2023_v7  ;;  %v2060_v53 = vmul.f32 %v11094_v2, %v2024_v24  ;;  %v11172_v37 = vadd.f32 %v11113_v33, %v2030_v4  ;;  %v11175_v60 = vadd.f32 %v11113_v33, %v2031_v61 }
 0x283   :  { %v11178_v21 = vadd.f32 %v11113_v33, %v2032_v59  ;;  %v11181_v46 = vadd.f32 %v11113_v33, %v2033_v54  ;;  %v11184_v57 = vadd.f32 %v11113_v33, %v2034_v26  ;;  %v11187_v20 = vadd.f32 %v11113_v33, %v2035_v42 }
 0x284   :  { %v11190_v2 = vadd.f32 %v11113_v33, %v2036_v13  ;;  %v11193_v52 = vadd.f32 %v11113_v33, %v2037_v30  ;;  %v11196_v0 = vadd.f32 %v11113_v33, %v2038_v45  ;;  %v11199_v36 = vadd.f32 %v11113_v33, %v2039_v51 }
 0x285   :  { %v11202_v9 = vadd.f32 %v11113_v33, %v2040_v49  ;;  %v11205_v58 = vadd.f32 %v11113_v33, %v2041_v10  ;;  %v11208_v25 = vadd.f32 %v11113_v33, %v2042_v19  ;;  %v11211_v56 = vadd.f32 %v11113_v33, %v2043_v16 }
 0x286   :  { %15112 = vst [vmem:[#allocation13_spill] sm:$0xff] %v11193_v52  ;;  %v11214_v48 = vadd.f32 %v11113_v33, %v2044_v31  ;;  %v11217_v44 = vadd.f32 %v11113_v33, %v2045_v55  ;;  %v11220_v6 = vadd.f32 %v11113_v33, %v2046_v63  ;;  %v11223_v1 = vadd.f32 %v11113_v33, %v2047_v18 }
 0x287   :  { %15113 = vst [vmem:[#allocation14_spill] sm:$0xff] %v11205_v58  ;;  %v11226_v41 = vadd.f32 %v11113_v33, %v2048_v35  ;;  %v11229_v29 = vadd.f32 %v11113_v33, %v2049_v50  ;;  %v11232_v23 = vadd.f32 %v11113_v33, %v2050_v5  ;;  %v11235_v39 = vadd.f32 %v11113_v33, %v2051_v27 }
 0x288   :  { %15114 = vst [vmem:[#allocation15_spill] sm:$0xff] %v11211_v56  ;;  %v11238_v22 = vadd.f32 %v11113_v33, %v2052_v17  ;;  %v11241_v43 = vadd.f32 %v11113_v33, %v2053_v3  ;;  %v11244_v7 = vadd.f32 %v11113_v33, %v2054_v14  ;;  %v11247_v24 = vadd.f32 %v11113_v33, %v2055_v32 }
 0x289   :  { %15115 = vst [vmem:[#allocation16_spill] sm:$0xff] %v11217_v44  ;;  %v11250_v4 = vadd.f32 %v11113_v33, %v2056_v38  ;;  %v11253_v61 = vadd.f32 %v11113_v33, %v2057_v11  ;;  %v11256_v59 = vadd.f32 %v11113_v33, %v2058_v62  ;;  %v11259_v54 = vadd.f32 %v11113_v33, %v2059_v47 }
 0x28a   :  { %15116 = vst [vmem:[#allocation17_spill] sm:$0xff] %v11223_v1  ;;  %v11262_v26 = vadd.f32 %v11113_v33, %v2060_v53  ;;  %v2130_v42 = vrot.slane %v11172_v37, 2  ;;  %v2131_v13 = vrot.slane %v11172_v37, 4  ;;  %v2132_v30 = vrot.slane %v11172_v37, 6 }
 0x28b   :  { %15117 = vst [vmem:[#allocation18_spill] sm:$0xff] %v11229_v29  ;;  %v2133_v45 = vrot.slane %v11175_v60, 2  ;;  %v2134_v51 = vrot.slane %v11175_v60, 4  ;;  %v2136_v10 = vrot.slane %v11178_v21, 2  ;;  %v2137_v19 = vrot.slane %v11178_v21, 4 }
 0x28c   :  { %15118 = vst [vmem:[#allocation19_spill] sm:$0xff] %v11235_v39  ;;  %v2323_v53 = vsel %vm2322_vm10, %v11172_v37, -inf  ;;  %v2330_v34 = vsel %vm2322_vm10, %v2130_v42, -inf  ;;  %v2337_v55 = vsel %vm2322_vm10, %v2131_v13, -inf  ;;  %v2344_v62 = vsel %vm2322_vm10, %v2132_v30, -inf }
 0x28d   :  { %15119 = vst [vmem:[#allocation20_spill] sm:$0xff] %v11241_v43  ;;  %v2324_v32 = vrot.slane %v2323_v53, 4  ;;  %v2331_v27 = vrot.slane %v2330_v34, 4  ;;  %v2338_v38 = vrot.slane %v2337_v55, 4  ;;  %v2345_v49 = vrot.slane %v2344_v62, 4 }
 0x28e   :  { %15120 = vst [vmem:[#allocation21_spill] sm:$0xff] %v11247_v24  ;;  %v2351_v47 = vsel %vm2322_vm10, %v11175_v60, -inf  ;;  %v2358_v40 = vsel %vm2322_vm10, %v2133_v45, -inf  ;;  %v2365_v42 = vsel %vm2322_vm10, %v2134_v51, -inf  ;;  %v2379_v30 = vsel %vm2322_vm10, %v11178_v21, -inf }
 0x28f   :  { %15121 = vst [vmem:[#allocation22_spill] sm:$0xff] %v11253_v61  ;;  %v2325_v13 = vmax.f32 %v2323_v53, %v2324_v32  ;;  %v2332_v11 = vmax.f32 %v2330_v34, %v2331_v27  ;;  %v2339_v14 = vmax.f32 %v2337_v55, %v2338_v38  ;;  %v2352_v3 = vrot.slane %v2351_v47, 4 }
 0x290   :  { %15122 = vst [vmem:[#allocation23_spill] sm:$0xff] %v11259_v54  ;;  %v2346_v17 = vmax.f32 %v2344_v62, %v2345_v49  ;;  %v2359_v37 = vrot.slane %v2358_v40, 4  ;;  %v2366_v5 = vrot.slane %v2365_v42, 4  ;;  %v2380_v51 = vrot.slane %v2379_v30, 4 }
 0x291   :  { %v2326_v50 = vrot.slane %v2325_v13, 2  ;;  %v2333_v35 = vrot.slane %v2332_v11, 2  ;;  %v2340_v18 = vrot.slane %v2339_v14, 2  ;;  %v2353_v63 = vmax.f32 %v2351_v47, %v2352_v3 }
 0x292   :  { %v2347_v31 = vrot.slane %v2346_v17, 2  ;;  %v11371_v45 = vmax.f32 %v2358_v40, %v2359_v37  ;;  %v11373_v33 = vmax.f32 %v2365_v42, %v2366_v5  ;;  %v2381_v62 = vmax.f32 %v2379_v30, %v2380_v51 }
 0x293   :  { %v2327_v32 = vmax.f32 %v2325_v13, %v2326_v50  ;;  %v2334_v34 = vmax.f32 %v2332_v11, %v2333_v35  ;;  %v2341_v55 = vmax.f32 %v2339_v14, %v2340_v18  ;;  %v2354_v27 = vrot.slane %v2353_v63, 2 }
 0x294   :  { %v2348_v49 = vmax.f32 %v2346_v17, %v2347_v31  ;;  %v2386_v53 = vsel %vm2322_vm10, %v2136_v10, -inf  ;;  %v2382_v42 = vrot.slane %v2381_v62, 2  ;;  %v2393_v18 = vsel %vm2322_vm10, %v2137_v19, -inf }
 0x295   :  { %v2328_v16 = vrot.slane %v2327_v32, 1  ;;  %v2335_v3 = vrot.slane %v2334_v34, 1  ;;  %v2342_v47 = vrot.slane %v2341_v55, 1  ;;  %v11379_v40 = vmax.f32 %v2353_v63, %v2354_v27 }
 0x296   :  { %v2349_v5 = vrot.slane %v2348_v49, 1  ;;  %v2387_v37 = vrot.slane %v2386_v53, 4  ;;  %v2383_v14 = vmax.f32 %v2381_v62, %v2382_v42  ;;  %v2394_v11 = vrot.slane %v2393_v18, 4 }
 0x297   :  { %v11384_v31 = vmax.f32 %v2327_v32, %v2328_v16  ;;  %v11386_v35 = vmax.f32 %v2334_v34, %v2335_v3  ;;  %v11388_v50 = vmax.f32 %v2341_v55, %v2342_v47  ;;  %v15124_v13 = vrot.slane %v11178_v21, 6 }
 0x298   :  { %v11391_v17 = vmax.f32 %v2348_v49, %v2349_v5  ;;  %v2388_v63 = vmax.f32 %v2386_v53, %v2387_v37  ;;  %v2407_v19 = vsel %vm2322_vm10, %v11181_v46, -inf  ;;  %v15125_v16 = vrot.slane %v11181_v46, 2 }
 0x299   :  { %v2400_v30 = vsel %vm2322_vm10, %v15124_v13, -inf  ;;  %v15126_v32 = vrot.slane %v11181_v46, 4  ;;  %v2384_v55 = vrot.slane %v2383_v14, 1  ;;  %v2395_v49 = vmax.f32 %v2393_v18, %v2394_v11 }
 0x29a   :  { %15123 = vst [vmem:[#allocation24_spill] sm:$0xff] %v11391_v17  ;;  %v2414_v51 = vsel %vm2322_vm10, %v15125_v16, -inf  ;;  %v2389_v27 = vrot.slane %v2388_v63, 2  ;;  %v2401_v62 = vrot.slane %v2400_v30, 4  ;;  %v2408_v53 = vrot.slane %v2407_v19, 4 }
 0x29b   :  { %v11404_v34 = vsel %vm2322_vm10, %v15126_v32, -inf  ;;  %v2415_v21 = vrot.slane %v2414_v51, 4  ;;  %v2435_v47 = vsel %vm2322_vm10, %v11184_v57, -inf  ;;  %v11409_v5 = vmax.f32 %v2383_v14, %v2384_v55 }
 0x29c   :  { %v2390_v42 = vmax.f32 %v2388_v63, %v2389_v27  ;;  %v2396_v37 = vrot.slane %v2395_v49, 2  ;;  %v2402_v13 = vmax.f32 %v2400_v30, %v2401_v62  ;;  %v2409_v16 = vmax.f32 %v2407_v19, %v2408_v53 }
 0x29d   :  { %15127 = vst [vmem:[#allocation25_spill] sm:$0xff] %v11409_v5  ;;  %v11411_v38 = vmax.f32 %v2414_v51, %v2415_v21  ;;  %v2436_v32 = vrot.slane %v2435_v47, 4  ;;  %v15128_v10 = vrot.slane %v11184_v57, 2  ;;  %v15129_v14 = vrot.slane %v11184_v57, 4 }
 0x29e   :  { %v2391_v11 = vrot.slane %v2390_v42, 1  ;;  %v2397_v28 = vmax.f32 %v2395_v49, %v2396_v37  ;;  %v2403_v8 = vrot.slane %v2402_v13, 2  ;;  %v2410_v15 = vrot.slane %v2409_v16, 2 }
 0x29f   :  { %v2442_v18 = vsel %vm2322_vm10, %v15128_v10, -inf  ;;  %v2437_v12 = vmax.f32 %v2435_v47, %v2436_v32  ;;  %v2449_v63 = vsel %vm2322_vm10, %v15129_v14, -inf  ;;  %v15130_v30 = vrot.slane %v11184_v57, 6 }
 0x2a0   :  { %v2443_v3 = vrot.slane %v2442_v18, 4  ;;  %v11422_v51 = vmax.f32 %v2390_v42, %v2391_v11  ;;  %v2398_v55 = vrot.slane %v2397_v28, 1  ;;  %v11424_v27 = vmax.f32 %v2402_v13, %v2403_v8 }
 0x2a1   :  { %v2456_v19 = vsel %vm2322_vm10, %v15130_v30, -inf  ;;  %v11426_v62 = vmax.f32 %v2409_v16, %v2410_v15  ;;  %v2438_v49 = vrot.slane %v2437_v12, 2  ;;  %v2450_v53 = vrot.slane %v2449_v63, 4 }
 0x2a2   :  { %15131 = vst [vmem:[#allocation26_spill] sm:$0xff] %v11422_v51  ;;  %v2444_v10 = vmax.f32 %v2442_v18, %v2443_v3  ;;  %v2457_v21 = vrot.slane %v2456_v19, 4  ;;  %v11428_v47 = vmax.f32 %v2397_v28, %v2398_v55  ;;  %v2463_v57 = vsel %vm2322_vm10, %v11187_v20, -inf }
 0x2a3   :  { %v2439_v14 = vmax.f32 %v2437_v12, %v2438_v49  ;;  %v2451_v42 = vmax.f32 %v2449_v63, %v2450_v53  ;;  %v2464_v30 = vrot.slane %v2463_v57, 4  ;;  %v15133_v3 = vrot.slane %v11187_v20, 2 }
 0x2a4   :  { %15132 = vst [vmem:[#allocation27_spill] sm:$0xff] %v11428_v47  ;;  %v2445_v32 = vrot.slane %v2444_v10, 2  ;;  %v2458_v11 = vmax.f32 %v2456_v19, %v2457_v21  ;;  %v15134_v13 = vrot.slane %v11187_v20, 4  ;;  %v2491_v16 = vsel %vm2322_vm10, %v11190_v2, -inf }
 0x2a5   :  { %v2470_v15 = vsel %vm2322_vm10, %v15133_v3, -inf  ;;  %v2440_v18 = vrot.slane %v2439_v14, 1  ;;  %v2452_v55 = vrot.slane %v2451_v42, 2  ;;  %v2465_v12 = vmax.f32 %v2463_v57, %v2464_v30 }
 0x2a6   :  { %v2446_v8 = vmax.f32 %v2444_v10, %v2445_v32  ;;  %v11439_v28 = vsel %vm2322_vm10, %v15134_v13, -inf  ;;  %v2459_v37 = vrot.slane %v2458_v11, 2  ;;  %v2471_v19 = vrot.slane %v2470_v15, 4 }
 0x2a7   :  { %v2492_v49 = vrot.slane %v2491_v16, 4  ;;  %v11444_v53 = vmax.f32 %v2439_v14, %v2440_v18  ;;  %v2453_v21 = vmax.f32 %v2451_v42, %v2452_v55  ;;  %v2466_v3 = vrot.slane %v2465_v12, 2 }
 0x2a8   :  { %v2447_v63 = vrot.slane %v2446_v8, 1  ;;  %v11446_v32 = vmax.f32 %v2458_v11, %v2459_v37  ;;  %v11450_v47 = vmax.f32 %v2470_v15, %v2471_v19  ;;  %v15137_v5 = vrot.slane %v11190_v2, 2 }
 0x2a9   :  { %15135 = vst [vmem:[#allocation28_spill] sm:$0xff] %v11444_v53  ;;  %v2493_v51 = vmax.f32 %v2491_v16, %v2492_v49  ;;  %v2454_v30 = vrot.slane %v2453_v21, 1  ;;  %v11456_v10 = vmax.f32 %v2465_v12, %v2466_v3  ;;  %v15138_v37 = vrot.slane %v11190_v2, 4 }
 0x2aa   :  { %v11448_v13 = vmax.f32 %v2446_v8, %v2447_v63  ;;  %v2498_v57 = vsel %vm2322_vm10, %v15137_v5, -inf  ;;  %v15139_v11 = vrot.slane %v11190_v2, 6  ;;  %v2519_v15 = vsel %vm2322_vm10, %v11193_v52, -inf }
 0x2ab   :  { %v2499_v14 = vrot.slane %v2498_v57, 4  ;;  %v2494_v18 = vrot.slane %v2493_v51, 2  ;;  %v2505_v42 = vsel %vm2322_vm10, %v15138_v37, -inf  ;;  %v11466_v16 = vmax.f32 %v2453_v21, %v2454_v30 }
 0x2ac   :  { %15136 = vst [vmem:[#allocation29_spill] sm:$0xff] %v11448_v13  ;;  %v2512_v8 = vsel %vm2322_vm10, %v15139_v11, -inf  ;;  %v2506_v55 = vrot.slane %v2505_v42, 4  ;;  %v2520_v19 = vrot.slane %v2519_v15, 4  ;;  %v2547_v49 = vsel %vm2322_vm10, %v11196_v0, -inf }
 0x2ad   :  { %15140 = vst [vmem:[#allocation30_spill] sm:$0xff] %v11466_v16  ;;  %v2500_v5 = vmax.f32 %v2498_v57, %v2499_v14  ;;  %v2513_v63 = vrot.slane %v2512_v8, 4  ;;  %v2495_v12 = vmax.f32 %v2493_v51, %v2494_v18  ;;  %v15141_v3 = vrot.slane %v11196_v0, 2 }
 0x2ae   :  { %v2507_v17 = vmax.f32 %v2505_v42, %v2506_v55  ;;  %v2548_v13 = vrot.slane %v2547_v49, 4  ;;  %v11475_v21 = vmax.f32 %v2519_v15, %v2520_v19  ;;  %v15144_v30 = vrot.slane %v11196_v0, 4 }
 0x2af   :  { %v2554_v37 = vsel %vm2322_vm10, %v15141_v3, -inf  ;;  %v2501_v2 = vrot.slane %v2500_v5, 2  ;;  %v11473_v11 = vmax.f32 %v2512_v8, %v2513_v63  ;;  %v2496_v52 = vrot.slane %v2495_v12, 1 }
 0x2b0   :  { %15143 = vst [vmem:[#allocation32_spill] sm:$0xff] %v11475_v21  ;;  %v2555_v57 = vrot.slane %v2554_v37, 4  ;;  %v2561_v51 = vsel %vm2322_vm10, %v15144_v30, -inf  ;;  %v2508_v18 = vrot.slane %v2507_v17, 2  ;;  %v2549_v53 = vmax.f32 %v2547_v49, %v2548_v13 }
 0x2b1   :  { %15142 = vst [vmem:[#allocation31_spill] sm:$0xff] %v11473_v11  ;;  %v11480_v14 = vmax.f32 %v2500_v5, %v2501_v2  ;;  %v11483_v3 = vmax.f32 %v2495_v12, %v2496_v52  ;;  %v2562_v8 = vrot.slane %v2561_v51, 4  ;;  %v15146_v55 = vrot.slane %v11196_v0, 6 }
 0x2b2   :  { %v2556_v42 = vmax.f32 %v2554_v37, %v2555_v57  ;;  %v11489_v19 = vmax.f32 %v2507_v17, %v2508_v18  ;;  %v2550_v21 = vrot.slane %v2549_v53, 2  ;;  %v2575_v16 = vsel %vm2322_vm10, %v11199_v36, -inf }
 0x2b3   :  { %15145 = vst [vmem:[#allocation33_spill] sm:$0xff] %v11483_v3  ;;  %v2568_v15 = vsel %vm2322_vm10, %v15146_v55, -inf  ;;  %v2563_v2 = vmax.f32 %v2561_v51, %v2562_v8  ;;  %v2603_v52 = vsel %vm2322_vm10, %v11202_v9, -inf  ;;  %v2576_v0 = vrot.slane %v2575_v16, 4 }
 0x2b4   :  { %15147 = vst [vmem:[#allocation34_spill] sm:$0xff] %v11489_v19  ;;  %v2569_v30 = vrot.slane %v2568_v15, 4  ;;  %v2557_v5 = vrot.slane %v2556_v42, 2  ;;  %v2551_v13 = vmax.f32 %v2549_v53, %v2550_v21  ;;  %v2604_v49 = vrot.slane %v2603_v52, 4 }
 0x2b5   :  { %v2564_v57 = vrot.slane %v2563_v2, 2  ;;  %v15149_v17 = vrot.slane %v11202_v9, 2  ;;  %v15150_v51 = vrot.slane %v11202_v9, 4  ;;  %v11506_v3 = vmax.f32 %v2575_v16, %v2576_v0 }
 0x2b6   :  { %v11495_v12 = vmax.f32 %v2568_v15, %v2569_v30  ;;  %v11497_v37 = vmax.f32 %v2556_v42, %v2557_v5  ;;  %v2552_v55 = vrot.slane %v2551_v13, 1  ;;  %v2605_v53 = vmax.f32 %v2603_v52, %v2604_v49 }
 0x2b7   :  { %v2610_v18 = vsel %vm2322_vm10, %v15149_v17, -inf  ;;  %v2617_v8 = vsel %vm2322_vm10, %v15150_v51, -inf  ;;  %15151 = vst [vmem:[#allocation36_spill] sm:$0xff] %v11506_v3  ;;  %v11509_v15 = vmax.f32 %v2563_v2, %v2564_v57  ;;  %v15153_v17 = vrot.slane %v11202_v9, 6 }
 0x2b8   :  { %15148 = vst [vmem:[#allocation35_spill] sm:$0xff] %v11495_v12  ;;  %v2611_v42 = vrot.slane %v2610_v18, 4  ;;  %v2618_v30 = vrot.slane %v2617_v8, 4  ;;  %v11511_v5 = vmax.f32 %v2551_v13, %v2552_v55  ;;  %v2606_v11 = vrot.slane %v2605_v53, 2 }
 0x2b9   :  { %v2624_v19 = vsel %vm2322_vm10, %v15153_v17, -inf  ;;  %v2631_v51 = vsel %vm2322_vm10, %v11205_v58, -inf  ;;  %v2659_v2 = vsel %vm2322_vm10, %v11208_v25, -inf  ;;  %v15154_v57 = vrot.slane %v11208_v25, 2 }
 0x2ba   :  { %15152 = vst [vmem:[#allocation37_spill] sm:$0xff] %v11511_v5  ;;  %v2612_v63 = vmax.f32 %v2610_v18, %v2611_v42  ;;  %v2619_v16 = vmax.f32 %v2617_v8, %v2618_v30  ;;  %v2625_v0 = vrot.slane %v2624_v19, 4  ;;  %v2632_v52 = vrot.slane %v2631_v51, 4 }
 0x2bb   :  { %v2607_v49 = vmax.f32 %v2605_v53, %v2606_v11  ;;  %v2666_v13 = vsel %vm2322_vm10, %v15154_v57, -inf  ;;  %v15155_v55 = vrot.slane %v11208_v25, 4  ;;  %v2660_v42 = vrot.slane %v2659_v2, 4 }
 0x2bc   :  { %v2613_v17 = vrot.slane %v2612_v63, 2  ;;  %v2620_v21 = vrot.slane %v2619_v16, 2  ;;  %v11526_v5 = vmax.f32 %v2624_v19, %v2625_v0  ;;  %v11528_v18 = vmax.f32 %v2631_v51, %v2632_v52 }
 0x2bd   :  { %v2673_v9 = vsel %vm2322_vm10, %v15155_v55, -inf  ;;  %v2608_v8 = vrot.slane %v2607_v49, 1  ;;  %v2667_v11 = vrot.slane %v2666_v13, 4  ;;  %v15160_v3 = vrot.slane %v11208_v25, 6 }
 0x2be   :  { %15156 = vst [vmem:[#allocation38_spill] sm:$0xff] %v11526_v5  ;;  %v2674_v53 = vrot.slane %v2673_v9, 4  ;;  %v11530_v30 = vmax.f32 %v2612_v63, %v2613_v17  ;;  %v11532_v58 = vmax.f32 %v2619_v16, %v2620_v21  ;;  %v2661_v19 = vmax.f32 %v2659_v2, %v2660_v42 }
 0x2bf   :  { %15157 = vst [vmem:[#allocation39_spill] sm:$0xff] %v11528_v18  ;;  %v2680_v55 = vsel %vm2322_vm10, %v15160_v3, -inf  ;;  %v11538_v12 = vmax.f32 %v2607_v49, %v2608_v8  ;;  %v2668_v0 = vmax.f32 %v2666_v13, %v2667_v11  ;;  %v2687_v63 = vsel %vm2322_vm10, %v11211_v56, -inf }
 0x2c0   :  { %15158 = vst [vmem:[#allocation40_spill] sm:$0xff] %v11530_v30  ;;  %v2675_v51 = vmax.f32 %v2673_v9, %v2674_v53  ;;  %v2681_v18 = vrot.slane %v2680_v55, 4  ;;  %v2715_v21 = vsel %vm2322_vm10, %v11214_v48, -inf  ;;  %v2662_v16 = vrot.slane %v2661_v19, 2 }
 0x2c1   :  { %15159 = vst [vmem:[#allocation41_spill] sm:$0xff] %v11532_v58  ;;  %v2669_v17 = vrot.slane %v2668_v0, 2  ;;  %v2688_v25 = vrot.slane %v2687_v63, 4  ;;  %v2716_v3 = vrot.slane %v2715_v21, 4  ;;  %v15163_v49 = vrot.slane %v11214_v48, 2 }
 0x2c2   :  { %15161 = vst [vmem:[#allocation42_spill] sm:$0xff] %v11538_v12  ;;  %v2676_v57 = vrot.slane %v2675_v51, 2  ;;  %v11545_v5 = vmax.f32 %v2680_v55, %v2681_v18  ;;  %v15164_v13 = vrot.slane %v11214_v48, 4  ;;  %v2663_v8 = vmax.f32 %v2661_v19, %v2662_v16 }
 0x2c3   :  { %v2722_v2 = vsel %vm2322_vm10, %v15163_v49, -inf  ;;  %v11553_v42 = vmax.f32 %v2668_v0, %v2669_v17  ;;  %v11557_v53 = vmax.f32 %v2687_v63, %v2688_v25  ;;  %v2717_v18 = vmax.f32 %v2715_v21, %v2716_v3 }
 0x2c4   :  { %15162 = vst [vmem:[#allocation43_spill] sm:$0xff] %v11545_v5  ;;  %v2729_v9 = vsel %vm2322_vm10, %v15164_v13, -inf  ;;  %v11555_v11 = vmax.f32 %v2675_v51, %v2676_v57  ;;  %v2723_v55 = vrot.slane %v2722_v2, 4  ;;  %v2664_v58 = vrot.slane %v2663_v8, 1 }
 0x2c5   :  { %15166 = vst [vmem:[#allocation45_spill] sm:$0xff] %v11557_v53  ;;  %v2730_v12 = vrot.slane %v2729_v9, 4  ;;  %v15167_v49 = vrot.slane %v11214_v48, 6  ;;  %v11566_v19 = vsel %vm2322_vm10, %v11217_v44, -inf  ;;  %v2718_v57 = vrot.slane %v2717_v18, 2 }
 0x2c6   :  { %15165 = vst [vmem:[#allocation44_spill] sm:$0xff] %v11555_v11  ;;  %v2724_v0 = vmax.f32 %v2722_v2, %v2723_v55  ;;  %v11570_v16 = vmax.f32 %v2663_v8, %v2664_v58  ;;  %v2771_v17 = vsel %vm2322_vm10, %v11220_v6, -inf  ;;  %v15171_v48 = vrot.slane %v11220_v6, 2 }
 0x2c7   :  { %v2736_v56 = vsel %vm2322_vm10, %v15167_v49, -inf  ;;  %15168 = vst [vmem:[#allocation46_spill] sm:$0xff] %v11566_v19  ;;  %v11568_v51 = vmax.f32 %v2729_v9, %v2730_v12  ;;  %v11578_v3 = vmax.f32 %v2717_v18, %v2718_v57  ;;  %v2772_v12 = vrot.slane %v2771_v17, 4 }
 0x2c8   :  { %v2737_v63 = vrot.slane %v2736_v56, 4  ;;  %15170 = vst [vmem:[#allocation48_spill] sm:$0xff] %v11570_v16  ;;  %v2778_v25 = vsel %vm2322_vm10, %v15171_v48, -inf  ;;  %v2725_v13 = vrot.slane %v2724_v0, 2  ;;  %v15174_v58 = vrot.slane %v11220_v6, 4 }
 0x2c9   :  { %15169 = vst [vmem:[#allocation47_spill] sm:$0xff] %v11568_v51  ;;  %v2779_v9 = vrot.slane %v2778_v25, 4  ;;  %v15175_v55 = vrot.slane %v11220_v6, 6  ;;  %v2773_v30 = vmax.f32 %v2771_v17, %v2772_v12  ;;  %v2827_v17 = vsel %vm2322_vm10, %v11226_v41, -inf }
 0x2ca   :  { %15172 = vst [vmem:[#allocation49_spill] sm:$0xff] %v11578_v3  ;;  %v11581_v2 = vmax.f32 %v2736_v56, %v2737_v63  ;;  %v2785_v8 = vsel %vm2322_vm10, %v15174_v58, -inf  ;;  %v11590_v48 = vmax.f32 %v2724_v0, %v2725_v13  ;;  %v2799_v56 = vsel %vm2322_vm10, %v11223_v1, -inf }
 0x2cb   :  { %v2792_v21 = vsel %vm2322_vm10, %v15175_v55, -inf  ;;  %v2786_v18 = vrot.slane %v2785_v8, 4  ;;  %v2780_v49 = vmax.f32 %v2778_v25, %v2779_v9  ;;  %v15177_v63 = vrot.slane %v11223_v1, 2 }
 0x2cc   :  { %15173 = vst [vmem:[#allocation50_spill] sm:$0xff] %v11581_v2  ;;  %v2793_v57 = vrot.slane %v2792_v21, 4  ;;  %v2800_v6 = vrot.slane %v2799_v56, 4  ;;  %v2774_v55 = vrot.slane %v2773_v30, 2  ;;  %v15178_v0 = vrot.slane %v11223_v1, 4 }
 0x2cd   :  { %15176 = vst [vmem:[#allocation51_spill] sm:$0xff] %v11590_v48  ;;  %v2806_v19 = vsel %vm2322_vm10, %v15177_v63, -inf  ;;  %v2787_v58 = vmax.f32 %v2785_v8, %v2786_v18  ;;  %v2781_v44 = vrot.slane %v2780_v49, 2  ;;  %v2828_v18 = vrot.slane %v2827_v17, 4 }
 0x2ce   :  { %v2794_v2 = vmax.f32 %v2792_v21, %v2793_v57  ;;  %v2807_v51 = vrot.slane %v2806_v19, 4  ;;  %v11600_v13 = vsel %vm2322_vm10, %v15178_v0, -inf  ;;  %v2801_v9 = vmax.f32 %v2799_v56, %v2800_v6 }
 0x2cf   :  { %v2788_v25 = vrot.slane %v2787_v58, 2  ;;  %v2775_v63 = vmax.f32 %v2773_v30, %v2774_v55  ;;  %v2782_v8 = vmax.f32 %v2780_v49, %v2781_v44  ;;  %v15179_v0 = vrot.slane %v11226_v41, 2 }
 0x2d0   :  { %v2795_v12 = vrot.slane %v2794_v2, 2  ;;  %v11604_v52 = vmax.f32 %v2806_v19, %v2807_v51  ;;  %v2802_v1 = vrot.slane %v2801_v9, 2  ;;  %v2829_v5 = vmax.f32 %v2827_v17, %v2828_v18 }
 0x2d1   :  { %v2789_v57 = vmax.f32 %v2787_v58, %v2788_v25  ;;  %v2834_v3 = vsel %vm2322_vm10, %v15179_v0, -inf  ;;  %v2776_v16 = vrot.slane %v2775_v63, 1  ;;  %v2783_v53 = vrot.slane %v2782_v8, 1 }
 0x2d2   :  { %v11607_v48 = vmax.f32 %v2794_v2, %v2795_v12  ;;  %v2835_v11 = vrot.slane %v2834_v3, 4  ;;  %v11613_v30 = vmax.f32 %v2801_v9, %v2802_v1  ;;  %v15180_v44 = vrot.slane %v11226_v41, 4 }
 0x2d3   :  { %v2790_v56 = vrot.slane %v2789_v57, 1  ;;  %v11618_v49 = vmax.f32 %v2775_v63, %v2776_v16  ;;  %v11620_v2 = vmax.f32 %v2782_v8, %v2783_v53  ;;  %v2830_v58 = vrot.slane %v2829_v5, 2  ;;  %v9461_v8 = vld [vmem:[%s15107_s30 + $0x78] sm:$0xff] }
 0x2d4   :  { %v2841_v51 = vsel %vm2322_vm10, %v15180_v44, -inf  ;;  %v2836_v6 = vmax.f32 %v2834_v3, %v2835_v11  ;;  %v15181_v17 = vrot.slane %v11226_v41, 6  ;;  %v2855_v1 = vsel %vm2322_vm10, %v11229_v29, -inf  ;;  %4403 = vmatpush.bf16.msra.mxu3 %v9461_v8 }
 0x2d5   :  { %v11622_v55 = vmax.f32 %v2789_v57, %v2790_v56  ;;  %v2842_v25 = vrot.slane %v2841_v51, 4  ;;  %v2831_v9 = vmax.f32 %v2829_v5, %v2830_v58  ;;  %v2856_v44 = vrot.slane %v2855_v1, 4 }
 0x2d6   :  { %v2848_v12 = vsel %vm2322_vm10, %v15181_v17, -inf  ;;  %v2837_v18 = vrot.slane %v2836_v6, 2  ;;  %v2883_v53 = vsel %vm2322_vm10, %v11232_v23, -inf  ;;  %v15182_v11 = vrot.slane %v11232_v23, 2 }
 0x2d7   :  { %v2849_v0 = vrot.slane %v2848_v12, 4  ;;  %v2843_v16 = vmax.f32 %v2841_v51, %v2842_v25  ;;  %v15183_v63 = vrot.slane %v11232_v23, 4  ;;  %v2832_v5 = vrot.slane %v2831_v9, 1 }
 0x2d8   :  { %v2890_v3 = vsel %vm2322_vm10, %v15182_v11, -inf  ;;  %v11640_v57 = vmax.f32 %v2836_v6, %v2837_v18  ;;  %v11644_v51 = vmax.f32 %v2855_v1, %v2856_v44  ;;  %v2884_v25 = vrot.slane %v2883_v53, 4  ;;  %v9460_v44 = vld [vmem:[%s15107_s30 + $0x70] sm:$0xff] }
 0x2d9   :  { %v2897_v41 = vsel %vm2322_vm10, %v15183_v63, -inf  ;;  %v11642_v56 = vmax.f32 %v2848_v12, %v2849_v0  ;;  %v2844_v58 = vrot.slane %v2843_v16, 2  ;;  %v2891_v17 = vrot.slane %v2890_v3, 4  ;;  %4404 = vmatpush.bf16.msra.mxu3 %v9460_v44  ;;  %v9459_v44 = vld [vmem:[%s15107_s30 + $0x68] sm:$0xff] }
 0x2da   :  { %15184 = vst [vmem:[#allocation52_spill] sm:$0xff] %v11644_v51  ;;  %v2898_v21 = vrot.slane %v2897_v41, 4  ;;  %v11646_v11 = vmax.f32 %v2831_v9, %v2832_v5  ;;  %v15186_v29 = vrot.slane %v11232_v23, 6  ;;  %v2885_v12 = vmax.f32 %v2883_v53, %v2884_v25 }
 0x2db   :  { %v11653_v18 = vmax.f32 %v2843_v16, %v2844_v58  ;;  %v2892_v1 = vmax.f32 %v2890_v3, %v2891_v17  ;;  %v2911_v9 = vsel %vm2322_vm10, %v11235_v39, -inf  ;;  %v15187_v5 = vrot.slane %v11235_v39, 2 }
 0x2dc   :  { %15185 = vst [vmem:[#allocation53_spill] sm:$0xff] %v11646_v11  ;;  %v2904_v6 = vsel %vm2322_vm10, %v15186_v29, -inf  ;;  %v2899_v0 = vmax.f32 %v2897_v41, %v2898_v21  ;;  %v2939_v29 = vsel %vm2322_vm10, %v11238_v22, -inf  ;;  %v2886_v23 = vrot.slane %v2885_v12, 2 }
 0x2dd   :  { %v2905_v8 = vrot.slane %v2904_v6, 4  ;;  %v11663_v19 = vsel %vm2322_vm10, %v15187_v5, -inf  ;;  %v2893_v16 = vrot.slane %v2892_v1, 2  ;;  %v2912_v21 = vrot.slane %v2911_v9, 4  ;;  %4405 = vmatpush.bf16.msra.mxu3 %v9459_v44 }
 0x2de   :  { %15188 = vst [vmem:[#allocation54_spill] sm:$0xff] %v11663_v19  ;;  %v2900_v53 = vrot.slane %v2899_v0, 2  ;;  %v2940_v58 = vrot.slane %v2939_v29, 4  ;;  %v15190_v25 = vrot.slane %v11238_v22, 2  ;;  %v2887_v63 = vmax.f32 %v2885_v12, %v2886_v23 }
 0x2df   :  { %v11667_v3 = vmax.f32 %v2904_v6, %v2905_v8  ;;  %v11673_v5 = vmax.f32 %v2892_v1, %v2893_v16  ;;  %v11677_v39 = vmax.f32 %v2911_v9, %v2912_v21  ;;  %v15192_v19 = vrot.slane %v11238_v22, 4 }
 0x2e0   :  { %v2946_v17 = vsel %vm2322_vm10, %v15190_v25, -inf  ;;  %v11675_v11 = vmax.f32 %v2899_v0, %v2900_v53  ;;  %v2941_v8 = vmax.f32 %v2939_v29, %v2940_v58  ;;  %v2888_v25 = vrot.slane %v2887_v63, 1 }
 0x2e1   :  { %15189 = vst [vmem:[#allocation55_spill] sm:$0xff] %v11667_v3  ;;  %v2947_v41 = vrot.slane %v2946_v17, 4  ;;  %v2953_v51 = vsel %vm2322_vm10, %v15192_v19, -inf  ;;  %v15193_v16 = vrot.slane %v11238_v22, 6  ;;  %v2967_v29 = vsel %vm2322_vm10, %v11241_v43, -inf  ;;  %v9466_v19 = vld [vmem:[%s15107_s30 + $0xa0] sm:$0xff] }
 0x2e2   :  { %15191 = vst [vmem:[#allocation56_spill] sm:$0xff] %v11677_v39  ;;  %v2954_v0 = vrot.slane %v2953_v51, 4  ;;  %v2942_v9 = vrot.slane %v2941_v8, 2  ;;  %v11696_v21 = vmax.f32 %v2887_v63, %v2888_v25  ;;  %v2968_v1 = vrot.slane %v2967_v29, 4  ;;  %4625 = vmatpush.bf16.msrb.mxu0 %v9466_v19 }
 0x2e3   :  { %v2948_v23 = vmax.f32 %v2946_v17, %v2947_v41  ;;  %v2960_v53 = vsel %vm2322_vm10, %v15193_v16, -inf  ;;  %v9458_v41 = vld [vmem:[%s15107_s30 + $0x60] sm:$0xff]  ;;  %v15195_v44 = vrot.slane %v11241_v43, 2  ;;  %v2995_v12 = vsel %vm2322_vm10, %v11244_v7, -inf }
 0x2e4   :  { %15194 = vst [vmem:[#allocation57_spill] sm:$0xff] %v11696_v21  ;;  %v2955_v58 = vmax.f32 %v2953_v51, %v2954_v0  ;;  %v2961_v6 = vrot.slane %v2960_v53, 4  ;;  %v2943_v17 = vmax.f32 %v2941_v8, %v2942_v9  ;;  %v9465_v51 = vld [vmem:[%s15107_s30 + $0x98] sm:$0xff]  ;;  %v11713_v0 = vmax.f32 %v2967_v29, %v2968_v1  ;;  %4406 = vmatpush.bf16.msra.mxu3 %v9458_v41 }
 0x2e5   :  { %v2949_v22 = vrot.slane %v2948_v23, 2  ;;  %v11704_v16 = vsel %vm2322_vm10, %v15195_v44, -inf  ;;  %v9457_v9 = vld [vmem:[%s15107_s30 + $0x58] sm:$0xff]  ;;  %v2996_v19 = vrot.slane %v2995_v12, 4  ;;  %v15200_v21 = vrot.slane %v11244_v7, 2 }
 0x2e6   :  { %15196 = vst [vmem:[#allocation58_spill] sm:$0xff] %v11704_v16  ;;  %v2956_v63 = vrot.slane %v2955_v58, 2  ;;  %v11711_v25 = vmax.f32 %v2960_v53, %v2961_v6  ;;  %v2944_v44 = vrot.slane %v2943_v17, 1  ;;  %4626 = vmatpush.bf16.msrb.mxu0 %v9465_v51  ;;  %v15204_v6 = vrot.slane %v11244_v7, 6 }
 0x2e7   :  { %15198 = vst [vmem:[#allocation60_spill] sm:$0xff] %v11713_v0  ;;  %v11719_v43 = vmax.f32 %v2948_v23, %v2949_v22  ;;  %v3002_v39 = vsel %vm2322_vm10, %v15200_v21, -inf  ;;  %v2997_v8 = vmax.f32 %v2995_v12, %v2996_v19  ;;  %v15203_v23 = vrot.slane %v11244_v7, 4  ;;  %v9464_v21 = vld [vmem:[%s15107_s30 + $0x90] sm:$0xff] }
 0x2e8   :  { %15197 = vst [vmem:[#allocation59_spill] sm:$0xff] %v11711_v25  ;;  %v11724_v3 = vmax.f32 %v2955_v58, %v2956_v63  ;;  %v3003_v53 = vrot.slane %v3002_v39, 4  ;;  %v11728_v29 = vmax.f32 %v2943_v17, %v2944_v44  ;;  %v3016_v1 = vsel %vm2322_vm10, %v15204_v6, -inf  ;;  %4407 = vmatpush.bf16.msra.mxu3 %v9457_v9  ;;  %v9456_v12 = vld [vmem:[%s15107_s30 + $0x50] sm:$0xff] }
 0x2e9   :  { %15199 = vst [vmem:[#allocation61_spill] sm:$0xff] %v11719_v43  ;;  %v3009_v22 = vsel %vm2322_vm10, %v15203_v23, -inf  ;;  %v3023_v17 = vsel %vm2322_vm10, %v11247_v24, -inf  ;;  %v2998_v44 = vrot.slane %v2997_v8, 2  ;;  %v3017_v51 = vrot.slane %v3016_v1, 4 }
 0x2ea   :  { %15201 = vst [vmem:[#allocation62_spill] sm:$0xff] %v11724_v3  ;;  %v3004_v58 = vmax.f32 %v3002_v39, %v3003_v53  ;;  %v3010_v63 = vrot.slane %v3009_v22, 4  ;;  %v3024_v19 = vrot.slane %v3023_v17, 4  ;;  %v15205_v23 = vrot.slane %v11247_v24, 2  ;;  %4627 = vmatpush.bf16.msrb.mxu0 %v9464_v21  ;;  %v9463_v24 = vld [vmem:[%s15107_s30 + $0x88] sm:$0xff] }
 0x2eb   :  { %15202 = vst [vmem:[#allocation63_spill] sm:$0xff] %v11728_v29  ;;  %v3051_v41 = vsel %vm2322_vm10, %v11250_v4, -inf  ;;  %v2999_v9 = vmax.f32 %v2997_v8, %v2998_v44  ;;  %v11753_v29 = vmax.f32 %v3016_v1, %v3017_v51  ;;  %v15210_v6 = vrot.slane %v11250_v4, 4  ;;  %v9455_v1 = vld [vmem:[%s15107_s30 + $0x48] sm:$0xff] }
 0x2ec   :  { %v11748_v39 = vsel %vm2322_vm10, %v15205_v23, -inf  ;;  %v3005_v53 = vrot.slane %v3004_v58, 2  ;;  %v3011_v7 = vmax.f32 %v3009_v22, %v3010_v63  ;;  %v11755_v16 = vmax.f32 %v3023_v17, %v3024_v19  ;;  %4408 = vmatpush.bf16.msra.mxu3 %v9456_v12 }
 0x2ed   :  { %15206 = vst [vmem:[#allocation64_spill] sm:$0xff] %v11748_v39  ;;  %v3052_v0 = vrot.slane %v3051_v41, 4  ;;  %v15209_v22 = vrot.slane %v11250_v4, 2  ;;  %v3065_v8 = vsel %vm2322_vm10, %v15210_v6, -inf  ;;  %v3000_v21 = vrot.slane %v2999_v9, 1 }
 0x2ee   :  { %15207 = vst [vmem:[#allocation65_spill] sm:$0xff] %v11753_v29  ;;  %v11760_v23 = vmax.f32 %v3004_v58, %v3005_v53  ;;  %v3012_v25 = vrot.slane %v3011_v7, 2  ;;  %v15213_v12 = vrot.slane %v11250_v4, 6  ;;  %v3079_v43 = vsel %vm2322_vm10, %v11253_v61, -inf  ;;  %4628 = vmatpush.bf16.msrb.mxu0 %v9463_v24 }
 0x2ef   :  { %15208 = vst [vmem:[#allocation66_spill] sm:$0xff] %v11755_v16  ;;  %v3058_v63 = vsel %vm2322_vm10, %v15209_v22, -inf  ;;  %v3053_v44 = vmax.f32 %v3051_v41, %v3052_v0  ;;  %v3066_v22 = vrot.slane %v3065_v8, 4  ;;  %v11776_v39 = vmax.f32 %v2999_v9, %v3000_v21  ;;  %v9462_v0 = vld [vmem:[%s15107_s30 + $0x80] sm:$0xff] }
 0x2f0   :  { %v11774_v19 = vmax.f32 %v3011_v7, %v3012_v25  ;;  %v3059_v53 = vrot.slane %v3058_v63, 4  ;;  %v3072_v3 = vsel %vm2322_vm10, %v15213_v12, -inf  ;;  %v3080_v58 = vrot.slane %v3079_v43, 4  ;;  %4409 = vmatpush.bf16.msra.mxu3 %v9455_v1  ;;  %v9454_v9 = vld [vmem:[%s15107_s30 + $0x40] sm:$0xff] }
 0x2f1   :  { %15212 = vst [vmem:[#allocation68_spill] sm:$0xff] %v11776_v39  ;;  %v3054_v6 = vrot.slane %v3053_v44, 2  ;;  %v3067_v25 = vmax.f32 %v3065_v8, %v3066_v22  ;;  %v3073_v7 = vrot.slane %v3072_v3, 4  ;;  %v15214_v21 = vrot.slane %v11253_v61, 2 }
 0x2f2   :  { %15211 = vst [vmem:[#allocation67_spill] sm:$0xff] %v11774_v19  ;;  %v3060_v41 = vmax.f32 %v3058_v63, %v3059_v53  ;;  %v3107_v24 = vsel %vm2322_vm10, %v11256_v59, -inf  ;;  %v15216_v17 = vrot.slane %v11256_v59, 2  ;;  %v11801_v22 = vmax.f32 %v3079_v43, %v3080_v58  ;;  %4629 = vmatpush.bf16.msrb.mxu0 %v9462_v0 }
 0x2f3   :  { %v3055_v4 = vmax.f32 %v3053_v44, %v3054_v6  ;;  %v11792_v12 = vsel %vm2322_vm10, %v15214_v21, -inf  ;;  %v3068_v53 = vrot.slane %v3067_v25, 2  ;;  %v11799_v1 = vmax.f32 %v3072_v3, %v3073_v7 }
 0x2f4   :  { %15215 = vst [vmem:[#allocation69_spill] sm:$0xff] %v11792_v12  ;;  %v3114_v63 = vsel %vm2322_vm10, %v15216_v17, -inf  ;;  %v3061_v8 = vrot.slane %v3060_v41, 2  ;;  %v3108_v6 = vrot.slane %v3107_v24, 4  ;;  %4410 = vmatpush.bf16.msra.mxu3 %v9454_v9  ;;  %v15222_v58 = vrot.slane %v11256_v59, 4 }
 0x2f5   :  { %15217 = vst [vmem:[#allocation70_spill] sm:$0xff] %v11799_v1  ;;  %v3056_v51 = vrot.slane %v3055_v4, 1  ;;  %v3115_v61 = vrot.slane %v3114_v63, 4  ;;  %v11806_v39 = vmax.f32 %v3067_v25, %v3068_v53 }
 0x2f6   :  { %15218 = vst [vmem:[#allocation71_spill] sm:$0xff] %v11801_v22  ;;  %v11804_v21 = vmax.f32 %v3060_v41, %v3061_v8  ;;  %v3109_v3 = vmax.f32 %v3107_v24, %v3108_v6  ;;  %v3121_v7 = vsel %vm2322_vm10, %v15222_v58, -inf  ;;  %v15223_v41 = vrot.slane %v11256_v59, 6 }
 0x2f7   :  { %15220 = vst [vmem:[#allocation73_spill] sm:$0xff] %v11806_v39  ;;  %v11810_v29 = vmax.f32 %v3055_v4, %v3056_v51  ;;  %v3116_v43 = vmax.f32 %v3114_v63, %v3115_v61  ;;  %v3122_v0 = vrot.slane %v3121_v7, 4  ;;  %v3135_v8 = vsel %vm2322_vm10, %v11259_v54, -inf }
 0x2f8   :  { %15219 = vst [vmem:[#allocation72_spill] sm:$0xff] %v11804_v21  ;;  %v3128_v25 = vsel %vm2322_vm10, %v15223_v41, -inf  ;;  %v3110_v53 = vrot.slane %v3109_v3, 2  ;;  %v3136_v4 = vrot.slane %v3135_v8, 4  ;;  %v15224_v61 = vrot.slane %v11259_v54, 2 }
 0x2f9   :  { %15221 = vst [vmem:[#allocation74_spill] sm:$0xff] %v11810_v29  ;;  %v3117_v9 = vrot.slane %v3116_v43, 2  ;;  %v3129_v51 = vrot.slane %v3128_v25, 4  ;;  %v3123_v24 = vmax.f32 %v3121_v7, %v3122_v0  ;;  %v3163_v6 = vsel %vm2322_vm10, %v11262_v26, -inf }
 0x2fa   :  { %v11824_v63 = vsel %vm2322_vm10, %v15224_v61, -inf  ;;  %v15226_v59 = vrot.slane %v11262_v26, 2  ;;  %v3111_v41 = vmax.f32 %v3109_v3, %v3110_v53  ;;  %v11835_v44 = vmax.f32 %v3135_v8, %v3136_v4 }
 0x2fb   :  { %15225 = vst [vmem:[#allocation75_spill] sm:$0xff] %v11824_v63  ;;  %v11831_v17 = vmax.f32 %v3116_v43, %v3117_v9  ;;  %v11833_v16 = vmax.f32 %v3128_v25, %v3129_v51  ;;  %v3124_v7 = vrot.slane %v3123_v24, 2  ;;  %v3164_v29 = vrot.slane %v3163_v6, 4 }
 0x2fc   :  { %v3170_v58 = vsel %vm2322_vm10, %v15226_v59, -inf  ;;  %15229 = vst [vmem:[#allocation78_spill] sm:$0xff] %v11835_v44  ;;  %v3112_v54 = vrot.slane %v3111_v41, 1  ;;  %v15231_v25 = vrot.slane %v11262_v26, 4  ;;  %v15233_v51 = vrot.slane %v11262_v26, 6 }
 0x2fd   :  { %15227 = vst [vmem:[#allocation76_spill] sm:$0xff] %v11831_v17  ;;  %v3171_v61 = vrot.slane %v3170_v58, 4  ;;  %v11841_v59 = vmax.f32 %v3123_v24, %v3124_v7  ;;  %v3165_v3 = vmax.f32 %v3163_v6, %v3164_v29  ;;  %v15234_v0 = vrot.slane %v11379_v40, 1 }
 0x2fe   :  { %15228 = vst [vmem:[#allocation77_spill] sm:$0xff] %v11833_v16  ;;  %v3177_v8 = vsel %vm2322_vm10, %v15231_v25, -inf  ;;  %v11846_v53 = vmax.f32 %v3111_v41, %v3112_v54  ;;  %v3184_v4 = vsel %vm2322_vm10, %v15233_v51, -inf  ;;  %v15235_v6 = vrot.slane %v11371_v45, 2 }
 0x2ff   :  { %15230 = vst [vmem:[#allocation79_spill] sm:$0xff] %v11841_v59  ;;  %v3172_v43 = vmax.f32 %v3170_v58, %v3171_v61  ;;  %v3178_v9 = vrot.slane %v3177_v8, 4  ;;  %v11854_v22 = vmax.f32 %v11379_v40, %v15234_v0  ;;  %v3166_v24 = vrot.slane %v3165_v3, 2 }
 0x300   :  { %15232 = vst [vmem:[#allocation80_spill] sm:$0xff] %v11846_v53  ;;  %v3185_v29 = vrot.slane %v3184_v4, 4  ;;  %v2362_v58 = vmax.f32 %v11371_v45, %v15235_v6  ;;  %v2368_v54 = vrot.slane %v11373_v33, 2  ;;  %v15237_v26 = vrot.slane %v11175_v60, 6 }
 0x301   :  { %v3173_v7 = vrot.slane %v3172_v43, 2  ;;  %v11859_v61 = vmax.f32 %v3177_v8, %v3178_v9  ;;  %v15238_v25 = vrot.slane %v11424_v27, 1  ;;  %v11870_v0 = vmax.f32 %v3165_v3, %v3166_v24 }
 0x302   :  { %v2372_v41 = vsel %vm2322_vm10, %v15237_v26, -inf  ;;  %v11874_v1 = vmax.f32 %v3184_v4, %v3185_v29  ;;  %v2363_v45 = vrot.slane %v2362_v58, 1  ;;  %v2369_v9 = vmax.f32 %v11373_v33, %v2368_v54 }
 0x303   :  { %15236 = vst [vmem:[#allocation81_spill] sm:$0xff] %v11859_v61  ;;  %v11868_v40 = vmax.f32 %v11424_v27, %v15238_v25  ;;  %v11872_v51 = vmax.f32 %v3172_v43, %v3173_v7  ;;  %v2373_v6 = vrot.slane %v2372_v41, 4  ;;  %v2412_v60 = vrot.slane %v11426_v62, 1 }
 0x304   :  { %15239 = vst [vmem:[#allocation82_spill] sm:$0xff] %v11870_v0  ;;  %v11880_v12 = vmax.f32 %v2362_v58, %v2363_v45  ;;  %v2417_v27 = vrot.slane %v11411_v38, 2  ;;  %v15242_v3 = vrot.slane %v11404_v34, 4  ;;  %v2370_v4 = vrot.slane %v2369_v9, 1 }
 0x305   :  { %15240 = vst [vmem:[#allocation83_spill] sm:$0xff] %v11872_v51  ;;  %v2374_v24 = vmax.f32 %v2372_v41, %v2373_v6  ;;  %v11887_v7 = vmax.f32 %v11426_v62, %v2412_v60  ;;  %v15243_v33 = vrot.slane %v11181_v46, 6  ;;  %v15244_v45 = vrot.slane %v11446_v32, 1 }
 0x306   :  { %15241 = vst [vmem:[#allocation84_spill] sm:$0xff] %v11874_v1  ;;  %v2423_v43 = vmax.f32 %v11404_v34, %v15242_v3  ;;  %v2418_v54 = vmax.f32 %v11411_v38, %v2417_v27  ;;  %v11898_v26 = vmax.f32 %v2369_v9, %v2370_v4  ;;  %v2468_v41 = vrot.slane %v11456_v10, 1 }
 0x307   :  { %v2428_v29 = vsel %vm2322_vm10, %v15243_v33, -inf  ;;  %v11896_v8 = vmax.f32 %v11446_v32, %v15244_v45  ;;  %v2375_v34 = vrot.slane %v2374_v24, 2  ;;  %v2473_v62 = vrot.slane %v11450_v47, 2  ;;  %v9453_v45 = vld [vmem:[%s15107_s30 + $0x38] sm:$0xff] }
 0x308   :  { %v2424_v25 = vrot.slane %v2423_v43, 2  ;;  %v2429_v58 = vrot.slane %v2428_v29, 4  ;;  %v2419_v6 = vrot.slane %v2418_v54, 1  ;;  %v15245_v3 = vrot.slane %v11439_v28, 4  ;;  %4500 = vmatpush.bf16.msrb.mxu3 %v9453_v45  ;;  %v15247_v45 = vld [vmem:[#allocation24_spill] sm:$0xff] }
 0x309   :  { %v2376_v27 = vmax.f32 %v2374_v24, %v2375_v34  ;;  %v11906_v33 = vmax.f32 %v11456_v10, %v2468_v41  ;;  %v2474_v32 = vmax.f32 %v11450_v47, %v2473_v62  ;;  %v15246_v9 = vrot.slane %v11187_v20, 6 }
 0x30a   :  { %v2425_v46 = vmax.f32 %v2423_v43, %v2424_v25  ;;  %v2430_v60 = vmax.f32 %v2428_v29, %v2429_v58  ;;  %v2479_v38 = vmax.f32 %v11439_v28, %v15245_v3  ;;  %v11915_v43 = vmax.f32 %v2418_v54, %v2419_v6 }
 0x30b   :  { %v2484_v4 = vsel %vm2322_vm10, %v15246_v9, -inf  ;;  %v2377_v28 = vrot.slane %v2376_v27, 1  ;;  %v2475_v24 = vrot.slane %v2474_v32, 1  ;;  %v3556_v41 = vsel %vm3555_vm14, %v11386_v35, %v11384_v31 }
 0x30c   :  { %v2426_v29 = vrot.slane %v2425_v46, 1  ;;  %v2431_v25 = vrot.slane %v2430_v60, 2  ;;  %v2480_v58 = vrot.slane %v2479_v38, 2  ;;  %v2485_v34 = vrot.slane %v2484_v4, 4 }
 0x30d   :  { %v11922_v62 = vmax.f32 %v2376_v27, %v2377_v28  ;;  %v11924_v54 = vmax.f32 %v2474_v32, %v2475_v24  ;;  %v3558_v1 = vsel %vm3557_vm15, %v11388_v50, %v3556_v41  ;;  %v15250_v24 = vld [vmem:[#allocation27_spill] sm:$0xff] }
 0x30e   :  { %v11917_v10 = vmax.f32 %v2425_v46, %v2426_v29  ;;  %v2432_v47 = vmax.f32 %v2430_v60, %v2431_v25  ;;  %v2481_v20 = vmax.f32 %v2479_v38, %v2480_v58  ;;  %v2486_v6 = vmax.f32 %v2484_v4, %v2485_v34  ;;  %v15248_v25 = vld [vmem:[#allocation25_spill] sm:$0xff]  ;;  %v15249_v58 = vld [vmem:[#allocation26_spill] sm:$0xff] }
 0x30f   :  { %v3560_v60 = vsel %vm3559_vm0, %v15247_v45, %v3558_v1  ;;  %v3569_v28 = vsel %vm3555_vm14, %v15249_v58, %v15248_v25 }
 0x310   :  { %v2433_v3 = vrot.slane %v2432_v47, 1  ;;  %v2482_v9 = vrot.slane %v2481_v20, 1  ;;  %v2487_v46 = vrot.slane %v2486_v6, 2  ;;  %v3562_v32 = vsel %vm3561_vm1, %v11854_v22, %v3560_v60  ;;  %v15254_v60 = vld [vmem:[#allocation30_spill] sm:$0xff] }
 0x311   :  { %v3564_v29 = vsel %vm3563_vm2, %v11880_v12, %v3562_v32  ;;  %v3570_v34 = vsel %vm3557_vm15, %v15250_v24, %v3569_v28 }
 0x312   :  { %v11930_v38 = vmax.f32 %v2432_v47, %v2433_v3  ;;  %v11932_v27 = vmax.f32 %v2481_v20, %v2482_v9  ;;  %v2488_v4 = vmax.f32 %v2486_v6, %v2487_v46  ;;  %v3566_v1 = vsel %vm3565_vm3, %v11898_v26, %v3564_v29  ;;  %v15251_v47 = vld [vmem:[#allocation28_spill] sm:$0xff]  ;;  %v15252_v20 = vld [vmem:[#allocation29_spill] sm:$0xff] }
 0x313   :  { %v3576_v41 = vsel %vm3555_vm14, %v15252_v20, %v15251_v47  ;;  %v3826_v6 = vpack.c.bf16 %v11384_v31, %v11384_v31  ;;  %v11952_v9 = vsel %vm3567_vm6, %v11922_v62, %v3566_v1  ;;  %v3571_v46 = vsel %vm3559_vm0, %v11868_v40, %v3570_v34 }
 0x314   :  { %v2489_v3 = vrot.slane %v2488_v4, 1  ;;  %15253 = vst [vmem:[#allocation24_spill] sm:$0xff] %v11952_v9  ;;  %v3577_v32 = vsel %vm3557_vm15, %v15254_v60, %v3576_v41  ;;  %v3572_v29 = vsel %vm3561_vm1, %v11887_v7, %v3571_v46  ;;  %v15062_v61 = vrot.slane %v11952_v9, 1 }
 0x315   :  { %v3578_v28 = vsel %vm3559_vm0, %v11896_v8, %v3577_v32  ;;  %v3827_v31 = vpack.c.bf16 %v11386_v35, %v11386_v35  ;;  %v3573_v1 = vsel %vm3563_vm2, %v11915_v43, %v3572_v29  ;;  %v3828_v41 = vpack.c.bf16 %v11388_v50, %v11388_v50 }
 0x316   :  { %v11965_v51 = vmax.f32 %v2488_v4, %v2489_v3  ;;  %v3579_v34 = vsel %vm3561_vm1, %v11906_v33, %v3578_v28  ;;  %v3574_v46 = vsel %vm3565_vm3, %v11917_v10, %v3573_v1  ;;  %v3829_v35 = vpack.c.bf16 %v15247_v45, %v15247_v45 }
 0x317   :  { %v3580_v32 = vsel %vm3563_vm2, %v11924_v54, %v3579_v34  ;;  %v3830_v4 = vpack.c.bf16 %v11854_v22, %v11854_v22  ;;  %v11983_v3 = vsel %vm3567_vm6, %v11930_v38, %v3574_v46  ;;  %v3831_v50 = vpack.c.bf16 %v11880_v12, %v11880_v12 }
 0x318   :  { %15255 = vst [vmem:[#allocation25_spill] sm:$0xff] %v11983_v3  ;;  %v3581_v29 = vsel %vm3565_vm3, %v11932_v27, %v3580_v32  ;;  %v3832_v28 = vpack.c.bf16 %v11898_v26, %v11898_v26  ;;  %v3755_v45 = vrot.slane %v11983_v3, 1  ;;  %v3833_v22 = vpack.c.bf16 %v11922_v62, %v11922_v62 }
 0x319   :  { %v11993_v1 = vsel %vm3567_vm6, %v11965_v51, %v3581_v29  ;;  %v3834_v34 = vpack.c.bf16 %v15248_v25, %v15248_v25  ;;  %v3835_v12 = vpack.c.bf16 %v15249_v58, %v15249_v58  ;;  %v3836_v26 = vpack.c.bf16 %v15250_v24, %v15250_v24  ;;  %v15256_v29 = vld [vmem:[#allocation9_spill] sm:$0xff] }
 0x31a   :  { %v15077_v46 = vrot.slane %v11993_v1, 1  ;;  %v3837_v32 = vpack.c.bf16 %v11868_v40, %v11868_v40  ;;  %v3784_v3 = vsel %vm1166_vm4, %v15062_v61, %v3755_v45  ;;  %v3838_v62 = vpack.c.bf16 %v11887_v7, %v11887_v7 }
 0x31b   :  { %v3839_v25 = vpack.c.bf16 %v11915_v43, %v11915_v43  ;;  %v3840_v58 = vpack.c.bf16 %v11917_v10, %v11917_v10  ;;  %v3841_v40 = vpack.c.bf16 %v11930_v38, %v11930_v38  ;;  %v4099_v9 = vunpack.c.l.b16 %v3826_v6 }
 0x31c   :  { %v3783_v24 = vsel %vm1166_vm4, %v3755_v45, %v15077_v46  ;;  %v4100_v0 = vunpack.c.l.b16 %v3827_v31  ;;  %v4101_v53 = vunpack.c.l.b16 %v3828_v41  ;;  %v4102_v63 = vunpack.c.l.b16 %v3829_v35  ;;  %v15257_v41 = vld [vmem:[#allocation13_spill] sm:$0xff] }
 0x31d   :  { %v4549_v61 = vpack.c.bf16 %v3783_v24, %v3784_v3  ;;  %v4103_v7 = vunpack.c.l.b16 %v3830_v4  ;;  %v4104_v44 = vunpack.c.l.b16 %v3831_v50  ;;  %v4105_v16 = vunpack.c.l.b16 %v3832_v28 }
 0x31e   :  { %v4106_v43 = vunpack.c.l.b16 %v3833_v22  ;;  %v4107_v59 = vunpack.c.l.b16 %v3834_v34  ;;  %v4108_v10 = vunpack.c.l.b16 %v3835_v12  ;;  %v4109_v17 = vunpack.c.l.b16 %v3836_v26  ;;  %v15259_v22 = vld [vmem:[#allocation34_spill] sm:$0xff]  ;;  %v15262_v26 = vld [vmem:[#allocation32_spill] sm:$0xff] }
 0x31f   :  { %4630 = vmatmul.bf16.vlgmr.msrb.gmra.mxu0 %v4549_v61  ;;  %v4110_v39 = vunpack.c.l.b16 %v3837_v32  ;;  %v4111_v21 = vunpack.c.l.b16 %v3838_v62  ;;  %v4112_v19 = vunpack.c.l.b16 %v3839_v25  ;;  %v4113_v45 = vunpack.c.l.b16 %v3840_v58 }
 0x320   :  { %v4114_v46 = vunpack.c.l.b16 %v3841_v40  ;;  %v4227_v38 = vsel %vm3555_vm14, %v4100_v0, %v4099_v9  ;;  %v4234_v31 = vsel %vm3555_vm14, %v4108_v10, %v4107_v59  ;;  %v2153_v35 = vrot.slane %v15257_v41, 6  ;;  %v15260_v59 = vld [vmem:[#allocation31_spill] sm:$0xff] }
 0x321   :  { %v4228_v6 = vsel %vm3557_vm15, %v4101_v53, %v4227_v38  ;;  %v2159_v4 = vrot.slane %v11199_v36, 6  ;;  %v4235_v61 = vsel %vm3557_vm15, %v4109_v17, %v4234_v31  ;;  %v15258_v50 = vrot.slane %v11480_v14, 1 }
 0x322   :  { %v4229_v3 = vsel %vm3559_vm0, %v4102_v63, %v4228_v6  ;;  %v2510_v34 = vrot.slane %v15259_v22, 1  ;;  %v4236_v53 = vsel %vm3559_vm0, %v4110_v39, %v4235_v61  ;;  %v15261_v9 = vrot.slane %v15260_v59, 2 }
 0x323   :  { %v12033_v28 = vmax.f32 %v11480_v14, %v15258_v50  ;;  %v4230_v0 = vsel %vm3561_vm1, %v4103_v7, %v4229_v3  ;;  %v2522_v32 = vrot.slane %v15262_v26, 2  ;;  %v4237_v17 = vsel %vm3561_vm1, %v4111_v21, %v4236_v53  ;;  %v15266_v53 = vld [vmem:[#allocation35_spill] sm:$0xff] }
 0x324   :  { %v2516_v12 = vmax.f32 %v15260_v59, %v15261_v9  ;;  %v4231_v63 = vsel %vm3563_vm2, %v4104_v44, %v4230_v0  ;;  %v12045_v62 = vmax.f32 %v15259_v22, %v2510_v34  ;;  %v15263_v14 = vrot.slane %v15257_v41, 2 }
 0x325   :  { %v4232_v58 = vsel %vm3565_vm3, %v4105_v16, %v4231_v63  ;;  %v4238_v39 = vsel %vm3563_vm2, %v4112_v19, %v4237_v17  ;;  %v2523_v40 = vmax.f32 %v15262_v26, %v2522_v32  ;;  %v15264_v21 = vrot.slane %v15257_v41, 4 }
 0x326   :  { %v2526_v25 = vsel %vm2322_vm10, %v15263_v14, -inf  ;;  %v2517_v24 = vrot.slane %v2516_v12, 1  ;;  %v4233_v7 = vsel %vm3567_vm6, %v4106_v43, %v4232_v58  ;;  %v4239_v44 = vsel %vm3565_vm3, %v4113_v45, %v4238_v39 }
 0x327   :  { %v2527_v10 = vrot.slane %v2526_v25, 4  ;;  %v2533_v38 = vsel %vm2322_vm10, %v15264_v21, -inf  ;;  %v4240_v6 = vsel %vm3567_vm6, %v4114_v46, %v4239_v44  ;;  %v2524_v3 = vrot.slane %v2523_v40, 1 }
 0x328   :  { %v12059_v31 = vmax.f32 %v2516_v12, %v2517_v24  ;;  %v2534_v16 = vrot.slane %v2533_v38, 4  ;;  %v4339_v61 = vpack.c.b16 %v4240_v6, %v4233_v7  ;;  %v2540_v50 = vsel %vm2322_vm10, %v2153_v35, -inf  ;;  %v15268_v12 = vld [vmem:[#allocation36_spill] sm:$0xff] }
 0x329   :  { %v2528_v19 = vmax.f32 %v2526_v25, %v2527_v10  ;;  %v15265_v22 = vrot.slane %v11497_v37, 1  ;;  %v12067_v45 = vmax.f32 %v2523_v40, %v2524_v3  ;;  %v2541_v34 = vrot.slane %v2540_v50, 4 }
 0x32a   :  { %v2535_v41 = vmax.f32 %v2533_v38, %v2534_v16  ;;  %v2566_v0 = vrot.slane %v11509_v15, 1  ;;  %4411 = vmatmul.bf16.vlgmr.msra.gmra.mxu3 %v4339_v61  ;;  %v15267_v59 = vrot.slane %v15266_v53, 2  ;;  %v2578_v26 = vrot.slane %v15268_v12, 2 }
 0x32b   :  { %v12065_v43 = vmax.f32 %v11497_v37, %v15265_v22  ;;  %v2529_v46 = vrot.slane %v2528_v19, 2  ;;  %v15269_v35 = vrot.slane %v11199_v36, 2  ;;  %v9452_v37 = vld [vmem:[%s15107_s30 + $0x30] sm:$0xff]  ;;  %v2542_v17 = vmax.f32 %v2540_v50, %v2541_v34 }
 0x32c   :  { %v2572_v9 = vmax.f32 %v15266_v53, %v15267_v59  ;;  %v2536_v63 = vrot.slane %v2535_v41, 2  ;;  %v12081_v14 = vmax.f32 %v11509_v15, %v2566_v0  ;;  %v2579_v24 = vmax.f32 %v15268_v12, %v2578_v26  ;;  %4501 = vmatpush.bf16.msrb.mxu3 %v9452_v37 }
 0x32d   :  { %v2582_v32 = vsel %vm2322_vm10, %v15269_v35, -inf  ;;  %v2530_v58 = vmax.f32 %v2528_v19, %v2529_v46  ;;  %v15270_v40 = vrot.slane %v11199_v36, 4  ;;  %v2543_v10 = vrot.slane %v2542_v17, 2  ;;  %v15271_v46 = vld [vmem:[#allocation33_spill] sm:$0xff] }
 0x32e   :  { %v2583_v25 = vrot.slane %v2582_v32, 4  ;;  %v2573_v39 = vrot.slane %v2572_v9, 1  ;;  %v2537_v44 = vmax.f32 %v2535_v41, %v2536_v63  ;;  %v2580_v16 = vrot.slane %v2579_v24, 1  ;;  %v15272_v35 = vld [vmem:[#allocation37_spill] sm:$0xff] }
 0x32f   :  { %v2589_v7 = vsel %vm2322_vm10, %v15270_v40, -inf  ;;  %v2531_v6 = vrot.slane %v2530_v58, 1  ;;  %v2596_v15 = vsel %vm2322_vm10, %v2159_v4, -inf  ;;  %v2544_v19 = vmax.f32 %v2542_v17, %v2543_v10 }
 0x330   :  { %v2584_v21 = vmax.f32 %v2582_v32, %v2583_v25  ;;  %v2590_v38 = vrot.slane %v2589_v7, 4  ;;  %v12087_v3 = vmax.f32 %v2572_v9, %v2573_v39  ;;  %v2538_v61 = vrot.slane %v2537_v44, 1 }
 0x331   :  { %v12090_v34 = vmax.f32 %v2530_v58, %v2531_v6  ;;  %v12092_v36 = vmax.f32 %v2579_v24, %v2580_v16  ;;  %v2597_v0 = vrot.slane %v2596_v15, 4  ;;  %v3583_v41 = vsel %vm3555_vm14, %v12033_v28, %v15271_v46 }
 0x332   :  { %v2585_v50 = vrot.slane %v2584_v21, 2  ;;  %v2591_v22 = vmax.f32 %v2589_v7, %v2590_v38  ;;  %v12097_v53 = vmax.f32 %v2537_v44, %v2538_v61  ;;  %v2545_v59 = vrot.slane %v2544_v19, 1 }
 0x333   :  { %v2598_v26 = vmax.f32 %v2596_v15, %v2597_v0  ;;  %v3584_v4 = vsel %vm3557_vm15, %v12045_v62, %v3583_v41  ;;  %v3590_v32 = vsel %vm3555_vm14, %v12065_v43, %v15272_v35  ;;  %v3842_v37 = vpack.c.bf16 %v15251_v47, %v15251_v47 }
 0x334   :  { %v2586_v9 = vmax.f32 %v2584_v21, %v2585_v50  ;;  %v2592_v12 = vrot.slane %v2591_v22, 2  ;;  %v2546_v63 = vmax.f32 %v2544_v19, %v2545_v59  ;;  %v3585_v58 = vsel %vm3559_vm0, %v12059_v31, %v3584_v4 }
 0x335   :  { %v2599_v39 = vrot.slane %v2598_v26, 2  ;;  %v3586_v24 = vsel %vm3561_vm1, %v12067_v45, %v3585_v58  ;;  %v3591_v40 = vsel %vm3557_vm15, %v12081_v14, %v3590_v32  ;;  %v3843_v7 = vpack.c.bf16 %v15252_v20, %v15252_v20 }
 0x336   :  { %v2587_v17 = vrot.slane %v2586_v9, 1  ;;  %v2593_v25 = vmax.f32 %v2591_v22, %v2592_v12  ;;  %v3587_v47 = vsel %vm3563_vm2, %v12090_v34, %v3586_v24  ;;  %v3592_v21 = vsel %vm3559_vm0, %v12087_v3, %v3591_v40 }
 0x337   :  { %v2600_v38 = vmax.f32 %v2598_v26, %v2599_v39  ;;  %v3588_v6 = vsel %vm3565_vm3, %v12097_v53, %v3587_v47  ;;  %v3593_v16 = vsel %vm3561_vm1, %v12092_v36, %v3592_v21  ;;  %v3844_v15 = vpack.c.bf16 %v15254_v60, %v15254_v60 }
 0x338   :  { %v12114_v44 = vmax.f32 %v2586_v9, %v2587_v17  ;;  %v2594_v10 = vrot.slane %v2593_v25, 1  ;;  %v12129_v61 = vsel %vm3567_vm6, %v2546_v63, %v3588_v6  ;;  %v3845_v50 = vpack.c.bf16 %v11896_v8, %v11896_v8 }
 0x339   :  { %v2601_v22 = vrot.slane %v2600_v38, 1  ;;  %v3757_v0 = vrot.slane %v12129_v61, 1  ;;  %v3846_v41 = vpack.c.bf16 %v11906_v33, %v11906_v33  ;;  %v3847_v60 = vpack.c.bf16 %v11924_v54, %v11924_v54 }
 0x33a   :  { %v12126_v20 = vmax.f32 %v2593_v25, %v2594_v10  ;;  %v3594_v19 = vsel %vm3563_vm2, %v12114_v44, %v3593_v16  ;;  %v3848_v9 = vpack.c.bf16 %v11932_v27, %v11932_v27  ;;  %v3849_v12 = vpack.c.bf16 %v11965_v51, %v11965_v51 }
 0x33b   :  { %v3850_v8 = vpack.c.bf16 %v15271_v46, %v15271_v46  ;;  %v12148_v26 = vmax.f32 %v2600_v38, %v2601_v22  ;;  %v15273_v4 = vrot.slane %v11993_v1, 1  ;;  %v3851_v54 = vpack.c.bf16 %v12033_v28, %v12033_v28  ;;  %v15274_v22 = vld [vmem:[#allocation14_spill] sm:$0xff] }
 0x33c   :  { %v3595_v59 = vsel %vm3565_vm3, %v12126_v20, %v3594_v19  ;;  %v3852_v32 = vpack.c.bf16 %v12045_v62, %v12045_v62  ;;  %v3853_v27 = vpack.c.bf16 %v12059_v31, %v12059_v31  ;;  %v3854_v51 = vpack.c.bf16 %v12067_v45, %v12067_v45 }
 0x33d   :  { %v3782_v33 = vsel %vm1166_vm4, %v15273_v4, %v3757_v0  ;;  %v3855_v46 = vpack.c.bf16 %v12090_v34, %v12090_v34  ;;  %v3856_v17 = vpack.c.bf16 %v12097_v53, %v12097_v53  ;;  %v12168_v25 = vsel %vm3567_vm6, %v12148_v26, %v3595_v59 }
 0x33e   :  { %v3857_v28 = vpack.c.bf16 %v2546_v63, %v2546_v63  ;;  %v4115_v58 = vunpack.c.l.b16 %v3842_v37  ;;  %v4116_v39 = vunpack.c.l.b16 %v3843_v7  ;;  %v3758_v62 = vrot.slane %v12168_v25, 1 }
 0x33f   :  { %v4117_v24 = vunpack.c.l.b16 %v3844_v15  ;;  %v4118_v31 = vunpack.c.l.b16 %v3845_v50  ;;  %v4119_v40 = vunpack.c.l.b16 %v3846_v41  ;;  %v4120_v10 = vunpack.c.l.b16 %v3847_v60 }
 0x340   :  { %v4121_v45 = vunpack.c.l.b16 %v3848_v9  ;;  %v4122_v47 = vunpack.c.l.b16 %v3849_v12  ;;  %v4123_v21 = vunpack.c.l.b16 %v3850_v8  ;;  %v3781_v34 = vsel %vm1166_vm4, %v3757_v0, %v3758_v62  ;;  %v15275_v0 = vld [vmem:[#allocation15_spill] sm:$0xff]  ;;  %v15276_v12 = vld [vmem:[#allocation40_spill] sm:$0xff] }
 0x341   :  { %v4124_v53 = vunpack.c.l.b16 %v3851_v54  ;;  %v4125_v38 = vunpack.c.l.b16 %v3852_v32  ;;  %v4126_v6 = vunpack.c.l.b16 %v3853_v27  ;;  %v4550_v63 = vpack.c.bf16 %v3781_v34, %v3782_v33  ;;  %v15278_v32 = vld [vmem:[#allocation41_spill] sm:$0xff] }
 0x342   :  { %v4127_v37 = vunpack.c.l.b16 %v3854_v51  ;;  %v4128_v7 = vunpack.c.l.b16 %v3855_v46  ;;  %v4129_v16 = vunpack.c.l.b16 %v3856_v17  ;;  %v4130_v19 = vunpack.c.l.b16 %v3857_v28  ;;  %v15279_v51 = vld [vmem:[#allocation38_spill] sm:$0xff] }
 0x343   :  { %v4241_v15 = vsel %vm3555_vm14, %v4116_v39, %v4115_v58  ;;  %v4248_v50 = vsel %vm3555_vm14, %v4124_v53, %v4123_v21  ;;  %v2165_v41 = vrot.slane %v15274_v22, 6  ;;  %4635 = vmatmul.bf16.gmra.mxu0 %v4550_v63  ;;  %v2171_v9 = vrot.slane %v15275_v0, 6  ;;  %v15281_v39 = vld [vmem:[#allocation39_spill] sm:$0xff] }
 0x344   :  { %v4242_v60 = vsel %vm3557_vm15, %v4117_v24, %v4241_v15  ;;  %v4249_v59 = vsel %vm3557_vm15, %v4125_v38, %v4248_v50  ;;  %v15277_v8 = vrot.slane %v15276_v12, 1  ;;  %v2622_v27 = vrot.slane %v15278_v32, 1 }
 0x345   :  { %v4243_v33 = vsel %vm3559_vm0, %v4118_v31, %v4242_v60  ;;  %v4250_v54 = vsel %vm3559_vm0, %v4126_v6, %v4249_v59  ;;  %v15280_v46 = vrot.slane %v15279_v51, 2  ;;  %v2634_v24 = vrot.slane %v15281_v39, 2 }
 0x346   :  { %v12184_v4 = vmax.f32 %v15276_v12, %v15277_v8  ;;  %v4244_v28 = vsel %vm3561_vm1, %v4119_v40, %v4243_v33  ;;  %v4251_v58 = vsel %vm3561_vm1, %v4127_v37, %v4250_v54  ;;  %v15282_v21 = vrot.slane %v15274_v22, 2 }
 0x347   :  { %v2628_v17 = vmax.f32 %v15279_v51, %v15280_v46  ;;  %v4245_v31 = vsel %vm3563_vm2, %v4120_v10, %v4244_v28  ;;  %v4252_v53 = vsel %vm3563_vm2, %v4128_v7, %v4251_v58  ;;  %v12201_v38 = vmax.f32 %v15278_v32, %v2622_v27 }
 0x348   :  { %v2638_v34 = vsel %vm2322_vm10, %v15282_v21, -inf  ;;  %v4246_v63 = vsel %vm3565_vm3, %v4121_v45, %v4245_v31  ;;  %v4253_v40 = vsel %vm3565_vm3, %v4129_v16, %v4252_v53  ;;  %v2635_v37 = vmax.f32 %v15281_v39, %v2634_v24  ;;  %v15288_v24 = vld [vmem:[#allocation45_spill] sm:$0xff] }
 0x349   :  { %v2629_v6 = vrot.slane %v2628_v17, 1  ;;  %v2639_v15 = vrot.slane %v2638_v34, 4  ;;  %v4247_v50 = vsel %vm3567_vm6, %v4122_v47, %v4246_v63  ;;  %v4254_v60 = vsel %vm3567_vm6, %v4130_v19, %v4253_v40  ;;  %v15285_v47 = vld [vmem:[#allocation44_spill] sm:$0xff]  ;;  %v15286_v19 = vld [vmem:[#allocation43_spill] sm:$0xff]  ;;  %v9451_v31 = vld [vmem:[%s15107_s30 + $0x28] sm:$0xff] }
 0x34a   :  { %v15283_v10 = vrot.slane %v15274_v22, 4  ;;  %v4340_v12 = vpack.c.b16 %v4254_v60, %v4247_v50  ;;  %v2636_v8 = vrot.slane %v2635_v37, 1  ;;  %v2652_v45 = vsel %vm2322_vm10, %v2165_v41, -inf  ;;  %4502 = vmatpush.bf16.msrb.mxu3 %v9451_v31 }
 0x34b   :  { %v12208_v59 = vmax.f32 %v2628_v17, %v2629_v6  ;;  %v2640_v33 = vmax.f32 %v2638_v34, %v2639_v15  ;;  %v15284_v16 = vrot.slane %v11553_v42, 1  ;;  %v2678_v27 = vrot.slane %v15285_v47, 1 }
 0x34c   :  { %v2645_v7 = vsel %vm2322_vm10, %v15283_v10, -inf  ;;  %v15287_v51 = vrot.slane %v15286_v19, 2  ;;  %4416 = vmatmul.bf16.gmra.mxu3 %v4340_v12  ;;  %v12223_v22 = vmax.f32 %v2635_v37, %v2636_v8  ;;  %v2653_v58 = vrot.slane %v2652_v45, 4 }
 0x34d   :  { %v2646_v54 = vrot.slane %v2645_v7, 4  ;;  %v12217_v32 = vmax.f32 %v11553_v42, %v15284_v16  ;;  %v2641_v17 = vrot.slane %v2640_v33, 2  ;;  %v12226_v39 = vmax.f32 %v15285_v47, %v2678_v27 }
 0x34e   :  { %v2684_v46 = vmax.f32 %v15286_v19, %v15287_v51  ;;  %v2690_v21 = vrot.slane %v15288_v24, 2  ;;  %v15289_v42 = vrot.slane %v15275_v0, 2  ;;  %v2654_v63 = vmax.f32 %v2652_v45, %v2653_v58  ;;  %v15291_v45 = vld [vmem:[#allocation42_spill] sm:$0xff] }
 0x34f   :  { %v2647_v28 = vmax.f32 %v2645_v7, %v2646_v54  ;;  %v2642_v53 = vmax.f32 %v2640_v33, %v2641_v17  ;;  %v15290_v50 = vrot.slane %v15275_v0, 4  ;;  %v2708_v10 = vsel %vm2322_vm10, %v2171_v9, -inf }
 0x350   :  { %v2685_v41 = vrot.slane %v2684_v46, 1  ;;  %v2694_v34 = vsel %vm2322_vm10, %v15289_v42, -inf  ;;  %v2691_v15 = vmax.f32 %v15288_v24, %v2690_v21  ;;  %v2655_v8 = vrot.slane %v2654_v63, 2 }
 0x351   :  { %v2648_v6 = vrot.slane %v2647_v28, 2  ;;  %v2695_v40 = vrot.slane %v2694_v34, 4  ;;  %v2701_v60 = vsel %vm2322_vm10, %v15290_v50, -inf  ;;  %v2643_v7 = vrot.slane %v2642_v53, 1 }
 0x352   :  { %v12235_v37 = vmax.f32 %v2684_v46, %v2685_v41  ;;  %v2692_v16 = vrot.slane %v2691_v15, 1  ;;  %v2702_v33 = vrot.slane %v2701_v60, 4  ;;  %v2709_v47 = vrot.slane %v2708_v10, 4 }
 0x353   :  { %v2649_v12 = vmax.f32 %v2647_v28, %v2648_v6  ;;  %v2696_v54 = vmax.f32 %v2694_v34, %v2695_v40  ;;  %v3597_v27 = vsel %vm3555_vm14, %v12184_v4, %v15291_v45  ;;  %v12245_v19 = vmax.f32 %v2642_v53, %v2643_v7  ;;  %v15292_v6 = vld [vmem:[#allocation48_spill] sm:$0xff] }
 0x354   :  { %v2656_v0 = vmax.f32 %v2654_v63, %v2655_v8  ;;  %v12247_v17 = vmax.f32 %v2691_v15, %v2692_v16  ;;  %v2703_v9 = vmax.f32 %v2701_v60, %v2702_v33  ;;  %v2710_v58 = vmax.f32 %v2708_v10, %v2709_v47 }
 0x355   :  { %v2650_v51 = vrot.slane %v2649_v12, 1  ;;  %v2697_v46 = vrot.slane %v2696_v54, 2  ;;  %v3598_v28 = vsel %vm3557_vm15, %v12201_v38, %v3597_v27  ;;  %v3604_v63 = vsel %vm3555_vm14, %v12217_v32, %v15292_v6 }
 0x356   :  { %v2657_v24 = vrot.slane %v2656_v0, 1  ;;  %v3599_v42 = vsel %vm3559_vm0, %v12208_v59, %v3598_v28  ;;  %v2704_v34 = vrot.slane %v2703_v9, 2  ;;  %v2711_v31 = vrot.slane %v2710_v58, 2 }
 0x357   :  { %v2651_v41 = vmax.f32 %v2649_v12, %v2650_v51  ;;  %v2698_v21 = vmax.f32 %v2696_v54, %v2697_v46  ;;  %v3600_v53 = vsel %vm3561_vm1, %v12223_v22, %v3599_v42  ;;  %v3605_v60 = vsel %vm3557_vm15, %v12226_v39, %v3604_v63 }
 0x358   :  { %v2658_v40 = vmax.f32 %v2656_v0, %v2657_v24  ;;  %v3601_v50 = vsel %vm3563_vm2, %v12245_v19, %v3600_v53  ;;  %v2705_v10 = vmax.f32 %v2703_v9, %v2704_v34  ;;  %v2712_v7 = vmax.f32 %v2710_v58, %v2711_v31 }
 0x359   :  { %v2699_v15 = vrot.slane %v2698_v21, 1  ;;  %v3602_v12 = vsel %vm3565_vm3, %v2651_v41, %v3601_v50  ;;  %v3606_v8 = vsel %vm3559_vm0, %v12235_v37, %v3605_v60  ;;  %v3858_v47 = vpack.c.bf16 %v15272_v35, %v15272_v35 }
 0x35a   :  { %v12268_v16 = vsel %vm3567_vm6, %v2658_v40, %v3602_v12  ;;  %v3607_v33 = vsel %vm3561_vm1, %v12247_v17, %v3606_v8  ;;  %v2706_v27 = vrot.slane %v2705_v10, 1  ;;  %v2713_v51 = vrot.slane %v2712_v7, 1 }
 0x35b   :  { %v12265_v54 = vmax.f32 %v2698_v21, %v2699_v15  ;;  %v3759_v0 = vrot.slane %v12268_v16, 1  ;;  %v3859_v46 = vpack.c.bf16 %v12065_v43, %v12065_v43  ;;  %v3860_v58 = vpack.c.bf16 %v12081_v14, %v12081_v14 }
 0x35c   :  { %v3861_v28 = vpack.c.bf16 %v12087_v3, %v12087_v3  ;;  %v3862_v24 = vpack.c.bf16 %v12092_v36, %v12092_v36  ;;  %v12285_v35 = vmax.f32 %v2705_v10, %v2706_v27  ;;  %v12287_v21 = vmax.f32 %v2712_v7, %v2713_v51 }
 0x35d   :  { %v3608_v9 = vsel %vm3563_vm2, %v12265_v54, %v3607_v33  ;;  %v3780_v43 = vsel %vm1166_vm4, %v3758_v62, %v3759_v0  ;;  %v3863_v42 = vpack.c.bf16 %v12114_v44, %v12114_v44  ;;  %v3864_v14 = vpack.c.bf16 %v12126_v20, %v12126_v20 }
 0x35e   :  { %v3865_v3 = vpack.c.bf16 %v12148_v26, %v12148_v26  ;;  %v3866_v36 = vpack.c.bf16 %v15291_v45, %v15291_v45  ;;  %v3867_v34 = vpack.c.bf16 %v12184_v4, %v12184_v4  ;;  %v3609_v31 = vsel %vm3565_vm3, %v12285_v35, %v3608_v9 }
 0x35f   :  { %v3868_v62 = vpack.c.bf16 %v12201_v38, %v12201_v38  ;;  %v3869_v44 = vpack.c.bf16 %v12208_v59, %v12208_v59  ;;  %v3870_v20 = vpack.c.bf16 %v12223_v22, %v12223_v22  ;;  %v12313_v26 = vsel %vm3567_vm6, %v12287_v21, %v3609_v31 }
 0x360   :  { %v3871_v45 = vpack.c.bf16 %v12245_v19, %v12245_v19  ;;  %v3872_v4 = vpack.c.bf16 %v2651_v41, %v2651_v41  ;;  %v3873_v53 = vpack.c.bf16 %v2658_v40, %v2658_v40  ;;  %v3760_v63 = vrot.slane %v12313_v26, 1 }
 0x361   :  { %v4131_v15 = vunpack.c.l.b16 %v3858_v47  ;;  %v4132_v50 = vunpack.c.l.b16 %v3859_v46  ;;  %v4133_v38 = vunpack.c.l.b16 %v3860_v58  ;;  %v4134_v60 = vunpack.c.l.b16 %v3861_v28 }
 0x362   :  { %v4135_v10 = vunpack.c.l.b16 %v3862_v24  ;;  %v4136_v59 = vunpack.c.l.b16 %v3863_v42  ;;  %v4137_v7 = vunpack.c.l.b16 %v3864_v14  ;;  %v3779_v22 = vsel %vm1166_vm4, %v3759_v0, %v3760_v63  ;;  %v15294_v0 = vld [vmem:[#allocation16_spill] sm:$0xff] }
 0x363   :  { %v4138_v12 = vunpack.c.l.b16 %v3865_v3  ;;  %v4139_v8 = vunpack.c.l.b16 %v3866_v36  ;;  %v4140_v33 = vunpack.c.l.b16 %v3867_v34  ;;  %v4551_v19 = vpack.c.bf16 %v3779_v22, %v3780_v43  ;;  %v15295_v36 = vld [vmem:[#allocation49_spill] sm:$0xff] }
 0x364   :  { %v4141_v41 = vunpack.c.l.b16 %v3868_v62  ;;  %v4142_v40 = vunpack.c.l.b16 %v3869_v44  ;;  %v4143_v27 = vunpack.c.l.b16 %v3870_v20  ;;  %v4144_v51 = vunpack.c.l.b16 %v3871_v45  ;;  %v15297_v20 = vld [vmem:[#allocation51_spill] sm:$0xff] }
 0x365   :  { %v4145_v47 = vunpack.c.l.b16 %v3872_v4  ;;  %v4146_v46 = vunpack.c.l.b16 %v3873_v53  ;;  %v4255_v9 = vsel %vm3555_vm14, %v4132_v50, %v4131_v15  ;;  %4640 = vmatmul.bf16.gmra.mxu0 %v4551_v19  ;;  %v4262_v28 = vsel %vm3555_vm14, %v4140_v33, %v4139_v8  ;;  %v15298_v4 = vld [vmem:[#allocation47_spill] sm:$0xff]  ;;  %v15301_v8 = vld [vmem:[#allocation46_spill] sm:$0xff] }
 0x366   :  { %v4256_v58 = vsel %vm3557_vm15, %v4133_v38, %v4255_v9  ;;  %v12326_v24 = vadd.s32 56, %v15256_v29  ;;  %v2176_v42 = vrot.slane %v15294_v0, 4  ;;  %v4263_v14 = vsel %vm3557_vm15, %v4141_v41, %v4262_v28 }
 0x367   :  { %v4257_v43 = vsel %vm3559_vm0, %v4134_v60, %v4256_v58  ;;  %v2177_v3 = vrot.slane %v15294_v0, 6  ;;  %v15296_v34 = vrot.slane %v15295_v36, 1  ;;  %v4264_v44 = vsel %vm3559_vm0, %v4142_v40, %v4263_v14  ;;  %v15300_v60 = vld [vmem:[#allocation50_spill] sm:$0xff] }
 0x368   :  { %15293 = vst [vmem:[#allocation26_spill] sm:$0xff] %v12326_v24  ;;  %v4258_v62 = vsel %vm3561_vm1, %v4135_v10, %v4257_v43  ;;  %v2727_v45 = vrot.slane %v15297_v20, 1  ;;  %v15299_v53 = vrot.slane %v15298_v4, 2  ;;  %v4265_v38 = vsel %vm3561_vm1, %v4143_v27, %v4264_v44 }
 0x369   :  { %v12335_v31 = vmax.f32 %v15295_v36, %v15296_v34  ;;  %v4259_v50 = vsel %vm3563_vm2, %v4136_v59, %v4258_v62  ;;  %v2739_v22 = vrot.slane %v15300_v60, 2  ;;  %v15302_v33 = vrot.slane %v15301_v8, 4 }
 0x36a   :  { %v2733_v15 = vmax.f32 %v15298_v4, %v15299_v53  ;;  %v4260_v10 = vsel %vm3565_vm3, %v4137_v7, %v4259_v50  ;;  %v4266_v41 = vsel %vm3563_vm2, %v4144_v51, %v4265_v38  ;;  %v12352_v40 = vmax.f32 %v15297_v20, %v2727_v45 }
 0x36b   :  { %v2745_v19 = vmax.f32 %v15301_v8, %v15302_v33  ;;  %v4261_v58 = vsel %vm3567_vm6, %v4138_v12, %v4260_v10  ;;  %v4267_v59 = vsel %vm3565_vm3, %v4145_v47, %v4266_v41  ;;  %v2740_v27 = vmax.f32 %v15300_v60, %v2739_v22  ;;  %v15306_v10 = vld [vmem:[#allocation17_spill] sm:$0xff] }
 0x36c   :  { %v2734_v9 = vrot.slane %v2733_v15, 1  ;;  %v4268_v43 = vsel %vm3567_vm6, %v4146_v46, %v4267_v59  ;;  %v15303_v36 = vrot.slane %v15294_v0, 2  ;;  %v2757_v51 = vsel %vm2322_vm10, %v2176_v42, -inf  ;;  %v9450_v0 = vld [vmem:[%s15107_s30 + $0x20] sm:$0xff] }
 0x36d   :  { %v2746_v28 = vrot.slane %v2745_v19, 2  ;;  %v4341_v34 = vpack.c.b16 %v4268_v43, %v4261_v58  ;;  %v2741_v62 = vrot.slane %v2740_v27, 1  ;;  %v2758_v12 = vrot.slane %v2757_v51, 4  ;;  %4503 = vmatpush.bf16.msrb.mxu3 %v9450_v0 }
 0x36e   :  { %v12358_v14 = vmax.f32 %v2733_v15, %v2734_v9  ;;  %v2750_v7 = vsel %vm2322_vm10, %v15303_v36, -inf  ;;  %v2764_v47 = vsel %vm2322_vm10, %v2177_v3, -inf  ;;  %v15304_v45 = vrot.slane %v11607_v48, 1 }
 0x36f   :  { %v2747_v44 = vmax.f32 %v2745_v19, %v2746_v28  ;;  %v2751_v20 = vrot.slane %v2750_v7, 4  ;;  %v2804_v46 = vrot.slane %v11613_v30, 1  ;;  %4421 = vmatmul.bf16.gmra.mxu3 %v4341_v34  ;;  %v12374_v42 = vmax.f32 %v2740_v27, %v2741_v62 }
 0x370   :  { %v12368_v4 = vmax.f32 %v11607_v48, %v15304_v45  ;;  %v2765_v50 = vrot.slane %v2764_v47, 4  ;;  %v2759_v38 = vmax.f32 %v2757_v51, %v2758_v12  ;;  %v2809_v60 = vrot.slane %v11604_v52, 2 }
 0x371   :  { %v2748_v53 = vrot.slane %v2747_v44, 1  ;;  %v2752_v15 = vmax.f32 %v2750_v7, %v2751_v20  ;;  %v12377_v3 = vmax.f32 %v11613_v30, %v2804_v46  ;;  %v15305_v48 = vrot.slane %v11600_v13, 4 }
 0x372   :  { %v2766_v19 = vmax.f32 %v2764_v47, %v2765_v50  ;;  %v15307_v41 = vrot.slane %v15306_v10, 6  ;;  %v2760_v58 = vrot.slane %v2759_v38, 2  ;;  %v2810_v59 = vmax.f32 %v11604_v52, %v2809_v60 }
 0x373   :  { %v2815_v22 = vmax.f32 %v11600_v13, %v15305_v48  ;;  %v12383_v8 = vmax.f32 %v2747_v44, %v2748_v53  ;;  %v2753_v33 = vrot.slane %v2752_v15, 2  ;;  %v3272_v36 = vand.u32 63, %v12326_v24 }
 0x374   :  { %v2820_v9 = vsel %vm2322_vm10, %v15307_v41, -inf  ;;  %v2767_v43 = vrot.slane %v2766_v19, 2  ;;  %v3611_v13 = vsel %vm3555_vm14, %v12352_v40, %v12335_v31  ;;  %v2761_v7 = vmax.f32 %v2759_v38, %v2760_v58 }
 0x375   :  { %v2816_v30 = vrot.slane %v2815_v22, 2  ;;  %v2821_v27 = vrot.slane %v2820_v9, 4  ;;  %v2754_v28 = vmax.f32 %v2752_v15, %v2753_v33  ;;  %v2811_v51 = vrot.slane %v2810_v59, 1 }
 0x376   :  { %v2768_v20 = vmax.f32 %v2766_v19, %v2767_v43  ;;  %v3612_v12 = vsel %vm3557_vm15, %v12358_v14, %v3611_v13  ;;  %v3618_v52 = vsel %vm3555_vm14, %v11620_v2, %v11618_v49  ;;  %v2762_v47 = vrot.slane %v2761_v7, 1 }
 0x377   :  { %v2817_v34 = vmax.f32 %v2815_v22, %v2816_v30  ;;  %v2822_v62 = vmax.f32 %v2820_v9, %v2821_v27  ;;  %v2755_v44 = vrot.slane %v2754_v28, 1  ;;  %v12398_v45 = vmax.f32 %v2810_v59, %v2811_v51 }
 0x378   :  { %v2769_v15 = vrot.slane %v2768_v20, 1  ;;  %v3613_v50 = vsel %vm3559_vm0, %v12374_v42, %v3612_v12  ;;  %v3619_v38 = vsel %vm3557_vm15, %v11622_v55, %v3618_v52  ;;  %v2763_v60 = vmax.f32 %v2761_v7, %v2762_v47 }
 0x379   :  { %v2818_v46 = vrot.slane %v2817_v34, 1  ;;  %v2823_v0 = vrot.slane %v2822_v62, 2  ;;  %v2756_v53 = vmax.f32 %v2754_v28, %v2755_v44  ;;  %v3614_v33 = vsel %vm3561_vm1, %v12383_v8, %v3613_v50 }
 0x37a   :  { %v2770_v19 = vmax.f32 %v2768_v20, %v2769_v15  ;;  %v3620_v41 = vsel %vm3559_vm0, %v12368_v4, %v3619_v38  ;;  %vm12411_vm7 = vcmp.eq.s32.totalorder %v3272_v36, 63  ;;  %v3874_v27 = vpack.c.bf16 %v15292_v6, %v15292_v6 }
 0x37b   :  { %v12404_v48 = vmax.f32 %v2817_v34, %v2818_v46  ;;  %v2824_v22 = vmax.f32 %v2822_v62, %v2823_v0  ;;  %v3615_v10 = vsel %vm3563_vm2, %v2756_v53, %v3614_v33  ;;  %v3621_v30 = vsel %vm3561_vm1, %v12377_v3, %v3620_v41 }
 0x37c   :  { %v3616_v59 = vsel %vm3565_vm3, %v2763_v60, %v3615_v10  ;;  %v3622_v43 = vsel %vm3563_vm2, %v12398_v45, %v3621_v30  ;;  %v3875_v36 = vpack.c.bf16 %v12217_v32, %v12217_v32  ;;  %v3876_v13 = vpack.c.bf16 %v12226_v39, %v12226_v39 }
 0x37d   :  { %v2825_v58 = vrot.slane %v2824_v22, 1  ;;  %v12421_v28 = vsel %vm3567_vm6, %v2770_v19, %v3616_v59  ;;  %v3623_v51 = vsel %vm3565_vm3, %v12404_v48, %v3622_v43  ;;  %v3877_v6 = vpack.c.bf16 %v12235_v37, %v12235_v37 }
 0x37e   :  { %v3761_v34 = vrot.slane %v12421_v28, 1  ;;  %v3878_v62 = vpack.c.bf16 %v12247_v17, %v12247_v17  ;;  %v3879_v44 = vpack.c.bf16 %v12265_v54, %v12265_v54  ;;  %v3880_v32 = vpack.c.bf16 %v12285_v35, %v12285_v35 }
 0x37f   :  { %v12429_v7 = vmax.f32 %v2824_v22, %v2825_v58  ;;  %v3881_v39 = vpack.c.bf16 %v12287_v21, %v12287_v21  ;;  %v3882_v17 = vpack.c.bf16 %v12335_v31, %v12335_v31  ;;  %v3883_v54 = vpack.c.bf16 %v12352_v40, %v12352_v40 }
 0x380   :  { %v3778_v37 = vsel %vm1166_vm4, %v3760_v63, %v3761_v34  ;;  %v3884_v21 = vpack.c.bf16 %v12358_v14, %v12358_v14  ;;  %v3885_v12 = vpack.c.bf16 %v12374_v42, %v12374_v42  ;;  %v3886_v52 = vpack.c.bf16 %v12383_v8, %v12383_v8 }
 0x381   :  { %v12446_v20 = vsel %vm3567_vm6, %v12429_v7, %v3623_v51  ;;  %v3887_v47 = vpack.c.bf16 %v2756_v53, %v2756_v53  ;;  %v3888_v46 = vpack.c.bf16 %v2763_v60, %v2763_v60  ;;  %v3889_v63 = vpack.c.bf16 %v2770_v19, %v2770_v19 }
 0x382   :  { %v3762_v35 = vrot.slane %v12446_v20, 1  ;;  %v4147_v0 = vunpack.c.l.b16 %v3874_v27  ;;  %v4148_v40 = vunpack.c.l.b16 %v3875_v36  ;;  %v4149_v15 = vunpack.c.l.b16 %v3876_v13  ;;  %v15310_v13 = vld [vmem:[#allocation18_spill] sm:$0xff] }
 0x383   :  { %v4150_v50 = vunpack.c.l.b16 %v3877_v6  ;;  %v4151_v42 = vunpack.c.l.b16 %v3878_v62  ;;  %v4152_v38 = vunpack.c.l.b16 %v3879_v44  ;;  %v4153_v22 = vunpack.c.l.b16 %v3880_v32 }
 0x384   :  { %v3777_v31 = vsel %vm1166_vm4, %v3761_v34, %v3762_v35  ;;  %v4154_v53 = vunpack.c.l.b16 %v3881_v39  ;;  %v4155_v60 = vunpack.c.l.b16 %v3882_v17  ;;  %v4156_v33 = vunpack.c.l.b16 %v3883_v54 }
 0x385   :  { %v3793_v14 = vsel %vm12411_vm7, %v12421_v28, %v3777_v31  ;;  %v4157_v19 = vunpack.c.l.b16 %v3884_v21  ;;  %v4158_v10 = vunpack.c.l.b16 %v3885_v12  ;;  %v4159_v41 = vunpack.c.l.b16 %v3886_v52  ;;  %v15313_v21 = vld [vmem:[#allocation52_spill] sm:$0xff] }
 0x386   :  { %v4552_v8 = vpack.c.bf16 %v3793_v14, %v3778_v37  ;;  %v4160_v58 = vunpack.c.l.b16 %v3887_v47  ;;  %v4161_v59 = vunpack.c.l.b16 %v3888_v46  ;;  %v4162_v30 = vunpack.c.l.b16 %v3889_v63 }
 0x387   :  { %v4269_v27 = vsel %vm3555_vm14, %v4148_v40, %v4147_v0  ;;  %v4276_v43 = vsel %vm3555_vm14, %v4156_v33, %v4155_v60  ;;  %v2189_v51 = vrot.slane %v15310_v13, 6  ;;  %v15311_v34 = vrot.slane %v11640_v57, 1 }
 0x388   :  { %4645 = vmatmul.bf16.gmra.mxu0 %v4552_v8  ;;  %v4270_v9 = vsel %vm3557_vm15, %v4149_v15, %v4269_v27  ;;  %v4277_v36 = vsel %vm3557_vm15, %v4157_v19, %v4276_v43  ;;  %v2846_v32 = vrot.slane %v11653_v18, 1  ;;  %v15312_v39 = vrot.slane %v11642_v56, 2 }
 0x389   :  { %v12478_v6 = vmax.f32 %v11640_v57, %v15311_v34  ;;  %v4271_v62 = vsel %vm3559_vm0, %v4150_v50, %v4270_v9  ;;  %v4278_v44 = vsel %vm3559_vm0, %v4158_v10, %v4277_v36  ;;  %v2858_v12 = vrot.slane %v15313_v21, 2  ;;  %v15319_v34 = vld [vmem:[#allocation56_spill] sm:$0xff] }
 0x38a   :  { %v2852_v37 = vmax.f32 %v11642_v56, %v15312_v39  ;;  %v4272_v17 = vsel %vm3561_vm1, %v4151_v42, %v4271_v62  ;;  %v4279_v54 = vsel %vm3561_vm1, %v4159_v41, %v4278_v44  ;;  %v15314_v52 = vrot.slane %v15310_v13, 2 }
 0x38b   :  { %v4273_v47 = vsel %vm3563_vm2, %v4152_v38, %v4272_v17  ;;  %v4280_v46 = vsel %vm3563_vm2, %v4160_v58, %v4279_v54  ;;  %v12495_v63 = vmax.f32 %v11653_v18, %v2846_v32  ;;  %v2859_v40 = vmax.f32 %v15313_v21, %v2858_v12  ;;  %v15317_v58 = vld [vmem:[#allocation55_spill] sm:$0xff]  ;;  %v15321_v32 = vld [vmem:[#allocation54_spill] sm:$0xff] }
 0x38c   :  { %v2862_v57 = vsel %vm2322_vm10, %v15314_v52, -inf  ;;  %v2853_v0 = vrot.slane %v2852_v37, 1  ;;  %v4274_v56 = vsel %vm3565_vm3, %v4153_v22, %v4273_v47  ;;  %v4281_v31 = vsel %vm3565_vm3, %v4161_v59, %v4280_v46  ;;  %v15323_v12 = vld [vmem:[#allocation19_spill] sm:$0xff] }
 0x38d   :  { %v2863_v15 = vrot.slane %v2862_v57, 4  ;;  %v4275_v50 = vsel %vm3567_vm6, %v4154_v53, %v4274_v56  ;;  %v4282_v14 = vsel %vm3567_vm6, %v4162_v30, %v4281_v31  ;;  %v15315_v38 = vrot.slane %v15310_v13, 4  ;;  %v9449_v13 = vld [vmem:[%s15107_s30 + $0x18] sm:$0xff] }
 0x38e   :  { %v12502_v42 = vmax.f32 %v2852_v37, %v2853_v0  ;;  %v4342_v18 = vpack.c.b16 %v4282_v14, %v4275_v50  ;;  %v2860_v60 = vrot.slane %v2859_v40, 1  ;;  %v2876_v22 = vsel %vm2322_vm10, %v2189_v51, -inf  ;;  %4504 = vmatpush.bf16.msrb.mxu3 %v9449_v13  ;;  %v15327_v13 = vld [vmem:[#allocation57_spill] sm:$0xff] }
 0x38f   :  { %v2869_v8 = vsel %vm2322_vm10, %v15315_v38, -inf  ;;  %v2864_v33 = vmax.f32 %v2862_v57, %v2863_v15  ;;  %v15316_v10 = vrot.slane %v11673_v5, 1  ;;  %v2902_v53 = vrot.slane %v11675_v11, 1 }
 0x390   :  { %v2870_v19 = vrot.slane %v2869_v8, 4  ;;  %v15318_v59 = vrot.slane %v15317_v58, 2  ;;  %4426 = vmatmul.bf16.gmra.mxu3 %v4342_v18  ;;  %v12517_v27 = vmax.f32 %v2859_v40, %v2860_v60  ;;  %v2877_v36 = vrot.slane %v2876_v22, 4 }
 0x391   :  { %v12511_v41 = vmax.f32 %v11673_v5, %v15316_v10  ;;  %v2865_v43 = vrot.slane %v2864_v33, 2  ;;  %v12523_v51 = vmax.f32 %v11675_v11, %v2902_v53  ;;  %v15320_v62 = vrot.slane %v15319_v34, 2 }
 0x392   :  { %v2908_v30 = vmax.f32 %v15317_v58, %v15318_v59  ;;  %v2871_v9 = vmax.f32 %v2869_v8, %v2870_v19  ;;  %v15322_v39 = vrot.slane %v15321_v32, 4  ;;  %v2878_v21 = vmax.f32 %v2876_v22, %v2877_v36  ;;  %v15326_v22 = vld [vmem:[#allocation53_spill] sm:$0xff] }
 0x393   :  { %v2915_v44 = vmax.f32 %v15319_v34, %v15320_v62  ;;  %v2866_v17 = vmax.f32 %v2864_v33, %v2865_v43  ;;  %v15324_v52 = vrot.slane %v15323_v12, 4  ;;  %v15325_v15 = vrot.slane %v15323_v12, 6 }
 0x394   :  { %v2909_v5 = vrot.slane %v2908_v30, 1  ;;  %v2920_v37 = vmax.f32 %v15321_v32, %v15322_v39  ;;  %v2872_v54 = vrot.slane %v2871_v9, 2  ;;  %v2879_v40 = vrot.slane %v2878_v21, 2 }
 0x395   :  { %v2925_v57 = vsel %vm2322_vm10, %v15324_v52, -inf  ;;  %v2916_v11 = vrot.slane %v2915_v44, 1  ;;  %v2867_v56 = vrot.slane %v2866_v17, 1  ;;  %v2932_v50 = vsel %vm2322_vm10, %v15325_v15, -inf }
 0x396   :  { %v12534_v47 = vmax.f32 %v2908_v30, %v2909_v5  ;;  %v2921_v46 = vrot.slane %v2920_v37, 2  ;;  %v2926_v0 = vrot.slane %v2925_v57, 4  ;;  %v2873_v31 = vmax.f32 %v2871_v9, %v2872_v54 }
 0x397   :  { %v12539_v14 = vmax.f32 %v2915_v44, %v2916_v11  ;;  %v2933_v18 = vrot.slane %v2932_v50, 4  ;;  %v12541_v60 = vmax.f32 %v2866_v17, %v2867_v56  ;;  %v2880_v19 = vmax.f32 %v2878_v21, %v2879_v40 }
 0x398   :  { %v2922_v38 = vmax.f32 %v2920_v37, %v2921_v46  ;;  %v2927_v8 = vmax.f32 %v2925_v57, %v2926_v0  ;;  %v2874_v33 = vrot.slane %v2873_v31, 1  ;;  %v3625_v10 = vsel %vm3555_vm14, %v12478_v6, %v15326_v22 }
 0x399   :  { %v2934_v59 = vmax.f32 %v2932_v50, %v2933_v18  ;;  %v3626_v30 = vsel %vm3557_vm15, %v12495_v63, %v3625_v10  ;;  %v2881_v9 = vrot.slane %v2880_v19, 1  ;;  %v3632_v5 = vsel %vm3555_vm14, %v12511_v41, %v15327_v13 }
 0x39a   :  { %v2923_v53 = vrot.slane %v2922_v38, 1  ;;  %v2928_v58 = vrot.slane %v2927_v8, 2  ;;  %v2875_v43 = vmax.f32 %v2873_v31, %v2874_v33  ;;  %v3627_v36 = vsel %vm3559_vm0, %v12502_v42, %v3626_v30 }
 0x39b   :  { %v2935_v44 = vrot.slane %v2934_v59, 2  ;;  %v3628_v32 = vsel %vm3561_vm1, %v12517_v27, %v3627_v36  ;;  %v2882_v39 = vmax.f32 %v2880_v19, %v2881_v9  ;;  %v3633_v17 = vsel %vm3557_vm15, %v12523_v51, %v3632_v5 }
 0x39c   :  { %v12553_v34 = vmax.f32 %v2922_v38, %v2923_v53  ;;  %v2929_v62 = vmax.f32 %v2927_v8, %v2928_v58  ;;  %v3629_v37 = vsel %vm3563_vm2, %v12541_v60, %v3628_v32  ;;  %v3890_v54 = vpack.c.bf16 %v11618_v49, %v11618_v49 }
 0x39d   :  { %v2936_v12 = vmax.f32 %v2934_v59, %v2935_v44  ;;  %v3630_v52 = vsel %vm3565_vm3, %v2875_v43, %v3629_v37  ;;  %v3634_v57 = vsel %vm3559_vm0, %v12534_v47, %v3633_v17  ;;  %v3891_v0 = vpack.c.bf16 %v11620_v2, %v11620_v2 }
 0x39e   :  { %v2930_v21 = vrot.slane %v2929_v62, 1  ;;  %v12567_v11 = vsel %vm3567_vm6, %v2882_v39, %v3630_v52  ;;  %v3635_v46 = vsel %vm3561_vm1, %v12539_v14, %v3634_v57  ;;  %v3892_v56 = vpack.c.bf16 %v11622_v55, %v11622_v55  ;;  %v15328_v52 = vld [vmem:[#allocation61_spill] sm:$0xff] }
 0x39f   :  { %v2937_v31 = vrot.slane %v2936_v12, 1  ;;  %v3636_v40 = vsel %vm3563_vm2, %v12553_v34, %v3635_v46  ;;  %v3763_v15 = vrot.slane %v12567_v11, 1  ;;  %v3893_v50 = vpack.c.bf16 %v12368_v4, %v12368_v4 }
 0x3a0   :  { %v12575_v49 = vmax.f32 %v2929_v62, %v2930_v21  ;;  %v3894_v38 = vpack.c.bf16 %v12377_v3, %v12377_v3  ;;  %v3895_v2 = vpack.c.bf16 %v12398_v45, %v12398_v45  ;;  %v3896_v55 = vpack.c.bf16 %v12404_v48, %v12404_v48 }
 0x3a1   :  { %v12588_v8 = vmax.f32 %v2936_v12, %v2937_v31  ;;  %v3776_v33 = vsel %vm1166_vm4, %v3762_v35, %v3763_v15  ;;  %v3897_v4 = vpack.c.bf16 %v12429_v7, %v12429_v7  ;;  %v3898_v3 = vpack.c.bf16 %v15326_v22, %v15326_v22 }
 0x3a2   :  { %v3637_v18 = vsel %vm3565_vm3, %v12575_v49, %v3636_v40  ;;  %v3899_v45 = vpack.c.bf16 %v12478_v6, %v12478_v6  ;;  %v3900_v48 = vpack.c.bf16 %v12495_v63, %v12495_v63  ;;  %v3901_v19 = vpack.c.bf16 %v12502_v42, %v12502_v42 }
 0x3a3   :  { %v12608_v10 = vsel %vm3567_vm6, %v12588_v8, %v3637_v18  ;;  %v3902_v35 = vpack.c.bf16 %v12517_v27, %v12517_v27  ;;  %v3903_v7 = vpack.c.bf16 %v12541_v60, %v12541_v60  ;;  %v3904_v22 = vpack.c.bf16 %v2875_v43, %v2875_v43 }
 0x3a4   :  { %v3764_v53 = vrot.slane %v12608_v10, 1  ;;  %v3905_v6 = vpack.c.bf16 %v2882_v39, %v2882_v39  ;;  %v4163_v58 = vunpack.c.l.b16 %v3890_v54  ;;  %v4164_v59 = vunpack.c.l.b16 %v3891_v0  ;;  %v15330_v0 = vld [vmem:[#allocation62_spill] sm:$0xff] }
 0x3a5   :  { %v4165_v63 = vunpack.c.l.b16 %v3892_v56  ;;  %v4166_v30 = vunpack.c.l.b16 %v3893_v50  ;;  %v4167_v9 = vunpack.c.l.b16 %v3894_v38  ;;  %v4168_v42 = vunpack.c.l.b16 %v3895_v2  ;;  %v15333_v2 = vld [vmem:[#allocation60_spill] sm:$0xff] }
 0x3a6   :  { %v3775_v36 = vsel %vm1166_vm4, %v3763_v15, %v3764_v53  ;;  %v4169_v5 = vunpack.c.l.b16 %v3896_v55  ;;  %v4170_v27 = vunpack.c.l.b16 %v3897_v4  ;;  %v4171_v62 = vunpack.c.l.b16 %v3898_v3  ;;  %v15331_v15 = vld [vmem:[#allocation59_spill] sm:$0xff] }
 0x3a7   :  { %v4553_v44 = vpack.c.bf16 %v3775_v36, %v3776_v33  ;;  %v4172_v60 = vunpack.c.l.b16 %v3899_v45  ;;  %v4173_v43 = vunpack.c.l.b16 %v3900_v48  ;;  %v4174_v32 = vunpack.c.l.b16 %v3901_v19  ;;  %v15335_v45 = vld [vmem:[#allocation58_spill] sm:$0xff] }
 0x3a8   :  { %v4175_v37 = vunpack.c.l.b16 %v3902_v35  ;;  %v4176_v39 = vunpack.c.l.b16 %v3903_v7  ;;  %v4177_v17 = vunpack.c.l.b16 %v3904_v22  ;;  %v4178_v54 = vunpack.c.l.b16 %v3905_v6 }
 0x3a9   :  { %4650 = vmatmul.bf16.gmra.mxu0 %v4553_v44  ;;  %v4283_v21 = vsel %vm3555_vm14, %v4164_v59, %v4163_v58  ;;  %v4290_v12 = vsel %vm3555_vm14, %v4172_v60, %v4171_v62  ;;  %v15329_v57 = vrot.slane %v15328_v52, 1  ;;  %v2958_v56 = vrot.slane %v15330_v0, 1 }
 0x3aa   :  { %v4284_v31 = vsel %vm3557_vm15, %v4165_v63, %v4283_v21  ;;  %v4291_v40 = vsel %vm3557_vm15, %v4173_v43, %v4290_v12  ;;  %v15332_v50 = vrot.slane %v15331_v15, 2  ;;  %v15334_v55 = vrot.slane %v15333_v2, 2 }
 0x3ab   :  { %v12624_v46 = vmax.f32 %v15328_v52, %v15329_v57  ;;  %v4285_v33 = vsel %vm3559_vm0, %v4166_v30, %v4284_v31  ;;  %v4292_v4 = vsel %vm3559_vm0, %v4174_v32, %v4291_v40  ;;  %v12638_v3 = vmax.f32 %v15330_v0, %v2958_v56  ;;  %v15337_v30 = vld [vmem:[#allocation20_spill] sm:$0xff]  ;;  %v15342_v40 = vld [vmem:[#allocation65_spill] sm:$0xff] }
 0x3ac   :  { %v2964_v38 = vmax.f32 %v15331_v15, %v15332_v50  ;;  %v2971_v18 = vmax.f32 %v15333_v2, %v15334_v55  ;;  %v15336_v48 = vrot.slane %v15335_v45, 4  ;;  %v4286_v35 = vsel %vm3561_vm1, %v4167_v9, %v4285_v33  ;;  %v15344_v2 = vld [vmem:[#allocation66_spill] sm:$0xff] }
 0x3ad   :  { %v4293_v7 = vsel %vm3561_vm1, %v4175_v37, %v4292_v4  ;;  %v4287_v58 = vsel %vm3563_vm2, %v4168_v42, %v4286_v35  ;;  %v15338_v36 = vrot.slane %v15337_v30, 4  ;;  %v15339_v12 = vrot.slane %v15337_v30, 6 }
 0x3ae   :  { %v2976_v19 = vmax.f32 %v15335_v45, %v15336_v48  ;;  %v2965_v22 = vrot.slane %v2964_v38, 1  ;;  %v2972_v6 = vrot.slane %v2971_v18, 1  ;;  %v4294_v59 = vsel %vm3563_vm2, %v4176_v39, %v4293_v7  ;;  %v15348_v45 = vld [vmem:[#allocation21_spill] sm:$0xff] }
 0x3af   :  { %v2981_v62 = vsel %vm2322_vm10, %v15338_v36, -inf  ;;  %v4288_v44 = vsel %vm3565_vm3, %v4169_v5, %v4287_v58  ;;  %v4295_v60 = vsel %vm3565_vm3, %v4177_v17, %v4294_v59  ;;  %v2988_v52 = vsel %vm2322_vm10, %v15339_v12, -inf  ;;  %v15341_v17 = vld [vmem:[#allocation67_spill] sm:$0xff] }
 0x3b0   :  { %v2977_v63 = vrot.slane %v2976_v19, 2  ;;  %v12652_v43 = vmax.f32 %v2964_v38, %v2965_v22  ;;  %v12654_v9 = vmax.f32 %v2971_v18, %v2972_v6  ;;  %v4289_v32 = vsel %vm3567_vm6, %v4170_v27, %v4288_v44  ;;  %v9448_v27 = vld [vmem:[%s15107_s30 + $0x10] sm:$0xff]  ;;  %v15346_v18 = vld [vmem:[#allocation64_spill] sm:$0xff] }
 0x3b1   :  { %v4296_v37 = vsel %vm3567_vm6, %v4178_v54, %v4295_v60  ;;  %v2982_v21 = vrot.slane %v2981_v62, 4  ;;  %v15340_v57 = vrot.slane %v11760_v23, 1  ;;  %v3014_v0 = vrot.slane %v15341_v17, 1  ;;  %4505 = vmatpush.bf16.msrb.mxu3 %v9448_v27 }
 0x3b2   :  { %v2978_v42 = vmax.f32 %v2976_v19, %v2977_v63  ;;  %v4343_v39 = vpack.c.b16 %v4296_v37, %v4289_v32  ;;  %v2989_v31 = vrot.slane %v2988_v52, 4  ;;  %v15343_v15 = vrot.slane %v15342_v40, 2 }
 0x3b3   :  { %v12664_v5 = vmax.f32 %v11760_v23, %v15340_v57  ;;  %v2983_v54 = vmax.f32 %v2981_v62, %v2982_v21  ;;  %v12674_v38 = vmax.f32 %v15341_v17, %v3014_v0  ;;  %v15345_v23 = vrot.slane %v15344_v2, 2 }
 0x3b4   :  { %v2979_v56 = vrot.slane %v2978_v42, 1  ;;  %v3020_v50 = vmax.f32 %v15342_v40, %v15343_v15  ;;  %4431 = vmatmul.bf16.gmra.mxu3 %v4343_v39  ;;  %v15347_v33 = vrot.slane %v15346_v18, 4  ;;  %v15349_v48 = vrot.slane %v15348_v45, 4  ;;  %v15351_v39 = vld [vmem:[#allocation63_spill] sm:$0xff] }
 0x3b5   :  { %v3027_v55 = vmax.f32 %v15344_v2, %v15345_v23  ;;  %v2984_v7 = vrot.slane %v2983_v54, 2  ;;  %v2990_v22 = vmax.f32 %v2988_v52, %v2989_v31  ;;  %v15350_v30 = vrot.slane %v15348_v45, 6  ;;  %v15352_v31 = vld [vmem:[#allocation68_spill] sm:$0xff] }
 0x3b6   :  { %v3032_v4 = vmax.f32 %v15346_v18, %v15347_v33  ;;  %v3037_v19 = vsel %vm2322_vm10, %v15349_v48, -inf  ;;  %v12685_v35 = vmax.f32 %v2978_v42, %v2979_v56  ;;  %v3021_v6 = vrot.slane %v3020_v50, 1 }
 0x3b7   :  { %v3028_v58 = vrot.slane %v3027_v55, 1  ;;  %v3038_v63 = vrot.slane %v3037_v19, 4  ;;  %v3044_v36 = vsel %vm2322_vm10, %v15350_v30, -inf  ;;  %v2985_v62 = vmax.f32 %v2983_v54, %v2984_v7 }
 0x3b8   :  { %v3033_v59 = vrot.slane %v3032_v4, 2  ;;  %v2991_v44 = vrot.slane %v2990_v22, 2  ;;  %v12690_v60 = vmax.f32 %v3020_v50, %v3021_v6  ;;  %v3045_v32 = vrot.slane %v3044_v36, 4 }
 0x3b9   :  { %v12692_v37 = vmax.f32 %v3027_v55, %v3028_v58  ;;  %v3039_v21 = vmax.f32 %v3037_v19, %v3038_v63  ;;  %v3639_v12 = vsel %vm3555_vm14, %v12624_v46, %v15351_v39  ;;  %v2986_v52 = vrot.slane %v2985_v62, 1 }
 0x3ba   :  { %v3034_v42 = vmax.f32 %v3032_v4, %v3033_v59  ;;  %v2992_v57 = vmax.f32 %v2990_v22, %v2991_v44  ;;  %v3046_v17 = vmax.f32 %v3044_v36, %v3045_v32  ;;  %v3640_v0 = vsel %vm3557_vm15, %v12638_v3, %v3639_v12 }
 0x3bb   :  { %v3040_v56 = vrot.slane %v3039_v21, 2  ;;  %v3641_v54 = vsel %vm3559_vm0, %v12652_v43, %v3640_v0  ;;  %v3646_v40 = vsel %vm3555_vm14, %v12664_v5, %v15352_v31  ;;  %v2987_v15 = vmax.f32 %v2985_v62, %v2986_v52 }
 0x3bc   :  { %v3035_v27 = vrot.slane %v3034_v42, 1  ;;  %v2993_v50 = vrot.slane %v2992_v57, 1  ;;  %v3047_v2 = vrot.slane %v3046_v17, 2  ;;  %v3642_v23 = vsel %vm3561_vm1, %v12654_v9, %v3641_v54 }
 0x3bd   :  { %v3041_v18 = vmax.f32 %v3039_v21, %v3040_v56  ;;  %v3643_v33 = vsel %vm3563_vm2, %v12685_v35, %v3642_v23  ;;  %v3647_v4 = vsel %vm3557_vm15, %v12674_v38, %v3646_v40  ;;  %v3906_v58 = vpack.c.bf16 %v15327_v13, %v15327_v13 }
 0x3be   :  { %v12706_v55 = vmax.f32 %v3034_v42, %v3035_v27  ;;  %v2994_v45 = vmax.f32 %v2992_v57, %v2993_v50  ;;  %v3048_v48 = vmax.f32 %v3046_v17, %v3047_v2  ;;  %v3644_v19 = vsel %vm3565_vm3, %v2987_v15, %v3643_v33 }
 0x3bf   :  { %v3648_v7 = vsel %vm3559_vm0, %v12690_v60, %v3647_v4  ;;  %v3042_v22 = vrot.slane %v3041_v18, 1  ;;  %v3907_v59 = vpack.c.bf16 %v12511_v41, %v12511_v41  ;;  %v3908_v62 = vpack.c.bf16 %v12523_v51, %v12523_v51 }
 0x3c0   :  { %v3649_v6 = vsel %vm3561_vm1, %v12692_v37, %v3648_v7  ;;  %v3049_v63 = vrot.slane %v3048_v48, 1  ;;  %v12722_v30 = vsel %vm3567_vm6, %v2994_v45, %v3644_v19  ;;  %v3909_v13 = vpack.c.bf16 %v12534_v47, %v12534_v47 }
 0x3c1   :  { %v3650_v36 = vsel %vm3563_vm2, %v12706_v55, %v3649_v6  ;;  %v12728_v44 = vmax.f32 %v3041_v18, %v3042_v22  ;;  %v3765_v32 = vrot.slane %v12722_v30, 1  ;;  %v3910_v41 = vpack.c.bf16 %v12539_v14, %v12539_v14 }
 0x3c2   :  { %v12735_v42 = vmax.f32 %v3048_v48, %v3049_v63  ;;  %v3911_v21 = vpack.c.bf16 %v12553_v34, %v12553_v34  ;;  %v3912_v12 = vpack.c.bf16 %v12575_v49, %v12575_v49  ;;  %v3913_v51 = vpack.c.bf16 %v12588_v8, %v12588_v8 }
 0x3c3   :  { %v3651_v52 = vsel %vm3565_vm3, %v12728_v44, %v3650_v36  ;;  %v3774_v47 = vsel %vm1166_vm4, %v3764_v53, %v3765_v32  ;;  %v3914_v14 = vpack.c.bf16 %v15351_v39, %v15351_v39  ;;  %v3915_v34 = vpack.c.bf16 %v12624_v46, %v12624_v46 }
 0x3c4   :  { %v12755_v49 = vsel %vm3567_vm6, %v12735_v42, %v3651_v52  ;;  %v3916_v8 = vpack.c.bf16 %v12638_v3, %v12638_v3  ;;  %v3917_v57 = vpack.c.bf16 %v12652_v43, %v12652_v43  ;;  %v3918_v17 = vpack.c.bf16 %v12654_v9, %v12654_v9  ;;  %v15358_v52 = vld [vmem:[#allocation71_spill] sm:$0xff] }
 0x3c5   :  { %v3766_v53 = vrot.slane %v12755_v49, 1  ;;  %v3919_v39 = vpack.c.bf16 %v12685_v35, %v12685_v35  ;;  %v3920_v0 = vpack.c.bf16 %v2987_v15, %v2987_v15  ;;  %v3921_v46 = vpack.c.bf16 %v2994_v45, %v2994_v45 }
 0x3c6   :  { %v4179_v27 = vunpack.c.l.b16 %v3906_v58  ;;  %v4180_v56 = vunpack.c.l.b16 %v3907_v59  ;;  %v4181_v54 = vunpack.c.l.b16 %v3908_v62  ;;  %v4182_v40 = vunpack.c.l.b16 %v3909_v13  ;;  %v15353_v59 = vld [vmem:[#allocation72_spill] sm:$0xff]  ;;  %v15355_v62 = vld [vmem:[#allocation73_spill] sm:$0xff] }
 0x3c7   :  { %v3773_v3 = vsel %vm1166_vm4, %v3765_v32, %v3766_v53  ;;  %v4183_v43 = vunpack.c.l.b16 %v3910_v41  ;;  %v4184_v50 = vunpack.c.l.b16 %v3911_v21  ;;  %v4185_v2 = vunpack.c.l.b16 %v3912_v12  ;;  %v15356_v21 = vld [vmem:[#allocation70_spill] sm:$0xff] }
 0x3c8   :  { %v4554_v9 = vpack.c.bf16 %v3773_v3, %v3774_v47  ;;  %v4186_v23 = vunpack.c.l.b16 %v3913_v51  ;;  %v4187_v18 = vunpack.c.l.b16 %v3914_v14  ;;  %v4188_v33 = vunpack.c.l.b16 %v3915_v34 }
 0x3c9   :  { %v4189_v4 = vunpack.c.l.b16 %v3916_v8  ;;  %v4190_v35 = vunpack.c.l.b16 %v3917_v57  ;;  %v4191_v15 = vunpack.c.l.b16 %v3918_v17  ;;  %v4192_v45 = vunpack.c.l.b16 %v3919_v39  ;;  %v15360_v17 = vld [vmem:[#allocation69_spill] sm:$0xff] }
 0x3ca   :  { %4655 = vmatmul.bf16.gmra.mxu0 %v4554_v9  ;;  %v4193_v48 = vunpack.c.l.b16 %v3920_v0  ;;  %v4194_v19 = vunpack.c.l.b16 %v3921_v46  ;;  %v4297_v7 = vsel %vm3555_vm14, %v4180_v56, %v4179_v27  ;;  %v4304_v22 = vsel %vm3555_vm14, %v4188_v33, %v4187_v18  ;;  %v15362_v9 = vld [vmem:[#allocation22_spill] sm:$0xff] }
 0x3cb   :  { %v4298_v6 = vsel %vm3557_vm15, %v4181_v54, %v4297_v7  ;;  %v4305_v58 = vsel %vm3557_vm15, %v4189_v4, %v4304_v22  ;;  %v15354_v63 = vrot.slane %v15353_v59, 1  ;;  %v3070_v32 = vrot.slane %v15355_v62, 1 }
 0x3cc   :  { %v4299_v13 = vsel %vm3559_vm0, %v4182_v40, %v4298_v6  ;;  %v4306_v41 = vsel %vm3559_vm0, %v4190_v35, %v4305_v58  ;;  %v15357_v12 = vrot.slane %v15356_v21, 2  ;;  %v15359_v47 = vrot.slane %v15358_v52, 2  ;;  %v15365_v58 = vld [vmem:[#allocation76_spill] sm:$0xff] }
 0x3cd   :  { %v12777_v36 = vmax.f32 %v15353_v59, %v15354_v63  ;;  %v4300_v34 = vsel %vm3561_vm1, %v4183_v43, %v4299_v13  ;;  %v4307_v8 = vsel %vm3561_vm1, %v4191_v15, %v4306_v41  ;;  %v12791_v57 = vmax.f32 %v15355_v62, %v3070_v32  ;;  %v9447_v41 = vld [vmem:[%s15107_s30 + $0x8] sm:$0xff] }
 0x3ce   :  { %v3076_v51 = vmax.f32 %v15356_v21, %v15357_v12  ;;  %v3083_v14 = vmax.f32 %v15358_v52, %v15359_v47  ;;  %v15361_v39 = vrot.slane %v15360_v17, 4  ;;  %v4301_v46 = vsel %vm3563_vm2, %v4184_v50, %v4300_v34  ;;  %4506 = vmatpush.bf16.msrb.mxu3 %v9447_v41 }
 0x3cf   :  { %v4308_v27 = vsel %vm3563_vm2, %v4192_v45, %v4307_v8  ;;  %v4302_v40 = vsel %vm3565_vm3, %v4185_v2, %v4301_v46  ;;  %v15363_v18 = vrot.slane %v15362_v9, 4  ;;  %v15364_v2 = vrot.slane %v15362_v9, 6  ;;  %v15374_v46 = vld [vmem:[#allocation23_spill] sm:$0xff] }
 0x3d0   :  { %v3088_v0 = vmax.f32 %v15360_v17, %v15361_v39  ;;  %v3077_v56 = vrot.slane %v3076_v51, 1  ;;  %v3084_v54 = vrot.slane %v3083_v14, 1  ;;  %v4309_v3 = vsel %vm3565_vm3, %v4193_v48, %v4308_v27 }
 0x3d1   :  { %v3093_v33 = vsel %vm2322_vm10, %v15363_v18, -inf  ;;  %v4303_v4 = vsel %vm3567_vm6, %v4186_v23, %v4302_v40  ;;  %v4310_v35 = vsel %vm3567_vm6, %v4194_v19, %v4309_v3  ;;  %v3100_v48 = vsel %vm2322_vm10, %v15364_v2, -inf  ;;  %v15367_v23 = vld [vmem:[#allocation79_spill] sm:$0xff]  ;;  %v15368_v19 = vld [vmem:[#allocation77_spill] sm:$0xff] }
 0x3d2   :  { %v3089_v43 = vrot.slane %v3088_v0, 2  ;;  %v12805_v15 = vmax.f32 %v3076_v51, %v3077_v56  ;;  %v12807_v50 = vmax.f32 %v3083_v14, %v3084_v54  ;;  %v4344_v45 = vpack.c.b16 %v4310_v35, %v4303_v4  ;;  %v15370_v51 = vld [vmem:[#allocation78_spill] sm:$0xff]  ;;  %v15372_v14 = vld [vmem:[#allocation75_spill] sm:$0xff] }
 0x3d3   :  { %v3094_v22 = vrot.slane %v3093_v33, 4  ;;  %v3101_v6 = vrot.slane %v3100_v48, 4  ;;  %v15366_v59 = vrot.slane %v15365_v58, 1  ;;  %v3126_v62 = vrot.slane %v15367_v23, 1 }
 0x3d4   :  { %v3090_v7 = vmax.f32 %v3088_v0, %v3089_v43  ;;  %v15369_v32 = vrot.slane %v15368_v19, 2  ;;  %4436 = vmatmul.bf16.gmra.mxu3 %v4344_v45  ;;  %v15371_v52 = vrot.slane %v15370_v51, 2  ;;  %v15373_v34 = vrot.slane %v15372_v14, 4 }
 0x3d5   :  { %v12815_v63 = vmax.f32 %v15365_v58, %v15366_v59  ;;  %v3095_v12 = vmax.f32 %v3093_v33, %v3094_v22  ;;  %v3102_v17 = vmax.f32 %v3100_v48, %v3101_v6  ;;  %v12831_v39 = vmax.f32 %v15367_v23, %v3126_v62  ;;  %v15378_v23 = vld [vmem:[#allocation80_spill] sm:$0xff] }
 0x3d6   :  { %v3132_v13 = vmax.f32 %v15368_v19, %v15369_v32  ;;  %v3091_v21 = vrot.slane %v3090_v7, 1  ;;  %v3139_v47 = vmax.f32 %v15370_v51, %v15371_v52  ;;  %v3144_v8 = vmax.f32 %v15372_v14, %v15373_v34 }
 0x3d7   :  { %v15375_v27 = vrot.slane %v15374_v46, 4  ;;  %v3096_v40 = vrot.slane %v3095_v12, 2  ;;  %v3103_v9 = vrot.slane %v3102_v17, 2  ;;  %v15376_v4 = vrot.slane %v15374_v46, 6 }
 0x3d8   :  { %v3133_v0 = vrot.slane %v3132_v13, 1  ;;  %v12836_v54 = vmax.f32 %v3090_v7, %v3091_v21  ;;  %v3140_v3 = vrot.slane %v3139_v47, 1  ;;  %v3145_v43 = vrot.slane %v3144_v8, 2  ;;  %v15377_v7 = vld [vmem:[#allocation74_spill] sm:$0xff] }
 0x3d9   :  { %v3149_v56 = vsel %vm2322_vm10, %v15375_v27, -inf  ;;  %v3156_v35 = vsel %vm2322_vm10, %v15376_v4, -inf  ;;  %v3097_v45 = vmax.f32 %v3095_v12, %v3096_v40  ;;  %v3104_v6 = vmax.f32 %v3102_v17, %v3103_v9 }
 0x3da   :  { %v12838_v18 = vmax.f32 %v3132_v13, %v3133_v0  ;;  %v3150_v33 = vrot.slane %v3149_v56, 4  ;;  %v12843_v22 = vmax.f32 %v3139_v47, %v3140_v3  ;;  %v3146_v2 = vmax.f32 %v3144_v8, %v3145_v43 }
 0x3db   :  { %v3157_v48 = vrot.slane %v3156_v35, 4  ;;  %v3653_v59 = vsel %vm3555_vm14, %v12777_v36, %v15377_v7  ;;  %v3660_v62 = vsel %vm3555_vm14, %v12815_v63, %v15378_v23  ;;  %v3098_v19 = vrot.slane %v3097_v45, 1 }
 0x3dc   :  { %v3151_v58 = vmax.f32 %v3149_v56, %v3150_v33  ;;  %v3147_v32 = vrot.slane %v3146_v2, 1  ;;  %v3654_v41 = vsel %vm3557_vm15, %v12791_v57, %v3653_v59  ;;  %v3105_v21 = vrot.slane %v3104_v6, 1 }
 0x3dd   :  { %v3158_v13 = vmax.f32 %v3156_v35, %v3157_v48  ;;  %v3655_v51 = vsel %vm3559_vm0, %v12805_v15, %v3654_v41  ;;  %v3661_v52 = vsel %vm3557_vm15, %v12831_v39, %v3660_v62  ;;  %v3099_v47 = vmax.f32 %v3097_v45, %v3098_v19 }
 0x3de   :  { %v3152_v12 = vrot.slane %v3151_v58, 2  ;;  %v12857_v14 = vmax.f32 %v3146_v2, %v3147_v32  ;;  %v3656_v8 = vsel %vm3561_vm1, %v12807_v50, %v3655_v51  ;;  %v3106_v17 = vmax.f32 %v3104_v6, %v3105_v21 }
 0x3df   :  { %v3159_v34 = vrot.slane %v3158_v13, 2  ;;  %v3657_v46 = vsel %vm3563_vm2, %v12836_v54, %v3656_v8  ;;  %v3662_v27 = vsel %vm3559_vm0, %v12838_v18, %v3661_v52  ;;  %v3922_v43 = vpack.c.bf16 %v15352_v31, %v15352_v31 }
 0x3e0   :  { %v3153_v0 = vmax.f32 %v3151_v58, %v3152_v12  ;;  %v3658_v40 = vsel %vm3565_vm3, %v3099_v47, %v3657_v46  ;;  %v3663_v3 = vsel %vm3561_vm1, %v12843_v22, %v3662_v27  ;;  %v3923_v35 = vpack.c.bf16 %v12664_v5, %v12664_v5 }
 0x3e1   :  { %v3160_v56 = vmax.f32 %v3158_v13, %v3159_v34  ;;  %v12871_v33 = vsel %vm3567_vm6, %v3106_v17, %v3658_v40  ;;  %v3664_v4 = vsel %vm3563_vm2, %v12857_v14, %v3663_v3  ;;  %v3924_v48 = vpack.c.bf16 %v12674_v38, %v12674_v38 }
 0x3e2   :  { %v3154_v9 = vrot.slane %v3153_v0, 1  ;;  %v3767_v2 = vrot.slane %v12871_v33, 1  ;;  %v3925_v6 = vpack.c.bf16 %v12690_v60, %v12690_v60  ;;  %v3926_v58 = vpack.c.bf16 %v12692_v37, %v12692_v37 }
 0x3e3   :  { %v3161_v45 = vrot.slane %v3160_v56, 1  ;;  %v3927_v59 = vpack.c.bf16 %v12706_v55, %v12706_v55  ;;  %v3928_v5 = vpack.c.bf16 %v12728_v44, %v12728_v44  ;;  %v3929_v60 = vpack.c.bf16 %v12735_v42, %v12735_v42 }
 0x3e4   :  { %v12882_v31 = vmax.f32 %v3153_v0, %v3154_v9  ;;  %v3772_v38 = vsel %vm1166_vm4, %v3766_v53, %v3767_v2  ;;  %v3930_v19 = vpack.c.bf16 %v15377_v7, %v15377_v7  ;;  %v3931_v55 = vpack.c.bf16 %v12777_v36, %v12777_v36 }
 0x3e5   :  { %v12890_v62 = vmax.f32 %v3160_v56, %v3161_v45  ;;  %v3932_v44 = vpack.c.bf16 %v12791_v57, %v12791_v57  ;;  %v3933_v32 = vpack.c.bf16 %v12805_v15, %v12805_v15  ;;  %v3934_v42 = vpack.c.bf16 %v12807_v50, %v12807_v50 }
 0x3e6   :  { %v3665_v37 = vsel %vm3565_vm3, %v12882_v31, %v3664_v4  ;;  %v3935_v7 = vpack.c.bf16 %v12836_v54, %v12836_v54  ;;  %v3936_v13 = vpack.c.bf16 %v3099_v47, %v3099_v47  ;;  %v3937_v36 = vpack.c.bf16 %v3106_v17, %v3106_v17  ;;  %v15379_v4 = vld [vmem:[#allocation11_spill] sm:$0xff] }
 0x3e7   :  { %v12910_v53 = vsel %vm3567_vm6, %v12890_v62, %v3665_v37  ;;  %v4195_v21 = vunpack.c.l.b16 %v3922_v43  ;;  %v4196_v12 = vunpack.c.l.b16 %v3923_v35  ;;  %v4197_v57 = vunpack.c.l.b16 %v3924_v48 }
 0x3e8   :  { %v3768_v41 = vrot.slane %v12910_v53, 1  ;;  %v4198_v51 = vunpack.c.l.b16 %v3925_v6  ;;  %v4199_v52 = vunpack.c.l.b16 %v3926_v58  ;;  %v4200_v15 = vunpack.c.l.b16 %v3927_v59  ;;  %v15380_v6 = vld [vmem:[#allocation82_spill] sm:$0xff] }
 0x3e9   :  { %v4201_v8 = vunpack.c.l.b16 %v3928_v5  ;;  %v4202_v50 = vunpack.c.l.b16 %v3929_v60  ;;  %v4203_v0 = vunpack.c.l.b16 %v3930_v19  ;;  %v4204_v54 = vunpack.c.l.b16 %v3931_v55  ;;  %v15382_v5 = vld [vmem:[#allocation83_spill] sm:$0xff]  ;;  %v9446_v60 = vld [vmem:[%s15107_s30] sm:$0xff]  ;;  %v15383_v55 = vld [vmem:[#allocation81_spill] sm:$0xff] }
 0x3ea   :  { %v3771_v34 = vsel %vm1166_vm4, %v3767_v2, %v3768_v41  ;;  %v4205_v47 = vunpack.c.l.b16 %v3932_v44  ;;  %v4206_v27 = vunpack.c.l.b16 %v3933_v32  ;;  %v4207_v56 = vunpack.c.l.b16 %v3934_v42  ;;  %v15385_v42 = vld [vmem:[#allocation84_spill] sm:$0xff]  ;;  %4507 = vmatpush.bf16.msrb.mxu3 %v9446_v60 }
 0x3eb   :  { %v4555_v46 = vpack.c.bf16 %v3771_v34, %v3772_v38  ;;  %v4208_v17 = vunpack.c.l.b16 %v3935_v7  ;;  %v4209_v40 = vunpack.c.l.b16 %v3936_v13  ;;  %v4210_v3 = vunpack.c.l.b16 %v3937_v36 }
 0x3ec   :  { %v4311_v43 = vsel %vm3555_vm14, %v4196_v12, %v4195_v21  ;;  %v4318_v9 = vsel %vm3555_vm14, %v4204_v54, %v4203_v0  ;;  %v2224_v35 = vrot.slane %v15379_v4, 4  ;;  %v2225_v45 = vrot.slane %v15379_v4, 6  ;;  %v15386_v12 = vld [vmem:[#allocation12_spill] sm:$0xff] }
 0x3ed   :  { %4660 = vmatmul.bf16.gmra.mxu0 %v4555_v46  ;;  %v4312_v2 = vsel %vm3557_vm15, %v4197_v57, %v4311_v43  ;;  %v4319_v48 = vsel %vm3557_vm15, %v4205_v47, %v4318_v9  ;;  %v15381_v58 = vrot.slane %v15380_v6, 1  ;;  %v3175_v38 = vrot.slane %v15382_v5, 1 }
 0x3ee   :  { %v4313_v19 = vsel %vm3559_vm0, %v4198_v51, %v4312_v2  ;;  %v4320_v37 = vsel %vm3559_vm0, %v4206_v27, %v4319_v48  ;;  %v15384_v44 = vrot.slane %v15383_v55, 2  ;;  %v3187_v7 = vrot.slane %v15385_v42, 2 }
 0x3ef   :  { %v12930_v59 = vmax.f32 %v15380_v6, %v15381_v58  ;;  %v4314_v13 = vsel %vm3561_vm1, %v4199_v52, %v4313_v19  ;;  %v4321_v36 = vsel %vm3561_vm1, %v4207_v56, %v4320_v37  ;;  %v12945_v21 = vmax.f32 %v15382_v5, %v3175_v38  ;;  %v15389_v37 = vld [vmem:[#allocation10_spill] sm:$0xff] }
 0x3f0   :  { %v3181_v32 = vmax.f32 %v15383_v55, %v15384_v44  ;;  %v15387_v57 = vrot.slane %v15386_v12, 4  ;;  %v4315_v51 = vsel %vm3563_vm2, %v4200_v15, %v4314_v13  ;;  %v4322_v0 = vsel %vm3563_vm2, %v4208_v17, %v4321_v36 }
 0x3f1   :  { %v3188_v54 = vmax.f32 %v15385_v42, %v3187_v7  ;;  %v4316_v47 = vsel %vm3565_vm3, %v4201_v8, %v4315_v51  ;;  %v4323_v52 = vsel %vm3565_vm3, %v4209_v40, %v4322_v0  ;;  %v15388_v56 = vrot.slane %v15379_v4, 2 }
 0x3f2   :  { %v3193_v34 = vmax.f32 %v15386_v12, %v15387_v57  ;;  %v3182_v46 = vrot.slane %v3181_v32, 1  ;;  %v4317_v9 = vsel %vm3567_vm6, %v4202_v50, %v4316_v47  ;;  %v4324_v2 = vsel %vm3567_vm6, %v4210_v3, %v4323_v52 }
 0x3f3   :  { %v3198_v43 = vsel %vm2322_vm10, %v15388_v56, -inf  ;;  %v3189_v15 = vrot.slane %v3188_v54, 1  ;;  %v4345_v6 = vpack.c.b16 %v4324_v2, %v4317_v9  ;;  %v3205_v5 = vsel %vm2322_vm10, %v2224_v35, -inf }
 0x3f4   :  { %v3194_v27 = vrot.slane %v3193_v34, 2  ;;  %v3183_v48 = vmax.f32 %v3181_v32, %v3182_v46  ;;  %v3199_v58 = vrot.slane %v3198_v43, 4  ;;  %v3206_v8 = vrot.slane %v3205_v5, 4 }
 0x3f5   :  { %v3190_v38 = vmax.f32 %v3188_v54, %v3189_v15  ;;  %v3212_v40 = vsel %vm2322_vm10, %v2225_v45, -inf  ;;  %4441 = vmatmul.bf16.gmra.mxu3 %v4345_v6  ;;  %v3667_v50 = vsel %vm3555_vm14, %v12945_v21, %v12930_v59  ;;  %v3328_v55 = vand.u32 63, %v15389_v37 }
 0x3f6   :  { %v3195_v17 = vmax.f32 %v3193_v34, %v3194_v27  ;;  %v3200_v4 = vmax.f32 %v3198_v43, %v3199_v58  ;;  %v3213_v19 = vrot.slane %v3212_v40, 4  ;;  %v3207_v3 = vmax.f32 %v3205_v5, %v3206_v8 }
 0x3f7   :  { %v3668_v44 = vsel %vm3557_vm15, %v3183_v48, %v3667_v50  ;;  %vm12969_vm8 = vcmp.eq.s32.totalorder %v3328_v55, 63  ;;  %v3938_v51 = vpack.c.bf16 %v15378_v23, %v15378_v23  ;;  %v3939_v54 = vpack.c.bf16 %v12815_v63, %v12815_v63 }
 0x3f8   :  { %v3196_v60 = vrot.slane %v3195_v17, 1  ;;  %v3201_v42 = vrot.slane %v3200_v4, 2  ;;  %v3214_v35 = vmax.f32 %v3212_v40, %v3213_v19  ;;  %v3669_v7 = vsel %vm3559_vm0, %v3190_v38, %v3668_v44 }
 0x3f9   :  { %v3208_v13 = vrot.slane %v3207_v3, 2  ;;  %v3940_v47 = vpack.c.bf16 %v12831_v39, %v12831_v39  ;;  %v3941_v27 = vpack.c.bf16 %v12838_v18, %v12838_v18  ;;  %v3942_v56 = vpack.c.bf16 %v12843_v22, %v12843_v22 }
 0x3fa   :  { %v3197_v32 = vmax.f32 %v3195_v17, %v3196_v60  ;;  %v3202_v45 = vmax.f32 %v3200_v4, %v3201_v42  ;;  %v3215_v36 = vrot.slane %v3214_v35, 2  ;;  %v3943_v43 = vpack.c.bf16 %v12857_v14, %v12857_v14 }
 0x3fb   :  { %v3209_v57 = vmax.f32 %v3207_v3, %v3208_v13  ;;  %v3944_v2 = vpack.c.bf16 %v12882_v31, %v12882_v31  ;;  %v3947_v63 = vpack.c.bf16 %v12945_v21, %v12945_v21  ;;  %v3945_v39 = vpack.c.bf16 %v12890_v62, %v12890_v62 }
 0x3fc   :  { %v3670_v12 = vsel %vm3561_vm1, %v3197_v32, %v3669_v7  ;;  %v3203_v0 = vrot.slane %v3202_v45, 1  ;;  %v3216_v46 = vmax.f32 %v3214_v35, %v3215_v36  ;;  %v3946_v18 = vpack.c.bf16 %v12930_v59, %v12930_v59 }
 0x3fd   :  { %v3210_v52 = vrot.slane %v3209_v57, 1  ;;  %v3948_v6 = vpack.c.bf16 %v3183_v48, %v3183_v48  ;;  %v3949_v14 = vpack.c.bf16 %v3190_v38, %v3190_v38  ;;  %v3950_v58 = vpack.c.bf16 %v3197_v32, %v3197_v32  ;;  %v15392_v32 = vld [vmem:[#allocation24_spill] sm:$0xff] }
 0x3fe   :  { %v3204_v9 = vmax.f32 %v3202_v45, %v3203_v0  ;;  %v3217_v23 = vrot.slane %v3216_v46, 1  ;;  %v4211_v8 = vunpack.c.l.b16 %v3938_v51  ;;  %v4212_v31 = vunpack.c.l.b16 %v3939_v54  ;;  %v13006_v45 = vpop.f32.mrf.mxu3 }
 0x3ff   :  { %v3211_v15 = vmax.f32 %v3209_v57, %v3210_v52  ;;  %v4213_v40 = vunpack.c.l.b16 %v3940_v47  ;;  %v4214_v60 = vunpack.c.l.b16 %v3941_v27  ;;  %v4215_v4 = vunpack.c.l.b16 %v3942_v56 }
 0x400   :  { %v3218_v22 = vmax.f32 %v3216_v46, %v3217_v23  ;;  %v3671_v17 = vsel %vm3563_vm2, %v3204_v9, %v3670_v12  ;;  %v4220_v19 = vunpack.c.l.b16 %v3947_v63  ;;  %v3951_v50 = vpack.c.bf16 %v3204_v9, %v3204_v9 }
 0x401   :  { %v3672_v5 = vsel %vm3565_vm3, %v3211_v15, %v3671_v17  ;;  %v4219_v3 = vunpack.c.l.b16 %v3946_v18  ;;  %v4221_v59 = vunpack.c.l.b16 %v3948_v6  ;;  %v3952_v48 = vpack.c.bf16 %v3211_v15, %v3211_v15 }
 0x402   :  { %v3673_v21 = vsel %vm3567_vm6, %v3218_v22, %v3672_v5  ;;  %v3953_v37 = vpack.c.bf16 %v3218_v22, %v3218_v22  ;;  %v4216_v55 = vunpack.c.l.b16 %v3943_v43  ;;  %v4222_v44 = vunpack.c.l.b16 %v3949_v14 }
 0x403   :  { %v3769_v62 = vrot.slane %v3673_v21, 1  ;;  %v15393_v42 = vrot.slane %v15392_v32, 1  ;;  %v4325_v7 = vsel %vm3555_vm14, %v4212_v31, %v4211_v8  ;;  %v4332_v13 = vsel %vm3555_vm14, %v4220_v19, %v4219_v3 }
 0x404   :  { %v4223_v12 = vunpack.c.l.b16 %v3950_v58  ;;  %v4326_v57 = vsel %vm3557_vm15, %v4213_v40, %v4325_v7  ;;  %v4333_v51 = vsel %vm3557_vm15, %v4221_v59, %v4332_v13  ;;  %v4224_v0 = vunpack.c.l.b16 %v3951_v50  ;;  %v15394_v40 = vld [vmem:[#allocation25_spill] sm:$0xff] }
 0x405   :  { %v3770_v38 = vsel %vm1166_vm4, %v3768_v41, %v3769_v62  ;;  %v3785_v35 = vsel %vm1166_vm4, %v3769_v62, %v15393_v42  ;;  %v4327_v46 = vsel %vm3559_vm0, %v4214_v60, %v4326_v57  ;;  %v4334_v54 = vsel %vm3559_vm0, %v4222_v44, %v4333_v51 }
 0x406   :  { %v3801_v36 = vsel %vm12969_vm8, %v3673_v21, %v3785_v35  ;;  %v4217_v47 = vunpack.c.l.b16 %v3944_v2  ;;  %v4225_v52 = vunpack.c.l.b16 %v3952_v48  ;;  %v4328_v27 = vsel %vm3561_vm1, %v4215_v4, %v4327_v46  ;;  %v13022_v22 = vpop.f32.mrf.mxu3 }
 0x407   :  { %v4556_v41 = vpack.c.bf16 %v3801_v36, %v3770_v38  ;;  %v4335_v56 = vsel %vm3561_vm1, %v4223_v12, %v4334_v54  ;;  %v4218_v34 = vunpack.c.l.b16 %v3945_v39  ;;  %v4226_v43 = vunpack.c.l.b16 %v3953_v37 }
 0x408   :  { %v4329_v9 = vsel %vm3563_vm2, %v4216_v55, %v4328_v27  ;;  %v4336_v23 = vsel %vm3563_vm2, %v4224_v0, %v4335_v56  ;;  %v3705_v17 = vrot.slane %v3673_v21, 7  ;;  %v3703_v39 = vrot.slane %v12871_v33, 7  ;;  %v9477_v0 = vld [vmem:[%s15395_s5 + $0x38] sm:$0xff]  ;;  %v9475_v33 = vld [vmem:[%s15395_s5 + $0x28] sm:$0xff] }
 0x409   :  { %4665 = vmatmul.bf16.gmra.mxu0 %v4556_v41  ;;  %v4330_v63 = vsel %vm3565_vm3, %v4217_v47, %v4329_v9  ;;  %v4337_v15 = vsel %vm3565_vm3, %v4225_v52, %v4336_v23  ;;  %v3223_v14 = vand.u32 63, %v15256_v29  ;;  %v3690_v58 = vrot.slane %v15392_v32, 7  ;;  %6142 = vmatpush.bf16.msrb.mxu2 %v9477_v0 }
 0x40a   :  { %v4331_v18 = vsel %vm3567_vm6, %v4218_v34, %v4330_v63  ;;  %v4338_v2 = vsel %vm3567_vm6, %v4226_v43, %v4337_v15  ;;  %v3704_v5 = vrot.slane %v12910_v53, 7  ;;  %v3691_v21 = vrot.slane %v15394_v40, 7 }
 0x40b   :  { %v4346_v6 = vpack.c.b16 %v4338_v2, %v4331_v18  ;;  %vm3411_vm9 = vcmp.eq.s32.totalorder %v3223_v14, 0  ;;  %v3721_v4 = vsel %vm1037_vm5, %v3705_v17, %v3690_v58  ;;  %v3692_v59 = vrot.slane %v11993_v1, 7 }
 0x40c   :  { %v13030_v8 = vsel %vm1037_vm5, %v3704_v5, %v3705_v17  ;;  %v13036_v31 = vsel %vm1037_vm5, %v3703_v39, %v3704_v5  ;;  %v3720_v53 = vsel %vm1037_vm5, %v3690_v58, %v3691_v21  ;;  %v3722_v19 = vsel %vm3411_vm9, %v15392_v32, %v3721_v4  ;;  %v4631_v5 = vpop.f32.mrf.mxu0 }
 0x40d   :  { %4446 = vmatmul.bf16.gmra.mxu3 %v4346_v6  ;;  %v3809_v60 = vpack.c.bf16 %v13030_v8, %v13036_v31  ;;  %v3802_v50 = vpack.c.bf16 %v3720_v53, %v3722_v19  ;;  %v3693_v48 = vrot.slane %v12129_v61, 7  ;;  %v3719_v55 = vsel %vm1037_vm5, %v3691_v21, %v3692_v59  ;;  %v9483_v53 = vld [vmem:[%s15395_s5 + $0x68] sm:$0xff] }
 0x40e   :  { %v13046_v62 = vpop.f32.mrf.mxu3  ;;  %v3694_v32 = vrot.slane %v12168_v25, 7  ;;  %v3695_v42 = vrot.slane %v12268_v16, 7  ;;  %v3696_v36 = vrot.slane %v12313_v26, 7  ;;  %v3697_v12 = vrot.slane %v12421_v28, 7  ;;  %v9485_v26 = vld [vmem:[%s15395_s5 + $0x78] sm:$0xff] }
 0x40f   :  { %v3718_v37 = vsel %vm1037_vm5, %v3692_v59, %v3693_v48  ;;  %v565_v41 = vadd.s32 64, %v15256_v29  ;;  %6065 = vmatpush.bf16.msrb.mxu1 %v9485_v26  ;;  %v3698_v46 = vrot.slane %v12446_v20, 7  ;;  %v3699_v54 = vrot.slane %v12567_v11, 7  ;;  %v9474_v59 = vld [vmem:[%s15395_s5 + $0x20] sm:$0xff]  ;;  %v9492_v26 = vld [vmem:[%s15395_s5 + $0xb0] sm:$0xff] }
 0x410   :  { %v3803_v44 = vpack.c.bf16 %v3718_v37, %v3719_v55  ;;  %v3716_v1 = vsel %vm1037_vm5, %v3694_v32, %v3695_v42  ;;  %v3717_v61 = vsel %vm1037_vm5, %v3693_v48, %v3694_v32  ;;  %v3714_v25 = vsel %vm1037_vm5, %v3696_v36, %v3697_v12  ;;  %v9482_v55 = vld [vmem:[%s15395_s5 + $0x60] sm:$0xff] }
 0x411   :  { %v3804_v7 = vpack.c.bf16 %v3716_v1, %v3717_v61  ;;  %v3715_v16 = vsel %vm1037_vm5, %v3695_v42, %v3696_v36  ;;  %v3279_v28 = vand.u32 63, %v565_v41  ;;  %v3713_v52 = vsel %vm1037_vm5, %v3697_v12, %v3698_v46  ;;  %v9473_v12 = vld [vmem:[%s15395_s5 + $0x18] sm:$0xff] }
 0x412   :  { %v3805_v51 = vpack.c.bf16 %v3714_v25, %v3715_v16  ;;  %v3712_v27 = vsel %vm1037_vm5, %v3698_v46, %v3699_v54  ;;  %v3700_v9 = vrot.slane %v12608_v10, 7  ;;  %v3701_v23 = vrot.slane %v12722_v30, 7  ;;  %v9484_v10 = vld [vmem:[%s15395_s5 + $0x70] sm:$0xff]  ;;  %v9493_v25 = vld [vmem:[%s15395_s5 + $0xb8] sm:$0xff] }
 0x413   :  { %vm3419_vm11 = vcmp.eq.s32.totalorder %v3279_v28, 0  ;;  %6066 = vmatpush.bf16.msrb.mxu1 %v9484_v10  ;;  %v3702_v2 = vrot.slane %v12755_v49, 7  ;;  %6240 = vmatpush.bf16.msra.mxu3 %v9493_v25 }
 0x414   :  { %v3730_v56 = vsel %vm3419_vm11, %v12446_v20, %v3713_v52  ;;  %v3710_v11 = vsel %vm1037_vm5, %v3700_v9, %v3701_v23  ;;  %v3711_v63 = vsel %vm1037_vm5, %v3699_v54, %v3700_v9  ;;  %v9476_v20 = vld [vmem:[%s15395_s5 + $0x30] sm:$0xff]  ;;  %v4633_v49 = vpop.f32.mrf.mxu0 }
 0x415   :  { %v3806_v34 = vpack.c.bf16 %v3712_v27, %v3730_v56  ;;  %v3807_v18 = vpack.c.bf16 %v3710_v11, %v3711_v63  ;;  %6143 = vmatpush.bf16.msrb.mxu2 %v9476_v20  ;;  %v3708_v6 = vsel %vm1037_vm5, %v3702_v2, %v3703_v39  ;;  %v3709_v17 = vsel %vm1037_vm5, %v3701_v23, %v3702_v2  ;;  %v9472_v9 = vld [vmem:[%s15395_s5 + $0x10] sm:$0xff]  ;;  %v9491_v23 = vld [vmem:[%s15395_s5 + $0xa8] sm:$0xff] }
 0x416   :  { %v13048_v3 = vpop.f32.mrf.mxu3  ;;  %v3808_v14 = vpack.c.bf16 %v3708_v6, %v3709_v17 }
 0x417   :  { %6067 = vmatpush.bf16.msrb.mxu1 %v9483_v53  ;;  %6241 = vmatpush.bf16.msra.mxu3 %v9492_v26 }
 0x419   :  { %6144 = vmatpush.bf16.msrb.mxu2 %v9475_v33 }
 0x41b   :  { %6068 = vmatpush.bf16.msrb.mxu1 %v9482_v55  ;;  %6242 = vmatpush.bf16.msra.mxu3 %v9491_v23 }
 0x41c   :  { %v4636_v39 = vpop.f32.mrf.mxu0 }
 0x41d   :  { %4508 = vmatmul.bf16.vlgmr.msrb.gmra.mxu3 %v3802_v50  ;;  %6145 = vmatpush.bf16.msrb.mxu2 %v9474_v59 }
 0x41e   :  { %v13056_v38 = vpop.f32.mrf.mxu3 }
 0x421   :  { %6146 = vmatpush.bf16.msrb.mxu2 %v9473_v12 }
 0x424   :  { %v4638_v50 = vpop.f32.mrf.mxu0 }
 0x425   :  { %6147 = vmatpush.bf16.msrb.mxu2 %v9472_v9 }
 0x426   :  { %v13060_v35 = vpop.f32.mrf.mxu3 }
 0x42c   :  { %v4641_v31 = vpop.f32.mrf.mxu0 }
 0x42d   :  { %4513 = vmatmul.bf16.gmra.mxu3 %v3803_v44 }
 0x42e   :  { %v13066_v13 = vpop.f32.mrf.mxu3 }
 0x434   :  { %v4643_v48 = vpop.f32.mrf.mxu0 }
 0x436   :  { %v13074_v57 = vpop.f32.mrf.mxu3 }
 0x43c   :  { %v4646_v44 = vpop.f32.mrf.mxu0 }
 0x43d   :  { %4518 = vmatmul.bf16.gmra.mxu3 %v3804_v7 }
 0x43e   :  { %v13085_v47 = vpop.f32.mrf.mxu3 }
 0x444   :  { %v4648_v7 = vpop.f32.mrf.mxu0 }
 0x446   :  { %v13092_v43 = vpop.f32.mrf.mxu3 }
 0x44c   :  { %v4651_v16 = vpop.f32.mrf.mxu0 }
 0x44d   :  { %4523 = vmatmul.bf16.gmra.mxu3 %v3805_v51 }
 0x454   :  { %v4653_v41 = vpop.f32.mrf.mxu0 }
 0x457   :  { %v13100_v15 = vpop.f32.mrf.mxu3 }
 0x45c   :  { %v4656_v28 = vpop.f32.mrf.mxu0 }
 0x45d   :  { %4528 = vmatmul.bf16.gmra.mxu3 %v3806_v34 }
 0x45f   :  { %v13108_v30 = vpop.f32.mrf.mxu3 }
 0x464   :  { %v13154_v27 = vpop.f32.mrf.mxu0 }
 0x46d   :  { %4533 = vmatmul.bf16.gmra.mxu3 %v3807_v18 }
 0x478   :  { %v13117_v58 = vpop.f32.mrf.mxu3 }
 0x47d   :  { %4538 = vmatmul.bf16.gmra.mxu3 %v3808_v14  ;;  %v9480_v14 = vld [vmem:[%s15395_s5 + $0x50] sm:$0xff] }
 0x480   :  { %v13119_v40 = vpop.f32.mrf.mxu3 }
 0x48d   :  { %4543 = vmatmul.bf16.gmra.mxu3 %v3809_v60 }
 0x490   :  { %v13124_v21 = vpop.f32.mrf.mxu3 }
 0x498   :  { %v13129_v4 = vpop.f32.mrf.mxu3 }
 0x4a0   :  { %v4509_v19 = vpop.f32.mrf.mxu3 }
 0x4a1   :  { %v4510_v56 = vadd.f32 %v4509_v19, %v13006_v45  ;;  %v13168_v45 = vld [vmem:[%s15396_s28] ss:$0 sm:$0xff] }
 0x4a8   :  { %v4511_v8 = vpop.f32.mrf.mxu3 }
 0x4a9   :  { %v4512_v52 = vadd.f32 %v4511_v8, %v13022_v22  ;;  %v4671_v22 = vadd.f32 %v4631_v5, %v4510_v56  ;;  %v4661_v5 = vpop.f32.mrf.mxu0 }
 0x4ab   :  { %v4672_v11 = vadd.f32 %v4633_v49, %v4512_v52  ;;  %v4691_v6 = vadd.f32 %v13168_v45, %v4671_v22 }
 0x4ad   :  { %v4692_v20 = vadd.f32 %v13168_v45, %v4672_v11 }
 0x4af   :  { %v13178_v49 = vmax.f32 %v4692_v20, 0.0 }
 0x4b0   :  { %v4514_v60 = vpop.f32.mrf.mxu3 }
 0x4b1   :  { %v4515_v34 = vadd.f32 %v4514_v60, %v13046_v62  ;;  %v4753_v60 = vmul.f32 %v13178_v49, %v13178_v49  ;;  %v4663_v12 = vpop.f32.mrf.mxu0 }
 0x4b3   :  { %v4673_v62 = vadd.f32 %v4636_v39, %v4515_v34 }
 0x4b5   :  { %v4693_v17 = vadd.f32 %v13168_v45, %v4673_v62 }
 0x4b7   :  { %v13184_v19 = vmax.f32 %v4693_v17, 0.0 }
 0x4b8   :  { %v4516_v37 = vpop.f32.mrf.mxu3 }
 0x4b9   :  { %v4517_v63 = vadd.f32 %v4516_v37, %v13048_v3 }
 0x4bb   :  { %v4674_v10 = vadd.f32 %v4638_v50, %v4517_v63 }
 0x4bd   :  { %v4694_v33 = vadd.f32 %v13168_v45, %v4674_v10 }
 0x4bf   :  { %v13190_v59 = vmax.f32 %v4694_v33, 0.0 }
 0x4c0   :  { %v4519_v32 = vpop.f32.mrf.mxu3 }
 0x4c1   :  { %v4520_v42 = vadd.f32 %v4519_v32, %v13056_v38  ;;  %v9481_v38 = vld [vmem:[%s15395_s5 + $0x58] sm:$0xff]  ;;  %v4754_v32 = vmul.f32 %v13184_v19, %v13184_v19 }
 0x4c2   :  { %6069 = vmatpush.bf16.msrb.mxu1 %v9481_v38 }
 0x4c3   :  { %v4675_v1 = vadd.f32 %v4641_v31, %v4520_v42 }
 0x4c5   :  { %v4695_v50 = vadd.f32 %v13168_v45, %v4675_v1 }
 0x4c6   :  { %6070 = vmatpush.bf16.msrb.mxu1 %v9480_v14 }
 0x4c8   :  { %v4521_v61 = vpop.f32.mrf.mxu3 }
 0x4c9   :  { %v4522_v2 = vadd.f32 %v4521_v61, %v13060_v35  ;;  %v13182_v35 = vmax.f32 %v4691_v6, 0.0 }
 0x4cb   :  { %v4676_v39 = vadd.f32 %v4643_v48, %v4522_v2  ;;  %v4752_v55 = vmul.f32 %v13182_v35, %v13182_v35  ;;  %v4723_v42 = vadd.f32 %v13178_v49, %v13182_v35 }
 0x4cd   :  { %v4696_v48 = vadd.f32 %v13168_v45, %v4676_v39  ;;  %v4724_v25 = vadd.f32 %v4723_v42, %v13184_v19 }
 0x4d0   :  { %v4524_v36 = vpop.f32.mrf.mxu3 }
 0x4d1   :  { %v4525_v3 = vadd.f32 %v4524_v36, %v13066_v13  ;;  %v4768_v36 = vadd.f32 %v4753_v60, %v4752_v55 }
 0x4d3   :  { %v4677_v13 = vadd.f32 %v4646_v44, %v4525_v3  ;;  %v13198_v44 = vmax.f32 %v4695_v50, 0.0 }
 0x4d5   :  { %v4756_v26 = vmul.f32 %v13198_v44, %v13198_v44 }
 0x4d8   :  { %v4526_v51 = vpop.f32.mrf.mxu3 }
 0x4d9   :  { %v4527_v53 = vadd.f32 %v4526_v51, %v13074_v57 }
 0x4db   :  { %v4678_v37 = vadd.f32 %v4648_v7, %v4527_v53  ;;  %v13206_v7 = vmax.f32 %v4696_v48, 0.0 }
 0x4dd   :  { %v4698_v51 = vadd.f32 %v13168_v45, %v4678_v37  ;;  %v4757_v9 = vmul.f32 %v13206_v7, %v13206_v7 }
 0x4df   :  { %v13221_v11 = vmax.f32 %v4698_v51, 0.0 }
 0x4e0   :  { %v4529_v0 = vpop.f32.mrf.mxu3 }
 0x4e1   :  { %v4530_v8 = vadd.f32 %v4529_v0, %v13085_v47  ;;  %v4697_v47 = vadd.f32 %v13168_v45, %v4677_v13  ;;  %v4769_v0 = vadd.f32 %v4768_v36, %v4754_v32  ;;  %v4759_v17 = vmul.f32 %v13221_v11, %v13221_v11 }
 0x4e2   :  { %v9648_v32 = vmov 128.0  }
 0x4e3   :  { %v4679_v1 = vadd.f32 %v4651_v16, %v4530_v8  ;;  %v4725_v16 = vadd.f32 %v4724_v25, %v13190_v59  ;;  %9616 = vrcp.f32 %v9648_v32 }
 0x4e5   :  { %v4726_v23 = vadd.f32 %v4725_v16, %v13198_v44 }
 0x4e8   :  { %v4531_v46 = vpop.f32.mrf.mxu3 }
 0x4e9   :  { %v4532_v57 = vadd.f32 %v4531_v46, %v13092_v43  ;;  %v4755_v43 = vmul.f32 %v13190_v59, %v13190_v59  ;;  %v13212_v46 = vmax.f32 %v4697_v47, 0.0 }
 0x4eb   :  { %v4680_v38 = vadd.f32 %v4653_v41, %v4532_v57  ;;  %v4770_v34 = vadd.f32 %v4769_v0, %v4755_v43  ;;  %v9617_v0 = vpop.eup %9616 }
 0x4ec   :  { %vm4749_vm12 = vweird.f32 %v9617_v0 }
 0x4ed   :  { %v4700_v63 = vadd.f32 %v13168_v45, %v4680_v38  ;;  %v4771_v22 = vadd.f32 %v4770_v34, %v4756_v26 }
 0x4ef   :  { %v4772_v10 = vadd.f32 %v4771_v22, %v4757_v9  ;;  %v13235_v3 = vmax.f32 %v4700_v63, 0.0 }
 0x4f0   :  { %v4534_v54 = vpop.f32.mrf.mxu3 }
 0x4f1   :  { %v4535_v61 = vadd.f32 %v4534_v54, %v13100_v15  ;;  %v4699_v54 = vadd.f32 %v13168_v45, %v4679_v1  ;;  %v4761_v48 = vmul.f32 %v13235_v3, %v13235_v3 }
 0x4f3   :  { %v4681_v52 = vadd.f32 %v4656_v28, %v4535_v61  ;;  %v13229_v20 = vmax.f32 %v4699_v54, 0.0 }
 0x4f5   :  { %v4760_v53 = vmul.f32 %v13229_v20, %v13229_v20 }
 0x4f8   :  { %v4536_v18 = vpop.f32.mrf.mxu3 }
 0x4f9   :  { %v4537_v15 = vadd.f32 %v4536_v18, %v13108_v30  ;;  %v4758_v30 = vmul.f32 %v13212_v46, %v13212_v46  ;;  %v4727_v18 = vadd.f32 %v4726_v23, %v13206_v7  ;;  %v4745_v23 = vmul.f32 128.0, %v9617_v0 }
 0x4fb   :  { %v4682_v62 = vadd.f32 %v13154_v27, %v4537_v15  ;;  %v4728_v6 = vadd.f32 %v4727_v18, %v13212_v46  ;;  %v4773_v14 = vadd.f32 %v4772_v10, %v4758_v30 }
 0x4fd   :  { %v4702_v27 = vadd.f32 %v13168_v45, %v4682_v62  ;;  %v4729_v39 = vadd.f32 %v4728_v6, %v13221_v11 }
 0x4ff   :  { %v4730_v60 = vadd.f32 %v4729_v39, %v13229_v20  ;;  %v13248_v37 = vmax.f32 %v4702_v27, 0.0 }
 0x500   :  { %v4539_v31 = vpop.f32.mrf.mxu3 }
 0x501   :  { %v4540_v41 = vadd.f32 %v4539_v31, %v13117_v58  ;;  %v4701_v58 = vadd.f32 %v13168_v45, %v4681_v52  ;;  %v4774_v31 = vadd.f32 %v4773_v14, %v4759_v17  ;;  %v4731_v1 = vadd.f32 %v4730_v60, %v13235_v3 }
 0x503   :  { %v4683_v2 = vadd.f32 %v4661_v5, %v4540_v41  ;;  %v13241_v50 = vmax.f32 %v4701_v58, 0.0  ;;  %v4775_v47 = vadd.f32 %v4774_v31, %v4760_v53  ;;  %v4746_v58 = vsub.f32 1.0, %v4745_v23 }
 0x505   :  { %v4703_v13 = vadd.f32 %v13168_v45, %v4683_v2  ;;  %v4762_v42 = vmul.f32 %v13241_v50, %v13241_v50  ;;  %v4776_v36 = vadd.f32 %v4775_v47, %v4761_v48  ;;  %v4732_v43 = vadd.f32 %v4731_v1, %v13241_v50 }
 0x506   :  { %v4747_v27 = vmul.f32 %v9617_v0, %v4746_v58 }
 0x507   :  { %v4777_v51 = vadd.f32 %v4776_v36, %v4762_v42  ;;  %v4733_v26 = vadd.f32 %v4732_v43, %v13248_v37  ;;  %v9490_v43 = vld [vmem:[%s15395_s5 + $0xa0] sm:$0xff] }
 0x508   :  { %v4541_v56 = vpop.f32.mrf.mxu3  ;;  %6243 = vmatpush.bf16.msra.mxu3 %v9490_v43 }
 0x509   :  { %v4542_v28 = vadd.f32 %v4541_v56, %v13119_v40  ;;  %v4666_v40 = vpop.f32.mrf.mxu0 }
 0x50b   :  { %v4684_v33 = vadd.f32 %v4663_v12, %v4542_v28  ;;  %v4763_v12 = vmul.f32 %v13248_v37, %v13248_v37 }
 0x50d   :  { %v4704_v57 = vadd.f32 %v13168_v45, %v4684_v33  ;;  %v4778_v56 = vadd.f32 %v4777_v51, %v4763_v12  ;;  %v9471_v12 = vld [vmem:[%s15395_s5 + $0x8] sm:$0xff] }
 0x50e   :  { %v9479_v51 = vld [vmem:[%s15395_s5 + $0x48] sm:$0xff]  ;;  %6148 = vmatpush.bf16.msrb.mxu2 %v9471_v12 }
 0x50f   :  { %v13260_v25 = vmax.f32 %v4704_v57, 0.0  ;;  %6071 = vmatpush.bf16.msrb.mxu1 %v9479_v51 }
 0x510   :  { %v4544_v5 = vpop.f32.mrf.mxu3 }
 0x511   :  { %v4545_v8 = vadd.f32 %v4544_v5, %v13124_v21  ;;  %v13254_v21 = vmax.f32 %v4703_v13, 0.0  ;;  %15397 = vst [vmem:[#allocation27_spill] sm:$0xff] %v13260_v25  ;;  %v4668_v52 = vpop.f32.mrf.mxu0  ;;  %v4765_v9 = vmul.f32 %v13260_v25, %v13260_v25 }
 0x513   :  { %v4685_v55 = vadd.f32 %v4666_v40, %v4545_v8  ;;  %v4764_v15 = vmul.f32 %v13254_v21, %v13254_v21  ;;  %v4734_v34 = vadd.f32 %v4733_v26, %v13254_v21 }
 0x515   :  { %v4705_v61 = vadd.f32 %v13168_v45, %v4685_v55  ;;  %v4779_v63 = vadd.f32 %v4778_v56, %v4764_v15  ;;  %v4735_v22 = vadd.f32 %v4734_v34, %v13260_v25  ;;  %v9478_v15 = vld [vmem:[%s15395_s5 + $0x40] sm:$0xff]  ;;  %v9488_v56 = vld [vmem:[%s15395_s5 + $0x90] sm:$0xff] }
 0x516   :  { %6072 = vmatpush.bf16.msrb.mxu1 %v9478_v15 }
 0x517   :  { %v13265_v16 = vmax.f32 %v4705_v61, 0.0  ;;  %v4780_v28 = vadd.f32 %v4779_v63, %v4765_v9 }
 0x518   :  { %v4546_v38 = vpop.f32.mrf.mxu3 }
 0x519   :  { %v4547_v54 = vadd.f32 %v4546_v38, %v13129_v4  ;;  %v4766_v30 = vmul.f32 %v13265_v16, %v13265_v16  ;;  %v4736_v4 = vadd.f32 %v4735_v22, %v13265_v16  ;;  %v9489_v38 = vld [vmem:[%s15395_s5 + $0x98] sm:$0xff]  ;;  %v13314_v22 = vld [vmem:[%s15398_s23] ss:$0 sm:$0xff] }
 0x51a   :  { %6244 = vmatpush.bf16.msra.mxu3 %v9489_v38 }
 0x51b   :  { %v4686_v41 = vadd.f32 %v4668_v52, %v4547_v54  ;;  %v4781_v10 = vadd.f32 %v4780_v28, %v4766_v30 }
 0x51d   :  { %v4706_v62 = vadd.f32 %v13168_v45, %v4686_v41  ;;  %v4748_v45 = vadd.f32 %v9617_v0, %v4747_v27  ;;  %v9487_v41 = vld [vmem:[%s15395_s5 + $0x88] sm:$0xff] }
 0x51e   :  { %6245 = vmatpush.bf16.msra.mxu3 %v9488_v56 }
 0x51f   :  { %v13276_v18 = vmax.f32 %v4706_v62, 0.0  ;;  %v4750_v60 = vsel %vm4749_vm12, %v9617_v0, %v4748_v45  ;;  %v9470_v0 = vld [vmem:[%s15395_s5] sm:$0xff] }
 0x520   :  { %6149 = vmatpush.bf16.msrb.mxu2 %v9470_v0 }
 0x521   :  { %v4737_v2 = vadd.f32 %v4736_v4, %v13276_v18  ;;  %v4767_v6 = vmul.f32 %v13276_v18, %v13276_v18 }
 0x522   :  { %6246 = vmatpush.bf16.msra.mxu3 %v9487_v41 }
 0x523   :  { %v4738_v17 = vrot.slane %v4737_v2, 4  ;;  %v4782_v14 = vadd.f32 %v4781_v10, %v4767_v6 }
 0x525   :  { %v4739_v33 = vadd.f32 %v4738_v17, %v4737_v2  ;;  %v4783_v40 = vrot.slane %v4782_v14, 4 }
 0x527   :  { %v4740_v39 = vrot.slane %v4739_v33, 2  ;;  %v4784_v53 = vadd.f32 %v4783_v40, %v4782_v14 }
 0x529   :  { %v4741_v5 = vadd.f32 %v4740_v39, %v4739_v33  ;;  %v4785_v13 = vrot.slane %v4784_v53, 2 }
 0x52b   :  { %v4742_v8 = vrot.slane %v4741_v5, 1  ;;  %v4786_v31 = vadd.f32 %v4785_v13, %v4784_v53 }
 0x52d   :  { %v4743_v48 = vadd.f32 %v4742_v8, %v4741_v5  ;;  %v4787_v57 = vrot.slane %v4786_v31, 1 }
 0x52f   :  { %v13281_v55 = vmul.f32 %v4750_v60, %v4743_v48  ;;  %v4788_v32 = vadd.f32 %v4787_v57, %v4786_v31 }
 0x531   :  { %v4789_v47 = vmul.f32 %v4788_v32, %v4750_v60  ;;  %v4790_v42 = vmul.f32 %v13281_v55, %v13281_v55  ;;  %v4808_v63 = vsub.f32 %v13276_v18, %v13281_v55  ;;  %v4793_v30 = vsub.f32 %v13182_v35, %v13281_v55  ;;  %v9486_v18 = vld [vmem:[%s15395_s5 + $0x80] sm:$0xff] }
 0x532   :  { %v4794_v62 = vsub.f32 %v13178_v49, %v13281_v55  ;;  %v4795_v28 = vsub.f32 %v13184_v19, %v13281_v55  ;;  %v4796_v58 = vsub.f32 %v13190_v59, %v13281_v55  ;;  %v4797_v10 = vsub.f32 %v13198_v44, %v13281_v55  ;;  %v13337_v19 = vld [vmem:[%s15399_s3] ss:$0 sm:$0xff]  ;;  %6247 = vmatpush.bf16.msra.mxu3 %v9486_v18 }
 0x533   :  { %v4791_v1 = vsub.f32 %v4789_v47, %v4790_v42  ;;  %v4798_v35 = vsub.f32 %v13206_v7, %v13281_v55 }
 0x535   :  { %v4792_v61 = vmax.f32 %v4791_v1, 0.0 }
 0x537   :  { %v4809_v36 = vadd.f32 1e-05, %v4792_v61 }
 0x539   :  { %9618 = vrsqrt.f32 %v4809_v36  ;;  %vm4816_vm7 = vweird.f32 %v4809_v36 }
 0x53f   :  { %v9619_v26 = vpop.eup %9618 }
 0x540   :  { %v4811_v54 = vmul.f32 %v9619_v26, %v4809_v36  ;;  %vm4817_vm13 = vweird.f32 %v9619_v26 }
 0x541   :  { %vm4818_vm8 = vmor %vm4816_vm7, %vm4817_vm13 }
 0x542   :  { %v4812_v52 = vmul.f32 %v9619_v26, %v4811_v54 }
 0x544   :  { %v4813_v34 = vmul.f32 0.5, %v4812_v52 }
 0x546   :  { %v4814_v9 = vsub.f32 1.5, %v4813_v34 }
 0x548   :  { %v4815_v23 = vmul.f32 %v9619_v26, %v4814_v9 }
 0x54a   :  { %v13322_v4 = vsel %vm4818_vm8, %v9619_v26, %v4815_v23 }
 0x54b   :  { %v4835_v49 = vmul.f32 %v13322_v4, %v4808_v63  ;;  %v4820_v2 = vmul.f32 %v13322_v4, %v4793_v30  ;;  %v4821_v6 = vmul.f32 %v13322_v4, %v4794_v62  ;;  %v4822_v17 = vmul.f32 %v13322_v4, %v4795_v28 }
 0x54c   :  { %v4823_v59 = vmul.f32 %v13322_v4, %v4796_v58  ;;  %v4824_v44 = vmul.f32 %v13322_v4, %v4797_v10  ;;  %v4825_v14 = vmul.f32 %v13322_v4, %v4798_v35 }
 0x54d   :  { %v4855_v7 = vmul.f32 %v13314_v22, %v4835_v49  ;;  %v4840_v27 = vmul.f32 %v13314_v22, %v4820_v2  ;;  %v4841_v33 = vmul.f32 %v13314_v22, %v4821_v6  ;;  %v4842_v40 = vmul.f32 %v13314_v22, %v4822_v17 }
 0x54e   :  { %v4843_v39 = vmul.f32 %v13314_v22, %v4823_v59  ;;  %v4844_v53 = vmul.f32 %v13314_v22, %v4824_v44  ;;  %v4845_v45 = vmul.f32 %v13314_v22, %v4825_v14 }
 0x54f   :  { %v4875_v5 = vadd.f32 %v13337_v19, %v4855_v7  ;;  %v4860_v13 = vadd.f32 %v13337_v19, %v4840_v27  ;;  %v13355_v8 = vadd.f32 %v13337_v19, %v4841_v33  ;;  %v13358_v31 = vadd.f32 %v13337_v19, %v4842_v40 }
 0x550   :  { %v13361_v60 = vadd.f32 %v13337_v19, %v4843_v39  ;;  %v13365_v1 = vadd.f32 %v13337_v19, %v4844_v53  ;;  %v13368_v61 = vadd.f32 %v13337_v19, %v4845_v45 }
 0x551   :  { %v4937_v48 = vrot.slane %v4875_v5, 2  ;;  %v4938_v57 = vrot.slane %v4875_v5, 4  ;;  %v4939_v32 = vrot.slane %v4875_v5, 6  ;;  %v5408_v47 = vsel %vm2322_vm10, %v4875_v5, -inf }
 0x552   :  { %v5409_v42 = vrot.slane %v5408_v47, 4  ;;  %v4892_v36 = vrot.slane %v4860_v13, 2  ;;  %v4893_v38 = vrot.slane %v4860_v13, 4  ;;  %v4894_v54 = vrot.slane %v4860_v13, 6 }
 0x553   :  { %v5415_v43 = vsel %vm2322_vm10, %v4937_v48, -inf  ;;  %v5422_v12 = vsel %vm2322_vm10, %v4938_v57, -inf  ;;  %v13373_v51 = vsel %vm2322_vm10, %v4939_v32, -inf  ;;  %v4895_v56 = vrot.slane %v13355_v8, 2 }
 0x554   :  { %v5410_v0 = vmax.f32 %v5408_v47, %v5409_v42  ;;  %v5416_v26 = vrot.slane %v5415_v43, 4  ;;  %v5423_v15 = vrot.slane %v5422_v12, 4  ;;  %v4896_v34 = vrot.slane %v13355_v8, 4 }
 0x555   :  { %v4897_v9 = vrot.slane %v13355_v8, 6  ;;  %v4898_v63 = vrot.slane %v13358_v31, 2  ;;  %v4899_v30 = vrot.slane %v13358_v31, 4  ;;  %v4900_v28 = vrot.slane %v13358_v31, 6 }
 0x556   :  { %v5411_v41 = vrot.slane %v5410_v0, 2  ;;  %v13379_v23 = vmax.f32 %v5415_v43, %v5416_v26  ;;  %v13383_v62 = vmax.f32 %v5422_v12, %v5423_v15  ;;  %v4901_v18 = vrot.slane %v13361_v60, 2 }
 0x557   :  { %v4902_v58 = vrot.slane %v13361_v60, 4  ;;  %v4903_v49 = vrot.slane %v13361_v60, 6  ;;  %v4904_v2 = vrot.slane %v13365_v1, 2  ;;  %v4905_v6 = vrot.slane %v13365_v1, 4 }
 0x558   :  { %v13388_v10 = vmax.f32 %v5410_v0, %v5411_v41  ;;  %v4906_v17 = vrot.slane %v13365_v1, 6  ;;  %v4988_v44 = vsel %vm2322_vm10, %v4860_v13, -inf  ;;  %v4995_v27 = vsel %vm2322_vm10, %v4892_v36, -inf }
 0x559   :  { %v4989_v7 = vrot.slane %v4988_v44, 4  ;;  %v5002_v33 = vsel %vm2322_vm10, %v4893_v38, -inf  ;;  %v4996_v40 = vrot.slane %v4995_v27, 4  ;;  %v5009_v53 = vsel %vm2322_vm10, %v4894_v54, -inf }
 0x55a   :  { %v5003_v39 = vrot.slane %v5002_v33, 4  ;;  %v5016_v45 = vsel %vm2322_vm10, %v13355_v8, -inf  ;;  %v5010_v57 = vrot.slane %v5009_v53, 4  ;;  %v5023_v42 = vsel %vm2322_vm10, %v4895_v56, -inf }
 0x55b   :  { %v4990_v48 = vmax.f32 %v4988_v44, %v4989_v7  ;;  %v5017_v32 = vrot.slane %v5016_v45, 4  ;;  %v4997_v13 = vmax.f32 %v4995_v27, %v4996_v40  ;;  %v5030_v36 = vsel %vm2322_vm10, %v4896_v34, -inf }
 0x55c   :  { %v5004_v47 = vmax.f32 %v5002_v33, %v5003_v39  ;;  %v5011_v12 = vmax.f32 %v5009_v53, %v5010_v57  ;;  %v5024_v0 = vrot.slane %v5023_v42, 4  ;;  %v5031_v54 = vrot.slane %v5030_v36, 4 }
 0x55d   :  { %v4991_v43 = vrot.slane %v4990_v48, 2  ;;  %v5018_v38 = vmax.f32 %v5016_v45, %v5017_v32  ;;  %v4998_v26 = vrot.slane %v4997_v13, 2  ;;  %v5037_v8 = vsel %vm2322_vm10, %v4897_v9, -inf }
 0x55e   :  { %v5005_v15 = vrot.slane %v5004_v47, 2  ;;  %v5012_v52 = vrot.slane %v5011_v12, 2  ;;  %v5025_v7 = vmax.f32 %v5023_v42, %v5024_v0  ;;  %v5032_v33 = vmax.f32 %v5030_v36, %v5031_v54 }
 0x55f   :  { %v4992_v41 = vmax.f32 %v4990_v48, %v4991_v43  ;;  %v5019_v44 = vrot.slane %v5018_v38, 2  ;;  %v4999_v35 = vmax.f32 %v4997_v13, %v4998_v26  ;;  %v5038_v40 = vrot.slane %v5037_v8, 4 }
 0x560   :  { %v5006_v27 = vmax.f32 %v5004_v47, %v5005_v15  ;;  %v5013_v39 = vmax.f32 %v5011_v12, %v5012_v52  ;;  %v5026_v5 = vrot.slane %v5025_v7, 2  ;;  %v5033_v57 = vrot.slane %v5032_v33, 2 }
 0x561   :  { %v4993_v56 = vrot.slane %v4992_v41, 1  ;;  %v5020_v34 = vmax.f32 %v5018_v38, %v5019_v44  ;;  %v5000_v53 = vrot.slane %v4999_v35, 1  ;;  %v5039_v32 = vmax.f32 %v5037_v8, %v5038_v40 }
 0x562   :  { %v5007_v45 = vrot.slane %v5006_v27, 1  ;;  %v5014_v59 = vrot.slane %v5013_v39, 1  ;;  %v5027_v48 = vmax.f32 %v5025_v7, %v5026_v5  ;;  %v5034_v13 = vmax.f32 %v5032_v33, %v5033_v57 }
 0x563   :  { %v5021_v9 = vrot.slane %v5020_v34, 1  ;;  %v13408_v43 = vmax.f32 %v4992_v41, %v4993_v56  ;;  %v13410_v42 = vmax.f32 %v4999_v35, %v5000_v53  ;;  %v5040_v47 = vrot.slane %v5039_v32, 2 }
 0x564   :  { %v13412_v36 = vmax.f32 %v5006_v27, %v5007_v45  ;;  %v13414_v52 = vmax.f32 %v5013_v39, %v5014_v59  ;;  %v5028_v12 = vrot.slane %v5027_v48, 1  ;;  %v5044_v38 = vsel %vm2322_vm10, %v13358_v31, -inf }
 0x565   :  { %v5035_v0 = vrot.slane %v5034_v13, 1  ;;  %v5041_v26 = vmax.f32 %v5039_v32, %v5040_v47  ;;  %v5045_v15 = vrot.slane %v5044_v38, 4  ;;  %v5051_v5 = vsel %vm2322_vm10, %v4898_v63, -inf }
 0x566   :  { %v13421_v54 = vmax.f32 %v5020_v34, %v5021_v9  ;;  %v5052_v35 = vrot.slane %v5051_v5, 4  ;;  %v5058_v8 = vsel %vm2322_vm10, %v4899_v30, -inf  ;;  %v5065_v59 = vsel %vm2322_vm10, %v4900_v28, -inf }
 0x567   :  { %v13429_v41 = vmax.f32 %v5027_v48, %v5028_v12  ;;  %v13431_v44 = vmax.f32 %v5034_v13, %v5035_v0  ;;  %v5046_v7 = vmax.f32 %v5044_v38, %v5045_v15  ;;  %v5059_v27 = vrot.slane %v5058_v8, 4 }
 0x568   :  { %v5053_v33 = vmax.f32 %v5051_v5, %v5052_v35  ;;  %v5066_v40 = vrot.slane %v5065_v59, 4  ;;  %v5072_v63 = vsel %vm2322_vm10, %v13361_v60, -inf  ;;  %v5079_v56 = vsel %vm2322_vm10, %v4901_v18, -inf }
 0x569   :  { %v5042_v30 = vrot.slane %v5041_v26, 1  ;;  %v5047_v39 = vrot.slane %v5046_v7, 2  ;;  %v5060_v31 = vmax.f32 %v5058_v8, %v5059_v27  ;;  %v5073_v34 = vrot.slane %v5072_v63, 4 }
 0x56a   :  { %v5054_v28 = vrot.slane %v5053_v33, 2  ;;  %v5067_v53 = vmax.f32 %v5065_v59, %v5066_v40  ;;  %v5080_v45 = vrot.slane %v5079_v56, 4  ;;  %v5086_v57 = vsel %vm2322_vm10, %v4902_v58, -inf }
 0x56b   :  { %v5048_v32 = vmax.f32 %v5046_v7, %v5047_v39  ;;  %v5061_v9 = vrot.slane %v5060_v31, 2  ;;  %v5074_v48 = vmax.f32 %v5072_v63, %v5073_v34  ;;  %v5087_v13 = vrot.slane %v5086_v57, 4 }
 0x56c   :  { %v5055_v47 = vmax.f32 %v5053_v33, %v5054_v28  ;;  %v5068_v12 = vrot.slane %v5067_v53, 2  ;;  %v5081_v38 = vmax.f32 %v5079_v56, %v5080_v45  ;;  %v5093_v18 = vsel %vm2322_vm10, %v4903_v49, -inf }
 0x56d   :  { %v5049_v0 = vrot.slane %v5048_v32, 1  ;;  %v5062_v15 = vmax.f32 %v5060_v31, %v5061_v9  ;;  %v5075_v5 = vrot.slane %v5074_v48, 2  ;;  %v5088_v35 = vmax.f32 %v5086_v57, %v5087_v13 }
 0x56e   :  { %v5056_v8 = vrot.slane %v5055_v47, 1  ;;  %v5069_v59 = vmax.f32 %v5067_v53, %v5068_v12  ;;  %v5082_v27 = vrot.slane %v5081_v38, 2  ;;  %v5094_v40 = vrot.slane %v5093_v18, 4 }
 0x56f   :  { %v13444_v58 = vmax.f32 %v5041_v26, %v5042_v30  ;;  %v5063_v7 = vrot.slane %v5062_v15, 1  ;;  %v5076_v63 = vmax.f32 %v5074_v48, %v5075_v5  ;;  %v5089_v39 = vrot.slane %v5088_v35, 2 }
 0x570   :  { %v13446_v33 = vmax.f32 %v5048_v32, %v5049_v0  ;;  %v5070_v56 = vrot.slane %v5069_v59, 1  ;;  %v5083_v34 = vmax.f32 %v5081_v38, %v5082_v27  ;;  %v5095_v60 = vmax.f32 %v5093_v18, %v5094_v40 }
 0x571   :  { %v13448_v28 = vmax.f32 %v5055_v47, %v5056_v8  ;;  %v5077_v49 = vrot.slane %v5076_v63, 1  ;;  %v5090_v31 = vmax.f32 %v5088_v35, %v5089_v39  ;;  %v5100_v45 = vsel %vm2322_vm10, %v13365_v1, -inf }
 0x572   :  { %v13452_v53 = vmax.f32 %v5062_v15, %v5063_v7  ;;  %v5084_v57 = vrot.slane %v5083_v34, 1  ;;  %v5096_v26 = vrot.slane %v5095_v60, 2  ;;  %v5101_v30 = vrot.slane %v5100_v45, 4 }
 0x573   :  { %v13454_v9 = vmax.f32 %v5069_v59, %v5070_v56  ;;  %v5091_v48 = vrot.slane %v5090_v31, 1  ;;  %v5107_v32 = vsel %vm2322_vm10, %v4904_v2, -inf  ;;  %v5114_v13 = vsel %vm2322_vm10, %v4905_v6, -inf }
 0x574   :  { %v13462_v47 = vmax.f32 %v5076_v63, %v5077_v49  ;;  %v5097_v12 = vmax.f32 %v5095_v60, %v5096_v26  ;;  %v5102_v38 = vmax.f32 %v5100_v45, %v5101_v30  ;;  %v5108_v18 = vrot.slane %v5107_v32, 4 }
 0x575   :  { %v13464_v0 = vmax.f32 %v5083_v34, %v5084_v57  ;;  %v5115_v15 = vrot.slane %v5114_v13, 4  ;;  %v5121_v5 = vsel %vm2322_vm10, %v4906_v17, -inf  ;;  %v5128_v35 = vsel %vm2322_vm10, %v13368_v61, -inf }
 0x576   :  { %v13471_v2 = vmax.f32 %v5090_v31, %v5091_v48  ;;  %v5103_v8 = vrot.slane %v5102_v38, 2  ;;  %v5109_v59 = vmax.f32 %v5107_v32, %v5108_v18  ;;  %v5122_v6 = vrot.slane %v5121_v5, 4 }
 0x577   :  { %v5116_v27 = vmax.f32 %v5114_v13, %v5115_v15  ;;  %v5129_v40 = vrot.slane %v5128_v35, 4  ;;  %v15400_v7 = vrot.slane %v13368_v61, 2  ;;  %v15401_v39 = vrot.slane %v13368_v61, 4 }
 0x578   :  { %v5098_v56 = vrot.slane %v5097_v12, 1  ;;  %v5104_v17 = vmax.f32 %v5102_v38, %v5103_v8  ;;  %v5110_v34 = vrot.slane %v5109_v59, 2  ;;  %v5123_v60 = vmax.f32 %v5121_v5, %v5122_v6 }
 0x579   :  { %v5135_v63 = vsel %vm2322_vm10, %v15400_v7, -inf  ;;  %v5142_v1 = vsel %vm2322_vm10, %v15401_v39, -inf  ;;  %v5117_v49 = vrot.slane %v5116_v27, 2  ;;  %v5130_v31 = vmax.f32 %v5128_v35, %v5129_v40 }
 0x57a   :  { %v5136_v45 = vrot.slane %v5135_v63, 4  ;;  %v5143_v57 = vrot.slane %v5142_v1, 4  ;;  %v5105_v26 = vrot.slane %v5104_v17, 1  ;;  %v5111_v30 = vmax.f32 %v5109_v59, %v5110_v34 }
 0x57b   :  { %v5124_v48 = vrot.slane %v5123_v60, 2  ;;  %v15402_v32 = vrot.slane %v13368_v61, 6  ;;  %v5118_v18 = vmax.f32 %v5116_v27, %v5117_v49  ;;  %v5131_v15 = vrot.slane %v5130_v31, 2 }
 0x57c   :  { %v5137_v7 = vmax.f32 %v5135_v63, %v5136_v45  ;;  %v5144_v14 = vmax.f32 %v5142_v1, %v5143_v57  ;;  %v13482_v39 = vmax.f32 %v5097_v12, %v5098_v56  ;;  %v5112_v38 = vrot.slane %v5111_v30, 1 }
 0x57d   :  { %v5149_v13 = vsel %vm2322_vm10, %v15402_v32, -inf  ;;  %v5125_v8 = vmax.f32 %v5123_v60, %v5124_v48  ;;  %v5119_v6 = vrot.slane %v5118_v18, 1  ;;  %v5132_v35 = vmax.f32 %v5130_v31, %v5131_v15 }
 0x57e   :  { %v5150_v5 = vrot.slane %v5149_v13, 4  ;;  %v5138_v40 = vrot.slane %v5137_v7, 2  ;;  %v5145_v24 = vrot.slane %v5144_v14, 2  ;;  %v13484_v25 = vmax.f32 %v5111_v30, %v5112_v38 }
 0x57f   :  { %v5126_v59 = vrot.slane %v5125_v8, 1  ;;  %v5604_v61 = vsel %vm3555_vm14, %v13410_v42, %v13408_v43  ;;  %v13489_v27 = vmax.f32 %v5104_v17, %v5105_v26  ;;  %v5133_v63 = vrot.slane %v5132_v35, 1 }
 0x580   :  { %v5151_v34 = vmax.f32 %v5149_v13, %v5150_v5  ;;  %v5139_v12 = vmax.f32 %v5137_v7, %v5138_v40  ;;  %v5146_v1 = vmax.f32 %v5144_v14, %v5145_v24  ;;  %v13491_v56 = vmax.f32 %v5118_v18, %v5119_v6 }
 0x581   :  { %v5605_v49 = vsel %vm3557_vm15, %v13412_v36, %v5604_v61  ;;  %v5611_v31 = vsel %vm3555_vm14, %v13448_v28, %v13446_v33  ;;  %v13498_v45 = vmax.f32 %v5125_v8, %v5126_v59  ;;  %v5618_v48 = vsel %vm3555_vm14, %v13484_v25, %v13489_v27 }
 0x582   :  { %v5152_v60 = vrot.slane %v5151_v34, 2  ;;  %v5140_v57 = vrot.slane %v5139_v12, 1  ;;  %v5147_v30 = vrot.slane %v5146_v1, 1  ;;  %v5606_v17 = vsel %vm3559_vm0, %v13414_v52, %v5605_v49 }
 0x583   :  { %v5607_v24 = vsel %vm3561_vm1, %v13421_v54, %v5606_v17  ;;  %v5612_v14 = vsel %vm3557_vm15, %v13452_v53, %v5611_v31  ;;  %v13509_v32 = vmax.f32 %v5132_v35, %v5133_v63  ;;  %v5619_v5 = vsel %vm3557_vm15, %v13491_v56, %v5618_v48 }
 0x584   :  { %v5153_v26 = vmax.f32 %v5151_v34, %v5152_v60  ;;  %v13511_v13 = vmax.f32 %v5139_v12, %v5140_v57  ;;  %v5608_v18 = vsel %vm3563_vm2, %v13429_v41, %v5607_v24  ;;  %v5613_v15 = vsel %vm3559_vm0, %v13454_v9, %v5612_v14 }
 0x585   :  { %v5609_v38 = vsel %vm3565_vm3, %v13431_v44, %v5608_v18  ;;  %v5614_v8 = vsel %vm3561_vm1, %v13462_v47, %v5613_v15  ;;  %v13523_v6 = vmax.f32 %v5146_v1, %v5147_v30  ;;  %v5620_v59 = vsel %vm3559_vm0, %v13498_v45, %v5619_v5 }
 0x586   :  { %v5154_v7 = vrot.slane %v5153_v26, 1  ;;  %v13527_v35 = vsel %vm3567_vm6, %v13444_v58, %v5609_v38  ;;  %v5615_v40 = vsel %vm3563_vm2, %v13464_v0, %v5614_v8  ;;  %v5621_v61 = vsel %vm3561_vm1, %v13509_v32, %v5620_v59 }
 0x587   :  { %v5616_v34 = vsel %vm3565_vm3, %v13471_v2, %v5615_v40  ;;  %v15080_v63 = vrot.slane %v13527_v35, 1  ;;  %v5744_v12 = vpack.c.bf16 %v13408_v43, %v13408_v43  ;;  %v5622_v49 = vsel %vm3563_vm2, %v13511_v13, %v5621_v61 }
 0x588   :  { %v13540_v1 = vmax.f32 %v5153_v26, %v5154_v7  ;;  %v13544_v60 = vsel %vm3567_vm6, %v13482_v39, %v5616_v34  ;;  %v5745_v31 = vpack.c.bf16 %v13410_v42, %v13410_v42  ;;  %v5623_v57 = vsel %vm3565_vm3, %v13523_v6, %v5622_v49 }
 0x589   :  { %v5701_v30 = vrot.slane %v13544_v60, 1  ;;  %v5746_v43 = vpack.c.bf16 %v13412_v36, %v13412_v36  ;;  %v5747_v17 = vpack.c.bf16 %v13414_v52, %v13414_v52  ;;  %v5748_v24 = vpack.c.bf16 %v13421_v54, %v13421_v54 }
 0x58a   :  { %v13559_v26 = vsel %vm3567_vm6, %v13540_v1, %v5623_v57  ;;  %v5749_v42 = vpack.c.bf16 %v13429_v41, %v13429_v41  ;;  %v5750_v14 = vpack.c.bf16 %v13431_v44, %v13431_v44  ;;  %v5751_v52 = vpack.c.bf16 %v13444_v58, %v13444_v58 }
 0x58b   :  { %v15081_v48 = vrot.slane %v13559_v26, 1  ;;  %v5714_v36 = vsel %vm1166_vm4, %v15080_v63, %v5701_v30  ;;  %v5752_v18 = vpack.c.bf16 %v13446_v33, %v13446_v33  ;;  %v5753_v54 = vpack.c.bf16 %v13448_v28, %v13448_v28 }
 0x58c   :  { %v5754_v41 = vpack.c.bf16 %v13452_v53, %v13452_v53  ;;  %v5755_v44 = vpack.c.bf16 %v13454_v9, %v13454_v9  ;;  %v5756_v15 = vpack.c.bf16 %v13462_v47, %v13462_v47  ;;  %v5757_v33 = vpack.c.bf16 %v13464_v0, %v13464_v0 }
 0x58d   :  { %v5713_v58 = vsel %vm1166_vm4, %v5701_v30, %v15081_v48  ;;  %v5758_v28 = vpack.c.bf16 %v13471_v2, %v13471_v2  ;;  %v5759_v53 = vpack.c.bf16 %v13482_v39, %v13482_v39  ;;  %v5889_v38 = vunpack.c.l.b16 %v5744_v12 }
 0x58e   :  { %v6171_v7 = vpack.c.bf16 %v5713_v58, %v5714_v36  ;;  %v5890_v9 = vunpack.c.l.b16 %v5745_v31  ;;  %v5891_v8 = vunpack.c.l.b16 %v5746_v43  ;;  %v5892_v5 = vunpack.c.l.b16 %v5747_v17 }
 0x58f   :  { %v5893_v47 = vunpack.c.l.b16 %v5748_v24  ;;  %v5894_v40 = vunpack.c.l.b16 %v5749_v42  ;;  %v5895_v59 = vunpack.c.l.b16 %v5750_v14  ;;  %v5896_v34 = vunpack.c.l.b16 %v5751_v52 }
 0x590   :  { %6248 = vmatmul.bf16.vlgmr.msra.gmra.mxu3 %v6171_v7  ;;  %v5897_v61 = vunpack.c.l.b16 %v5752_v18  ;;  %v5898_v49 = vunpack.c.l.b16 %v5753_v54  ;;  %v5899_v57 = vunpack.c.l.b16 %v5754_v41  ;;  %v5900_v0 = vunpack.c.l.b16 %v5755_v44 }
 0x591   :  { %v5901_v30 = vunpack.c.l.b16 %v5756_v15  ;;  %v5902_v63 = vunpack.c.l.b16 %v5757_v33  ;;  %v5903_v2 = vunpack.c.l.b16 %v5758_v28  ;;  %v5953_v48 = vsel %vm3555_vm14, %v5890_v9, %v5889_v38 }
 0x592   :  { %v5960_v39 = vsel %vm3555_vm14, %v5898_v49, %v5897_v61  ;;  %v4807_v12 = vsub.f32 %v13265_v16, %v13281_v55  ;;  %v15403_v31 = vrot.slane %v13379_v23, 2  ;;  %v5954_v17 = vsel %vm3557_vm15, %v5891_v8, %v5953_v48 }
 0x593   :  { %v5961_v24 = vsel %vm3557_vm15, %v5899_v57, %v5960_v39  ;;  %v5425_v42 = vrot.slane %v13383_v62, 2  ;;  %v15404_v14 = vrot.slane %v13373_v51, 4  ;;  %v5955_v52 = vsel %vm3559_vm0, %v5892_v5, %v5954_v17 }
 0x594   :  { %v5419_v43 = vmax.f32 %v13379_v23, %v15403_v31  ;;  %v5962_v18 = vsel %vm3559_vm0, %v5900_v0, %v5961_v24  ;;  %v4834_v16 = vmul.f32 %v13322_v4, %v4807_v12  ;;  %v5956_v41 = vsel %vm3561_vm1, %v5893_v47, %v5955_v52 }
 0x595   :  { %v5431_v36 = vmax.f32 %v13373_v51, %v15404_v14  ;;  %v5963_v23 = vsel %vm3561_vm1, %v5901_v30, %v5962_v18  ;;  %v5426_v48 = vmax.f32 %v13383_v62, %v5425_v42  ;;  %v5904_v15 = vunpack.c.l.b16 %v5759_v53 }
 0x596   :  { %v5420_v54 = vrot.slane %v5419_v43, 1  ;;  %v5957_v58 = vsel %vm3563_vm2, %v5894_v40, %v5956_v41  ;;  %v5964_v33 = vsel %vm3563_vm2, %v5902_v63, %v5963_v23  ;;  %v4854_v51 = vmul.f32 %v13314_v22, %v4834_v16 }
 0x597   :  { %v5432_v44 = vrot.slane %v5431_v36, 2  ;;  %v5958_v28 = vsel %vm3565_vm3, %v5895_v59, %v5957_v58  ;;  %v5965_v7 = vsel %vm3565_vm3, %v5903_v2, %v5964_v33  ;;  %v5427_v38 = vrot.slane %v5426_v48, 1 }
 0x598   :  { %v15405_v8 = vrot.slane %v13388_v10, 1  ;;  %v5959_v62 = vsel %vm3567_vm6, %v5896_v34, %v5958_v28  ;;  %v5966_v53 = vsel %vm3567_vm6, %v5904_v15, %v5965_v7  ;;  %v4874_v47 = vadd.f32 %v13337_v19, %v4854_v51 }
 0x599   :  { %v5433_v9 = vmax.f32 %v5431_v36, %v5432_v44  ;;  %v6009_v63 = vpack.c.b16 %v5966_v53, %v5959_v62  ;;  %v13626_v40 = vmax.f32 %v5419_v43, %v5420_v54  ;;  %v5440_v59 = vand.u32 31, %v15256_v29 }
 0x59a   :  { %v13621_v5 = vmax.f32 %v13388_v10, %v15405_v8  ;;  %v4934_v49 = vrot.slane %v4874_v47, 2  ;;  %v4935_v57 = vrot.slane %v4874_v47, 4  ;;  %v4936_v0 = vrot.slane %v4874_v47, 6 }
 0x59b   :  { %v5434_v61 = vrot.slane %v5433_v9, 1  ;;  %v5380_v30 = vsel %vm2322_vm10, %v4874_v47, -inf  ;;  %6073 = vmatmul.bf16.vlgmr.msrb.gmra.mxu1 %v6009_v63  ;;  %v13630_v2 = vmax.f32 %v5426_v48, %v5427_v38  ;;  %v5668_v39 = vrot.slane %v13527_v35, 7 }
 0x59c   :  { %v5381_v10 = vrot.slane %v5380_v30, 4  ;;  %v5387_v12 = vsel %vm2322_vm10, %v4934_v49, -inf  ;;  %v5394_v31 = vsel %vm2322_vm10, %v4935_v57, -inf  ;;  %v5401_v43 = vsel %vm2322_vm10, %v4936_v0, -inf }
 0x59d   :  { %15406 = vst [vmem:[#allocation28_spill] sm:$0xff] %v13630_v2  ;;  %v13632_v34 = vmax.f32 %v5433_v9, %v5434_v61  ;;  %v15082_v17 = vrot.slane %v13544_v60, 7  ;;  %v5388_v42 = vrot.slane %v5387_v12, 4  ;;  %v5395_v14 = vrot.slane %v5394_v31, 4 }
 0x59e   :  { %v5382_v24 = vmax.f32 %v5380_v30, %v5381_v10  ;;  %v5402_v36 = vrot.slane %v5401_v43, 4  ;;  %v13640_v52 = vadd.s32 24, %v15256_v29  ;;  %v4799_v18 = vsub.f32 %v13212_v46, %v13281_v55 }
 0x59f   :  { %15407 = vst [vmem:[#allocation29_spill] sm:$0xff] %v13632_v34  ;;  %v4800_v16 = vsub.f32 %v13221_v11, %v13281_v55  ;;  %v4801_v54 = vsub.f32 %v13229_v20, %v13281_v55  ;;  %v5389_v23 = vmax.f32 %v5387_v12, %v5388_v42  ;;  %v5396_v48 = vmax.f32 %v5394_v31, %v5395_v14 }
 0x5a0   :  { %v5383_v41 = vrot.slane %v5382_v24, 2  ;;  %v5403_v44 = vmax.f32 %v5401_v43, %v5402_v36  ;;  %v4802_v15 = vsub.f32 %v13235_v3, %v13281_v55  ;;  %v4826_v58 = vmul.f32 %v13322_v4, %v4799_v18 }
 0x5a1   :  { %v4827_v33 = vmul.f32 %v13322_v4, %v4800_v16  ;;  %v4828_v51 = vmul.f32 %v13322_v4, %v4801_v54  ;;  %v5390_v28 = vrot.slane %v5389_v23, 2  ;;  %v5397_v7 = vrot.slane %v5396_v48, 2 }
 0x5a2   :  { %v5384_v46 = vmax.f32 %v5382_v24, %v5383_v41  ;;  %v5404_v11 = vrot.slane %v5403_v44, 2  ;;  %v4829_v38 = vmul.f32 %v13322_v4, %v4802_v15  ;;  %v4846_v20 = vmul.f32 %v13314_v22, %v4826_v58 }
 0x5a3   :  { %v4847_v9 = vmul.f32 %v13314_v22, %v4827_v33  ;;  %v4848_v8 = vmul.f32 %v13314_v22, %v4828_v51  ;;  %v5391_v3 = vmax.f32 %v5389_v23, %v5390_v28  ;;  %v5398_v53 = vmax.f32 %v5396_v48, %v5397_v7 }
 0x5a4   :  { %v5385_v62 = vrot.slane %v5384_v46, 1  ;;  %v5405_v47 = vmax.f32 %v5403_v44, %v5404_v11  ;;  %v4849_v63 = vmul.f32 %v13314_v22, %v4829_v38  ;;  %v4866_v61 = vadd.f32 %v13337_v19, %v4846_v20 }
 0x5a5   :  { %v13660_v49 = vadd.f32 %v13337_v19, %v4847_v9  ;;  %v13663_v57 = vadd.f32 %v13337_v19, %v4848_v8  ;;  %v5392_v0 = vrot.slane %v5391_v3, 1  ;;  %v5399_v30 = vrot.slane %v5398_v53, 1 }
 0x5a6   :  { %v5406_v10 = vrot.slane %v5405_v47, 1  ;;  %v5682_v12 = vsel %vm1037_vm5, %v5668_v39, %v15082_v17  ;;  %v13671_v31 = vmax.f32 %v5384_v46, %v5385_v62  ;;  %v13674_v22 = vadd.f32 %v13337_v19, %v4849_v63 }
 0x5a7   :  { %v4910_v43 = vrot.slane %v4866_v61, 2  ;;  %v4911_v24 = vrot.slane %v4866_v61, 4  ;;  %v13676_v42 = vmax.f32 %v5391_v3, %v5392_v0  ;;  %v13678_v14 = vmax.f32 %v5398_v53, %v5399_v30 }
 0x5a8   :  { %v13680_v36 = vmax.f32 %v5405_v47, %v5406_v10  ;;  %v4912_v18 = vrot.slane %v4866_v61, 6  ;;  %vm13682_vm9 = vcmp.eq.s32.totalorder %v5440_v59, 0  ;;  %v4913_v54 = vrot.slane %v13660_v49, 2 }
 0x5a9   :  { %v4914_v41 = vrot.slane %v13660_v49, 4  ;;  %v4915_v19 = vrot.slane %v13660_v49, 6  ;;  %v4916_v23 = vrot.slane %v13663_v57, 2  ;;  %v5653_v48 = vsel %vm3555_vm14, %v13676_v42, %v13671_v31 }
 0x5aa   :  { %v4917_v44 = vrot.slane %v13663_v57, 4  ;;  %v4918_v15 = vrot.slane %v13663_v57, 6  ;;  %v4919_v59 = vrot.slane %v13674_v22, 2  ;;  %v5654_v58 = vsel %vm3557_vm15, %v13678_v14, %v5653_v48 }
 0x5ab   :  { %v5156_v51 = vsel %vm2322_vm10, %v4866_v61, -inf  ;;  %v5163_v46 = vsel %vm2322_vm10, %v4910_v43, -inf  ;;  %v5655_v28 = vsel %vm3559_vm0, %v13680_v36, %v5654_v58  ;;  %v5170_v38 = vsel %vm2322_vm10, %v4911_v24, -inf }
 0x5ac   :  { %v5157_v7 = vrot.slane %v5156_v51, 4  ;;  %v5164_v11 = vrot.slane %v5163_v46, 4  ;;  %v5656_v20 = vsel %vm3561_vm1, %v13621_v5, %v5655_v28  ;;  %v5171_v9 = vrot.slane %v5170_v38, 4 }
 0x5ad   :  { %v5177_v8 = vsel %vm2322_vm10, %v4912_v18, -inf  ;;  %v5184_v62 = vsel %vm2322_vm10, %v13660_v49, -inf  ;;  %v5657_v3 = vsel %vm3563_vm2, %v13626_v40, %v5656_v20  ;;  %v5191_v10 = vsel %vm2322_vm10, %v4913_v54, -inf }
 0x5ae   :  { %v5158_v53 = vmax.f32 %v5156_v51, %v5157_v7  ;;  %v5165_v47 = vmax.f32 %v5163_v46, %v5164_v11  ;;  %v5178_v63 = vrot.slane %v5177_v8, 4  ;;  %v5658_v61 = vsel %vm3565_vm3, %v13630_v2, %v5657_v3 }
 0x5af   :  { %v5172_v0 = vmax.f32 %v5170_v38, %v5171_v9  ;;  %v5185_v30 = vrot.slane %v5184_v62, 4  ;;  %v13716_v43 = vsel %vm3567_vm6, %v13632_v34, %v5658_v61  ;;  %v5192_v46 = vrot.slane %v5191_v10, 4 }
 0x5b0   :  { %v5159_v24 = vrot.slane %v5158_v53, 2  ;;  %v5166_v18 = vrot.slane %v5165_v47, 2  ;;  %v5179_v49 = vmax.f32 %v5177_v8, %v5178_v63  ;;  %v15083_v48 = vrot.slane %v13716_v43, 7 }
 0x5b1   :  { %v5173_v58 = vrot.slane %v5172_v0, 2  ;;  %v5186_v51 = vmax.f32 %v5184_v62, %v5185_v30  ;;  %v5198_v38 = vsel %vm2322_vm10, %v4914_v41, -inf  ;;  %v5193_v8 = vmax.f32 %v5191_v10, %v5192_v46 }
 0x5b2   :  { %v5160_v28 = vmax.f32 %v5158_v53, %v5159_v24  ;;  %v5167_v7 = vmax.f32 %v5165_v47, %v5166_v18  ;;  %v5180_v11 = vrot.slane %v5179_v49, 2  ;;  %v5683_v54 = vsel %vm1037_vm5, %v15083_v48, %v5668_v39 }
 0x5b3   :  { %v5174_v20 = vmax.f32 %v5172_v0, %v5173_v58  ;;  %v5187_v9 = vrot.slane %v5186_v51, 2  ;;  %v5684_v62 = vsel %vm13682_vm9, %v13527_v35, %v5683_v54  ;;  %v5194_v30 = vrot.slane %v5193_v8, 2 }
 0x5b4   :  { %v5161_v3 = vrot.slane %v5160_v28, 1  ;;  %v5168_v53 = vrot.slane %v5167_v7, 1  ;;  %v5181_v47 = vmax.f32 %v5179_v49, %v5180_v11  ;;  %v5724_v63 = vpack.c.bf16 %v5682_v12, %v5684_v62 }
 0x5b5   :  { %v5175_v61 = vrot.slane %v5174_v20, 1  ;;  %v5188_v41 = vmax.f32 %v5186_v51, %v5187_v9  ;;  %v4921_v24 = vrot.slane %v13674_v22, 6  ;;  %v5199_v39 = vrot.slane %v5198_v38, 4 }
 0x5b6   :  { %v13730_v18 = vmax.f32 %v5160_v28, %v5161_v3  ;;  %v5182_v17 = vrot.slane %v5181_v47, 1  ;;  %6150 = vmatmul.bf16.vlgmr.msrb.gmra.mxu2 %v5724_v63  ;;  %v13732_v0 = vmax.f32 %v5167_v7, %v5168_v53  ;;  %v5195_v58 = vmax.f32 %v5193_v8, %v5194_v30 }
 0x5b7   :  { %v5189_v10 = vrot.slane %v5188_v41, 1  ;;  %v5205_v16 = vsel %vm2322_vm10, %v4915_v19, -inf  ;;  %v13735_v46 = vmax.f32 %v5174_v20, %v5175_v61  ;;  %v5200_v49 = vmax.f32 %v5198_v38, %v5199_v39 }
 0x5b8   :  { %v5206_v12 = vrot.slane %v5205_v16, 4  ;;  %v5212_v51 = vsel %vm2322_vm10, %v13663_v57, -inf  ;;  %v13739_v11 = vmax.f32 %v5181_v47, %v5182_v17  ;;  %v5219_v7 = vsel %vm2322_vm10, %v4916_v23, -inf }
 0x5b9   :  { %v13741_v28 = vmax.f32 %v5188_v41, %v5189_v10  ;;  %v5213_v54 = vrot.slane %v5212_v51, 4  ;;  %v5201_v9 = vrot.slane %v5200_v49, 2  ;;  %v5220_v62 = vrot.slane %v5219_v7, 4 }
 0x5ba   :  { %v5207_v8 = vmax.f32 %v5205_v16, %v5206_v12  ;;  %v5226_v19 = vsel %vm2322_vm10, %v4917_v44, -inf  ;;  %v5196_v38 = vrot.slane %v5195_v58, 1  ;;  %v5233_v17 = vsel %vm2322_vm10, %v4918_v15, -inf }
 0x5bb   :  { %v5214_v20 = vmax.f32 %v5212_v51, %v5213_v54  ;;  %v5227_v3 = vrot.slane %v5226_v19, 4  ;;  %v5202_v53 = vmax.f32 %v5200_v49, %v5201_v9  ;;  %v5221_v63 = vmax.f32 %v5219_v7, %v5220_v62 }
 0x5bc   :  { %v5208_v47 = vrot.slane %v5207_v8, 2  ;;  %v5234_v61 = vrot.slane %v5233_v17, 4  ;;  %v5240_v30 = vsel %vm2322_vm10, %v13674_v22, -inf  ;;  %v5247_v44 = vsel %vm2322_vm10, %v4919_v59, -inf }
 0x5bd   :  { %v5215_v41 = vrot.slane %v5214_v20, 2  ;;  %v5228_v23 = vmax.f32 %v5226_v19, %v5227_v3  ;;  %v5203_v39 = vrot.slane %v5202_v53, 1  ;;  %v5222_v16 = vrot.slane %v5221_v63, 2 }
 0x5be   :  { %v5209_v10 = vmax.f32 %v5207_v8, %v5208_v47  ;;  %v5235_v12 = vmax.f32 %v5233_v17, %v5234_v61  ;;  %v5241_v15 = vrot.slane %v5240_v30, 4  ;;  %v5248_v49 = vrot.slane %v5247_v44, 4 }
 0x5bf   :  { %v5216_v57 = vmax.f32 %v5214_v20, %v5215_v41  ;;  %v5229_v51 = vrot.slane %v5228_v23, 2  ;;  %v13757_v54 = vmax.f32 %v5195_v58, %v5196_v38  ;;  %v5223_v9 = vmax.f32 %v5221_v63, %v5222_v16 }
 0x5c0   :  { %v5210_v7 = vrot.slane %v5209_v10, 1  ;;  %v5236_v62 = vrot.slane %v5235_v12, 2  ;;  %v5242_v48 = vmax.f32 %v5240_v30, %v5241_v15  ;;  %v5249_v33 = vmax.f32 %v5247_v44, %v5248_v49 }
 0x5c1   :  { %v5217_v19 = vrot.slane %v5216_v57, 1  ;;  %v5230_v3 = vmax.f32 %v5228_v23, %v5229_v51  ;;  %v13759_v34 = vmax.f32 %v5202_v53, %v5203_v39  ;;  %v5224_v59 = vrot.slane %v5223_v9, 1 }
 0x5c2   :  { %v5237_v2 = vmax.f32 %v5235_v12, %v5236_v62  ;;  %v15410_v8 = vrot.slane %v13674_v22, 4  ;;  %v13764_v17 = vmax.f32 %v5209_v10, %v5210_v7  ;;  %v5243_v58 = vrot.slane %v5242_v48, 2 }
 0x5c3   :  { %v5231_v47 = vrot.slane %v5230_v3, 1  ;;  %v5250_v38 = vrot.slane %v5249_v33, 2  ;;  %v13766_v61 = vmax.f32 %v5223_v9, %v5224_v59  ;;  %v5261_v23 = vsel %vm2322_vm10, %v4921_v24, -inf }
 0x5c4   :  { %v5254_v20 = vsel %vm2322_vm10, %v15410_v8, -inf  ;;  %v5238_v63 = vrot.slane %v5237_v2, 1  ;;  %v13769_v30 = vmax.f32 %v5216_v57, %v5217_v19  ;;  %v5244_v53 = vmax.f32 %v5242_v48, %v5243_v58 }
 0x5c5   :  { %v5255_v41 = vrot.slane %v5254_v20, 4  ;;  %v5251_v44 = vmax.f32 %v5249_v33, %v5250_v38  ;;  %v5262_v39 = vrot.slane %v5261_v23, 4  ;;  %v13771_v16 = vmax.f32 %v5230_v3, %v5231_v47 }
 0x5c6   :  { %v5461_v10 = vand.u32 31, %v13640_v52  ;;  %v5625_v12 = vsel %vm3555_vm14, %v13732_v0, %v13730_v18  ;;  %v5245_v51 = vrot.slane %v5244_v53, 1  ;;  %v13779_v57 = vmax.f32 %v5237_v2, %v5238_v63 }
 0x5c7   :  { %v5256_v22 = vmax.f32 %v5254_v20, %v5255_v41  ;;  %v5252_v15 = vrot.slane %v5251_v44, 1  ;;  %v5263_v49 = vmax.f32 %v5261_v23, %v5262_v39  ;;  %v5626_v24 = vsel %vm3557_vm15, %v13735_v46, %v5625_v12 }
 0x5c8   :  { %v5627_v33 = vsel %vm3559_vm0, %v13739_v11, %v5626_v24  ;;  %v5632_v7 = vsel %vm3555_vm14, %v13766_v61, %v13769_v30  ;;  %v13786_v9 = vmax.f32 %v5244_v53, %v5245_v51  ;;  %vm13796_vm11 = vcmp.eq.s32.totalorder %v5461_v10, 31 }
 0x5c9   :  { %v5257_v48 = vrot.slane %v5256_v22, 2  ;;  %v13788_v62 = vmax.f32 %v5251_v44, %v5252_v15  ;;  %v5264_v19 = vrot.slane %v5263_v49, 2  ;;  %v5628_v3 = vsel %vm3561_vm1, %v13741_v28, %v5627_v33 }
 0x5ca   :  { %v5629_v2 = vsel %vm3563_vm2, %v13757_v54, %v5628_v3  ;;  %v5633_v8 = vsel %vm3557_vm15, %v13771_v16, %v5632_v7  ;;  %v5760_v47 = vpack.c.bf16 %v13489_v27, %v13489_v27  ;;  %v5761_v41 = vpack.c.bf16 %v13484_v25, %v13484_v25 }
 0x5cb   :  { %v5258_v59 = vmax.f32 %v5256_v22, %v5257_v48  ;;  %v5265_v58 = vmax.f32 %v5263_v49, %v5264_v19  ;;  %v5630_v38 = vsel %vm3565_vm3, %v13759_v34, %v5629_v2  ;;  %v5634_v63 = vsel %vm3559_vm0, %v13779_v57, %v5633_v8 }
 0x5cc   :  { %v13810_v53 = vsel %vm3567_vm6, %v13764_v17, %v5630_v38  ;;  %v5635_v44 = vsel %vm3561_vm1, %v13786_v9, %v5634_v63  ;;  %v5762_v27 = vpack.c.bf16 %v13491_v56, %v13491_v56  ;;  %v5763_v25 = vpack.c.bf16 %v13498_v45, %v13498_v45 }
 0x5cd   :  { %v5259_v23 = vrot.slane %v5258_v59, 1  ;;  %v5266_v39 = vrot.slane %v5265_v58, 1  ;;  %v5636_v22 = vsel %vm3563_vm2, %v13788_v62, %v5635_v44  ;;  %v5703_v10 = vrot.slane %v13810_v53, 1 }
 0x5ce   :  { %v5764_v51 = vpack.c.bf16 %v13509_v32, %v13509_v32  ;;  %v5765_v15 = vpack.c.bf16 %v13511_v13, %v13511_v13  ;;  %v5766_v56 = vpack.c.bf16 %v13523_v6, %v13523_v6  ;;  %v15413_v24 = vrot.slane %v13559_v26, 1 }
 0x5cf   :  { %v13821_v12 = vmax.f32 %v5258_v59, %v5259_v23  ;;  %v13829_v49 = vmax.f32 %v5265_v58, %v5266_v39  ;;  %v5767_v45 = vpack.c.bf16 %v13540_v1, %v13540_v1  ;;  %v5768_v33 = vpack.c.bf16 %v13730_v18, %v13730_v18 }
 0x5d0   :  { %v5712_v48 = vsel %vm1166_vm4, %v15413_v24, %v5703_v10  ;;  %v5769_v13 = vpack.c.bf16 %v13732_v0, %v13732_v0  ;;  %v5770_v6 = vpack.c.bf16 %v13735_v46, %v13735_v46  ;;  %v5771_v7 = vpack.c.bf16 %v13739_v11, %v13739_v11 }
 0x5d1   :  { %v5637_v32 = vsel %vm3565_vm3, %v13821_v12, %v5636_v22  ;;  %v5772_v1 = vpack.c.bf16 %v13741_v28, %v13741_v28  ;;  %v5773_v18 = vpack.c.bf16 %v13757_v54, %v13757_v54  ;;  %v5774_v3 = vpack.c.bf16 %v13759_v34, %v13759_v34 }
 0x5d2   :  { %v13849_v19 = vsel %vm3567_vm6, %v13829_v49, %v5637_v32  ;;  %v5775_v46 = vpack.c.bf16 %v13764_v17, %v13764_v17  ;;  %v5905_v59 = vunpack.c.l.b16 %v5760_v47  ;;  %v5906_v11 = vunpack.c.l.b16 %v5761_v41 }
 0x5d3   :  { %v15087_v0 = vrot.slane %v13849_v19, 1  ;;  %v5907_v2 = vunpack.c.l.b16 %v5762_v27  ;;  %v5908_v8 = vunpack.c.l.b16 %v5763_v25  ;;  %v5909_v58 = vunpack.c.l.b16 %v5764_v51 }
 0x5d4   :  { %v5910_v38 = vunpack.c.l.b16 %v5765_v15  ;;  %v5911_v54 = vunpack.c.l.b16 %v5766_v56  ;;  %v5912_v63 = vunpack.c.l.b16 %v5767_v45  ;;  %v5913_v23 = vunpack.c.l.b16 %v5768_v33 }
 0x5d5   :  { %v5711_v28 = vsel %vm1166_vm4, %v5703_v10, %v15087_v0  ;;  %v5914_v44 = vunpack.c.l.b16 %v5769_v13  ;;  %v5915_v17 = vunpack.c.l.b16 %v5770_v6  ;;  %v5916_v47 = vunpack.c.l.b16 %v5771_v7 }
 0x5d6   :  { %v5719_v34 = vsel %vm13796_vm11, %v13810_v53, %v5711_v28  ;;  %v5917_v27 = vunpack.c.l.b16 %v5772_v1  ;;  %v5918_v39 = vunpack.c.l.b16 %v5773_v18  ;;  %v5919_v22 = vunpack.c.l.b16 %v5774_v3 }
 0x5d7   :  { %v6172_v41 = vpack.c.bf16 %v5719_v34, %v5712_v48  ;;  %v5920_v25 = vunpack.c.l.b16 %v5775_v46  ;;  %v5967_v51 = vsel %vm3555_vm14, %v5906_v11, %v5905_v59  ;;  %v5974_v15 = vsel %vm3555_vm14, %v5914_v44, %v5913_v23  ;;  %v15415_v46 = vld [vmem:[#allocation27_spill] sm:$0xff] }
 0x5d8   :  { %v5670_v10 = vrot.slane %v13559_v26, 7  ;;  %v5968_v56 = vsel %vm3557_vm15, %v5907_v2, %v5967_v51  ;;  %v5975_v20 = vsel %vm3557_vm15, %v5915_v17, %v5974_v15  ;;  %v15086_v24 = vrot.slane %v13810_v53, 7 }
 0x5d9   :  { %6253 = vmatmul.bf16.gmra.mxu3 %v6172_v41  ;;  %v4803_v48 = vsub.f32 %v13241_v50, %v13281_v55  ;;  %v5969_v45 = vsel %vm3559_vm0, %v5908_v8, %v5968_v56  ;;  %v5976_v33 = vsel %vm3559_vm0, %v5916_v47, %v5975_v20  ;;  %v15414_v32 = vrot.slane %v13544_v60, 7 }
 0x5da   :  { %v4804_v26 = vsub.f32 %v13248_v37, %v13281_v55  ;;  %v5970_v6 = vsel %vm3561_vm1, %v5909_v58, %v5969_v45  ;;  %v5977_v7 = vsel %vm3561_vm1, %v5917_v27, %v5976_v33  ;;  %v5680_v50 = vsel %vm1037_vm5, %v5670_v10, %v15086_v24 }
 0x5db   :  { %v5681_v13 = vsel %vm1037_vm5, %v15414_v32, %v5670_v10  ;;  %v4805_v1 = vsub.f32 %v13254_v21, %v13281_v55  ;;  %v5971_v60 = vsel %vm3563_vm2, %v5910_v38, %v5970_v6  ;;  %v5978_v18 = vsel %vm3563_vm2, %v5918_v39, %v5977_v7 }
 0x5dc   :  { %v5725_v3 = vpack.c.bf16 %v5680_v50, %v5681_v13  ;;  %v4806_v37 = vsub.f32 %v15415_v46, %v13281_v55  ;;  %v5972_v59 = vsel %vm3565_vm3, %v5911_v54, %v5971_v60  ;;  %v5979_v11 = vsel %vm3565_vm3, %v5919_v22, %v5978_v18  ;;  %v9628_v55 = vld [vmem:[%s15398_s23] ss:$0 sm:$0xff] }
 0x5dd   :  { %v4830_v2 = vmul.f32 %v13322_v4, %v4803_v48  ;;  %v4831_v8 = vmul.f32 %v13322_v4, %v4804_v26  ;;  %v5973_v58 = vsel %vm3567_vm6, %v5912_v63, %v5972_v59  ;;  %v5980_v21 = vsel %vm3567_vm6, %v5920_v25, %v5979_v11  ;;  %v9629_v63 = vld [vmem:[%s15399_s3] ss:$0 sm:$0xff] }
 0x5de   :  { %6155 = vmatmul.bf16.gmra.mxu2 %v5725_v3  ;;  %v4832_v38 = vmul.f32 %v13322_v4, %v4805_v1  ;;  %v4833_v28 = vmul.f32 %v13322_v4, %v4806_v37  ;;  %v6010_v23 = vpack.c.b16 %v5980_v21, %v5973_v58 }
 0x5df   :  { %v4850_v54 = vmul.f32 %v9628_v55, %v4830_v2  ;;  %v4851_v34 = vmul.f32 %v9628_v55, %v4831_v8 }
 0x5e0   :  { %v4852_v44 = vmul.f32 %v9628_v55, %v4832_v38  ;;  %v4853_v17 = vmul.f32 %v9628_v55, %v4833_v28  ;;  %6078 = vmatmul.bf16.gmra.mxu1 %v6010_v23 }
 0x5e1   :  { %v4870_v47 = vadd.f32 %v9629_v63, %v4850_v54  ;;  %v4871_v41 = vadd.f32 %v9629_v63, %v4851_v34 }
 0x5e2   :  { %v13909_v27 = vadd.f32 %v9629_v63, %v4852_v44  ;;  %v13911_v39 = vadd.f32 %v9629_v63, %v4853_v17 }
 0x5e3   :  { %v4922_v4 = vrot.slane %v4870_v47, 2  ;;  %v4923_v22 = vrot.slane %v4870_v47, 4  ;;  %v4924_v25 = vrot.slane %v4870_v47, 6  ;;  %v4925_v51 = vrot.slane %v4871_v41, 2 }
 0x5e4   :  { %v4926_v15 = vrot.slane %v4871_v41, 4  ;;  %v4927_v10 = vrot.slane %v4871_v41, 6  ;;  %v4928_v56 = vrot.slane %v13909_v27, 2  ;;  %v4929_v20 = vrot.slane %v13909_v27, 4 }
 0x5e5   :  { %v4930_v48 = vrot.slane %v13909_v27, 6  ;;  %v4931_v45 = vrot.slane %v13911_v39, 2  ;;  %v4932_v33 = vrot.slane %v13911_v39, 4  ;;  %v4933_v32 = vrot.slane %v13911_v39, 6 }
 0x5e6   :  { %v5268_v13 = vsel %vm2322_vm10, %v4870_v47, -inf  ;;  %v5275_v26 = vsel %vm2322_vm10, %v4922_v4, -inf  ;;  %v5282_v6 = vsel %vm2322_vm10, %v4923_v22, -inf  ;;  %v5289_v7 = vsel %vm2322_vm10, %v4924_v25, -inf }
 0x5e7   :  { %v5269_v50 = vrot.slane %v5268_v13, 4  ;;  %v5276_v1 = vrot.slane %v5275_v26, 4  ;;  %v5283_v60 = vrot.slane %v5282_v6, 4  ;;  %v5290_v18 = vrot.slane %v5289_v7, 4 }
 0x5e8   :  { %v5296_v3 = vsel %vm2322_vm10, %v4871_v41, -inf  ;;  %v5303_v46 = vsel %vm2322_vm10, %v4925_v51, -inf  ;;  %v5310_v37 = vsel %vm2322_vm10, %v4926_v15, -inf  ;;  %v5317_v59 = vsel %vm2322_vm10, %v4927_v10, -inf }
 0x5e9   :  { %v5270_v11 = vmax.f32 %v5268_v13, %v5269_v50  ;;  %v5277_v2 = vmax.f32 %v5275_v26, %v5276_v1  ;;  %v5284_v8 = vmax.f32 %v5282_v6, %v5283_v60  ;;  %v5291_v58 = vmax.f32 %v5289_v7, %v5290_v18 }
 0x5ea   :  { %v5297_v21 = vrot.slane %v5296_v3, 4  ;;  %v5304_v38 = vrot.slane %v5303_v46, 4  ;;  %v5311_v28 = vrot.slane %v5310_v37, 4  ;;  %v5318_v23 = vrot.slane %v5317_v59, 4 }
 0x5eb   :  { %v5271_v55 = vrot.slane %v5270_v11, 2  ;;  %v5278_v54 = vrot.slane %v5277_v2, 2  ;;  %v5285_v34 = vrot.slane %v5284_v8, 2  ;;  %v5292_v44 = vrot.slane %v5291_v58, 2 }
 0x5ec   :  { %v5298_v17 = vmax.f32 %v5296_v3, %v5297_v21  ;;  %v5305_v63 = vmax.f32 %v5303_v46, %v5304_v38  ;;  %v5312_v47 = vmax.f32 %v5310_v37, %v5311_v28  ;;  %v5319_v41 = vmax.f32 %v5317_v59, %v5318_v23 }
 0x5ed   :  { %v5272_v4 = vmax.f32 %v5270_v11, %v5271_v55  ;;  %v5279_v22 = vmax.f32 %v5277_v2, %v5278_v54  ;;  %v5286_v25 = vmax.f32 %v5284_v8, %v5285_v34  ;;  %v5293_v51 = vmax.f32 %v5291_v58, %v5292_v44 }
 0x5ee   :  { %v5299_v15 = vrot.slane %v5298_v17, 2  ;;  %v5306_v10 = vrot.slane %v5305_v63, 2  ;;  %v5313_v13 = vrot.slane %v5312_v47, 2  ;;  %v5320_v26 = vrot.slane %v5319_v41, 2 }
 0x5ef   :  { %v5273_v6 = vrot.slane %v5272_v4, 1  ;;  %v5280_v7 = vrot.slane %v5279_v22, 1  ;;  %v5287_v50 = vrot.slane %v5286_v25, 1  ;;  %v5294_v1 = vrot.slane %v5293_v51, 1 }
 0x5f0   :  { %v5300_v60 = vmax.f32 %v5298_v17, %v5299_v15  ;;  %v5307_v18 = vmax.f32 %v5305_v63, %v5306_v10  ;;  %v5314_v24 = vmax.f32 %v5312_v47, %v5313_v13  ;;  %v5321_v0 = vmax.f32 %v5319_v41, %v5320_v26 }
 0x5f1   :  { %v13927_v3 = vmax.f32 %v5272_v4, %v5273_v6  ;;  %v13929_v46 = vmax.f32 %v5279_v22, %v5280_v7  ;;  %v13931_v37 = vmax.f32 %v5286_v25, %v5287_v50  ;;  %v13933_v59 = vmax.f32 %v5293_v51, %v5294_v1 }
 0x5f2   :  { %v5301_v11 = vrot.slane %v5300_v60, 1  ;;  %v5308_v2 = vrot.slane %v5307_v18, 1  ;;  %v5315_v8 = vrot.slane %v5314_v24, 1  ;;  %v5322_v58 = vrot.slane %v5321_v0, 1 }
 0x5f3   :  { %v5324_v21 = vsel %vm2322_vm10, %v13909_v27, -inf  ;;  %v5331_v38 = vsel %vm2322_vm10, %v4928_v56, -inf  ;;  %v5338_v28 = vsel %vm2322_vm10, %v4929_v20, -inf  ;;  %v5345_v23 = vsel %vm2322_vm10, %v4930_v48, -inf }
 0x5f4   :  { %v13940_v55 = vmax.f32 %v5300_v60, %v5301_v11  ;;  %v13942_v54 = vmax.f32 %v5307_v18, %v5308_v2  ;;  %v13944_v34 = vmax.f32 %v5314_v24, %v5315_v8  ;;  %v13946_v44 = vmax.f32 %v5321_v0, %v5322_v58 }
 0x5f5   :  { %v5325_v17 = vrot.slane %v5324_v21, 4  ;;  %v5332_v63 = vrot.slane %v5331_v38, 4  ;;  %v5339_v47 = vrot.slane %v5338_v28, 4  ;;  %v5346_v41 = vrot.slane %v5345_v23, 4 }
 0x5f6   :  { %v5352_v27 = vsel %vm2322_vm10, %v13911_v39, -inf  ;;  %v5359_v56 = vsel %vm2322_vm10, %v4931_v45, -inf  ;;  %v5366_v20 = vsel %vm2322_vm10, %v4932_v33, -inf  ;;  %v5373_v0 = vsel %vm2322_vm10, %v4933_v32, -inf }
 0x5f7   :  { %v5326_v24 = vmax.f32 %v5324_v21, %v5325_v17  ;;  %v5333_v48 = vmax.f32 %v5331_v38, %v5332_v63  ;;  %v5340_v4 = vmax.f32 %v5338_v28, %v5339_v47  ;;  %v5347_v22 = vmax.f32 %v5345_v23, %v5346_v41 }
 0x5f8   :  { %v5353_v25 = vrot.slane %v5352_v27, 4  ;;  %v5360_v51 = vrot.slane %v5359_v56, 4  ;;  %v5367_v15 = vrot.slane %v5366_v20, 4  ;;  %v5374_v10 = vrot.slane %v5373_v0, 4 }
 0x5f9   :  { %v5327_v13 = vrot.slane %v5326_v24, 2  ;;  %v5334_v26 = vrot.slane %v5333_v48, 2  ;;  %v5341_v6 = vrot.slane %v5340_v4, 2  ;;  %v5348_v45 = vrot.slane %v5347_v22, 2 }
 0x5fa   :  { %v5354_v7 = vmax.f32 %v5352_v27, %v5353_v25  ;;  %v5361_v50 = vmax.f32 %v5359_v56, %v5360_v51  ;;  %v5368_v1 = vmax.f32 %v5366_v20, %v5367_v15  ;;  %v5375_v33 = vmax.f32 %v5373_v0, %v5374_v10 }
 0x5fb   :  { %v5328_v60 = vmax.f32 %v5326_v24, %v5327_v13  ;;  %v5335_v39 = vmax.f32 %v5333_v48, %v5334_v26  ;;  %v5342_v18 = vmax.f32 %v5340_v4, %v5341_v6  ;;  %v5349_v32 = vmax.f32 %v5347_v22, %v5348_v45 }
 0x5fc   :  { %v5355_v11 = vrot.slane %v5354_v7, 2  ;;  %v5362_v2 = vrot.slane %v5361_v50, 2  ;;  %v5369_v8 = vrot.slane %v5368_v1, 2  ;;  %v5376_v58 = vrot.slane %v5375_v33, 2 }
 0x5fd   :  { %v5329_v21 = vrot.slane %v5328_v60, 1  ;;  %v5336_v38 = vrot.slane %v5335_v39, 1  ;;  %v5343_v28 = vrot.slane %v5342_v18, 1  ;;  %v5350_v23 = vrot.slane %v5349_v32, 1 }
 0x5fe   :  { %v5356_v17 = vmax.f32 %v5354_v7, %v5355_v11  ;;  %v5363_v63 = vmax.f32 %v5361_v50, %v5362_v2  ;;  %v5370_v47 = vmax.f32 %v5368_v1, %v5369_v8  ;;  %v5377_v41 = vmax.f32 %v5375_v33, %v5376_v58 }
 0x5ff   :  { %v13959_v27 = vmax.f32 %v5328_v60, %v5329_v21  ;;  %v13961_v56 = vmax.f32 %v5335_v39, %v5336_v38  ;;  %v13963_v20 = vmax.f32 %v5342_v18, %v5343_v28  ;;  %v13965_v0 = vmax.f32 %v5349_v32, %v5350_v23 }
 0x600   :  { %v5357_v24 = vrot.slane %v5356_v17, 1  ;;  %v5364_v48 = vrot.slane %v5363_v63, 1  ;;  %v5371_v4 = vrot.slane %v5370_v47, 1  ;;  %v5378_v22 = vrot.slane %v5377_v41, 1 }
 0x601   :  { %v5639_v25 = vsel %vm3555_vm14, %v13929_v46, %v13927_v3  ;;  %v5646_v51 = vsel %vm3555_vm14, %v13961_v56, %v13959_v27  ;;  %v5776_v15 = vpack.c.bf16 %v13769_v30, %v13769_v30  ;;  %v5777_v10 = vpack.c.bf16 %v13766_v61, %v13766_v61 }
 0x602   :  { %v13977_v13 = vmax.f32 %v5356_v17, %v5357_v24  ;;  %v13979_v26 = vmax.f32 %v5363_v63, %v5364_v48  ;;  %v13981_v6 = vmax.f32 %v5370_v47, %v5371_v4  ;;  %v13983_v45 = vmax.f32 %v5377_v41, %v5378_v22 }
 0x603   :  { %v5640_v7 = vsel %vm3557_vm15, %v13931_v37, %v5639_v25  ;;  %v5647_v50 = vsel %vm3557_vm15, %v13963_v20, %v5646_v51  ;;  %v5778_v30 = vpack.c.bf16 %v13771_v16, %v13771_v16  ;;  %v5779_v61 = vpack.c.bf16 %v13779_v57, %v13779_v57 }
 0x604   :  { %v5641_v1 = vsel %vm3559_vm0, %v13933_v59, %v5640_v7  ;;  %v5648_v33 = vsel %vm3559_vm0, %v13965_v0, %v5647_v50  ;;  %v5780_v60 = vpack.c.bf16 %v13786_v9, %v13786_v9  ;;  %v5781_v39 = vpack.c.bf16 %v13788_v62, %v13788_v62 }
 0x605   :  { %v5642_v18 = vsel %vm3561_vm1, %v13940_v55, %v5641_v1  ;;  %v5649_v16 = vsel %vm3561_vm1, %v13977_v13, %v5648_v33  ;;  %v5782_v57 = vpack.c.bf16 %v13821_v12, %v13821_v12  ;;  %v5783_v32 = vpack.c.bf16 %v13829_v49, %v13829_v49 }
 0x606   :  { %v5643_v11 = vsel %vm3563_vm2, %v13942_v54, %v5642_v18  ;;  %v5650_v9 = vsel %vm3563_vm2, %v13979_v26, %v5649_v16  ;;  %v5784_v62 = vpack.c.bf16 %v13927_v3, %v13927_v3  ;;  %v5785_v2 = vpack.c.bf16 %v13929_v46, %v13929_v46 }
 0x607   :  { %v5644_v8 = vsel %vm3565_vm3, %v13944_v34, %v5643_v11  ;;  %v5651_v12 = vsel %vm3565_vm3, %v13981_v6, %v5650_v9  ;;  %v5786_v49 = vpack.c.bf16 %v13931_v37, %v13931_v37  ;;  %v5787_v58 = vpack.c.bf16 %v13933_v59, %v13933_v59  ;;  %v15417_v11 = vld [vmem:[#allocation26_spill] sm:$0xff] }
 0x608   :  { %v14027_v21 = vsel %vm3567_vm6, %v13946_v44, %v5644_v8  ;;  %v14031_v3 = vsel %vm3567_vm6, %v13983_v45, %v5651_v12  ;;  %v5788_v46 = vpack.c.bf16 %v13940_v55, %v13940_v55  ;;  %v5789_v38 = vpack.c.bf16 %v13942_v54, %v13942_v54 }
 0x609   :  { %v5705_v28 = vrot.slane %v14027_v21, 1  ;;  %v5706_v37 = vrot.slane %v14031_v3, 1  ;;  %v5790_v59 = vpack.c.bf16 %v13944_v34, %v13944_v34  ;;  %v5791_v23 = vpack.c.bf16 %v13946_v44, %v13946_v44 }
 0x60a   :  { %v5921_v17 = vunpack.c.l.b16 %v5776_v15  ;;  %v5922_v63 = vunpack.c.l.b16 %v5777_v10  ;;  %v5923_v47 = vunpack.c.l.b16 %v5778_v30  ;;  %v5924_v41 = vunpack.c.l.b16 %v5779_v61 }
 0x60b   :  { %v5709_v55 = vsel %vm1166_vm4, %v5705_v28, %v5706_v37  ;;  %v15416_v24 = vrot.slane %v13849_v19, 1  ;;  %v5925_v48 = vunpack.c.l.b16 %v5780_v60  ;;  %v5926_v4 = vunpack.c.l.b16 %v5781_v39 }
 0x60c   :  { %v5927_v25 = vunpack.c.l.b16 %v5782_v57  ;;  %v5928_v34 = vunpack.c.l.b16 %v5783_v32  ;;  %v5929_v51 = vunpack.c.l.b16 %v5784_v62  ;;  %v5930_v7 = vunpack.c.l.b16 %v5785_v2 }
 0x60d   :  { %v5710_v54 = vsel %vm1166_vm4, %v15416_v24, %v5705_v28  ;;  %v5931_v44 = vunpack.c.l.b16 %v5786_v49  ;;  %v5932_v15 = vunpack.c.l.b16 %v5787_v58  ;;  %v5933_v10 = vunpack.c.l.b16 %v5788_v46 }
 0x60e   :  { %v6173_v22 = vpack.c.bf16 %v5709_v55, %v5710_v54  ;;  %v5934_v50 = vunpack.c.l.b16 %v5789_v38  ;;  %v5935_v30 = vunpack.c.l.b16 %v5790_v59  ;;  %v5936_v61 = vunpack.c.l.b16 %v5791_v23 }
 0x60f   :  { %v5981_v1 = vsel %vm3555_vm14, %v5922_v63, %v5921_v17  ;;  %v5988_v18 = vsel %vm3555_vm14, %v5930_v7, %v5929_v51  ;;  %v561_v60 = vadd.s32 32, %v15256_v29  ;;  %v5672_v39 = vrot.slane %v13849_v19, 7 }
 0x610   :  { %6258 = vmatmul.bf16.gmra.mxu3 %v6173_v22  ;;  %v5982_v33 = vsel %vm3557_vm15, %v5923_v47, %v5981_v1  ;;  %v5989_v57 = vsel %vm3557_vm15, %v5931_v44, %v5988_v18  ;;  %v5673_v32 = vrot.slane %v14027_v21, 7  ;;  %v5489_v9 = vand.u32 31, %v15417_v11 }
 0x611   :  { %v5983_v16 = vsel %vm3559_vm0, %v5924_v41, %v5982_v33  ;;  %v5990_v2 = vsel %vm3559_vm0, %v5932_v15, %v5989_v57  ;;  %v5468_v8 = vand.u32 31, %v561_v60  ;;  %v15418_v12 = vrot.slane %v13810_v53, 7 }
 0x612   :  { %v5984_v62 = vsel %vm3561_vm1, %v5925_v48, %v5983_v16  ;;  %v5991_v46 = vsel %vm3561_vm1, %v5933_v10, %v5990_v2  ;;  %v5678_v38 = vsel %vm1037_vm5, %v5672_v39, %v5673_v32  ;;  %vm14070_vm12 = vcmp.eq.s32.totalorder %v5489_v9, 31 }
 0x613   :  { %v5679_v49 = vsel %vm1037_vm5, %v15418_v12, %v5672_v39  ;;  %v5985_v58 = vsel %vm3563_vm2, %v5926_v4, %v5984_v62  ;;  %v5992_v53 = vsel %vm3563_vm2, %v5934_v50, %v5991_v46  ;;  %vm5536_vm13 = vcmp.eq.s32.totalorder %v5468_v8, 0  ;;  %v15423_v50 = vld [vmem:[#allocation29_spill] sm:$0xff] }
 0x614   :  { %v5986_v59 = vsel %vm3565_vm3, %v5927_v25, %v5985_v58  ;;  %v5707_v23 = vrot.slane %v13716_v43, 1  ;;  %v5993_v63 = vsel %vm3565_vm3, %v5935_v30, %v5992_v53  ;;  %v5688_v47 = vsel %vm5536_vm13, %v13849_v19, %v5679_v49 }
 0x615   :  { %v5987_v17 = vsel %vm3567_vm6, %v5928_v34, %v5986_v59  ;;  %v5994_v41 = vsel %vm3567_vm6, %v5936_v61, %v5993_v63  ;;  %v5726_v55 = vpack.c.bf16 %v5678_v38, %v5688_v47  ;;  %v15421_v54 = vrot.slane %v13527_v35, 1 }
 0x616   :  { %v5708_v24 = vsel %vm1166_vm4, %v5706_v37, %v5707_v23  ;;  %v6011_v4 = vpack.c.b16 %v5994_v41, %v5987_v17  ;;  %v5793_v25 = vpack.c.bf16 %v13961_v56, %v13961_v56  ;;  %v5794_v19 = vpack.c.bf16 %v13963_v20, %v13963_v20 }
 0x617   :  { %v5715_v48 = vsel %vm1166_vm4, %v5707_v23, %v15421_v54  ;;  %6160 = vmatmul.bf16.gmra.mxu2 %v5726_v55  ;;  %v5792_v35 = vpack.c.bf16 %v13959_v27, %v13959_v27  ;;  %v5800_v37 = vpack.c.bf16 %v13671_v31, %v13671_v31  ;;  %v5801_v51 = vpack.c.bf16 %v13676_v42, %v13676_v42  ;;  %v6249_v54 = vpop.f32.mrf.mxu3 }
 0x618   :  { %v5723_v22 = vsel %vm14070_vm12, %v13716_v43, %v5715_v48  ;;  %6083 = vmatmul.bf16.gmra.mxu1 %v6011_v4  ;;  %v5795_v7 = vpack.c.bf16 %v13965_v0, %v13965_v0  ;;  %v5796_v56 = vpack.c.bf16 %v13977_v13, %v13977_v13  ;;  %v5797_v20 = vpack.c.bf16 %v13979_v26, %v13979_v26  ;;  %v15422_v26 = vld [vmem:[#allocation28_spill] sm:$0xff] }
 0x619   :  { %v6174_v34 = vpack.c.bf16 %v5723_v22, %v5708_v24  ;;  %v5802_v44 = vpack.c.bf16 %v13678_v14, %v13678_v14  ;;  %v5798_v27 = vpack.c.bf16 %v13981_v6, %v13981_v6  ;;  %v5799_v31 = vpack.c.bf16 %v13983_v45, %v13983_v45 }
 0x61a   :  { %v5803_v42 = vpack.c.bf16 %v13680_v36, %v13680_v36  ;;  %v5938_v15 = vunpack.c.l.b16 %v5793_v25  ;;  %v5804_v0 = vpack.c.bf16 %v13621_v5, %v13621_v5  ;;  %v5805_v13 = vpack.c.bf16 %v13626_v40, %v13626_v40 }
 0x61b   :  { %v5806_v10 = vpack.c.bf16 %v15422_v26, %v15422_v26  ;;  %v5939_v14 = vunpack.c.l.b16 %v5794_v19  ;;  %v5807_v6 = vpack.c.bf16 %v15423_v50, %v15423_v50  ;;  %v5937_v30 = vunpack.c.l.b16 %v5792_v35  ;;  %v9604_v26 = vld [vmem:[%s14934_s12] ss:$0 sm:$0xff] }
 0x61c   :  { %v5945_v61 = vunpack.c.l.b16 %v5800_v37  ;;  %v5946_v45 = vunpack.c.l.b16 %v5801_v51  ;;  %v5940_v1 = vunpack.c.l.b16 %v5795_v7  ;;  %v5941_v33 = vunpack.c.l.b16 %v5796_v56 }
 0x61d   :  { %v5942_v36 = vunpack.c.l.b16 %v5797_v20  ;;  %v5947_v18 = vunpack.c.l.b16 %v5802_v44  ;;  %v5943_v60 = vunpack.c.l.b16 %v5798_v27  ;;  %v5948_v5 = vunpack.c.l.b16 %v5803_v42 }
 0x61e   :  { %v5995_v39 = vsel %vm3555_vm14, %v5938_v15, %v5937_v30  ;;  %v6002_v40 = vsel %vm3555_vm14, %v5946_v45, %v5945_v61  ;;  %v5949_v16 = vunpack.c.l.b16 %v5804_v0  ;;  %v5674_v9 = vrot.slane %v14031_v3, 7 }
 0x61f   :  { %v5996_v57 = vsel %vm3557_vm15, %v5939_v14, %v5995_v39  ;;  %v6003_v11 = vsel %vm3557_vm15, %v5947_v18, %v6002_v40  ;;  %v5944_v62 = vunpack.c.l.b16 %v5799_v31  ;;  %v5950_v2 = vunpack.c.l.b16 %v5805_v13  ;;  %v6251_v21 = vpop.f32.mrf.mxu3 }
 0x620   :  { %6263 = vmatmul.bf16.gmra.mxu3 %v6174_v34  ;;  %v5997_v8 = vsel %vm3559_vm0, %v5940_v1, %v5996_v57  ;;  %v6004_v12 = vsel %vm3559_vm0, %v5948_v5, %v6003_v11  ;;  %v5951_v49 = vunpack.c.l.b16 %v5806_v10  ;;  %v5952_v58 = vunpack.c.l.b16 %v5807_v6 }
 0x621   :  { %v5998_v46 = vsel %vm3561_vm1, %v5941_v33, %v5997_v8  ;;  %v6005_v38 = vsel %vm3561_vm1, %v5949_v16, %v6004_v12  ;;  %v15424_v53 = vrot.slane %v13716_v43, 7  ;;  %v5677_v23 = vsel %vm1037_vm5, %v5673_v32, %v5674_v9  ;;  %v6074_v43 = vpop.f32.mrf.mxu1 }
 0x622   :  { %v5999_v28 = vsel %vm3563_vm2, %v5942_v36, %v5998_v46  ;;  %v6006_v59 = vsel %vm3563_vm2, %v5950_v2, %v6005_v38 }
 0x623   :  { %v5676_v3 = vsel %vm1037_vm5, %v5674_v9, %v15424_v53  ;;  %v6000_v17 = vsel %vm3565_vm3, %v5943_v60, %v5999_v28  ;;  %v6007_v63 = vsel %vm3565_vm3, %v5951_v49, %v6006_v59  ;;  %v9649_v49 = vmov 64.0  }
 0x624   :  { %v6001_v47 = vsel %vm3567_vm6, %v5944_v62, %v6000_v17  ;;  %v6008_v41 = vsel %vm3567_vm6, %v5952_v58, %v6007_v63  ;;  %v5727_v55 = vpack.c.bf16 %v5676_v3, %v5677_v23  ;;  %9620 = vrcp.f32 %v9649_v49 }
 0x625   :  { %v6012_v24 = vpack.c.b16 %v6008_v41, %v6001_v47 }
 0x627   :  { %6165 = vmatmul.bf16.gmra.mxu2 %v5727_v55 }
 0x628   :  { %6088 = vmatmul.bf16.gmra.mxu1 %v6012_v24 }
 0x629   :  { %v6076_v4 = vpop.f32.mrf.mxu1 }
 0x62a   :  { %v9621_v55 = vpop.eup %9620 }
 0x62b   :  { %vm6315_vm7 = vweird.f32 %v9621_v55 }
 0x639   :  { %v6151_v48 = vpop.f32.mrf.mxu2 }
 0x63a   :  { %v6152_v44 = vadd.f32 %v6151_v48, %v6074_v43 }
 0x63c   :  { %v6269_v13 = vadd.f32 %v6249_v54, %v6152_v44 }
 0x63e   :  { %v6281_v45 = vadd.f32 %v9604_v26, %v6269_v13 }
 0x640   :  { %v14150_v39 = vmax.f32 %v6281_v45, 0.0 }
 0x641   :  { %v6153_v22 = vpop.f32.mrf.mxu2 }
 0x642   :  { %v6154_v20 = vadd.f32 %v6153_v22, %v6076_v4  ;;  %v6318_v58 = vmul.f32 %v14150_v39, %v14150_v39 }
 0x644   :  { %v6270_v42 = vadd.f32 %v6251_v21, %v6154_v20 }
 0x646   :  { %v6282_v6 = vadd.f32 %v9604_v26, %v6270_v42 }
 0x648   :  { %v14148_v36 = vmax.f32 %v6282_v6, 0.0 }
 0x64a   :  { %v6319_v62 = vmul.f32 %v14148_v36, %v14148_v36  ;;  %v6297_v38 = vadd.f32 %v14148_v36, %v14150_v39 }
 0x64c   :  { %v6326_v53 = vadd.f32 %v6319_v62, %v6318_v58 }
 0x65c   :  { %v6254_v32 = vpop.f32.mrf.mxu3 }
 0x65d   :  { %v6079_v25 = vpop.f32.mrf.mxu1 }
 0x661   :  { %v6156_v19 = vpop.f32.mrf.mxu2 }
 0x662   :  { %v6157_v27 = vadd.f32 %v6156_v19, %v6079_v25  ;;  %v6311_v19 = vmul.f32 64.0, %v9621_v55 }
 0x664   :  { %v6256_v35 = vpop.f32.mrf.mxu3  ;;  %v6271_v10 = vadd.f32 %v6254_v32, %v6157_v27  ;;  %v6312_v44 = vsub.f32 1.0, %v6311_v19  ;;  %v9514_v19 = vld [vmem:[%s14937_s15 + $0xa0] sm:$0xff] }
 0x665   :  { %v6081_v34 = vpop.f32.mrf.mxu1 }
 0x666   :  { %v6283_v1 = vadd.f32 %v9604_v26, %v6271_v10  ;;  %v6313_v13 = vmul.f32 %v9621_v55, %v6312_v44 }
 0x668   :  { %v14152_v40 = vmax.f32 %v6283_v1, 0.0 }
 0x669   :  { %v6158_v37 = vpop.f32.mrf.mxu2 }
 0x66a   :  { %v6159_v0 = vadd.f32 %v6158_v37, %v6081_v34  ;;  %v6320_v46 = vmul.f32 %v14152_v40, %v14152_v40  ;;  %v6298_v3 = vadd.f32 %v6297_v38, %v14152_v40  ;;  %v9517_v38 = vld [vmem:[%s14937_s15 + $0xb8] sm:$0xff] }
 0x66b   :  { %7182 = vmatpush.bf16.msrb.mxu3 %v9517_v38 }
 0x66c   :  { %v6272_v30 = vadd.f32 %v6256_v35, %v6159_v0  ;;  %v6327_v63 = vadd.f32 %v6326_v53, %v6320_v46  ;;  %v9501_v46 = vld [vmem:[%s14937_s15 + $0x38] sm:$0xff]  ;;  %v9500_v53 = vld [vmem:[%s14937_s15 + $0x30] sm:$0xff] }
 0x66d   :  { %7096 = vmatpush.bf16.msra.mxu2 %v9501_v46 }
 0x66e   :  { %v6284_v60 = vadd.f32 %v9604_v26, %v6272_v30 }
 0x670   :  { %v14156_v2 = vmax.f32 %v6284_v60, 0.0 }
 0x671   :  { %7097 = vmatpush.bf16.msra.mxu2 %v9500_v53 }
 0x672   :  { %v6321_v23 = vmul.f32 %v14156_v2, %v14156_v2  ;;  %v6299_v24 = vadd.f32 %v6298_v3, %v14156_v2  ;;  %v9516_v3 = vld [vmem:[%s14937_s15 + $0xb0] sm:$0xff] }
 0x673   :  { %7183 = vmatpush.bf16.msrb.mxu3 %v9516_v3 }
 0x674   :  { %v6328_v21 = vadd.f32 %v6327_v63, %v6321_v23  ;;  %v9508_v63 = vld [vmem:[%s14937_s15 + $0x70] sm:$0xff] }
 0x693   :  { %v6259_v7 = vpop.f32.mrf.mxu3 }
 0x695   :  { %v6084_v51 = vpop.f32.mrf.mxu1 }
 0x69a   :  { %v6161_v56 = vpop.f32.mrf.mxu2 }
 0x69b   :  { %v6261_v15 = vpop.f32.mrf.mxu3  ;;  %v6162_v50 = vadd.f32 %v6161_v56, %v6084_v51 }
 0x69d   :  { %v6086_v31 = vpop.f32.mrf.mxu1  ;;  %v6273_v33 = vadd.f32 %v6259_v7, %v6162_v50 }
 0x69f   :  { %v6285_v11 = vadd.f32 %v9604_v26, %v6273_v33 }
 0x6a1   :  { %v14164_v28 = vmax.f32 %v6285_v11, 0.0 }
 0x6a2   :  { %v6163_v14 = vpop.f32.mrf.mxu2 }
 0x6a3   :  { %v6164_v61 = vadd.f32 %v6163_v14, %v6086_v31  ;;  %v6264_v16 = vpop.f32.mrf.mxu3  ;;  %v6322_v43 = vmul.f32 %v14164_v28, %v14164_v28  ;;  %v6300_v22 = vadd.f32 %v6299_v24, %v14164_v28 }
 0x6a5   :  { %v6089_v18 = vpop.f32.mrf.mxu1  ;;  %v6274_v5 = vadd.f32 %v6261_v15, %v6164_v61  ;;  %v6329_v34 = vadd.f32 %v6328_v21, %v6322_v43  ;;  %v9507_v43 = vld [vmem:[%s14937_s15 + $0x68] sm:$0xff] }
 0x6a7   :  { %v6286_v8 = vadd.f32 %v9604_v26, %v6274_v5 }
 0x6a9   :  { %v14169_v17 = vmax.f32 %v6286_v8, 0.0 }
 0x6aa   :  { %v6166_v57 = vpop.f32.mrf.mxu2 }
 0x6ab   :  { %v6167_v9 = vadd.f32 %v6166_v57, %v6089_v18  ;;  %v6266_v4 = vpop.f32.mrf.mxu3  ;;  %v6323_v25 = vmul.f32 %v14169_v17, %v14169_v17  ;;  %v6301_v35 = vadd.f32 %v6300_v22, %v14169_v17 }
 0x6ad   :  { %v6275_v12 = vadd.f32 %v6264_v16, %v6167_v9  ;;  %v6091_v47 = vpop.f32.mrf.mxu1  ;;  %v6330_v7 = vadd.f32 %v6329_v34, %v6323_v25 }
 0x6af   :  { %v6287_v59 = vadd.f32 %v9604_v26, %v6275_v12 }
 0x6b1   :  { %v14174_v54 = vmax.f32 %v6287_v59, 0.0 }
 0x6b2   :  { %v6168_v41 = vpop.f32.mrf.mxu2 }
 0x6b3   :  { %v6169_v48 = vadd.f32 %v6168_v41, %v6091_v47  ;;  %v6324_v37 = vmul.f32 %v14174_v54, %v14174_v54  ;;  %v6302_v56 = vadd.f32 %v6301_v35, %v14174_v54  ;;  %v9499_v41 = vld [vmem:[%s14937_s15 + $0x28] sm:$0xff] }
 0x6b4   :  { %7098 = vmatpush.bf16.msra.mxu2 %v9499_v41 }
 0x6b5   :  { %v6276_v32 = vadd.f32 %v6266_v4, %v6169_v48  ;;  %v6331_v27 = vadd.f32 %v6330_v7, %v6324_v37  ;;  %v14226_v4 = vld [vmem:[%s14935_s13] ss:$0 sm:$0xff] }
 0x6b7   :  { %v6288_v51 = vadd.f32 %v9604_v26, %v6276_v32  ;;  %v6314_v26 = vadd.f32 %v9621_v55, %v6313_v13  ;;  %v9498_v32 = vld [vmem:[%s14937_s15 + $0x20] sm:$0xff] }
 0x6b8   :  { %7099 = vmatpush.bf16.msra.mxu2 %v9498_v32 }
 0x6b9   :  { %v14183_v20 = vmax.f32 %v6288_v51, 0.0  ;;  %v6316_v33 = vsel %vm6315_vm7, %v9621_v55, %v6314_v26  ;;  %v9515_v55 = vld [vmem:[%s14937_s15 + $0xa8] sm:$0xff] }
 0x6ba   :  { %7184 = vmatpush.bf16.msrb.mxu3 %v9515_v55  ;;  %v9495_v55 = vld [vmem:[%s14937_s15 + $0x8] sm:$0xff] }
 0x6bb   :  { %v6303_v31 = vadd.f32 %v6302_v56, %v14183_v20  ;;  %v6325_v42 = vmul.f32 %v14183_v20, %v14183_v20  ;;  %v14252_v56 = vld [vmem:[%s14936_s14] ss:$0 sm:$0xff] }
 0x6bd   :  { %v6304_v15 = vrot.slane %v6303_v31, 4  ;;  %v6332_v0 = vadd.f32 %v6331_v27, %v6325_v42 }
 0x6be   :  { %7185 = vmatpush.bf16.msrb.mxu3 %v9514_v19 }
 0x6bf   :  { %v6305_v10 = vadd.f32 %v6304_v15, %v6303_v31  ;;  %v6333_v14 = vrot.slane %v6332_v0, 4 }
 0x6c1   :  { %v6306_v50 = vrot.slane %v6305_v10, 2  ;;  %v6334_v6 = vadd.f32 %v6333_v14, %v6332_v0  ;;  %v9513_v0 = vld [vmem:[%s14937_s15 + $0x98] sm:$0xff] }
 0x6c2   :  { %v9505_v14 = vld [vmem:[%s14937_s15 + $0x58] sm:$0xff]  ;;  %7186 = vmatpush.bf16.msrb.mxu3 %v9513_v0 }
 0x6c3   :  { %v6307_v30 = vadd.f32 %v6306_v50, %v6305_v10  ;;  %v6335_v61 = vrot.slane %v6334_v6, 2 }
 0x6c5   :  { %v6308_v45 = vrot.slane %v6307_v30, 1  ;;  %v6336_v1 = vadd.f32 %v6335_v61, %v6334_v6 }
 0x6c7   :  { %v6309_v18 = vadd.f32 %v6308_v45, %v6307_v30  ;;  %v6337_v60 = vrot.slane %v6336_v1, 1 }
 0x6c9   :  { %v14188_v5 = vmul.f32 %v6316_v33, %v6309_v18  ;;  %v6338_v16 = vadd.f32 %v6337_v60, %v6336_v1  ;;  %v9496_v60 = vld [vmem:[%s14937_s15 + $0x10] sm:$0xff] }
 0x6cb   :  { %v6339_v57 = vmul.f32 %v6338_v16, %v6316_v33  ;;  %v6340_v11 = vmul.f32 %v14188_v5, %v14188_v5  ;;  %v6347_v9 = vsub.f32 %v14164_v28, %v14188_v5  ;;  %v6348_v62 = vsub.f32 %v14169_v17, %v14188_v5  ;;  %v9509_v28 = vld [vmem:[%s14937_s15 + $0x78] sm:$0xff]  ;;  %v9512_v17 = vld [vmem:[%s14937_s15 + $0x90] sm:$0xff] }
 0x6cc   :  { %7029 = vmatpush.bf16.msra.mxu1 %v9509_v28  ;;  %v6343_v21 = vsub.f32 %v14150_v39, %v14188_v5  ;;  %v6345_v22 = vsub.f32 %v14152_v40, %v14188_v5  ;;  %v6349_v25 = vsub.f32 %v14174_v54, %v14188_v5  ;;  %v6350_v39 = vsub.f32 %v14183_v20, %v14188_v5  ;;  %v9506_v40 = vld [vmem:[%s14937_s15 + $0x60] sm:$0xff] }
 0x6cd   :  { %v6341_v8 = vsub.f32 %v6339_v57, %v6340_v11  ;;  %v6344_v54 = vsub.f32 %v14148_v36, %v14188_v5  ;;  %v6346_v35 = vsub.f32 %v14156_v2, %v14188_v5  ;;  %v9497_v2 = vld [vmem:[%s14937_s15 + $0x18] sm:$0xff]  ;;  %7187 = vmatpush.bf16.msrb.mxu3 %v9512_v17 }
 0x6ce   :  { %7100 = vmatpush.bf16.msra.mxu2 %v9497_v2 }
 0x6cf   :  { %v6342_v12 = vmax.f32 %v6341_v8, 0.0 }
 0x6d0   :  { %7030 = vmatpush.bf16.msra.mxu1 %v9508_v63 }
 0x6d1   :  { %v6351_v49 = vadd.f32 1e-05, %v6342_v12  ;;  %v9504_v12 = vld [vmem:[%s14937_s15 + $0x50] sm:$0xff] }
 0x6d2   :  { %7101 = vmatpush.bf16.msra.mxu2 %v9496_v60 }
 0x6d3   :  { %9622 = vrsqrt.f32 %v6351_v49  ;;  %vm6358_vm9 = vweird.f32 %v6351_v49 }
 0x6d4   :  { %7031 = vmatpush.bf16.msra.mxu1 %v9507_v43  ;;  %v9503_v43 = vld [vmem:[%s14937_s15 + $0x48] sm:$0xff] }
 0x6d6   :  { %7102 = vmatpush.bf16.msra.mxu2 %v9495_v55 }
 0x6d8   :  { %7032 = vmatpush.bf16.msra.mxu1 %v9506_v40 }
 0x6d9   :  { %v9623_v58 = vpop.eup %9622 }
 0x6da   :  { %v6353_v59 = vmul.f32 %v9623_v58, %v6351_v49  ;;  %vm6359_vm8 = vweird.f32 %v9623_v58 }
 0x6db   :  { %vm6360_vm11 = vmor %vm6358_vm9, %vm6359_vm8 }
 0x6dc   :  { %v6354_v23 = vmul.f32 %v9623_v58, %v6353_v59  ;;  %7033 = vmatpush.bf16.msra.mxu1 %v9505_v14 }
 0x6de   :  { %v6355_v47 = vmul.f32 0.5, %v6354_v23 }
 0x6e0   :  { %v6356_v24 = vsub.f32 1.5, %v6355_v47  ;;  %7034 = vmatpush.bf16.msra.mxu1 %v9504_v12 }
 0x6e2   :  { %v6357_v48 = vmul.f32 %v9623_v58, %v6356_v24  ;;  %v9511_v24 = vld [vmem:[%s14937_s15 + $0x88] sm:$0xff] }
 0x6e3   :  { %7188 = vmatpush.bf16.msrb.mxu3 %v9511_v24 }
 0x6e4   :  { %v6361_v34 = vsel %vm6360_vm11, %v9623_v58, %v6357_v48  ;;  %7035 = vmatpush.bf16.msra.mxu1 %v9503_v43 }
 0x6e5   :  { %v6362_v37 = vmul.f32 %v6361_v34, %v6343_v21  ;;  %v6364_v51 = vmul.f32 %v6361_v34, %v6345_v22  ;;  %v6366_v7 = vmul.f32 %v6361_v34, %v6347_v9  ;;  %v6368_v20 = vmul.f32 %v6361_v34, %v6349_v25 }
 0x6e6   :  { %v6369_v44 = vmul.f32 %v6361_v34, %v6350_v39  ;;  %v6363_v27 = vmul.f32 %v6361_v34, %v6344_v54  ;;  %v6365_v31 = vmul.f32 %v6361_v34, %v6346_v35  ;;  %v14277_v61 = vmul.f32 %v6361_v34, %v6348_v62 }
 0x6e7   :  { %v6374_v42 = vmul.f32 %v14226_v4, %v6362_v37  ;;  %v6376_v15 = vmul.f32 %v14226_v4, %v6364_v51  ;;  %v6378_v36 = vmul.f32 %v14226_v4, %v6366_v7  ;;  %v6380_v13 = vmul.f32 %v14226_v4, %v6368_v20 }
 0x6e8   :  { %v6381_v10 = vmul.f32 %v14226_v4, %v6369_v44  ;;  %v6375_v50 = vmul.f32 %v14226_v4, %v6363_v27  ;;  %v6377_v6 = vmul.f32 %v14226_v4, %v6365_v31  ;;  %v9494_v27 = vld [vmem:[%s14937_s15] sm:$0xff] }
 0x6e9   :  { %v6386_v26 = vadd.f32 %v14252_v56, %v6374_v42  ;;  %v14272_v30 = vadd.f32 %v14252_v56, %v6376_v15  ;;  %v14280_v45 = vadd.f32 %v14252_v56, %v6378_v36  ;;  %v14287_v18 = vadd.f32 %v14252_v56, %v6380_v13  ;;  %v9510_v31 = vld [vmem:[%s14937_s15 + $0x80] sm:$0xff]  ;;  %7103 = vmatpush.bf16.msra.mxu2 %v9494_v27 }
 0x6ea   :  { %v6393_v1 = vadd.f32 %v14252_v56, %v6381_v10  ;;  %v14284_v33 = vadd.f32 %v14252_v56, %v6375_v50  ;;  %v14296_v5 = vadd.f32 %v14252_v56, %v6377_v6  ;;  %v9502_v42 = vld [vmem:[%s14937_s15 + $0x40] sm:$0xff]  ;;  %7189 = vmatpush.bf16.msrb.mxu3 %v9510_v31 }
 0x6eb   :  { %v6402_v16 = vrot.slane %v6386_v26, 2  ;;  %v6403_v57 = vrot.slane %v6386_v26, 4  ;;  %v6404_v58 = vrot.slane %v6386_v26, 6  ;;  %v6408_v38 = vrot.slane %v14272_v30, 2  ;;  %7036 = vmatpush.bf16.msra.mxu1 %v9502_v42 }
 0x6ec   :  { %v6423_v11 = vrot.slane %v6393_v1, 2  ;;  %v6424_v9 = vrot.slane %v6393_v1, 4  ;;  %v6425_v62 = vrot.slane %v6393_v1, 6  ;;  %v6646_v8 = vsel %vm2322_vm10, %v6393_v1, -inf }
 0x6ed   :  { %v6647_v49 = vrot.slane %v6646_v8, 4  ;;  %v6405_v46 = vrot.slane %v14284_v33, 2  ;;  %v6406_v3 = vrot.slane %v14284_v33, 4  ;;  %v6407_v48 = vrot.slane %v14284_v33, 6 }
 0x6ee   :  { %v6653_v28 = vsel %vm2322_vm10, %v6423_v11, -inf  ;;  %v6660_v59 = vsel %vm2322_vm10, %v6424_v9, -inf  ;;  %v6667_v53 = vsel %vm2322_vm10, %v6425_v62, -inf  ;;  %v6409_v21 = vrot.slane %v14272_v30, 4 }
 0x6ef   :  { %v6648_v23 = vmax.f32 %v6646_v8, %v6647_v49  ;;  %v6654_v63 = vrot.slane %v6653_v28, 4  ;;  %v6661_v47 = vrot.slane %v6660_v59, 4  ;;  %v6668_v41 = vrot.slane %v6667_v53, 4 }
 0x6f0   :  { %v6410_v22 = vrot.slane %v14272_v30, 6  ;;  %v6411_v25 = vrot.slane %v14296_v5, 2  ;;  %v6412_v34 = vrot.slane %v14296_v5, 4  ;;  %v6450_v40 = vsel %vm2322_vm10, %v6386_v26, -inf }
 0x6f1   :  { %v6649_v32 = vrot.slane %v6648_v23, 2  ;;  %v6655_v19 = vmax.f32 %v6653_v28, %v6654_v63  ;;  %v6662_v39 = vmax.f32 %v6660_v59, %v6661_v47  ;;  %v6457_v54 = vsel %vm2322_vm10, %v6402_v16, -inf }
 0x6f2   :  { %v6464_v35 = vsel %vm2322_vm10, %v6403_v57, -inf  ;;  %v6471_v37 = vsel %vm2322_vm10, %v6404_v58, -inf  ;;  %v14328_v44 = vmax.f32 %v6667_v53, %v6668_v41  ;;  %v6451_v15 = vrot.slane %v6450_v40, 4 }
 0x6f3   :  { %v14326_v51 = vmax.f32 %v6648_v23, %v6649_v32  ;;  %v6656_v7 = vrot.slane %v6655_v19, 2  ;;  %v6663_v20 = vrot.slane %v6662_v39, 2  ;;  %v6458_v36 = vrot.slane %v6457_v54, 4 }
 0x6f4   :  { %v6465_v2 = vrot.slane %v6464_v35, 4  ;;  %v6472_v0 = vrot.slane %v6471_v37, 4  ;;  %v6413_v14 = vrot.slane %v14296_v5, 6  ;;  %v6478_v50 = vsel %vm2322_vm10, %v14284_v33, -inf }
 0x6f5   :  { %v14339_v13 = vmax.f32 %v6655_v19, %v6656_v7  ;;  %v14341_v10 = vmax.f32 %v6662_v39, %v6663_v20  ;;  %v6452_v6 = vmax.f32 %v6450_v40, %v6451_v15  ;;  %v6459_v26 = vmax.f32 %v6457_v54, %v6458_v36 }
 0x6f6   :  { %v6466_v1 = vmax.f32 %v6464_v35, %v6465_v2  ;;  %v6473_v60 = vmax.f32 %v6471_v37, %v6472_v0  ;;  %v6651_v17 = vrot.slane %v14326_v51, 1  ;;  %v6670_v57 = vrot.slane %v14328_v44, 2 }
 0x6f7   :  { %v6658_v16 = vrot.slane %v14339_v13, 1  ;;  %v6479_v11 = vrot.slane %v6478_v50, 4  ;;  %v6453_v9 = vrot.slane %v6452_v6, 2  ;;  %v6460_v62 = vrot.slane %v6459_v26, 2 }
 0x6f8   :  { %v6467_v8 = vrot.slane %v6466_v1, 2  ;;  %v6474_v12 = vrot.slane %v6473_v60, 2  ;;  %v6665_v49 = vrot.slane %v14341_v10, 1  ;;  %v6485_v28 = vsel %vm2322_vm10, %v6405_v46, -inf }
 0x6f9   :  { %v6480_v58 = vmax.f32 %v6478_v50, %v6479_v11  ;;  %v6492_v59 = vsel %vm2322_vm10, %v6406_v3, -inf  ;;  %v6454_v53 = vmax.f32 %v6452_v6, %v6453_v9  ;;  %v6461_v23 = vmax.f32 %v6459_v26, %v6460_v62 }
 0x6fa   :  { %v6468_v63 = vmax.f32 %v6466_v1, %v6467_v8  ;;  %v6475_v47 = vmax.f32 %v6473_v60, %v6474_v12  ;;  %v6486_v55 = vrot.slane %v6485_v28, 4  ;;  %v6493_v24 = vrot.slane %v6492_v59, 4 }
 0x6fb   :  { %v6481_v41 = vrot.slane %v6480_v58, 2  ;;  %v6499_v43 = vsel %vm2322_vm10, %v6407_v48, -inf  ;;  %v6455_v32 = vrot.slane %v6454_v53, 1  ;;  %v6462_v19 = vrot.slane %v6461_v23, 1 }
 0x6fc   :  { %v6469_v39 = vrot.slane %v6468_v63, 1  ;;  %v6476_v40 = vrot.slane %v6475_v47, 1  ;;  %v6487_v35 = vmax.f32 %v6485_v28, %v6486_v55  ;;  %v6494_v33 = vmax.f32 %v6492_v59, %v6493_v24 }
 0x6fd   :  { %v6482_v54 = vmax.f32 %v6480_v58, %v6481_v41  ;;  %v6500_v37 = vrot.slane %v6499_v43, 4  ;;  %v14355_v46 = vmax.f32 %v6454_v53, %v6455_v32  ;;  %v14357_v3 = vmax.f32 %v6461_v23, %v6462_v19 }
 0x6fe   :  { %v14359_v7 = vmax.f32 %v6468_v63, %v6469_v39  ;;  %v14361_v20 = vmax.f32 %v6475_v47, %v6476_v40  ;;  %v6488_v31 = vrot.slane %v6487_v35, 2  ;;  %v6495_v42 = vrot.slane %v6494_v33, 2 }
 0x6ff   :  { %v6483_v27 = vrot.slane %v6482_v54, 1  ;;  %v6501_v48 = vmax.f32 %v6499_v43, %v6500_v37  ;;  %v6506_v15 = vsel %vm2322_vm10, %v14272_v30, -inf  ;;  %v6513_v36 = vsel %vm2322_vm10, %v6408_v38, -inf }
 0x700   :  { %v6520_v2 = vsel %vm2322_vm10, %v6409_v21, -inf  ;;  %v6527_v0 = vsel %vm2322_vm10, %v6410_v22, -inf  ;;  %v6489_v6 = vmax.f32 %v6487_v35, %v6488_v31  ;;  %v6496_v26 = vmax.f32 %v6494_v33, %v6495_v42 }
 0x701   :  { %v14374_v50 = vmax.f32 %v6482_v54, %v6483_v27  ;;  %v6502_v1 = vrot.slane %v6501_v48, 2  ;;  %v6507_v60 = vrot.slane %v6506_v15, 4  ;;  %v6514_v11 = vrot.slane %v6513_v36, 4 }
 0x702   :  { %v6521_v9 = vrot.slane %v6520_v2, 4  ;;  %v6528_v62 = vrot.slane %v6527_v0, 4  ;;  %v6490_v8 = vrot.slane %v6489_v6, 1  ;;  %v6497_v12 = vrot.slane %v6496_v26, 1 }
 0x703   :  { %v6503_v38 = vmax.f32 %v6501_v48, %v6502_v1  ;;  %v6534_v58 = vsel %vm2322_vm10, %v14296_v5, -inf  ;;  %v6508_v21 = vmax.f32 %v6506_v15, %v6507_v60  ;;  %v6515_v28 = vmax.f32 %v6513_v36, %v6514_v11 }
 0x704   :  { %v6522_v30 = vmax.f32 %v6520_v2, %v6521_v9  ;;  %v6529_v59 = vmax.f32 %v6527_v0, %v6528_v62  ;;  %v14378_v22 = vmax.f32 %v6489_v6, %v6490_v8  ;;  %v14380_v53 = vmax.f32 %v6496_v26, %v6497_v12 }
 0x705   :  { %v6504_v23 = vrot.slane %v6503_v38, 1  ;;  %v6535_v63 = vrot.slane %v6534_v58, 4  ;;  %v6509_v47 = vrot.slane %v6508_v21, 2  ;;  %v6516_v41 = vrot.slane %v6515_v28, 2 }
 0x706   :  { %v6523_v55 = vrot.slane %v6522_v30, 2  ;;  %v6530_v24 = vrot.slane %v6529_v59, 2  ;;  %v6541_v19 = vsel %vm2322_vm10, %v6411_v25, -inf  ;;  %v6548_v39 = vsel %vm2322_vm10, %v6412_v34, -inf }
 0x707   :  { %v14382_v43 = vmax.f32 %v6503_v38, %v6504_v23  ;;  %v6536_v32 = vmax.f32 %v6534_v58, %v6535_v63  ;;  %v6510_v40 = vmax.f32 %v6508_v21, %v6509_v47  ;;  %v6517_v54 = vmax.f32 %v6515_v28, %v6516_v41 }
 0x708   :  { %v6524_v35 = vmax.f32 %v6522_v30, %v6523_v55  ;;  %v6531_v33 = vmax.f32 %v6529_v59, %v6530_v24  ;;  %v6542_v27 = vrot.slane %v6541_v19, 4  ;;  %v6549_v31 = vrot.slane %v6548_v39, 4 }
 0x709   :  { %v6537_v37 = vrot.slane %v6536_v32, 2  ;;  %v6555_v42 = vsel %vm2322_vm10, %v6413_v14, -inf  ;;  %v6511_v48 = vrot.slane %v6510_v40, 1  ;;  %v6518_v15 = vrot.slane %v6517_v54, 1 }
 0x70a   :  { %v6525_v36 = vrot.slane %v6524_v35, 1  ;;  %v6532_v2 = vrot.slane %v6531_v33, 1  ;;  %v6543_v0 = vmax.f32 %v6541_v19, %v6542_v27  ;;  %v6550_v6 = vmax.f32 %v6548_v39, %v6549_v31 }
 0x70b   :  { %v6538_v25 = vmax.f32 %v6536_v32, %v6537_v37  ;;  %v6556_v26 = vrot.slane %v6555_v42, 4  ;;  %v14393_v34 = vmax.f32 %v6510_v40, %v6511_v48  ;;  %v14395_v1 = vmax.f32 %v6517_v54, %v6518_v15 }
 0x70c   :  { %v14397_v60 = vmax.f32 %v6524_v35, %v6525_v36  ;;  %v14399_v11 = vmax.f32 %v6531_v33, %v6532_v2  ;;  %v6544_v5 = vrot.slane %v6543_v0, 2  ;;  %v6551_v62 = vrot.slane %v6550_v6, 2 }
 0x70d   :  { %v6539_v9 = vrot.slane %v6538_v25, 1  ;;  %v6557_v14 = vmax.f32 %v6555_v42, %v6556_v26  ;;  %v6836_v8 = vpack.c.bf16 %v14355_v46, %v14355_v46  ;;  %v6837_v12 = vpack.c.bf16 %v14357_v3, %v14357_v3 }
 0x70e   :  { %v6838_v38 = vpack.c.bf16 %v14359_v7, %v14359_v7  ;;  %v6839_v58 = vpack.c.bf16 %v14361_v20, %v14361_v20  ;;  %v6545_v28 = vmax.f32 %v6543_v0, %v6544_v5  ;;  %v6552_v30 = vmax.f32 %v6550_v6, %v6551_v62 }
 0x70f   :  { %v14409_v21 = vmax.f32 %v6538_v25, %v6539_v9  ;;  %v6558_v59 = vrot.slane %v6557_v14, 2  ;;  %v6840_v23 = vpack.c.bf16 %v14374_v50, %v14374_v50  ;;  %v6841_v63 = vpack.c.bf16 %v14378_v22, %v14378_v22 }
 0x710   :  { %v6842_v47 = vpack.c.bf16 %v14380_v53, %v14380_v53  ;;  %v6843_v41 = vpack.c.bf16 %v14382_v43, %v14382_v43  ;;  %v6546_v55 = vrot.slane %v6545_v28, 1  ;;  %v6553_v24 = vrot.slane %v6552_v30, 1 }
 0x711   :  { %v6559_v32 = vmax.f32 %v6557_v14, %v6558_v59  ;;  %v6844_v19 = vpack.c.bf16 %v14393_v34, %v14393_v34  ;;  %v6845_v39 = vpack.c.bf16 %v14395_v1, %v14395_v1  ;;  %v6846_v40 = vpack.c.bf16 %v14397_v60, %v14397_v60 }
 0x712   :  { %v6847_v54 = vpack.c.bf16 %v14399_v11, %v14399_v11  ;;  %v6848_v35 = vpack.c.bf16 %v14409_v21, %v14409_v21  ;;  %v14429_v33 = vmax.f32 %v6545_v28, %v6546_v55  ;;  %v14431_v37 = vmax.f32 %v6552_v30, %v6553_v24 }
 0x713   :  { %v6560_v27 = vrot.slane %v6559_v32, 1  ;;  %v6917_v31 = vunpack.c.l.b16 %v6836_v8  ;;  %v6918_v42 = vunpack.c.l.b16 %v6837_v12  ;;  %v6919_v48 = vunpack.c.l.b16 %v6838_v38 }
 0x714   :  { %v6920_v15 = vunpack.c.l.b16 %v6839_v58  ;;  %v6921_v36 = vunpack.c.l.b16 %v6840_v23  ;;  %v6849_v25 = vpack.c.bf16 %v14429_v33, %v14429_v33  ;;  %v6850_v0 = vpack.c.bf16 %v14431_v37, %v14431_v37 }
 0x715   :  { %v14433_v2 = vmax.f32 %v6559_v32, %v6560_v27  ;;  %v6922_v6 = vunpack.c.l.b16 %v6841_v63  ;;  %v6923_v26 = vunpack.c.l.b16 %v6842_v47  ;;  %v6924_v9 = vunpack.c.l.b16 %v6843_v41 }
 0x716   :  { %v6925_v5 = vunpack.c.l.b16 %v6844_v19  ;;  %v6926_v62 = vunpack.c.l.b16 %v6845_v39  ;;  %v6927_v8 = vunpack.c.l.b16 %v6846_v40  ;;  %v6928_v12 = vunpack.c.l.b16 %v6847_v54 }
 0x717   :  { %v6851_v14 = vpack.c.bf16 %v14433_v2, %v14433_v2  ;;  %v6929_v38 = vunpack.c.l.b16 %v6848_v35  ;;  %v6930_v58 = vunpack.c.l.b16 %v6849_v25  ;;  %v6931_v28 = vunpack.c.l.b16 %v6850_v0 }
 0x718   :  { %v6949_v30 = vsel %vm3555_vm14, %v6918_v42, %v6917_v31  ;;  %v6956_v59 = vsel %vm3555_vm14, %v6926_v62, %v6925_v5  ;;  %v6420_v47 = vrot.slane %v14287_v18, 2  ;;  %v6421_v32 = vrot.slane %v14287_v18, 4 }
 0x719   :  { %v6932_v23 = vunpack.c.l.b16 %v6851_v14  ;;  %v6950_v55 = vsel %vm3557_vm15, %v6919_v48, %v6949_v30  ;;  %v6957_v63 = vsel %vm3557_vm15, %v6927_v8, %v6956_v59  ;;  %v6422_v19 = vrot.slane %v14287_v18, 6 }
 0x71a   :  { %v6951_v41 = vsel %vm3559_vm0, %v6920_v15, %v6950_v55  ;;  %v6958_v24 = vsel %vm3559_vm0, %v6928_v12, %v6957_v63  ;;  %v6618_v54 = vsel %vm2322_vm10, %v14287_v18, -inf  ;;  %v6625_v35 = vsel %vm2322_vm10, %v6420_v47, -inf }
 0x71b   :  { %v6952_v39 = vsel %vm3561_vm1, %v6921_v36, %v6951_v41  ;;  %v6959_v40 = vsel %vm3561_vm1, %v6929_v38, %v6958_v24  ;;  %v6619_v42 = vrot.slane %v6618_v54, 4  ;;  %v6626_v48 = vrot.slane %v6625_v35, 4 }
 0x71c   :  { %v6953_v27 = vsel %vm3563_vm2, %v6922_v6, %v6952_v39  ;;  %v6960_v31 = vsel %vm3563_vm2, %v6930_v58, %v6959_v40  ;;  %v6632_v0 = vsel %vm2322_vm10, %v6421_v32, -inf  ;;  %v6639_v36 = vsel %vm2322_vm10, %v6422_v19, -inf }
 0x71d   :  { %v6954_v15 = vsel %vm3565_vm3, %v6923_v26, %v6953_v27  ;;  %v6961_v25 = vsel %vm3565_vm3, %v6931_v28, %v6960_v31  ;;  %v6620_v62 = vmax.f32 %v6618_v54, %v6619_v42  ;;  %v6627_v14 = vmax.f32 %v6625_v35, %v6626_v48 }
 0x71e   :  { %v6955_v5 = vsel %vm3567_vm6, %v6924_v9, %v6954_v15  ;;  %v6962_v18 = vsel %vm3567_vm6, %v6932_v23, %v6961_v25  ;;  %v14466_v6 = vmax.f32 %v14326_v51, %v6651_v17  ;;  %v6633_v12 = vrot.slane %v6632_v0, 4 }
 0x71f   :  { %v6977_v8 = vpack.c.b16 %v6962_v18, %v6955_v5  ;;  %v6640_v26 = vrot.slane %v6639_v36, 4  ;;  %v14471_v38 = vmax.f32 %v14339_v13, %v6658_v16  ;;  %v6621_v58 = vrot.slane %v6620_v62, 2 }
 0x720   :  { %v6628_v28 = vrot.slane %v6627_v14, 2  ;;  %v6671_v9 = vmax.f32 %v14328_v44, %v6670_v57  ;;  %v6634_v30 = vmax.f32 %v6632_v0, %v6633_v12  ;;  %v6758_v51 = vsel %vm3555_vm14, %v14357_v3, %v14355_v46 }
 0x721   :  { %7037 = vmatmul.bf16.vlgmr.msra.gmra.mxu1 %v6977_v8  ;;  %v6641_v59 = vmax.f32 %v6639_v36, %v6640_v26  ;;  %v6765_v17 = vsel %vm3555_vm14, %v14395_v1, %v14393_v34  ;;  %v6622_v23 = vmax.f32 %v6620_v62, %v6621_v58  ;;  %v14485_v16 = vmax.f32 %v14341_v10, %v6665_v49 }
 0x722   :  { %v6629_v13 = vmax.f32 %v6627_v14, %v6628_v28  ;;  %v6678_v44 = vand.u32 15, %v15256_v29  ;;  %v6635_v57 = vrot.slane %v6634_v30, 2  ;;  %v6759_v63 = vsel %vm3557_vm15, %v14359_v7, %v6758_v51 }
 0x723   :  { %v6642_v55 = vrot.slane %v6641_v59, 2  ;;  %v6766_v46 = vsel %vm3557_vm15, %v14397_v60, %v6765_v17  ;;  %v6623_v3 = vrot.slane %v6622_v23, 1  ;;  %v6672_v34 = vrot.slane %v6671_v9, 1 }
 0x724   :  { %v6630_v47 = vrot.slane %v6629_v13, 1  ;;  %v6760_v1 = vsel %vm3559_vm0, %v14361_v20, %v6759_v63  ;;  %v6636_v41 = vmax.f32 %v6634_v30, %v6635_v57  ;;  %v6767_v49 = vsel %vm3559_vm0, %v14399_v11, %v6766_v46 }
 0x725   :  { %v6643_v24 = vmax.f32 %v6641_v59, %v6642_v55  ;;  %v6761_v10 = vsel %vm3561_vm1, %v14374_v50, %v6760_v1  ;;  %v14498_v32 = vmax.f32 %v6622_v23, %v6623_v3  ;;  %v6768_v19 = vsel %vm3561_vm1, %v14409_v21, %v6767_v49 }
 0x726   :  { %v14500_v7 = vmax.f32 %v6629_v13, %v6630_v47  ;;  %v6762_v60 = vsel %vm3563_vm2, %v14378_v22, %v6761_v10  ;;  %v6637_v39 = vrot.slane %v6636_v41, 1  ;;  %v6769_v50 = vsel %vm3563_vm2, %v14429_v33, %v6768_v19 }
 0x727   :  { %v6644_v20 = vrot.slane %v6643_v24, 1  ;;  %v6763_v40 = vsel %vm3565_vm3, %v14380_v53, %v6762_v60  ;;  %v14510_v54 = vmax.f32 %v6671_v9, %v6672_v34  ;;  %v6770_v22 = vsel %vm3565_vm3, %v14431_v37, %v6769_v50 }
 0x728   :  { %v14514_v11 = vsel %vm3567_vm6, %v14382_v43, %v6763_v40  ;;  %v6779_v21 = vsel %vm3555_vm14, %v14500_v7, %v14498_v32  ;;  %v14521_v35 = vmax.f32 %v6636_v41, %v6637_v39  ;;  %vm14525_vm12 = vcmp.eq.s32.totalorder %v6678_v44, 0 }
 0x729   :  { %v14523_v27 = vmax.f32 %v6643_v24, %v6644_v20  ;;  %v14531_v33 = vsel %vm3567_vm6, %v14433_v2, %v6770_v22  ;;  %v6790_v43 = vrot.slane %v14514_v11, 7  ;;  %v6379_v31 = vmul.f32 %v14226_v4, %v14277_v61 }
 0x72a   :  { %v6791_v37 = vrot.slane %v14531_v33, 7  ;;  %v6414_v42 = vrot.slane %v14280_v45, 2  ;;  %v6415_v48 = vrot.slane %v14280_v45, 4  ;;  %v6780_v15 = vsel %vm3557_vm15, %v14521_v35, %v6779_v21 }
 0x72b   :  { %v14542_v25 = vadd.s32 8, %v15256_v29  ;;  %v6416_v2 = vrot.slane %v14280_v45, 6  ;;  %v6562_v0 = vsel %vm2322_vm10, %v14280_v45, -inf  ;;  %v6781_v36 = vsel %vm3559_vm0, %v14523_v27, %v6780_v15 }
 0x72c   :  { %v6796_v4 = vsel %vm1037_vm5, %v6790_v43, %v6791_v37  ;;  %v6391_v61 = vadd.f32 %v14252_v56, %v6379_v31  ;;  %v6563_v5 = vrot.slane %v6562_v0, 4  ;;  %v6782_v18 = vsel %vm3561_vm1, %v14466_v6, %v6781_v36 }
 0x72d   :  { %v6569_v62 = vsel %vm2322_vm10, %v6414_v42, -inf  ;;  %v6576_v14 = vsel %vm2322_vm10, %v6415_v48, -inf  ;;  %v6583_v45 = vsel %vm2322_vm10, %v6416_v2, -inf  ;;  %v6783_v8 = vsel %vm3563_vm2, %v14471_v38, %v6782_v18 }
 0x72e   :  { %v6417_v12 = vrot.slane %v6391_v61, 2  ;;  %v6418_v26 = vrot.slane %v6391_v61, 4  ;;  %v6419_v58 = vrot.slane %v6391_v61, 6  ;;  %v6784_v28 = vsel %vm3565_vm3, %v14485_v16, %v6783_v8 }
 0x72f   :  { %v6564_v56 = vmax.f32 %v6562_v0, %v6563_v5  ;;  %v6570_v9 = vrot.slane %v6569_v62, 4  ;;  %v6577_v30 = vrot.slane %v6576_v14, 4  ;;  %v14565_v59 = vsel %vm3567_vm6, %v14510_v54, %v6784_v28 }
 0x730   :  { %v6584_v51 = vrot.slane %v6583_v45, 4  ;;  %v6590_v17 = vsel %vm2322_vm10, %v6391_v61, -inf  ;;  %v6597_v23 = vsel %vm2322_vm10, %v6417_v12, -inf  ;;  %v6793_v13 = vrot.slane %v14565_v59, 7 }
 0x731   :  { %v6565_v44 = vrot.slane %v6564_v56, 2  ;;  %v6571_v57 = vmax.f32 %v6569_v62, %v6570_v9  ;;  %v6578_v55 = vmax.f32 %v6576_v14, %v6577_v30  ;;  %v6591_v46 = vrot.slane %v6590_v17, 4 }
 0x732   :  { %v6585_v63 = vmax.f32 %v6583_v45, %v6584_v51  ;;  %v6598_v3 = vrot.slane %v6597_v23, 4  ;;  %v6604_v47 = vsel %vm2322_vm10, %v6418_v26, -inf  ;;  %v6797_v34 = vsel %vm1037_vm5, %v6793_v13, %v6790_v43 }
 0x733   :  { %v6566_v1 = vmax.f32 %v6564_v56, %v6565_v44  ;;  %v6572_v41 = vrot.slane %v6571_v57, 2  ;;  %v6579_v24 = vrot.slane %v6578_v55, 2  ;;  %v6798_v10 = vsel %vm14525_vm12, %v14514_v11, %v6797_v34 }
 0x734   :  { %v6586_v49 = vrot.slane %v6585_v63, 2  ;;  %v6592_v60 = vmax.f32 %v6590_v17, %v6591_v46  ;;  %v6599_v19 = vmax.f32 %v6597_v23, %v6598_v3  ;;  %v6818_v39 = vpack.c.bf16 %v6796_v4, %v6798_v10 }
 0x735   :  { %v6567_v20 = vrot.slane %v6566_v1, 1  ;;  %v6573_v40 = vmax.f32 %v6571_v57, %v6572_v41  ;;  %v6580_v50 = vmax.f32 %v6578_v55, %v6579_v24  ;;  %v6605_v42 = vrot.slane %v6604_v47, 4 }
 0x736   :  { %v6587_v22 = vmax.f32 %v6585_v63, %v6586_v49  ;;  %v6593_v21 = vrot.slane %v6592_v60, 2  ;;  %v6600_v31 = vrot.slane %v6599_v19, 2  ;;  %7104 = vmatmul.bf16.vlgmr.msra.gmra.mxu2 %v6818_v39  ;;  %v6611_v15 = vsel %vm2322_vm10, %v6419_v58, -inf }
 0x737   :  { %v6574_v43 = vrot.slane %v6573_v40, 1  ;;  %v6581_v48 = vrot.slane %v6580_v50, 1  ;;  %v6685_v2 = vand.u32 15, %v14542_v25  ;;  %v6606_v61 = vmax.f32 %v6604_v47, %v6605_v42 }
 0x738   :  { %v6588_v53 = vrot.slane %v6587_v22, 1  ;;  %v6594_v0 = vmax.f32 %v6592_v60, %v6593_v21  ;;  %v6601_v36 = vmax.f32 %v6599_v19, %v6600_v31  ;;  %v6568_v5 = vmax.f32 %v6566_v1, %v6567_v20 }
 0x739   :  { %v6575_v4 = vmax.f32 %v6573_v40, %v6574_v43  ;;  %v6582_v18 = vmax.f32 %v6580_v50, %v6581_v48  ;;  %v6612_v62 = vrot.slane %v6611_v15, 4  ;;  %v6607_v12 = vrot.slane %v6606_v61, 2 }
 0x73a   :  { %v6589_v14 = vmax.f32 %v6587_v22, %v6588_v53  ;;  %v6595_v45 = vrot.slane %v6594_v0, 1  ;;  %v6602_v8 = vrot.slane %v6601_v36, 1  ;;  %v6806_v56 = vrot.slane %v14514_v11, 1 }
 0x73b   :  { %v6613_v26 = vmax.f32 %v6611_v15, %v6612_v62  ;;  %v6772_v28 = vsel %vm3555_vm14, %v6575_v4, %v6568_v5  ;;  %v6807_v58 = vrot.slane %v14531_v33, 1  ;;  %v6608_v51 = vmax.f32 %v6606_v61, %v6607_v12 }
 0x73c   :  { %v6596_v9 = vmax.f32 %v6594_v0, %v6595_v45  ;;  %v6603_v30 = vmax.f32 %v6601_v36, %v6602_v8  ;;  %v6773_v17 = vsel %vm3557_vm15, %v6582_v18, %v6772_v28  ;;  %v6852_v55 = vpack.c.bf16 %v6568_v5, %v6568_v5 }
 0x73d   :  { %v6614_v23 = vrot.slane %v6613_v26, 2  ;;  %v6774_v44 = vsel %vm3559_vm0, %v6589_v14, %v6773_v17  ;;  %v6812_v57 = vsel %vm1166_vm4, %v6806_v56, %v6807_v58  ;;  %v6609_v63 = vrot.slane %v6608_v51, 1 }
 0x73e   :  { %v6775_v46 = vsel %vm3561_vm1, %v6596_v9, %v6774_v44  ;;  %vm14590_vm13 = vcmp.eq.s32.totalorder %v6685_v2, 15  ;;  %v6853_v47 = vpack.c.bf16 %v6575_v4, %v6575_v4  ;;  %v6854_v34 = vpack.c.bf16 %v6582_v18, %v6582_v18 }
 0x73f   :  { %v6615_v1 = vmax.f32 %v6613_v26, %v6614_v23  ;;  %v6776_v41 = vsel %vm3563_vm2, %v6603_v30, %v6775_v46  ;;  %v6855_v24 = vpack.c.bf16 %v6589_v14, %v6589_v14  ;;  %v6856_v10 = vpack.c.bf16 %v6596_v9, %v6596_v9 }
 0x740   :  { %v6610_v49 = vmax.f32 %v6608_v51, %v6609_v63  ;;  %v6857_v60 = vpack.c.bf16 %v6603_v30, %v6603_v30  ;;  %v6860_v19 = vpack.c.bf16 %v14498_v32, %v14498_v32  ;;  %v6861_v39 = vpack.c.bf16 %v14500_v7, %v14500_v7 }
 0x741   :  { %v6616_v20 = vrot.slane %v6615_v1, 1  ;;  %v6862_v40 = vpack.c.bf16 %v14521_v35, %v14521_v35  ;;  %v6863_v50 = vpack.c.bf16 %v14523_v27, %v14523_v27  ;;  %v6864_v22 = vpack.c.bf16 %v14466_v6, %v14466_v6 }
 0x742   :  { %v6777_v21 = vsel %vm3565_vm3, %v6610_v49, %v6776_v41  ;;  %v6858_v31 = vpack.c.bf16 %v6610_v49, %v6610_v49  ;;  %v6865_v42 = vpack.c.bf16 %v14471_v38, %v14471_v38  ;;  %v6866_v32 = vpack.c.bf16 %v14485_v16, %v14485_v16 }
 0x743   :  { %v6617_v7 = vmax.f32 %v6615_v1, %v6616_v20  ;;  %v6867_v43 = vpack.c.bf16 %v14510_v54, %v14510_v54  ;;  %v6933_v35 = vunpack.c.l.b16 %v6852_v55  ;;  %v6934_v48 = vunpack.c.l.b16 %v6853_v47 }
 0x744   :  { %v6935_v15 = vunpack.c.l.b16 %v6854_v34  ;;  %v6936_v27 = vunpack.c.l.b16 %v6855_v24  ;;  %v6937_v2 = vunpack.c.l.b16 %v6856_v10  ;;  %v6938_v53 = vunpack.c.l.b16 %v6857_v60 }
 0x745   :  { %v6778_v6 = vsel %vm3567_vm6, %v6617_v7, %v6777_v21  ;;  %v6859_v0 = vpack.c.bf16 %v6617_v7, %v6617_v7  ;;  %v6939_v36 = vunpack.c.l.b16 %v6858_v31  ;;  %v6941_v61 = vunpack.c.l.b16 %v6860_v19 }
 0x746   :  { %v6808_v5 = vrot.slane %v6778_v6, 1  ;;  %v6942_v38 = vunpack.c.l.b16 %v6861_v39  ;;  %v6943_v4 = vunpack.c.l.b16 %v6862_v40  ;;  %v6944_v18 = vunpack.c.l.b16 %v6863_v50 }
 0x747   :  { %v6940_v16 = vunpack.c.l.b16 %v6859_v0  ;;  %v6945_v62 = vunpack.c.l.b16 %v6864_v22  ;;  %v6946_v14 = vunpack.c.l.b16 %v6865_v42  ;;  %v6947_v45 = vunpack.c.l.b16 %v6866_v32 }
 0x748   :  { %v6811_v54 = vsel %vm1166_vm4, %v6807_v58, %v6808_v5  ;;  %v6948_v8 = vunpack.c.l.b16 %v6867_v43  ;;  %v6963_v12 = vsel %vm3555_vm14, %v6934_v48, %v6933_v35  ;;  %v6970_v26 = vsel %vm3555_vm14, %v6942_v38, %v6941_v61 }
 0x749   :  { %v6815_v28 = vsel %vm14590_vm13, %v14531_v33, %v6811_v54  ;;  %v6964_v9 = vsel %vm3557_vm15, %v6935_v15, %v6963_v12  ;;  %v6971_v30 = vsel %vm3557_vm15, %v6943_v4, %v6970_v26  ;;  %v559_v51 = vadd.s32 16, %v15256_v29 }
 0x74a   :  { %v7115_v17 = vpack.c.bf16 %v6815_v28, %v6812_v57  ;;  %v6965_v23 = vsel %vm3559_vm0, %v6936_v27, %v6964_v9  ;;  %v6972_v58 = vsel %vm3559_vm0, %v6944_v18, %v6971_v30  ;;  %v6792_v44 = vrot.slane %v6778_v6, 7 }
 0x74b   :  { %v6966_v55 = vsel %vm3561_vm1, %v6937_v2, %v6965_v23  ;;  %v6973_v63 = vsel %vm3561_vm1, %v6945_v62, %v6972_v58  ;;  %v6692_v46 = vand.u32 15, %v559_v51  ;;  %v6699_v3 = vand.u32 15, %v13640_v52 }
 0x74c   :  { %7190 = vmatmul.bf16.vlgmr.msrb.gmra.mxu3 %v7115_v17  ;;  %v6967_v47 = vsel %vm3563_vm2, %v6938_v53, %v6966_v55  ;;  %v6974_v34 = vsel %vm3563_vm2, %v6946_v14, %v6973_v63  ;;  %v6794_v57 = vsel %vm1037_vm5, %v6792_v44, %v6793_v13  ;;  %v6795_v1 = vsel %vm1037_vm5, %v6791_v37, %v6792_v44 }
 0x74d   :  { %v6968_v41 = vsel %vm3565_vm3, %v6939_v36, %v6967_v47  ;;  %v6975_v24 = vsel %vm3565_vm3, %v6947_v45, %v6974_v34  ;;  %vm6724_vm7 = vcmp.eq.s32.totalorder %v6692_v46, 0  ;;  %vm6805_vm8 = vcmp.eq.s32.totalorder %v6699_v3, 15 }
 0x74e   :  { %v6969_v52 = vsel %vm3567_vm6, %v6940_v16, %v6968_v41  ;;  %v6976_v10 = vsel %vm3567_vm6, %v6948_v8, %v6975_v24  ;;  %v6800_v49 = vsel %vm6724_vm7, %v6778_v6, %v6795_v1  ;;  %v6809_v60 = vrot.slane %v14565_v59, 1 }
 0x74f   :  { %v6978_v19 = vpack.c.b16 %v6976_v10, %v6969_v52  ;;  %v6819_v13 = vpack.c.bf16 %v6794_v57, %v6800_v49  ;;  %v9650_v53 = vmov 32.0  }
 0x750   :  { %v6810_v33 = vsel %vm1166_vm4, %v6808_v5, %v6809_v60  ;;  %v6813_v37 = vsel %vm1166_vm4, %v6809_v60, %v6806_v56  ;;  %v9607_v56 = vld [vmem:[%s14938_s16] ss:$0 sm:$0xff]  ;;  %9624 = vrcp.f32 %v9650_v53 }
 0x751   :  { %7042 = vmatmul.bf16.gmra.mxu1 %v6978_v19  ;;  %7109 = vmatmul.bf16.gmra.mxu2 %v6819_v13  ;;  %v6817_v39 = vsel %vm6805_vm8, %v14565_v59, %v6813_v37 }
 0x752   :  { %v7116_v20 = vpack.c.bf16 %v6817_v39, %v6810_v33 }
 0x756   :  { %v9625_v4 = vpop.eup %9624 }
 0x757   :  { %v7227_v54 = vmul.f32 32.0, %v9625_v4  ;;  %vm7231_vm9 = vweird.f32 %v9625_v4 }
 0x759   :  { %v7228_v17 = vsub.f32 1.0, %v7227_v54 }
 0x75b   :  { %v7229_v46 = vmul.f32 %v9625_v4, %v7228_v17 }
 0x75c   :  { %7195 = vmatmul.bf16.gmra.mxu3 %v7116_v20 }
 0x75d   :  { %v7230_v1 = vadd.f32 %v9625_v4, %v7229_v46 }
 0x75f   :  { %v7232_v49 = vsel %vm7231_vm9, %v9625_v4, %v7230_v1 }
 0x79e   :  { %v7038_v50 = vpop.f32.mrf.mxu1 }
 0x7a6   :  { %v7040_v31 = vpop.f32.mrf.mxu1 }
 0x7b9   :  { %v7105_v40 = vpop.f32.mrf.mxu2 }
 0x7ba   :  { %v7106_v35 = vadd.f32 %v7105_v40, %v7038_v50 }
 0x7c1   :  { %v7107_v22 = vpop.f32.mrf.mxu2 }
 0x7c2   :  { %v7108_v7 = vadd.f32 %v7107_v22, %v7040_v31 }
 0x7ce   :  { %v7043_v43 = vpop.f32.mrf.mxu1 }
 0x7cf   :  { %v7191_v21 = vpop.f32.mrf.mxu3 }
 0x7d0   :  { %v7201_v15 = vadd.f32 %v7191_v21, %v7106_v35 }
 0x7d2   :  { %v7209_v0 = vadd.f32 %v9607_v56, %v7201_v15  ;;  %v9608_v15 = vld [vmem:[%s14939_s17] ss:$0 sm:$0xff] }
 0x7d4   :  { %v7110_v32 = vpop.f32.mrf.mxu2  ;;  %v7213_v18 = vmax.f32 %v7209_v0, 0.0 }
 0x7d5   :  { %v7111_v48 = vadd.f32 %v7110_v32, %v7043_v43 }
 0x7d6   :  { %v7045_v61 = vpop.f32.mrf.mxu1  ;;  %v7234_v8 = vmul.f32 %v7213_v18, %v7213_v18 }
 0x7d7   :  { %v7193_v42 = vpop.f32.mrf.mxu3 }
 0x7d8   :  { %v7202_v11 = vadd.f32 %v7193_v42, %v7108_v7 }
 0x7da   :  { %v7210_v27 = vadd.f32 %v9607_v56, %v7202_v11 }
 0x7dc   :  { %v7112_v6 = vpop.f32.mrf.mxu2  ;;  %v7214_v5 = vmax.f32 %v7210_v27, 0.0 }
 0x7dd   :  { %v7113_v38 = vadd.f32 %v7112_v6, %v7045_v61  ;;  %v9609_v6 = vld [vmem:[%s14940_s18] ss:$0 sm:$0xff] }
 0x7de   :  { %v7235_v14 = vmul.f32 %v7214_v5, %v7214_v5  ;;  %v7217_v12 = vadd.f32 %v7214_v5, %v7213_v18 }
 0x7df   :  { %v7196_v59 = vpop.f32.mrf.mxu3 }
 0x7e0   :  { %v7203_v2 = vadd.f32 %v7196_v59, %v7111_v48  ;;  %v7238_v9 = vadd.f32 %v7235_v14, %v7234_v8 }
 0x7e2   :  { %v7211_v36 = vadd.f32 %v9607_v56, %v7203_v2 }
 0x7e4   :  { %v7215_v16 = vmax.f32 %v7211_v36, 0.0 }
 0x7e6   :  { %v7236_v26 = vmul.f32 %v7215_v16, %v7215_v16  ;;  %v7218_v30 = vadd.f32 %v7217_v12, %v7215_v16 }
 0x7e7   :  { %v7198_v62 = vpop.f32.mrf.mxu3 }
 0x7e8   :  { %v7204_v45 = vadd.f32 %v7198_v62, %v7113_v38  ;;  %v7239_v23 = vadd.f32 %v7238_v9, %v7236_v26 }
 0x7ea   :  { %v7212_v28 = vadd.f32 %v9607_v56, %v7204_v45 }
 0x7ec   :  { %v7216_v51 = vmax.f32 %v7212_v28, 0.0 }
 0x7ee   :  { %v7219_v58 = vadd.f32 %v7218_v30, %v7216_v51  ;;  %v7237_v44 = vmul.f32 %v7216_v51, %v7216_v51 }
 0x7f0   :  { %v7220_v55 = vrot.slane %v7219_v58, 4  ;;  %v7240_v63 = vadd.f32 %v7239_v23, %v7237_v44 }
 0x7f2   :  { %v7221_v3 = vadd.f32 %v7220_v55, %v7219_v58  ;;  %v7241_v47 = vrot.slane %v7240_v63, 4 }
 0x7f4   :  { %v7222_v34 = vrot.slane %v7221_v3, 2  ;;  %v7242_v57 = vadd.f32 %v7241_v47, %v7240_v63 }
 0x7f6   :  { %v7223_v41 = vadd.f32 %v7222_v34, %v7221_v3  ;;  %v7243_v24 = vrot.slane %v7242_v57, 2 }
 0x7f8   :  { %v7224_v52 = vrot.slane %v7223_v41, 1  ;;  %v7244_v10 = vadd.f32 %v7243_v24, %v7242_v57 }
 0x7fa   :  { %v7225_v60 = vadd.f32 %v7224_v52, %v7223_v41  ;;  %v7245_v19 = vrot.slane %v7244_v10, 1 }
 0x7fc   :  { %v7233_v13 = vmul.f32 %v7232_v49, %v7225_v60  ;;  %v7246_v33 = vadd.f32 %v7245_v19, %v7244_v10 }
 0x7fe   :  { %v7247_v37 = vmul.f32 %v7246_v33, %v7232_v49  ;;  %v7248_v39 = vmul.f32 %v7233_v13, %v7233_v13  ;;  %v7251_v43 = vsub.f32 %v7213_v18, %v7233_v13  ;;  %v7252_v35 = vsub.f32 %v7214_v5, %v7233_v13 }
 0x7ff   :  { %v7253_v11 = vsub.f32 %v7215_v16, %v7233_v13  ;;  %v7254_v48 = vsub.f32 %v7216_v51, %v7233_v13 }
 0x800   :  { %v7249_v20 = vsub.f32 %v7247_v37, %v7248_v39 }
 0x802   :  { %v7250_v40 = vmax.f32 %v7249_v20, 0.0 }
 0x804   :  { %v7255_v50 = vadd.f32 1e-05, %v7250_v40 }
 0x806   :  { %9626 = vrsqrt.f32 %v7255_v50  ;;  %vm7262_vm12 = vweird.f32 %v7255_v50 }
 0x80c   :  { %v9627_v22 = vpop.eup %9626 }
 0x80d   :  { %v7257_v21 = vmul.f32 %v9627_v22, %v7255_v50  ;;  %vm7263_vm11 = vweird.f32 %v9627_v22 }
 0x80e   :  { %vm7264_vm13 = vmor %vm7262_vm12, %vm7263_vm11 }
 0x80f   :  { %v7258_v31 = vmul.f32 %v9627_v22, %v7257_v21 }
 0x811   :  { %v7259_v42 = vmul.f32 0.5, %v7258_v31 }
 0x813   :  { %v7260_v32 = vsub.f32 1.5, %v7259_v42 }
 0x815   :  { %v7261_v7 = vmul.f32 %v9627_v22, %v7260_v32 }
 0x817   :  { %v7265_v56 = vsel %vm7264_vm13, %v9627_v22, %v7261_v7 }
 0x818   :  { %v7266_v59 = vmul.f32 %v7265_v56, %v7251_v43  ;;  %v7267_v27 = vmul.f32 %v7265_v56, %v7252_v35  ;;  %v7268_v2 = vmul.f32 %v7265_v56, %v7253_v11  ;;  %v7269_v53 = vmul.f32 %v7265_v56, %v7254_v48 }
 0x81a   :  { %v7274_v0 = vmul.f32 %v9608_v15, %v7266_v59  ;;  %v7275_v36 = vmul.f32 %v9608_v15, %v7267_v27  ;;  %v7276_v61 = vmul.f32 %v9608_v15, %v7268_v2  ;;  %v7277_v5 = vmul.f32 %v9608_v15, %v7269_v53 }
 0x81c   :  { %v7282_v38 = vadd.f32 %v9609_v6, %v7274_v0  ;;  %v7283_v4 = vadd.f32 %v9609_v6, %v7275_v36  ;;  %v14659_v18 = vadd.f32 %v9609_v6, %v7276_v61  ;;  %v14661_v16 = vadd.f32 %v9609_v6, %v7277_v5 }
 0x81e   :  { %v7290_v62 = vrot.slane %v7282_v38, 2  ;;  %v7291_v14 = vrot.slane %v7282_v38, 4  ;;  %v7292_v45 = vrot.slane %v7282_v38, 6  ;;  %v7293_v54 = vrot.slane %v7283_v4, 2 }
 0x81f   :  { %v7294_v8 = vrot.slane %v7283_v4, 4  ;;  %v7295_v12 = vrot.slane %v7283_v4, 6  ;;  %v7296_v26 = vrot.slane %v14659_v18, 2  ;;  %v7297_v28 = vrot.slane %v14659_v18, 4 }
 0x820   :  { %v7298_v9 = vrot.slane %v14659_v18, 6  ;;  %v7299_v30 = vrot.slane %v14661_v16, 2  ;;  %v7300_v51 = vrot.slane %v14661_v16, 4  ;;  %v7301_v17 = vrot.slane %v14661_v16, 6 }
 0x821   :  { %v7314_v23 = vsel %vm2322_vm10, %v7282_v38, -inf  ;;  %v7321_v58 = vsel %vm2322_vm10, %v7290_v62, -inf  ;;  %v7328_v44 = vsel %vm2322_vm10, %v7291_v14, -inf  ;;  %v7335_v55 = vsel %vm2322_vm10, %v7292_v45, -inf }
 0x822   :  { %v7315_v63 = vrot.slane %v7314_v23, 4  ;;  %v7322_v46 = vrot.slane %v7321_v58, 4  ;;  %v7329_v3 = vrot.slane %v7328_v44, 4  ;;  %v7336_v47 = vrot.slane %v7335_v55, 4 }
 0x823   :  { %v7342_v34 = vsel %vm2322_vm10, %v7283_v4, -inf  ;;  %v7349_v57 = vsel %vm2322_vm10, %v7293_v54, -inf  ;;  %v7356_v1 = vsel %vm2322_vm10, %v7294_v8, -inf  ;;  %v7363_v41 = vsel %vm2322_vm10, %v7295_v12, -inf }
 0x824   :  { %v7316_v24 = vmax.f32 %v7314_v23, %v7315_v63  ;;  %v7323_v52 = vmax.f32 %v7321_v58, %v7322_v46  ;;  %v7330_v10 = vmax.f32 %v7328_v44, %v7329_v3  ;;  %v7337_v49 = vmax.f32 %v7335_v55, %v7336_v47 }
 0x825   :  { %v7343_v60 = vrot.slane %v7342_v34, 4  ;;  %v7350_v19 = vrot.slane %v7349_v57, 4  ;;  %v7357_v13 = vrot.slane %v7356_v1, 4  ;;  %v7364_v33 = vrot.slane %v7363_v41, 4 }
 0x826   :  { %v7317_v37 = vrot.slane %v7316_v24, 2  ;;  %v7324_v39 = vrot.slane %v7323_v52, 2  ;;  %v7331_v20 = vrot.slane %v7330_v10, 2  ;;  %v7338_v40 = vrot.slane %v7337_v49, 2 }
 0x827   :  { %v7344_v50 = vmax.f32 %v7342_v34, %v7343_v60  ;;  %v7351_v22 = vmax.f32 %v7349_v57, %v7350_v19  ;;  %v7358_v21 = vmax.f32 %v7356_v1, %v7357_v13  ;;  %v7365_v31 = vmax.f32 %v7363_v41, %v7364_v33 }
 0x828   :  { %v7318_v42 = vmax.f32 %v7316_v24, %v7317_v37  ;;  %v7325_v32 = vmax.f32 %v7323_v52, %v7324_v39  ;;  %v7332_v7 = vmax.f32 %v7330_v10, %v7331_v20  ;;  %v7339_v43 = vmax.f32 %v7337_v49, %v7338_v40 }
 0x829   :  { %v7345_v35 = vrot.slane %v7344_v50, 2  ;;  %v7352_v11 = vrot.slane %v7351_v22, 2  ;;  %v7359_v48 = vrot.slane %v7358_v21, 2  ;;  %v7366_v15 = vrot.slane %v7365_v31, 2 }
 0x82a   :  { %v7319_v56 = vrot.slane %v7318_v42, 1  ;;  %v7326_v59 = vrot.slane %v7325_v32, 1  ;;  %v7333_v27 = vrot.slane %v7332_v7, 1  ;;  %v7340_v2 = vrot.slane %v7339_v43, 1 }
 0x82b   :  { %v7346_v53 = vmax.f32 %v7344_v50, %v7345_v35  ;;  %v7353_v6 = vmax.f32 %v7351_v22, %v7352_v11  ;;  %v7360_v0 = vmax.f32 %v7358_v21, %v7359_v48  ;;  %v7367_v36 = vmax.f32 %v7365_v31, %v7366_v15 }
 0x82c   :  { %v14677_v61 = vmax.f32 %v7318_v42, %v7319_v56  ;;  %v14679_v5 = vmax.f32 %v7325_v32, %v7326_v59  ;;  %v14681_v38 = vmax.f32 %v7332_v7, %v7333_v27  ;;  %v14683_v4 = vmax.f32 %v7339_v43, %v7340_v2 }
 0x82d   :  { %v7347_v62 = vrot.slane %v7346_v53, 1  ;;  %v7354_v14 = vrot.slane %v7353_v6, 1  ;;  %v7361_v45 = vrot.slane %v7360_v0, 1  ;;  %v7368_v54 = vrot.slane %v7367_v36, 1 }
 0x82e   :  { %v7370_v8 = vsel %vm2322_vm10, %v14659_v18, -inf  ;;  %v7377_v12 = vsel %vm2322_vm10, %v7296_v26, -inf  ;;  %v7384_v23 = vsel %vm2322_vm10, %v7297_v28, -inf  ;;  %v7391_v58 = vsel %vm2322_vm10, %v7298_v9, -inf }
 0x82f   :  { %v14690_v44 = vmax.f32 %v7346_v53, %v7347_v62  ;;  %v14692_v55 = vmax.f32 %v7353_v6, %v7354_v14  ;;  %v14694_v63 = vmax.f32 %v7360_v0, %v7361_v45  ;;  %v14696_v46 = vmax.f32 %v7367_v36, %v7368_v54 }
 0x830   :  { %v7371_v3 = vrot.slane %v7370_v8, 4  ;;  %v7378_v47 = vrot.slane %v7377_v12, 4  ;;  %v7385_v34 = vrot.slane %v7384_v23, 4  ;;  %v7392_v57 = vrot.slane %v7391_v58, 4 }
 0x831   :  { %v7398_v18 = vsel %vm2322_vm10, %v14661_v16, -inf  ;;  %v7405_v26 = vsel %vm2322_vm10, %v7299_v30, -inf  ;;  %v7412_v28 = vsel %vm2322_vm10, %v7300_v51, -inf  ;;  %v7419_v9 = vsel %vm2322_vm10, %v7301_v17, -inf }
 0x832   :  { %v7372_v1 = vmax.f32 %v7370_v8, %v7371_v3  ;;  %v7379_v41 = vmax.f32 %v7377_v12, %v7378_v47  ;;  %v7386_v24 = vmax.f32 %v7384_v23, %v7385_v34  ;;  %v7393_v52 = vmax.f32 %v7391_v58, %v7392_v57 }
 0x833   :  { %v7399_v10 = vrot.slane %v7398_v18, 4  ;;  %v7406_v49 = vrot.slane %v7405_v26, 4  ;;  %v7413_v60 = vrot.slane %v7412_v28, 4  ;;  %v7420_v19 = vrot.slane %v7419_v9, 4 }
 0x834   :  { %v7373_v13 = vrot.slane %v7372_v1, 2  ;;  %v7380_v33 = vrot.slane %v7379_v41, 2  ;;  %v7387_v37 = vrot.slane %v7386_v24, 2  ;;  %v7394_v30 = vrot.slane %v7393_v52, 2 }
 0x835   :  { %v7400_v39 = vmax.f32 %v7398_v18, %v7399_v10  ;;  %v7407_v20 = vmax.f32 %v7405_v26, %v7406_v49  ;;  %v7414_v40 = vmax.f32 %v7412_v28, %v7413_v60  ;;  %v7421_v51 = vmax.f32 %v7419_v9, %v7420_v19 }
 0x836   :  { %v7374_v50 = vmax.f32 %v7372_v1, %v7373_v13  ;;  %v7381_v16 = vmax.f32 %v7379_v41, %v7380_v33  ;;  %v7388_v22 = vmax.f32 %v7386_v24, %v7387_v37  ;;  %v7395_v17 = vmax.f32 %v7393_v52, %v7394_v30 }
 0x837   :  { %v7401_v21 = vrot.slane %v7400_v39, 2  ;;  %v7408_v31 = vrot.slane %v7407_v20, 2  ;;  %v7415_v42 = vrot.slane %v7414_v40, 2  ;;  %v7422_v32 = vrot.slane %v7421_v51, 2 }
 0x838   :  { %v7375_v7 = vrot.slane %v7374_v50, 1  ;;  %v7382_v43 = vrot.slane %v7381_v16, 1  ;;  %v7389_v35 = vrot.slane %v7388_v22, 1  ;;  %v7396_v11 = vrot.slane %v7395_v17, 1 }
 0x839   :  { %v7402_v48 = vmax.f32 %v7400_v39, %v7401_v21  ;;  %v7409_v15 = vmax.f32 %v7407_v20, %v7408_v31  ;;  %v7416_v56 = vmax.f32 %v7414_v40, %v7415_v42  ;;  %v7423_v59 = vmax.f32 %v7421_v51, %v7422_v32 }
 0x83a   :  { %v7376_v27 = vmax.f32 %v7374_v50, %v7375_v7  ;;  %v7383_v2 = vmax.f32 %v7381_v16, %v7382_v43  ;;  %v7390_v53 = vmax.f32 %v7388_v22, %v7389_v35  ;;  %v7397_v6 = vmax.f32 %v7395_v17, %v7396_v11 }
 0x83b   :  { %v7403_v0 = vrot.slane %v7402_v48, 1  ;;  %v7410_v36 = vrot.slane %v7409_v15, 1  ;;  %v7417_v62 = vrot.slane %v7416_v56, 1  ;;  %v7424_v14 = vrot.slane %v7423_v59, 1 }
 0x83d   :  { %v7404_v45 = vmax.f32 %v7402_v48, %v7403_v0  ;;  %v14709_v54 = vmax.f32 %v7409_v15, %v7410_v36  ;;  %v14711_v8 = vmax.f32 %v7416_v56, %v7417_v62  ;;  %v14713_v12 = vmax.f32 %v7423_v59, %v7424_v14 }
 0x83e   :  { %9643 = dma.done.wait [#allocation4], 3072 }
 0x83f   :  { %9644 = vsyncadd [#allocation4], 4294964224  ;;  %v7520_v23 = vpack.c.bf16 %v14677_v61, %v14677_v61  ;;  %v7521_v58 = vpack.c.bf16 %v14679_v5, %v14679_v5  ;;  %v9533_v3 = vld [vmem:[#allocation2 + $0xa0] sm:$0xff]  ;;  %v9525_v47 = vld [vmem:[#allocation2 + $0x78] sm:$0xff]  ;;  %v7528_v57 = vpack.c.bf16 %v7376_v27, %v7376_v27  ;;  %v7529_v18 = vpack.c.bf16 %v7383_v2, %v7383_v2 }
 0x840   :  { %v9541_v34 = vld [vmem:[#allocation2 + $0x8] sm:$0xff]  ;;  %7649 = vmatpush.bf16.msrb.mxu1 %v9533_v3  ;;  %7711 = vmatpush.bf16.msrb.mxu2 %v9525_v47  ;;  %v9532_v26 = vld [vmem:[#allocation2 + $0x70] sm:$0xff]  ;;  %v9524_v28 = vld [vmem:[#allocation2 + $0x40] sm:$0xff]  ;;  %v7522_v9 = vpack.c.bf16 %v14681_v38, %v14681_v38  ;;  %v7473_v1 = vsel %vm3555_vm14, %v14679_v5, %v14677_v61  ;;  %v7530_v24 = vpack.c.bf16 %v7390_v53, %v7390_v53 }
 0x841   :  { %7791 = vmatpush.bf16.msra.mxu3 %v9541_v34  ;;  %v9540_v41 = vld [vmem:[#allocation2 + $0x20] sm:$0xff]  ;;  %v7569_v52 = vunpack.c.l.b16 %v7520_v23  ;;  %v7570_v10 = vunpack.c.l.b16 %v7521_v58  ;;  %v7577_v49 = vunpack.c.l.b16 %v7528_v57  ;;  %v7578_v60 = vunpack.c.l.b16 %v7529_v18  ;;  %v9531_v5 = vld [vmem:[#allocation2 + $0x50] sm:$0xff]  ;;  %v9523_v30 = vld [vmem:[#allocation2 + $0x28] sm:$0xff] }
 0x842   :  { %v7474_v19 = vsel %vm3557_vm15, %v14681_v38, %v7473_v1  ;;  %v7480_v13 = vsel %vm3555_vm14, %v7383_v2, %v7376_v27  ;;  %v7523_v33 = vpack.c.bf16 %v14683_v4, %v14683_v4  ;;  %v7531_v39 = vpack.c.bf16 %v7397_v6, %v7397_v6  ;;  %v9539_v40 = vld [vmem:[#allocation2 + $0xb8] sm:$0xff]  ;;  %v9522_v32 = vld [vmem:[#allocation2 + $0x60] sm:$0xff]  ;;  %v9521_v36 = vld [vmem:[#allocation2 + $0x48] sm:$0xff] }
 0x843   :  { %v7475_v37 = vsel %vm3559_vm0, %v14683_v4, %v7474_v19  ;;  %v7481_v61 = vsel %vm3557_vm15, %v7390_v53, %v7480_v13  ;;  %v7571_v20 = vunpack.c.l.b16 %v7522_v9  ;;  %v7579_v51 = vunpack.c.l.b16 %v7530_v24  ;;  %v9530_v42 = vld [vmem:[#allocation2 + $0x38] sm:$0xff]  ;;  %v9520_v57 = vld [vmem:[#allocation2 + $0x10] sm:$0xff]  ;;  %v9519_v13 = vld [vmem:[#allocation2] sm:$0xff] }
 0x844   :  { %7650 = vmatpush.bf16.msrb.mxu1 %v9532_v26  ;;  %7712 = vmatpush.bf16.msrb.mxu2 %v9524_v28  ;;  %v7585_v38 = vsel %vm3555_vm14, %v7570_v10, %v7569_v52  ;;  %v7476_v50 = vsel %vm3561_vm1, %v14690_v44, %v7475_v37  ;;  %v7482_v16 = vsel %vm3559_vm0, %v7397_v6, %v7481_v61  ;;  %v7572_v31 = vunpack.c.l.b16 %v7523_v33  ;;  %v9529_v0 = vld [vmem:[#allocation2 + $0x98] sm:$0xff]  ;;  %v9536_v1 = vld [vmem:[#allocation2 + $0x30] sm:$0xff] }
 0x845   :  { %7792 = vmatpush.bf16.msra.mxu3 %v9540_v41  ;;  %v7524_v4 = vpack.c.bf16 %v14690_v44, %v14690_v44  ;;  %v7592_v22 = vsel %vm3555_vm14, %v7578_v60, %v7577_v49  ;;  %v7483_v17 = vsel %vm3561_vm1, %v7404_v45, %v7482_v16  ;;  %v7532_v21 = vpack.c.bf16 %v7404_v45, %v7404_v45  ;;  %v9538_v44 = vld [vmem:[#allocation2 + $0x80] sm:$0xff]  ;;  %v9537_v45 = vld [vmem:[#allocation2 + $0x58] sm:$0xff] }
 0x846   :  { %v7580_v7 = vunpack.c.l.b16 %v7531_v39  ;;  %v7586_v43 = vsel %vm3557_vm15, %v7571_v20, %v7585_v38  ;;  %v7477_v35 = vsel %vm3563_vm2, %v14692_v55, %v7476_v50  ;;  %v7484_v11 = vsel %vm3563_vm2, %v14709_v54, %v7483_v17 }
 0x847   :  { %v7525_v48 = vpack.c.bf16 %v14692_v55, %v14692_v55  ;;  %v7593_v15 = vsel %vm3557_vm15, %v7579_v51, %v7592_v22  ;;  %v7533_v56 = vpack.c.bf16 %v14709_v54, %v14709_v54  ;;  %v7573_v59 = vunpack.c.l.b16 %v7524_v4  ;;  %v9526_v4 = vld [vmem:[#allocation2 + $0x88] sm:$0xff]  ;;  %v9518_v22 = vld [vmem:[#allocation2 + $0xb0] sm:$0xff] }
 0x848   :  { %7651 = vmatpush.bf16.msrb.mxu1 %v9531_v5  ;;  %7713 = vmatpush.bf16.msrb.mxu2 %v9523_v30  ;;  %v7581_v27 = vunpack.c.l.b16 %v7532_v21  ;;  %v7587_v2 = vsel %vm3559_vm0, %v7572_v31, %v7586_v43  ;;  %v7478_v53 = vsel %vm3565_vm3, %v14694_v63, %v7477_v35  ;;  %v7485_v6 = vsel %vm3565_vm3, %v14711_v8, %v7484_v11 }
 0x849   :  { %7793 = vmatpush.bf16.msra.mxu3 %v9539_v40  ;;  %v7526_v55 = vpack.c.bf16 %v14694_v63, %v14694_v63  ;;  %v7534_v62 = vpack.c.bf16 %v14711_v8, %v14711_v8  ;;  %v7594_v14 = vsel %vm3559_vm0, %v7580_v7, %v7593_v15  ;;  %v7574_v54 = vunpack.c.l.b16 %v7525_v48  ;;  %v9528_v8 = vld [vmem:[#allocation2 + $0x18] sm:$0xff] }
 0x84a   :  { %v7582_v23 = vunpack.c.l.b16 %v7533_v56  ;;  %v7588_v58 = vsel %vm3561_vm1, %v7573_v59, %v7587_v2  ;;  %v7479_v3 = vsel %vm3567_vm6, %v14696_v46, %v7478_v53  ;;  %v7486_v47 = vsel %vm3567_vm6, %v14713_v12, %v7485_v6  ;;  %v9630_v2 = vld [vmem:[%s14942_s20] ss:$0 sm:$0xff] }
 0x84b   :  { %v7527_v63 = vpack.c.bf16 %v14696_v46, %v14696_v46  ;;  %v7595_v34 = vsel %vm3561_vm1, %v7581_v27, %v7594_v14  ;;  %v7535_v18 = vpack.c.bf16 %v14713_v12, %v14713_v12  ;;  %v7575_v26 = vunpack.c.l.b16 %v7526_v55  ;;  %v9527_v12 = vld [vmem:[#allocation2 + $0x90] sm:$0xff] }
 0x84c   :  { %7652 = vmatpush.bf16.msrb.mxu1 %v9530_v42  ;;  %7714 = vmatpush.bf16.msrb.mxu2 %v9522_v32  ;;  %v7583_v28 = vunpack.c.l.b16 %v7534_v62  ;;  %v7435_v9 = vand.u32 7, %v15256_v29  ;;  %v7589_v41 = vsel %vm3563_vm2, %v7574_v54, %v7588_v58  ;;  %v7442_v24 = vand.u32 7, %v14542_v25  ;;  %v9535_v25 = vld [vmem:[#allocation2 + $0x68] sm:$0xff] }
 0x84d   :  { %7794 = vmatpush.bf16.msra.mxu3 %v9538_v44  ;;  %v7489_v46 = vrot.slane %v7479_v3, 7  ;;  %v7490_v52 = vrot.slane %v7486_v47, 7  ;;  %v7596_v10 = vsel %vm3563_vm2, %v7582_v23, %v7595_v34  ;;  %v7497_v49 = vrot.slane %v7479_v3, 1  ;;  %v9534_v42 = vld [vmem:[#allocation2 + $0xa8] sm:$0xff] }
 0x84e   :  { %v7498_v60 = vrot.slane %v7486_v47, 1  ;;  %v7576_v19 = vunpack.c.l.b16 %v7527_v63  ;;  %v7584_v33 = vunpack.c.l.b16 %v7535_v18  ;;  %v7590_v37 = vsel %vm3565_vm3, %v7575_v26, %v7589_v41 }
 0x84f   :  { %vm14775_vm7 = vcmp.eq.s32.totalorder %v7435_v9, 0  ;;  %v7597_v5 = vsel %vm3565_vm3, %v7583_v28, %v7596_v10  ;;  %vm14780_vm8 = vcmp.eq.s32.totalorder %v7442_v24, 0  ;;  %v7491_v39 = vsel %vm1037_vm5, %v7489_v46, %v7490_v52 }
 0x850   :  { %7653 = vmatpush.bf16.msrb.mxu1 %v9529_v0  ;;  %7715 = vmatpush.bf16.msrb.mxu2 %v9521_v36  ;;  %v7492_v20 = vsel %vm1037_vm5, %v7490_v52, %v7489_v46  ;;  %vm14788_vm9 = vcmp.eq.s32.totalorder %v7435_v9, 7  ;;  %vm14792_vm11 = vcmp.eq.s32.totalorder %v7442_v24, 7  ;;  %v7499_v38 = vsel %vm1166_vm4, %v7497_v49, %v7498_v60 }
 0x851   :  { %7795 = vmatpush.bf16.msra.mxu3 %v9537_v45  ;;  %v7500_v50 = vsel %vm1166_vm4, %v7498_v60, %v7497_v49  ;;  %v7591_v16 = vsel %vm3567_vm6, %v7576_v19, %v7590_v37  ;;  %v7598_v17 = vsel %vm3567_vm6, %v7584_v33, %v7597_v5  ;;  %v7493_v21 = vsel %vm14775_vm7, %v7479_v3, %v7492_v20 }
 0x852   :  { %v7494_v31 = vsel %vm14780_vm8, %v7486_v47, %v7491_v39  ;;  %v7501_v32 = vsel %vm14788_vm9, %v7479_v3, %v7499_v38  ;;  %v7502_v7 = vsel %vm14792_vm11, %v7486_v47, %v7500_v50  ;;  %v7599_v43 = vpack.c.b16 %v7598_v17, %v7591_v16 }
 0x853   :  { %v7503_v35 = vpack.c.bf16 %v7494_v31, %v7493_v21  ;;  %v7725_v11 = vpack.c.bf16 %v7502_v7, %v7501_v32  ;;  %v9651_v59 = vmov 16.0   ;;  %v9632_v31 = vld [vmem:[%s14944_s22] ss:$0 sm:$0xff] }
 0x854   :  { %7654 = vmatpush.bf16.msrb.mxu1 %v9528_v8  ;;  %7716 = vmatpush.bf16.msrb.mxu2 %v9520_v57  ;;  %9633 = vrcp.f32 %v9651_v59 }
 0x855   :  { %7796 = vmatpush.bf16.msra.mxu3 %v9536_v1 }
 0x858   :  { %7655 = vmatpush.bf16.msrb.mxu1 %v9527_v12  ;;  %7717 = vmatpush.bf16.msrb.mxu2 %v9519_v13 }
 0x859   :  { %7797 = vmatpush.bf16.msra.mxu3 %v9535_v25 }
 0x85a   :  { %v9634_v0 = vpop.eup %9633 }
 0x85b   :  { %v7823_v45 = vmul.f32 16.0, %v9634_v0  ;;  %vm7827_vm4 = vweird.f32 %v9634_v0 }
 0x85c   :  { %7656 = vmatpush.bf16.msrb.mxu1 %v9526_v4  ;;  %7718 = vmatpush.bf16.msrb.mxu2 %v9518_v22  ;;  %v9631_v4 = vld [vmem:[%s14943_s21] ss:$0 sm:$0xff] }
 0x85d   :  { %7798 = vmatpush.bf16.msra.mxu3 %v9534_v42  ;;  %v7824_v3 = vsub.f32 1.0, %v7823_v45 }
 0x85f   :  { %7657 = vmatmul.bf16.vlgmr.msrb.gmra.mxu1 %v7599_v43  ;;  %7719 = vmatmul.bf16.vlgmr.msrb.gmra.mxu2 %v7503_v35  ;;  %v7825_v18 = vmul.f32 %v9634_v0, %v7824_v3 }
 0x860   :  { %7799 = vmatmul.bf16.vlgmr.msra.gmra.mxu3 %v7725_v11 }
 0x861   :  { %v7826_v41 = vadd.f32 %v9634_v0, %v7825_v18 }
 0x863   :  { %v7828_v49 = vsel %vm7827_vm4, %v9634_v0, %v7826_v41 }
 0x8dc   :  { %v7658_v44 = vpop.f32.mrf.mxu1 }
 0x8e2   :  { %v7720_v48 = vpop.f32.mrf.mxu2 }
 0x8e3   :  { %v7721_v15 = vadd.f32 %v7720_v48, %v7658_v44  ;;  %v7800_v56 = vpop.f32.mrf.mxu3 }
 0x8e4   :  { %v7660_v53 = vpop.f32.mrf.mxu1 }
 0x8e5   :  { %v7805_v27 = vadd.f32 %v7800_v56, %v7721_v15 }
 0x8e7   :  { %v7811_v36 = vadd.f32 %v9630_v2, %v7805_v27 }
 0x8e9   :  { %v7813_v54 = vmax.f32 %v7811_v36, 0.0 }
 0x8ea   :  { %v7722_v6 = vpop.f32.mrf.mxu2 }
 0x8eb   :  { %v7723_v55 = vadd.f32 %v7722_v6, %v7660_v53  ;;  %v7802_v62 = vpop.f32.mrf.mxu3  ;;  %v7830_v47 = vmul.f32 %v7813_v54, %v7813_v54 }
 0x8ed   :  { %v7806_v14 = vadd.f32 %v7802_v62, %v7723_v55 }
 0x8ef   :  { %v7812_v23 = vadd.f32 %v9630_v2, %v7806_v14 }
 0x8f1   :  { %v7814_v58 = vmax.f32 %v7812_v23, 0.0 }
 0x8f3   :  { %v7815_v63 = vadd.f32 %v7814_v58, %v7813_v54  ;;  %v7831_v34 = vmul.f32 %v7814_v58, %v7814_v58 }
 0x8f5   :  { %v7816_v8 = vrot.slane %v7815_v63, 4  ;;  %v7832_v57 = vadd.f32 %v7831_v34, %v7830_v47 }
 0x8f7   :  { %v7817_v26 = vadd.f32 %v7816_v8, %v7815_v63  ;;  %v7833_v28 = vrot.slane %v7832_v57, 4 }
 0x8f9   :  { %v7818_v9 = vrot.slane %v7817_v26, 2  ;;  %v7834_v1 = vadd.f32 %v7833_v28, %v7832_v57 }
 0x8fb   :  { %v7819_v24 = vadd.f32 %v7818_v9, %v7817_v26  ;;  %v7835_v46 = vrot.slane %v7834_v1, 2 }
 0x8fd   :  { %v7820_v52 = vrot.slane %v7819_v24, 1  ;;  %v7836_v10 = vadd.f32 %v7835_v46, %v7834_v1 }
 0x8ff   :  { %v7821_v60 = vadd.f32 %v7820_v52, %v7819_v24  ;;  %v7837_v19 = vrot.slane %v7836_v10, 1 }
 0x901   :  { %v7829_v12 = vmul.f32 %v7828_v49, %v7821_v60  ;;  %v7838_v13 = vadd.f32 %v7837_v19, %v7836_v10 }
 0x903   :  { %v7839_v33 = vmul.f32 %v7838_v13, %v7828_v49  ;;  %v7840_v37 = vmul.f32 %v7829_v12, %v7829_v12  ;;  %v7843_v50 = vsub.f32 %v7813_v54, %v7829_v12  ;;  %v7844_v16 = vsub.f32 %v7814_v58, %v7829_v12 }
 0x905   :  { %v7841_v61 = vsub.f32 %v7839_v33, %v7840_v37 }
 0x907   :  { %v7842_v25 = vmax.f32 %v7841_v61, 0.0 }
 0x909   :  { %v7845_v5 = vadd.f32 1e-05, %v7842_v25 }
 0x90b   :  { %9635 = vrsqrt.f32 %v7845_v5  ;;  %vm7852_vm12 = vweird.f32 %v7845_v5 }
 0x911   :  { %v9636_v30 = vpop.eup %9635 }
 0x912   :  { %v7847_v39 = vmul.f32 %v9636_v30, %v7845_v5  ;;  %vm7853_vm5 = vweird.f32 %v9636_v30 }
 0x913   :  { %vm7854_vm13 = vmor %vm7852_vm12, %vm7853_vm5 }
 0x914   :  { %v7848_v20 = vmul.f32 %v9636_v30, %v7847_v39 }
 0x916   :  { %v7849_v40 = vmul.f32 0.5, %v7848_v20 }
 0x918   :  { %v7850_v51 = vsub.f32 1.5, %v7849_v40 }
 0x91a   :  { %v7851_v38 = vmul.f32 %v9636_v30, %v7850_v51 }
 0x91c   :  { %v7855_v22 = vsel %vm7854_vm13, %v9636_v30, %v7851_v38 }
 0x91d   :  { %v7856_v17 = vmul.f32 %v7855_v22, %v7843_v50  ;;  %v7857_v21 = vmul.f32 %v7855_v22, %v7844_v16 }
 0x91f   :  { %v7862_v42 = vmul.f32 %v9631_v4, %v7856_v17  ;;  %v7863_v32 = vmul.f32 %v9631_v4, %v7857_v21 }
 0x921   :  { %v7868_v7 = vadd.f32 %v9632_v31, %v7862_v42  ;;  %v7869_v43 = vadd.f32 %v9632_v31, %v7863_v32 }
 0x923   :  { %v7872_v35 = vrot.slane %v7868_v7, 2  ;;  %v7873_v11 = vrot.slane %v7868_v7, 4  ;;  %v7874_v44 = vrot.slane %v7868_v7, 6  ;;  %v7875_v48 = vrot.slane %v7869_v43, 2 }
 0x924   :  { %v7876_v15 = vrot.slane %v7869_v43, 4  ;;  %v7877_v56 = vrot.slane %v7869_v43, 6  ;;  %v7884_v59 = vsel %vm2322_vm10, %v7868_v7, -inf  ;;  %v7912_v27 = vsel %vm2322_vm10, %v7869_v43, -inf }
 0x925   :  { %v7885_v2 = vrot.slane %v7884_v59, 4  ;;  %v7891_v53 = vsel %vm2322_vm10, %v7872_v35, -inf  ;;  %v7898_v6 = vsel %vm2322_vm10, %v7873_v11, -inf  ;;  %v7905_v0 = vsel %vm2322_vm10, %v7874_v44, -inf }
 0x926   :  { %v7892_v36 = vrot.slane %v7891_v53, 4  ;;  %v7899_v55 = vrot.slane %v7898_v6, 4  ;;  %v7906_v62 = vrot.slane %v7905_v0, 4  ;;  %v7913_v14 = vrot.slane %v7912_v27, 4 }
 0x927   :  { %v7886_v45 = vmax.f32 %v7884_v59, %v7885_v2  ;;  %v7919_v54 = vsel %vm2322_vm10, %v7875_v48, -inf  ;;  %v7926_v23 = vsel %vm2322_vm10, %v7876_v15, -inf  ;;  %v7933_v58 = vsel %vm2322_vm10, %v7877_v56, -inf }
 0x928   :  { %v7893_v3 = vmax.f32 %v7891_v53, %v7892_v36  ;;  %v7900_v47 = vmax.f32 %v7898_v6, %v7899_v55  ;;  %v7907_v63 = vmax.f32 %v7905_v0, %v7906_v62  ;;  %v7914_v34 = vmax.f32 %v7912_v27, %v7913_v14 }
 0x929   :  { %v7887_v8 = vrot.slane %v7886_v45, 2  ;;  %v7920_v57 = vrot.slane %v7919_v54, 4  ;;  %v7927_v18 = vrot.slane %v7926_v23, 4  ;;  %v7934_v26 = vrot.slane %v7933_v58, 4 }
 0x92a   :  { %v7894_v28 = vrot.slane %v7893_v3, 2  ;;  %v7901_v9 = vrot.slane %v7900_v47, 2  ;;  %v7908_v1 = vrot.slane %v7907_v63, 2  ;;  %v7915_v41 = vrot.slane %v7914_v34, 2 }
 0x92b   :  { %v7888_v24 = vmax.f32 %v7886_v45, %v7887_v8  ;;  %v7921_v46 = vmax.f32 %v7919_v54, %v7920_v57  ;;  %v7928_v52 = vmax.f32 %v7926_v23, %v7927_v18  ;;  %v7935_v10 = vmax.f32 %v7933_v58, %v7934_v26 }
 0x92c   :  { %v7895_v49 = vmax.f32 %v7893_v3, %v7894_v28  ;;  %v7902_v60 = vmax.f32 %v7900_v47, %v7901_v9  ;;  %v7909_v19 = vmax.f32 %v7907_v63, %v7908_v1  ;;  %v7916_v12 = vmax.f32 %v7914_v34, %v7915_v41 }
 0x92d   :  { %v7889_v13 = vrot.slane %v7888_v24, 1  ;;  %v7922_v33 = vrot.slane %v7921_v46, 2  ;;  %v7929_v37 = vrot.slane %v7928_v52, 2  ;;  %v7936_v61 = vrot.slane %v7935_v10, 2 }
 0x92e   :  { %v7896_v25 = vrot.slane %v7895_v49, 1  ;;  %v7903_v5 = vrot.slane %v7902_v60, 1  ;;  %v7910_v30 = vrot.slane %v7909_v19, 1  ;;  %v7917_v39 = vrot.slane %v7916_v12, 1 }
 0x92f   :  { %v7890_v20 = vmax.f32 %v7888_v24, %v7889_v13  ;;  %v7923_v40 = vmax.f32 %v7921_v46, %v7922_v33  ;;  %v7930_v51 = vmax.f32 %v7928_v52, %v7929_v37  ;;  %v7937_v38 = vmax.f32 %v7935_v10, %v7936_v61 }
 0x930   :  { %v7897_v50 = vmax.f32 %v7895_v49, %v7896_v25  ;;  %v7904_v16 = vmax.f32 %v7902_v60, %v7903_v5  ;;  %v14827_v4 = vmax.f32 %v7909_v19, %v7910_v30  ;;  %v14829_v22 = vmax.f32 %v7916_v12, %v7917_v39 }
 0x931   :  { %v7924_v17 = vrot.slane %v7923_v40, 1  ;;  %v7931_v21 = vrot.slane %v7930_v51, 1  ;;  %v7938_v31 = vrot.slane %v7937_v38, 1 }
 0x933   :  { %v14831_v42 = vmax.f32 %v7923_v40, %v7924_v17  ;;  %v14833_v32 = vmax.f32 %v7930_v51, %v7931_v21  ;;  %v14835_v7 = vmax.f32 %v7937_v38, %v7938_v31 }
 0x934   :  { %9645 = dma.done.wait [#allocation4 + $0x1], 6144 }
 0x935   :  { %9646 = vsyncadd [#allocation4 + $0x1], 4294961152  ;;  %v9286_v43 = vld [vmem:[#allocation3 + $0xf0] sm:$0xf]  ;;  %v9573_v35 = vld [vmem:[#allocation3 + $0xf4] sm:$0xf0]  ;;  %v7994_v59 = vpack.c.bf16 %v7890_v20, %v7890_v20  ;;  %v7995_v0 = vpack.c.bf16 %v7897_v50, %v7897_v50  ;;  %v7996_v8 = vpack.c.bf16 %v7904_v16, %v7904_v16  ;;  %v7964_v9 = vsel %vm3555_vm14, %v7897_v50, %v7890_v20 }
 0x936   :  { %v9572_v11 = vld [vmem:[#allocation3 + $0xf4] sm:$0xf]  ;;  %v9287_v44 = vor.u32 %v9573_v35, %v9286_v43  ;;  %v9288_v48 = vld [vmem:[#allocation3 + $0xf8] sm:$0xf0]  ;;  %v9278_v15 = vld [vmem:[#allocation3 + $0xe0] sm:$0xf]  ;;  %v7997_v12 = vpack.c.bf16 %v14827_v4, %v14827_v4  ;;  %v7965_v61 = vsel %vm3557_vm15, %v7904_v16, %v7964_v9  ;;  %v7998_v38 = vpack.c.bf16 %v14829_v22, %v14829_v22 }
 0x937   :  { %v9571_v56 = vld [vmem:[#allocation3 + $0xe4] sm:$0xf0]  ;;  %v9291_v27 = vor.u32 %v9572_v11, %v9288_v48  ;;  %v9570_v2 = vld [vmem:[#allocation3 + $0xe4] sm:$0xf]  ;;  %v9280_v53 = vld [vmem:[#allocation3 + $0xe8] sm:$0xf0]  ;;  %v8027_v57 = vunpack.c.l.b16 %v7994_v59  ;;  %v8028_v28 = vunpack.c.l.b16 %v7995_v0  ;;  %v8029_v37 = vunpack.c.l.b16 %v7996_v8 }
 0x938   :  { %v9556_v6 = vld [vmem:[#allocation3 + $0x74] sm:$0xf]  ;;  %8124 = vmatpush.bf16.msra.mxu0 %v9287_v44  ;;  %v9279_v36 = vor.u32 %v9571_v56, %v9278_v15  ;;  %v9352_v55 = vld [vmem:[#allocation3 + $0x78] sm:$0xf0]  ;;  %v9270_v62 = vld [vmem:[#allocation3 + $0xd0] sm:$0xf]  ;;  %v9283_v45 = vor.u32 %v9570_v2, %v9280_v53  ;;  %v8030_v43 = vunpack.c.l.b16 %v7997_v12  ;;  %v7966_v35 = vsel %vm3559_vm0, %v14827_v4, %v7965_v61 }
 0x939   :  { %v9569_v14 = vld [vmem:[#allocation3 + $0xd4] sm:$0xf0]  ;;  %8137 = vmatpush.bf16.msra.mxu1 %v9291_v27  ;;  %v9355_v54 = vor.u32 %v9556_v6, %v9352_v55  ;;  %v9568_v23 = vld [vmem:[#allocation3 + $0xd4] sm:$0xf]  ;;  %v9272_v58 = vld [vmem:[#allocation3 + $0xd8] sm:$0xf0]  ;;  %v8035_v39 = vsel %vm3555_vm14, %v8028_v28, %v8027_v57  ;;  %v7999_v59 = vpack.c.bf16 %v14831_v42, %v14831_v42  ;;  %v8031_v6 = vunpack.c.l.b16 %v7998_v38 }
 0x93a   :  { %v9350_v3 = vld [vmem:[#allocation3 + $0x70] sm:$0xf]  ;;  %v9557_v47 = vld [vmem:[#allocation3 + $0x74] sm:$0xf0]  ;;  %v9554_v63 = vld [vmem:[#allocation3 + $0x64] sm:$0xf]  ;;  %v9271_v1 = vor.u32 %v9569_v14, %v9270_v62  ;;  %v9275_v52 = vor.u32 %v9568_v23, %v9272_v58  ;;  %v8036_v15 = vsel %vm3557_vm15, %v8029_v37, %v8035_v39  ;;  %v7967_v0 = vsel %vm3561_vm1, %v14829_v22, %v7966_v35 }
 0x93b   :  { %v9344_v34 = vld [vmem:[#allocation3 + $0x68] sm:$0xf0]  ;;  %8243 = vmatpush.bf16.msrb.mxu3 %v9355_v54  ;;  %v9351_v18 = vor.u32 %v9557_v47, %v9350_v3  ;;  %v9262_v41 = vld [vmem:[#allocation3 + $0xc0] sm:$0xf]  ;;  %v9555_v46 = vld [vmem:[#allocation3 + $0x64] sm:$0xf0]  ;;  %v8000_v3 = vpack.c.bf16 %v14833_v32, %v14833_v32  ;;  %v7968_v22 = vsel %vm3563_vm2, %v14831_v42, %v7967_v0 }
 0x93c   :  { %v9347_v26 = vor.u32 %v9554_v63, %v9344_v34  ;;  %8125 = vmatpush.bf16.msra.mxu0 %v9279_v36  ;;  %v9342_v24 = vld [vmem:[#allocation3 + $0x60] sm:$0xf]  ;;  %v9567_v10 = vld [vmem:[#allocation3 + $0xc4] sm:$0xf0]  ;;  %v9552_v60 = vld [vmem:[#allocation3 + $0x54] sm:$0xf]  ;;  %v8032_v63 = vunpack.c.l.b16 %v7999_v59 }
 0x93d   :  { %8138 = vmatpush.bf16.msra.mxu1 %v9283_v45  ;;  %8230 = vmatpush.bf16.msra.mxu2 %v9351_v18  ;;  %v9343_v49 = vor.u32 %v9555_v46, %v9342_v24  ;;  %v9336_v19 = vld [vmem:[#allocation3 + $0x58] sm:$0xf0]  ;;  %v9566_v13 = vld [vmem:[#allocation3 + $0xc4] sm:$0xf]  ;;  %v9264_v33 = vld [vmem:[#allocation3 + $0xc8] sm:$0xf0]  ;;  %v9263_v20 = vor.u32 %v9567_v10, %v9262_v41  ;;  %v8037_v45 = vsel %vm3559_vm0, %v8030_v43, %v8036_v15  ;;  %v8033_v42 = vunpack.c.l.b16 %v8000_v3 }
 0x93e   :  { %v9339_v25 = vor.u32 %v9552_v60, %v9336_v19  ;;  %v9334_v5 = vld [vmem:[#allocation3 + $0x50] sm:$0xf]  ;;  %v9553_v30 = vld [vmem:[#allocation3 + $0x54] sm:$0xf0]  ;;  %v9550_v40 = vld [vmem:[#allocation3 + $0x44] sm:$0xf]  ;;  %v9267_v50 = vor.u32 %v9566_v13, %v9264_v33  ;;  %v8038_v18 = vsel %vm3561_vm1, %v8031_v6, %v8037_v45  ;;  %v8001_v24 = vpack.c.bf16 %v14835_v7, %v14835_v7 }
 0x93f   :  { %8244 = vmatpush.bf16.msrb.mxu3 %v9347_v26  ;;  %v9328_v51 = vld [vmem:[#allocation3 + $0x48] sm:$0xf0]  ;;  %v9254_v17 = vld [vmem:[#allocation3 + $0xb0] sm:$0xf]  ;;  %v9565_v21 = vld [vmem:[#allocation3 + $0xb4] sm:$0xf0]  ;;  %v9335_v16 = vor.u32 %v9553_v30, %v9334_v5  ;;  %v8039_v12 = vsel %vm3563_vm2, %v8032_v63, %v8038_v18 }
 0x940   :  { %8126 = vmatpush.bf16.msra.mxu0 %v9271_v1  ;;  %v9564_v31 = vld [vmem:[#allocation3 + $0xb4] sm:$0xf]  ;;  %v9256_v11 = vld [vmem:[#allocation3 + $0xb8] sm:$0xf0]  ;;  %v9326_v44 = vld [vmem:[#allocation3 + $0x40] sm:$0xf]  ;;  %v9331_v56 = vor.u32 %v9550_v40, %v9328_v51  ;;  %v9255_v27 = vor.u32 %v9565_v21, %v9254_v17  ;;  %v8034_v40 = vunpack.c.l.b16 %v8001_v24 }
 0x941   :  { %8139 = vmatpush.bf16.msra.mxu1 %v9275_v52  ;;  %8231 = vmatpush.bf16.msra.mxu2 %v9343_v49  ;;  %v9551_v48 = vld [vmem:[#allocation3 + $0x44] sm:$0xf0]  ;;  %v9548_v2 = vld [vmem:[#allocation3 + $0x34] sm:$0xf]  ;;  %v9320_v53 = vld [vmem:[#allocation3 + $0x38] sm:$0xf0]  ;;  %v9259_v4 = vor.u32 %v9564_v31, %v9256_v11  ;;  %v7969_v49 = vsel %vm3565_vm3, %v14833_v32, %v7968_v22 }
 0x942   :  { %v9246_v36 = vld [vmem:[#allocation3 + $0xa0] sm:$0xf]  ;;  %v9563_v55 = vld [vmem:[#allocation3 + $0xa4] sm:$0xf0]  ;;  %v9562_v62 = vld [vmem:[#allocation3 + $0xa4] sm:$0xf]  ;;  %v9327_v14 = vor.u32 %v9551_v48, %v9326_v44  ;;  %v9323_v47 = vor.u32 %v9548_v2, %v9320_v53  ;;  %v14864_v32 = vsel %vm3567_vm6, %v14835_v7, %v7969_v49 }
 0x943   :  { %8245 = vmatpush.bf16.msrb.mxu3 %v9339_v25  ;;  %v9248_v54 = vld [vmem:[#allocation3 + $0xa8] sm:$0xf0]  ;;  %v9318_v23 = vld [vmem:[#allocation3 + $0x30] sm:$0xf]  ;;  %v9549_v58 = vld [vmem:[#allocation3 + $0x34] sm:$0xf0]  ;;  %v9247_v34 = vor.u32 %v9563_v55, %v9246_v36 }
 0x944   :  { %8127 = vmatpush.bf16.msra.mxu0 %v9263_v20  ;;  %v9546_v8 = vld [vmem:[#allocation3 + $0x24] sm:$0xf]  ;;  %v9312_v57 = vld [vmem:[#allocation3 + $0x28] sm:$0xf0]  ;;  %v9251_v26 = vor.u32 %v9562_v62, %v9248_v54  ;;  %v9238_v28 = vld [vmem:[#allocation3 + $0x90] sm:$0xf]  ;;  %v9319_v41 = vor.u32 %v9549_v58, %v9318_v23 }
 0x945   :  { %8140 = vmatpush.bf16.msra.mxu1 %v9267_v50  ;;  %8232 = vmatpush.bf16.msra.mxu2 %v9335_v16  ;;  %v9561_v9 = vld [vmem:[#allocation3 + $0x94] sm:$0xf0]  ;;  %v9560_v1 = vld [vmem:[#allocation3 + $0x94] sm:$0xf]  ;;  %v9240_v46 = vld [vmem:[#allocation3 + $0x98] sm:$0xf0]  ;;  %v9315_v60 = vor.u32 %v9546_v8, %v9312_v57  ;;  %v8040_v50 = vsel %vm3565_vm3, %v8033_v42, %v8039_v12 }
 0x946   :  { %v9310_v52 = vld [vmem:[#allocation3 + $0x20] sm:$0xf]  ;;  %v9547_v10 = vld [vmem:[#allocation3 + $0x24] sm:$0xf0]  ;;  %v9239_v13 = vor.u32 %v9561_v9, %v9238_v28  ;;  %v9544_v37 = vld [vmem:[#allocation3 + $0x14] sm:$0xf]  ;;  %v9243_v25 = vor.u32 %v9560_v1, %v9240_v46 }
 0x947   :  { %8246 = vmatpush.bf16.msrb.mxu3 %v9331_v56  ;;  %v9230_v19 = vld [vmem:[#allocation3 + $0x80] sm:$0xf]  ;;  %v9559_v33 = vld [vmem:[#allocation3 + $0x84] sm:$0xf0]  ;;  %v9304_v61 = vld [vmem:[#allocation3 + $0x18] sm:$0xf0]  ;;  %v9311_v39 = vor.u32 %v9547_v10, %v9310_v52  ;;  %v8041_v56 = vsel %vm3567_vm6, %v8034_v40, %v8040_v50 }
 0x948   :  { %8128 = vmatpush.bf16.msra.mxu0 %v9255_v27  ;;  %v9558_v5 = vld [vmem:[#allocation3 + $0x84] sm:$0xf]  ;;  %v9232_v30 = vld [vmem:[#allocation3 + $0x88] sm:$0xf0]  ;;  %v9414_v20 = vld [vmem:[#allocation3 + $0x170] sm:$0xf]  ;;  %v9307_v31 = vor.u32 %v9544_v37, %v9304_v61  ;;  %v9231_v35 = vor.u32 %v9559_v33, %v9230_v19  ;;  %v8042_v62 = vpack.c.b16 %v8041_v56, %v8041_v56 }
 0x949   :  { %8141 = vmatpush.bf16.msra.mxu1 %v9259_v4  ;;  %8233 = vmatpush.bf16.msra.mxu2 %v9327_v14  ;;  %v9589_v51 = vld [vmem:[#allocation3 + $0x174] sm:$0xf0]  ;;  %v9588_v38 = vld [vmem:[#allocation3 + $0x174] sm:$0xf]  ;;  %v7947_v17 = vand.u32 3, %v15256_v29  ;;  %v7972_v48 = vrot.slane %v14864_v32, 7  ;;  %v9235_v7 = vor.u32 %v9558_v5, %v9232_v30 }
 0x94a   :  { %v9416_v21 = vld [vmem:[#allocation3 + $0x178] sm:$0xf0]  ;;  %v9302_v16 = vld [vmem:[#allocation3 + $0x10] sm:$0xf]  ;;  %v9545_v43 = vld [vmem:[#allocation3 + $0x14] sm:$0xf0]  ;;  %v9415_v15 = vor.u32 %v9589_v51, %v9414_v20 }
 0x94b   :  { %8247 = vmatpush.bf16.msrb.mxu3 %v9323_v47  ;;  %v9542_v11 = vld [vmem:[#allocation3 + $0x4] sm:$0xf]  ;;  %v9296_v44 = vld [vmem:[#allocation3 + $0x8] sm:$0xf0]  ;;  %vm7955_vm1 = vcmp.eq.s32.totalorder %v7947_v17, 0  ;;  %v9419_v59 = vor.u32 %v9588_v38, %v9416_v21  ;;  %v9303_v27 = vor.u32 %v9545_v43, %v9302_v16  ;;  %vm7974_vm7 = vcmp.eq.s32.totalorder %v7947_v17, 3 }
 0x94c   :  { %8129 = vmatpush.bf16.msra.mxu0 %v9247_v34  ;;  %v9406_v2 = vld [vmem:[#allocation3 + $0x160] sm:$0xf]  ;;  %v9587_v53 = vld [vmem:[#allocation3 + $0x164] sm:$0xf0]  ;;  %v9586_v6 = vld [vmem:[#allocation3 + $0x164] sm:$0xf]  ;;  %v9299_v4 = vor.u32 %v9542_v11, %v9296_v44  ;;  %v7973_v14 = vsel %vm7955_vm1, %v14864_v32, %v7972_v48 }
 0x94d   :  { %8142 = vmatpush.bf16.msra.mxu1 %v9251_v26  ;;  %8234 = vmatpush.bf16.msra.mxu2 %v9319_v41  ;;  %v9408_v0 = vld [vmem:[#allocation3 + $0x168] sm:$0xf0]  ;;  %v9294_v36 = vld [vmem:[#allocation3] sm:$0xf]  ;;  %v9543_v55 = vld [vmem:[#allocation3 + $0x4] sm:$0xf0]  ;;  %v9407_v45 = vor.u32 %v9587_v53, %v9406_v2  ;;  %v7977_v22 = vpack.c.bf16 %v7973_v14, %v7973_v14 }
 0x94e   :  { %v9411_v54 = vor.u32 %v9586_v6, %v9408_v0  ;;  %v9295_v23 = vor.u32 %v9543_v55, %v9294_v36  ;;  %v9398_v58 = vld [vmem:[#allocation3 + $0x150] sm:$0xf]  ;;  %v9585_v3 = vld [vmem:[#allocation3 + $0x154] sm:$0xf0]  ;;  %v9584_v47 = vld [vmem:[#allocation3 + $0x154] sm:$0xf] }
 0x94f   :  { %8248 = vmatpush.bf16.msrb.mxu3 %v9315_v60  ;;  %v9400_v63 = vld [vmem:[#allocation3 + $0x158] sm:$0xf0]  ;;  %v9399_v34 = vor.u32 %v9585_v3, %v9398_v58  ;;  %v9390_v57 = vld [vmem:[#allocation3 + $0x140] sm:$0xf]  ;;  %v9583_v18 = vld [vmem:[#allocation3 + $0x144] sm:$0xf0] }
 0x950   :  { %8130 = vmatpush.bf16.msra.mxu0 %v9239_v13  ;;  %v9403_v8 = vor.u32 %v9584_v47, %v9400_v63  ;;  %v9582_v26 = vld [vmem:[#allocation3 + $0x144] sm:$0xf]  ;;  %v9392_v28 = vld [vmem:[#allocation3 + $0x148] sm:$0xf0]  ;;  %v9391_v9 = vor.u32 %v9583_v18, %v9390_v57  ;;  %v9382_v41 = vld [vmem:[#allocation3 + $0x130] sm:$0xf] }
 0x951   :  { %8143 = vmatpush.bf16.msra.mxu1 %v9243_v25  ;;  %8235 = vmatpush.bf16.msra.mxu2 %v9311_v39  ;;  %v9395_v1 = vor.u32 %v9582_v26, %v9392_v28  ;;  %v9581_v24 = vld [vmem:[#allocation3 + $0x134] sm:$0xf0]  ;;  %v9580_v46 = vld [vmem:[#allocation3 + $0x134] sm:$0xf]  ;;  %v9384_v52 = vld [vmem:[#allocation3 + $0x138] sm:$0xf0] }
 0x952   :  { %v9383_v10 = vor.u32 %v9581_v24, %v9382_v41  ;;  %v9387_v42 = vor.u32 %v9580_v46, %v9384_v52  ;;  %v9374_v49 = vld [vmem:[#allocation3 + $0x120] sm:$0xf]  ;;  %v9579_v60 = vld [vmem:[#allocation3 + $0x124] sm:$0xf0]  ;;  %v9578_v19 = vld [vmem:[#allocation3 + $0x124] sm:$0xf] }
 0x953   :  { %8249 = vmatpush.bf16.msrb.mxu3 %v9307_v31  ;;  %v9376_v12 = vld [vmem:[#allocation3 + $0x128] sm:$0xf0]  ;;  %v9375_v13 = vor.u32 %v9579_v60, %v9374_v49  ;;  %v9366_v37 = vld [vmem:[#allocation3 + $0x110] sm:$0xf]  ;;  %v9577_v61 = vld [vmem:[#allocation3 + $0x114] sm:$0xf0] }
 0x954   :  { %8131 = vmatpush.bf16.msra.mxu0 %v9231_v35  ;;  %v9379_v33 = vor.u32 %v9578_v19, %v9376_v12  ;;  %v9576_v25 = vld [vmem:[#allocation3 + $0x114] sm:$0xf]  ;;  %v9368_v5 = vld [vmem:[#allocation3 + $0x118] sm:$0xf0]  ;;  %v9367_v30 = vor.u32 %v9577_v61, %v9366_v37  ;;  %v7975_v39 = vrot.slane %v14864_v32, 1  ;;  %v9652_v56 = vmov 8.0  }
 0x955   :  { %8144 = vmatpush.bf16.msra.mxu1 %v9235_v7  ;;  %8236 = vmatpush.bf16.msra.mxu2 %v9303_v27  ;;  %v9371_v20 = vor.u32 %v9576_v25, %v9368_v5  ;;  %v9358_v40 = vld [vmem:[#allocation3 + $0x100] sm:$0xf]  ;;  %v9575_v51 = vld [vmem:[#allocation3 + $0x104] sm:$0xf0]  ;;  %v9574_v38 = vld [vmem:[#allocation3 + $0x104] sm:$0xf]  ;;  %9637 = vrcp.f32 %v9652_v56 }
 0x956   :  { %v9360_v50 = vld [vmem:[#allocation3 + $0x108] sm:$0xf0]  ;;  %v9359_v21 = vor.u32 %v9575_v51, %v9358_v40  ;;  %v7976_v31 = vsel %vm7974_vm7, %v14864_v32, %v7975_v39  ;;  %v8382_v32 = vld [vmem:[%s14946_s24] sm:$0x3]  ;;  %vm8481_vm1 = vcmask 1043458   ;;  %vm8484_vm7 = vcmask 1045508  }
 0x957   :  { %8250 = vmatpush.bf16.msrb.mxu3 %v9299_v4  ;;  %8132 = vmatmul.bf16.vlgmr.msra.gmra.mxu0 %v8042_v62  ;;  %v9363_v16 = vor.u32 %v9574_v38, %v9360_v50  ;;  %v8256_v43 = vpack.c.bf16 %v7976_v31, %v7976_v31  ;;  %v8384_v2 = vperm.slane %v8382_v32, 0  ;;  %v8385_v4 = vperm.slane %v8382_v32, 1 }
 0x958   :  { %8354 = vmatpush.bf16.msrb.mxu0 %v9415_v15  ;;  %8145 = vmatmul.bf16.vlgmr.msra.gmra.mxu1 %v8042_v62 }
 0x959   :  { %8367 = vmatpush.bf16.msrb.mxu1 %v9419_v59  ;;  %8237 = vmatpush.bf16.msra.mxu2 %v9295_v23 }
 0x95a   :  { %8251 = vmatmul.bf16.vlgmr.msrb.gmra.mxu3 %v7977_v22 }
 0x95b   :  { %v9638_v59 = vpop.eup %9637 }
 0x95c   :  { %8355 = vmatpush.bf16.msrb.mxu0 %v9407_v45  ;;  %8238 = vmatmul.bf16.vlgmr.msra.gmra.mxu2 %v7977_v22  ;;  %v8405_v0 = vmul.f32 8.0, %v9638_v59  ;;  %vm8409_vm8 = vweird.f32 %v9638_v59 }
 0x95d   :  { %8368 = vmatpush.bf16.msrb.mxu1 %v9411_v54 }
 0x95e   :  { %v8406_v45 = vsub.f32 1.0, %v8405_v0 }
 0x960   :  { %8356 = vmatpush.bf16.msrb.mxu0 %v9399_v34  ;;  %v8407_v63 = vmul.f32 %v9638_v59, %v8406_v45 }
 0x961   :  { %8369 = vmatpush.bf16.msrb.mxu1 %v9403_v8 }
 0x962   :  { %v8408_v24 = vadd.f32 %v9638_v59, %v8407_v63 }
 0x964   :  { %8357 = vmatpush.bf16.msrb.mxu0 %v9391_v9 }
 0x965   :  { %8370 = vmatpush.bf16.msrb.mxu1 %v9395_v1 }
 0x968   :  { %8358 = vmatpush.bf16.msrb.mxu0 %v9383_v10 }
 0x969   :  { %8371 = vmatpush.bf16.msrb.mxu1 %v9387_v42 }
 0x96c   :  { %8359 = vmatpush.bf16.msrb.mxu0 %v9375_v13  ;;  %v8410_v13 = vsel %vm8409_vm8, %v9638_v59, %v8408_v24  ;;  %vm8487_vm8 = vcmask 1045504  }
 0x96d   :  { %8372 = vmatpush.bf16.msrb.mxu1 %v9379_v33 }
 0x970   :  { %8360 = vmatpush.bf16.msrb.mxu0 %v9367_v30 }
 0x971   :  { %8373 = vmatpush.bf16.msrb.mxu1 %v9371_v20 }
 0x974   :  { %8361 = vmatpush.bf16.msrb.mxu0 %v9359_v21 }
 0x975   :  { %8374 = vmatpush.bf16.msrb.mxu1 %v9363_v16 }
 0x977   :  { %8362 = vmatmul.bf16.vlgmr.msrb.gmra.mxu0 %v8256_v43 }
 0x978   :  { %8375 = vmatmul.bf16.vlgmr.msrb.gmra.mxu1 %v8256_v43 }
 0x9d4   :  { %v8133_v35 = vpop.f32.mrf.mxu0 }
 0x9d5   :  { %v8146_v11 = vpop.f32.mrf.mxu1 }
 0x9dc   :  { %v8135_v44 = vpop.f32.mrf.mxu0 }
 0x9dd   :  { %v8148_v48 = vpop.f32.mrf.mxu1  ;;  %v8252_v7 = vpop.f32.mrf.mxu3 }
 0x9de   :  { %v8253_v53 = vadd.f32 %v8252_v7, %v8146_v11 }
 0x9df   :  { %v8239_v29 = vpop.f32.mrf.mxu2 }
 0x9e0   :  { %v8240_v27 = vadd.f32 %v8239_v29, %v8133_v35 }
 0x9e5   :  { %v8254_v17 = vpop.f32.mrf.mxu3 }
 0x9e7   :  { %v8241_v15 = vpop.f32.mrf.mxu2 }
 0x9f4   :  { %v8363_v6 = vpop.f32.mrf.mxu0 }
 0x9f5   :  { %v8380_v36 = vadd.f32 %v8363_v6, %v8240_v27  ;;  %v8376_v55 = vpop.f32.mrf.mxu1 }
 0x9f6   :  { %v8381_v62 = vadd.f32 %v8376_v55, %v8253_v53  ;;  %v8461_v53 = vld [vmem:[%s14947_s25] sm:$0x3] }
 0x9f7   :  { %v8388_v14 = vadd.f32 %v8384_v2, %v8380_v36  ;;  %v8469_v36 = vld [vmem:[%s14948_s26] sm:$0x3] }
 0x9f8   :  { %v8389_v54 = vadd.f32 %v8385_v4, %v8381_v62 }
 0x9f9   :  { %v14880_v23 = vmax.f32 %v8388_v14, 0.0  ;;  %v8463_v14 = vperm.slane %v8461_v53, 0 }
 0x9fa   :  { %v14882_v58 = vmax.f32 %v8389_v54, 0.0  ;;  %v8464_v54 = vperm.slane %v8461_v53, 1 }
 0x9fb   :  { %v8392_v3 = vrot.slane %v14880_v23, 4  ;;  %v8413_v47 = vmul.f32 %v14880_v23, %v14880_v23 }
 0x9fc   :  { %v8398_v22 = vrot.slane %v14882_v58, 4  ;;  %v8414_v34 = vmul.f32 %v14882_v58, %v14882_v58  ;;  %v8365_v8 = vpop.f32.mrf.mxu0 }
 0x9fd   :  { %v8393_v57 = vadd.f32 %v8392_v3, %v14880_v23  ;;  %v8415_v18 = vrot.slane %v8413_v47, 4  ;;  %v8378_v26 = vpop.f32.mrf.mxu1  ;;  %v8471_v8 = vperm.slane %v8469_v36, 0 }
 0x9fe   :  { %v8399_v28 = vadd.f32 %v8398_v22, %v14882_v58  ;;  %v8421_v9 = vrot.slane %v8414_v34, 4  ;;  %v8472_v22 = vperm.slane %v8469_v36, 1 }
 0x9ff   :  { %v8394_v1 = vrot.slane %v8393_v57, 2  ;;  %v8416_v41 = vadd.f32 %v8415_v18, %v8413_v47 }
 0xa00   :  { %v8400_v46 = vrot.slane %v8399_v28, 2  ;;  %v8422_v52 = vadd.f32 %v8421_v9, %v8414_v34 }
 0xa01   :  { %v8395_v10 = vadd.f32 %v8394_v1, %v8393_v57  ;;  %v8417_v42 = vrot.slane %v8416_v41, 2 }
 0xa02   :  { %v8401_v49 = vadd.f32 %v8400_v46, %v8399_v28  ;;  %v8423_v60 = vrot.slane %v8422_v52, 2 }
 0xa03   :  { %v8396_v19 = vrot.slane %v8395_v10, 1  ;;  %v8418_v12 = vadd.f32 %v8417_v42, %v8416_v41 }
 0xa04   :  { %v8402_v33 = vrot.slane %v8401_v49, 1  ;;  %v8424_v37 = vadd.f32 %v8423_v60, %v8422_v52 }
 0xa05   :  { %v8397_v61 = vadd.f32 %v8396_v19, %v8395_v10  ;;  %v8419_v25 = vrot.slane %v8418_v12, 1 }
 0xa06   :  { %v8403_v5 = vadd.f32 %v8402_v33, %v8401_v49  ;;  %v8425_v30 = vrot.slane %v8424_v37, 1 }
 0xa07   :  { %v8411_v39 = vmul.f32 %v8410_v13, %v8397_v61  ;;  %v8420_v20 = vadd.f32 %v8419_v25, %v8418_v12 }
 0xa08   :  { %v8412_v40 = vmul.f32 %v8410_v13, %v8403_v5  ;;  %v8426_v51 = vadd.f32 %v8425_v30, %v8424_v37 }
 0xa09   :  { %v8427_v38 = vmul.f32 %v8420_v20, %v8410_v13  ;;  %v8429_v50 = vmul.f32 %v8411_v39, %v8411_v39  ;;  %v8435_v4 = vsub.f32 %v14880_v23, %v8411_v39 }
 0xa0a   :  { %v8428_v21 = vmul.f32 %v8426_v51, %v8410_v13  ;;  %v8430_v31 = vmul.f32 %v8412_v40, %v8412_v40  ;;  %v8436_v45 = vsub.f32 %v14882_v58, %v8412_v40 }
 0xa0b   :  { %v8431_v16 = vsub.f32 %v8427_v38, %v8429_v50 }
 0xa0c   :  { %v8432_v43 = vsub.f32 %v8428_v21, %v8430_v31 }
 0xa0d   :  { %v8433_v35 = vmax.f32 %v8431_v16, 0.0 }
 0xa0e   :  { %v8434_v11 = vmax.f32 %v8432_v43, 0.0 }
 0xa0f   :  { %v8437_v44 = vadd.f32 1e-05, %v8433_v35 }
 0xa10   :  { %v8438_v48 = vadd.f32 1e-05, %v8434_v11 }
 0xa11   :  { %9639 = vrsqrt.f32 %v8437_v44  ;;  %vm8445_vm4 = vweird.f32 %v8437_v44 }
 0xa12   :  { %9641 = vrsqrt.f32 %v8438_v48  ;;  %vm8455_vm12 = vweird.f32 %v8438_v48 }
 0xa17   :  { %v9640_v7 = vpop.eup %9639 }
 0xa18   :  { %v9642_v29 = vpop.eup %9641  ;;  %v8440_v17 = vmul.f32 %v9640_v7, %v8437_v44  ;;  %vm8446_vm9 = vweird.f32 %v9640_v7 }
 0xa19   :  { %v8450_v15 = vmul.f32 %v9642_v29, %v8438_v48  ;;  %vm8456_vm11 = vweird.f32 %v9642_v29  ;;  %vm8447_vm5 = vmor %vm8445_vm4, %vm8446_vm9  ;;  %vm8579_vm9 = vcmask 1043456  }
 0xa1a   :  { %v8441_v56 = vmul.f32 %v9640_v7, %v8440_v17  ;;  %vm8457_vm13 = vmor %vm8455_vm12, %vm8456_vm11 }
 0xa1b   :  { %v8451_v32 = vmul.f32 %v9642_v29, %v8450_v15 }
 0xa1c   :  { %v8442_v59 = vmul.f32 0.5, %v8441_v56 }
 0xa1d   :  { %v8452_v27 = vmul.f32 0.5, %v8451_v32 }
 0xa1e   :  { %v8443_v2 = vsub.f32 1.5, %v8442_v59 }
 0xa1f   :  { %v8453_v6 = vsub.f32 1.5, %v8452_v27 }
 0xa20   :  { %v8444_v0 = vmul.f32 %v9640_v7, %v8443_v2 }
 0xa21   :  { %v8454_v55 = vmul.f32 %v9642_v29, %v8453_v6 }
 0xa22   :  { %v8448_v62 = vsel %vm8447_vm5, %v9640_v7, %v8444_v0 }
 0xa23   :  { %v8459_v3 = vmul.f32 %v8448_v62, %v8435_v4  ;;  %v8458_v47 = vsel %vm8457_vm13, %v9642_v29, %v8454_v55 }
 0xa24   :  { %v8460_v63 = vmul.f32 %v8458_v47, %v8436_v45 }
 0xa25   :  { %v8467_v34 = vmul.f32 %v8463_v14, %v8459_v3 }
 0xa26   :  { %v8468_v23 = vmul.f32 %v8464_v54, %v8460_v63 }
 0xa27   :  { %v8475_v18 = vadd.f32 %v8471_v8, %v8467_v34 }
 0xa28   :  { %v8476_v57 = vadd.f32 %v8472_v22, %v8468_v23 }
 0xa2a   :  { %v8479_v26 = vrot.slane %v8476_v57, 6 }
 0xa2c   :  { %v8480_v28 = vsel %vm2322_vm10, %v8475_v18, %v8479_v26  ;;  %v8482_v9 = vsel %vm8481_vm1, %v8475_v18, %v8479_v26  ;;  %v8485_v58 = vsel %vm8484_vm7, %v8475_v18, %v8479_v26  ;;  %v8488_v41 = vsel %vm8487_vm8, %v8479_v26, %v8475_v18 }
 0xa2d   :  { %v8483_v1 = vrot.slane %v8482_v9, 2  ;;  %8490 = vst [vmem:[#allocation1] ss:$4 sm:$0xff] %v8480_v28  ;;  %v8486_v24 = vrot.slane %v8485_v58, 4  ;;  %v8489_v10 = vrot.slane %v8488_v41, 6 }
 0xa2f   :  { %8494 = vst [vmem:[#allocation1 + $0x20] ss:$4 sm:$0xff] %v8483_v1 }
 0xa34   :  { %v8491_v46 = vld.sshfl [vmem:[#allocation1] sm:$0xff pattern:$0x73625140]  ;;  %v8492_v52 = vld.sshfl [vmem:[#allocation1 + $0x8] sm:$0xff pattern:$0x73625140] }
 0xa35   :  { %8497 = vst [vmem:[#allocation1] ss:$4 sm:$0xff] %v8486_v24  ;;  %v8511_v42 = vsel %vm2322_vm10, %v8491_v46, -inf  ;;  %v8518_v49 = vsel %vm2322_vm10, %v8492_v52, -inf }
 0xa36   :  { %v8495_v60 = vld.sshfl [vmem:[#allocation1 + $0x20] sm:$0xff pattern:$0x73625140]  ;;  %v8496_v19 = vld.sshfl [vmem:[#allocation1 + $0x28] sm:$0xff pattern:$0x73625140] }
 0xa37   :  { %8500 = vst [vmem:[#allocation1 + $0x20] ss:$4 sm:$0xff] %v8489_v10  ;;  %v8512_v12 = vrot.slane %v8511_v42, 4  ;;  %v8519_v13 = vrot.slane %v8518_v49, 4  ;;  %v8525_v33 = vsel %vm2322_vm10, %v8495_v60, -inf  ;;  %v8532_v37 = vsel %vm2322_vm10, %v8496_v19, -inf }
 0xa38   :  { %v8526_v61 = vrot.slane %v8525_v33, 4  ;;  %v8533_v25 = vrot.slane %v8532_v37, 4 }
 0xa39   :  { %v8520_v5 = vmax.f32 %v8518_v49, %v8519_v13  ;;  %v8513_v20 = vmax.f32 %v8511_v42, %v8512_v12 }
 0xa3a   :  { %v8527_v30 = vmax.f32 %v8525_v33, %v8526_v61  ;;  %v8534_v39 = vmax.f32 %v8532_v37, %v8533_v25 }
 0xa3b   :  { %v8521_v40 = vrot.slane %v8520_v5, 2  ;;  %v8514_v35 = vrot.slane %v8513_v20, 2 }
 0xa3c   :  { %v8498_v51 = vld.sshfl [vmem:[#allocation1] sm:$0xff pattern:$0x73625140]  ;;  %v8499_v38 = vld.sshfl [vmem:[#allocation1 + $0x8] sm:$0xff pattern:$0x73625140] }
 0xa3d   :  { %v8522_v50 = vmax.f32 %v8520_v5, %v8521_v40  ;;  %v8528_v21 = vrot.slane %v8527_v30, 2  ;;  %v8535_v31 = vrot.slane %v8534_v39, 2  ;;  %v8539_v48 = vsel %vm2322_vm10, %v8498_v51, -inf }
 0xa3e   :  { %v8501_v16 = vld.sshfl [vmem:[#allocation1 + $0x20] sm:$0xff pattern:$0x73625140]  ;;  %v8502_v43 = vld.sshfl [vmem:[#allocation1 + $0x28] sm:$0xff pattern:$0x73625140]  ;;  %v8515_v6 = vmax.f32 %v8513_v20, %v8514_v35 }
 0xa3f   :  { %v8529_v11 = vmax.f32 %v8527_v30, %v8528_v21  ;;  %v8536_v44 = vmax.f32 %v8534_v39, %v8535_v31  ;;  %v8546_v7 = vsel %vm2322_vm10, %v8499_v38, -inf  ;;  %v8553_v29 = vsel %vm2322_vm10, %v8501_v16, -inf }
 0xa40   :  { %v8560_v17 = vsel %vm2322_vm10, %v8502_v43, -inf  ;;  %v8523_v15 = vrot.slane %v8522_v50, 1  ;;  %v8540_v59 = vrot.slane %v8539_v48, 4  ;;  %v8547_v27 = vrot.slane %v8546_v7, 4 }
 0xa41   :  { %v8530_v56 = vrot.slane %v8529_v11, 1  ;;  %v8537_v32 = vrot.slane %v8536_v44, 1  ;;  %v8554_v2 = vrot.slane %v8553_v29, 4  ;;  %v8561_v53 = vrot.slane %v8560_v17, 4 }
 0xa42   :  { %v8541_v4 = vmax.f32 %v8539_v48, %v8540_v59  ;;  %v8548_v36 = vmax.f32 %v8546_v7, %v8547_v27  ;;  %v8524_v14 = vmax.f32 %v8522_v50, %v8523_v15  ;;  %v8516_v34 = vrot.slane %v8515_v6, 1 }
 0xa43   :  { %v8538_v0 = vmax.f32 %v8536_v44, %v8537_v32  ;;  %v8555_v55 = vmax.f32 %v8553_v29, %v8554_v2  ;;  %v8562_v62 = vmax.f32 %v8560_v17, %v8561_v53  ;;  %v8531_v45 = vmax.f32 %v8529_v11, %v8530_v56 }
 0xa44   :  { %v8542_v3 = vrot.slane %v8541_v4, 2  ;;  %v8549_v47 = vrot.slane %v8548_v36, 2  ;;  %v8575_v28 = vrot.slane %v8524_v14, 4  ;;  %v8517_v24 = vmax.f32 %v8515_v6, %v8516_v34 }
 0xa45   :  { %v8576_v54 = vrot.slane %v8538_v0, 4  ;;  %v8556_v63 = vrot.slane %v8555_v55, 2  ;;  %v8563_v22 = vrot.slane %v8562_v62, 2 }
 0xa46   :  { %v8543_v23 = vmax.f32 %v8541_v4, %v8542_v3  ;;  %v8550_v57 = vmax.f32 %v8548_v36, %v8549_v47  ;;  %v8580_v42 = vsel %vm8579_vm9, %v8517_v24, %v8575_v28 }
 0xa47   :  { %v8581_v8 = vsel %vm8579_vm9, %v8531_v45, %v8576_v54  ;;  %v8557_v18 = vmax.f32 %v8555_v55, %v8556_v63  ;;  %v8564_v26 = vmax.f32 %v8562_v62, %v8563_v22 }
 0xa48   :  { %v8544_v9 = vrot.slane %v8543_v23, 1  ;;  %v8551_v1 = vrot.slane %v8550_v57, 1  ;;  %v8584_v46 = vrot.slane %v8581_v8, 7 }
 0xa49   :  { %v8558_v58 = vrot.slane %v8557_v18, 1  ;;  %v8565_v41 = vrot.slane %v8564_v26, 1 }
 0xa4a   :  { %v8552_v52 = vmax.f32 %v8550_v57, %v8551_v1  ;;  %v8545_v49 = vmax.f32 %v8543_v23, %v8544_v9  ;;  %v8585_v13 = vsel %vm3555_vm14, %v8584_v46, %v8580_v42 }
 0xa4b   :  { %v8566_v10 = vmax.f32 %v8564_v26, %v8565_v41  ;;  %v8559_v60 = vmax.f32 %v8557_v18, %v8558_v58  ;;  %v8586_v5 = vsel %vm3563_vm2, %v8584_v46, %v8585_v13 }
 0xa4c   :  { %v8577_v19 = vrot.slane %v8552_v52, 4 }
 0xa4d   :  { %v8578_v12 = vrot.slane %v8566_v10, 4 }
 0xa4e   :  { %v8582_v33 = vsel %vm8579_vm9, %v8545_v49, %v8577_v19 }
 0xa4f   :  { %v8583_v37 = vsel %vm8579_vm9, %v8559_v60, %v8578_v12  ;;  %v8587_v61 = vrot.slane %v8582_v33, 6 }
 0xa50   :  { %v8590_v25 = vrot.slane %v8583_v37, 5 }
 0xa51   :  { %v8588_v30 = vsel %vm3557_vm15, %v8587_v61, %v8586_v5 }
 0xa52   :  { %v8589_v39 = vsel %vm3565_vm3, %v8587_v61, %v8588_v30 }
 0xa53   :  { %v8591_v20 = vsel %vm3559_vm0, %v8590_v25, %v8589_v39 }
 0xa54   :  { %v8592_v40 = vsel %vm3567_vm6, %v8590_v25, %v8591_v20 }
 0xa55   :  { %8594 = vst [vmem:[%s14949_s27] sm:$0xff] %v8592_v40 }
 0xa56   :  { %8599 = vsyncmov [#allocation4] }
 0xa59   :  { %s8600_s29 = vpop.sfrf %8599 }
 0xa5a   :  { %p9420_p0 = scmp.ne.s32.totalorder %s8600_s29, 0 }
 0xa5c   :  { %8604 = shalt.err (%p9420_p0)  }
 0xa5d   :  { %8606 = vsyncmov [#allocation4 + $0x1] }
 0xa60   :  { %s8607_s1 = vpop.sfrf %8606 }
 0xa61   :  { %p9421_p1 = scmp.ne.s32.totalorder %s8607_s1, 0 }
 0xa63   :  { %8611 = shalt.err (%p9421_p1)  }

</bundles_post_ra>
